<compile_context>
chip_gen: v7x
topology: tpu7x:2x2x1
jax: 0.10.0
libtpu: 0.0.40
codegen_flags: <defaults>
</compile_context>

<pallas_src>
import functools

import jax
import jax.numpy as jnp
from jax.experimental import pallas as pl
from jax.experimental.pallas import tpu as pltpu


# ----------------------------------------------------------------------------
# Fused Pallas kernel (one batch element per grid step)
# ----------------------------------------------------------------------------
def _decoder_block_kernel(x_ref, skip_ref,
                          upw_ref, upb_ref,
                          w1_ref, s1_ref, b1_ref,
                          w2_ref, s2_ref, b2_ref,
                          cw1t_ref, cb1_ref, cw2_4_ref, cb2_4_ref,
                          msse_ref, sseb_ref,
                          o_ref,
                          xpad, spu, sp1, sp2,
                          *, H, W, Cin, Cskip, Cout):
    f32, bf16 = jnp.float32, jnp.bfloat16
    CC = Cin + Cskip
    HW = H * W

    # ---- border-only zeroing (interiors fully overwritten every step) -------
    xpad[0:1, :, :] = jnp.zeros((1, W + 2, Cin), f32)
    xpad[H + 1:H + 2, :, :] = jnp.zeros((1, W + 2, Cin), f32)
    xpad[:, 0:1, :] = jnp.zeros((H + 2, 1, Cin), f32)
    xpad[:, W + 1:W + 2, :] = jnp.zeros((H + 2, 1, Cin), f32)
    for scr, ch in ((spu, Cin), (sp1, CC), (sp2, Cout)):
        for bb in range(2):
            for dd in range(2):
                scr[bb, dd, bb * H:bb * H + 1, :, :] = jnp.zeros((1, W + 1, ch), f32)
                scr[bb, dd, :, dd * W:dd * W + 1, :] = jnp.zeros((H + 1, 1, ch), f32)

    # ---- SubpixelUpsample conv3x3 (Cin -> 4*Cin, bias): im2col as a value ----
    xpad[1:H + 1, 1:W + 1, :] = x_ref[0].astype(f32)
    taps0 = [xpad[dy:dy + H, dx:dx + W, :].astype(bf16)
             for dy in range(3) for dx in range(3)]
    patch0 = jnp.concatenate(taps0, axis=-1).reshape(HW, 9 * Cin)
    u0 = jnp.dot(patch0, upw_ref[...], preferred_element_type=f32) + upb_ref[...]

    # ---- PixelShuffle(x2) into the top/left-padded parity-factored scratch ---
    # spu[b, d, a, c, :] == P[2a+b, 2c+d, :],  P = shuffled image zero-padded by
    # 1 on top/left (the pad before AvgPool2d).  u0 columns are parity-major
    # (weights permuted in the wrapper).
    for fh in range(2):
        for fw in range(2):
            sub = u0[:, (2 * fh + fw) * Cin:(2 * fh + fw + 1) * Cin].reshape(H, W, Cin)
            spu[1 - fh, 1 - fw, fh:fh + H, fw:fw + W, :] = sub

    # ---- AvgPool2d(2, stride=1) + fused channel-concat with skip -> sp1 ------
    # sp1[b, d, a, c, :] == zero-padded conv1 input at (2a+b, 2c+d);
    # channels [0:Cin] = upsampled branch, [Cin:CC] = skip.
    for ph in range(2):
        for pw in range(2):
            acc = None
            for wy in range(2):
                for wx in range(2):
                    ro, rb = (ph + wy) // 2, (ph + wy) % 2
                    co, cb = (pw + wx) // 2, (pw + wx) % 2
                    t = spu[rb, cb, ro:ro + H, co:co + W, :]
                    acc = t if acc is None else acc + t
            z = jnp.concatenate(
                [acc * 0.25, skip_ref[0, ph, pw].astype(f32)], axis=-1)
            sp1[1 - ph, 1 - pw, ph:ph + H, pw:pw + W, :] = z

    def conv3x3(src_scr, w_ref, scale_ref, bias_ref):
        """ReLU(BN(3x3 conv on the 2Hx2W grid)) -> (HW, 4*Cout), parity on lanes.

        The im2col matrix is built as one concatenated VALUE (no patch scratch,
        no masked scatter stores) and fed into a single block-diagonal matmul
        with N = 4*Cout lanes.
        """
        blocks = []
        for ph in range(2):
            for pw in range(2):
                for dy in range(3):
                    for dx in range(3):
                        ro, rb = (ph + dy) // 2, (ph + dy) % 2
                        co, cb = (pw + dx) // 2, (pw + dx) % 2
                        blocks.append(
                            src_scr[rb, cb, ro:ro + H, co:co + W, :].astype(bf16))
        patch = jnp.concatenate(blocks, axis=-1)          # (H, W, 4*9*C) bf16
        patch = patch.reshape(HW, patch.shape[-1])
        y = jnp.dot(patch, w_ref[...], preferred_element_type=f32)
        return jnp.maximum(y * scale_ref[...] + bias_ref[...], 0.0)

    # ---- ConvBnAct 1 ----------------------------------------------------------
    y1 = conv3x3(sp1, w1_ref, s1_ref, b1_ref)              # (HW, 4*Cout) f32

    # scatter y1's parity sub-images into the padded scratch for conv2
    for ph in range(2):
        for pw in range(2):
            par = 2 * ph + pw
            sp2[1 - ph, 1 - pw, ph:ph + H, pw:pw + W, :] = (
                y1[:, par * Cout:(par + 1) * Cout].reshape(H, W, Cout))

    # ---- ConvBnAct 2 ----------------------------------------------------------
    y2 = conv3x3(sp2, w2_ref, s2_ref, b2_ref)              # (HW, 4*Cout) f32

    # ---- SCSE attention -------------------------------------------------------
    colsum = jnp.sum(y2, axis=0, keepdims=True)            # (1, 4*Cout)
    pooled = (colsum[:, 0:Cout] + colsum[:, Cout:2 * Cout] +
              colsum[:, 2 * Cout:3 * Cout] +
              colsum[:, 3 * Cout:4 * Cout]) * (1.0 / (4 * HW))   # (1, Cout)
    # cSE: two tiny 1x1 convs on the VPU (no M=1 MXU matmuls).
    h = jnp.maximum(jnp.sum(pooled * cw1t_ref[...], axis=-1, keepdims=True)
                    + cb1_ref[...], 0.0)                    # (CR, 1)
    c_att = jax.nn.sigmoid(jnp.sum(h * cw2_4_ref[...], axis=0, keepdims=True)
                           + cb2_4_ref[...])                # (1, 4*Cout)
    # sSE: per-pixel channel reduction as one lane-dense matmul (block-diagonal
    # weight) so the result stays in the packed (HW, 4*Cout) layout.
    s_att = jax.nn.sigmoid(jnp.dot(y2.astype(bf16), msse_ref[...],
                                   preferred_element_type=f32) + sseb_ref[...])

    # single full-width (HW, 128) store
    o_ref[0] = (y2 * (c_att + s_att)).astype(o_ref.dtype)


# ----------------------------------------------------------------------------
# Wrapper: layout-only prep + one pallas_call
# ----------------------------------------------------------------------------
def fold_bn(gamma, beta, mean, var, eps=1e-5):
    scale = gamma * jax.lax.rsqrt(var + eps)
    return scale, beta - mean * scale


def decoder_block_forward(x_nchw, skip_nchw, p):
    """Matches DecoderBlock.forward(x, skip). Inputs/outputs are NCHW."""
    B, Cin, H, W = x_nchw.shape
    Cskip = skip_nchw.shape[1]
    Cout = p["c1_w"].shape[-1]
    CR = p["cse_w1"].shape[-1]
    CC = Cin + Cskip
    HW = H * W
    f32, bf16 = jnp.float32, jnp.bfloat16

    # TODO(synk): bilinear interpolate branch not implemented; shapes must match.
    assert skip_nchw.shape[2:] == (2 * H, 2 * W)

    # layout-only prep (tiny XLA ops)
    x = jnp.transpose(x_nchw, (0, 2, 3, 1))                              # NHWC
    skip = (skip_nchw.reshape(B, Cskip, H, 2, W, 2)
            .transpose(0, 3, 5, 2, 4, 1))                # (B, ph, pw, H, W, Cs)

    # SubpixelUpsample conv: permute output channels from PixelShuffle order
    # (c, fh, fw) to parity-major (fh, fw, c) and flatten 3x3 taps for im2col.
    up_w = (p["up_w"].reshape(3, 3, Cin, Cin, 2, 2)
            .transpose(0, 1, 2, 4, 5, 3)
            .reshape(9 * Cin, 4 * Cin).astype(bf16))
    up_b = (p["up_b"].reshape(Cin, 2, 2).transpose(1, 2, 0)
            .reshape(1, 4 * Cin).astype(f32))

    # conv1/conv2: block-diagonal (one identical block per output parity) so a
    # single matmul produces all four parities with N = 4*Cout lanes.
    eye4 = jnp.eye(4, dtype=f32)
    w1 = jnp.kron(eye4, p["c1_w"].reshape(9 * CC, Cout)).astype(bf16)
    w2 = jnp.kron(eye4, p["c2_w"].reshape(9 * Cout, Cout)).astype(bf16)
    s1 = jnp.tile(p["c1_scale"].reshape(1, Cout), (1, 4)).astype(f32)
    b1 = jnp.tile(p["c1_bias"].reshape(1, Cout), (1, 4)).astype(f32)
    s2 = jnp.tile(p["c2_scale"].reshape(1, Cout), (1, 4)).astype(f32)
    b2 = jnp.tile(p["c2_bias"].reshape(1, Cout), (1, 4)).astype(f32)

    # SCSE params (cSE for the VPU path, sSE as a block-diagonal matmul).
    cw1t = p["cse_w1"].T.astype(f32)                                    # (CR, Cout)
    cb1 = p["cse_b1"].reshape(CR, 1).astype(f32)
    cw2_4 = jnp.tile(p["cse_w2"], (1, 4)).astype(f32)                   # (CR, 4*Cout)
    cb2_4 = jnp.tile(p["cse_b2"].reshape(1, Cout), (1, 4)).astype(f32)
    msse = jnp.kron(eye4, jnp.tile(p["sse_w"].reshape(Cout, 1),
                                   (1, Cout))).astype(bf16)             # (4C, 4C)
    sseb = p["sse_b"].reshape(1, 1).astype(f32)

    kernel = functools.partial(_decoder_block_kernel,
                               H=H, W=W, Cin=Cin, Cskip=Cskip, Cout=Cout)

    def rep(shape):
        n = len(shape)
        return pl.BlockSpec(shape, lambda b, _n=n: (0,) * _n)

    out_flat = pl.pallas_call(
        kernel,
        out_shape=jax.ShapeDtypeStruct((B, HW, 4 * Cout), x_nchw.dtype),
        grid_spec=pltpu.PrefetchScalarGridSpec(
            num_scalar_prefetch=0,
            grid=(B,),
            in_specs=[
                pl.BlockSpec((1, H, W, Cin), lambda b: (b, 0, 0, 0)),
                pl.BlockSpec((1, 2, 2, H, W, Cskip),
                             lambda b: (b, 0, 0, 0, 0, 0)),
                rep(up_w.shape), rep(up_b.shape),
                rep(w1.shape), rep(s1.shape), rep(b1.shape),
                rep(w2.shape), rep(s2.shape), rep(b2.shape),
                rep(cw1t.shape), rep(cb1.shape), rep(cw2_4.shape), rep(cb2_4.shape),
                rep(msse.shape), rep(sseb.shape),
            ],
            out_specs=pl.BlockSpec((1, HW, 4 * Cout), lambda b: (b, 0, 0)),
            scratch_shapes=[
                pltpu.VMEM((H + 2, W + 2, Cin), jnp.float32),          # xpad
                pltpu.VMEM((2, 2, H + 1, W + 1, Cin), jnp.float32),    # spu
                pltpu.VMEM((2, 2, H + 1, W + 1, CC), jnp.float32),     # sp1
                pltpu.VMEM((2, 2, H + 1, W + 1, Cout), jnp.float32),   # sp2
            ],
        ),
        compiler_params=pltpu.CompilerParams(
            dimension_semantics=("parallel",),
            vmem_limit_bytes=32 * 1024 * 1024),
    )(x, skip, up_w, up_b, w1, s1, b1, w2, s2, b2,
      cw1t, cb1, cw2_4, cb2_4, msse, sseb)

    # Un-pack (parity, channel) lanes back to NCHW (reshapes are free bitcasts;
    # one small transpose).
    out = (out_flat.reshape(B, H, W, 2, 2, Cout)
           .transpose(0, 5, 1, 3, 2, 4)
           .reshape(B, Cout, 2 * H, 2 * W))
    return out


# ----------------------------------------------------------------------------
# Pure-JAX (XLA, f32) reference of the PyTorch DecoderBlock, for tolerance check
# ----------------------------------------------------------------------------
def reference_forward(x_nchw, skip_nchw, p):
    f32 = jnp.float32
    x = jnp.transpose(x_nchw, (0, 2, 3, 1)).astype(f32)
    skip = jnp.transpose(skip_nchw, (0, 2, 3, 1)).astype(f32)
    dn = ("NHWC", "HWIO", "NHWC")

    def conv(v, w):
        return jax.lax.conv_general_dilated(v, w, (1, 1), "SAME",
                                            dimension_numbers=dn)

    # SubpixelUpsample: conv3x3(+bias) -> PixelShuffle(2) -> pad(top/left) ->
    # AvgPool2d(2, stride=1) (count_include_pad=True).
    u = conv(x, p["up_w"]) + p["up_b"]
    B, H, W, C4 = u.shape
    Cin = C4 // 4
    u = (u.reshape(B, H, W, Cin, 2, 2)
         .transpose(0, 1, 4, 2, 5, 3)
         .reshape(B, 2 * H, 2 * W, Cin))
    up = jnp.pad(u, ((0, 0), (1, 0), (1, 0), (0, 0)))
    a = (up[:, :-1, :-1] + up[:, :-1, 1:] + up[:, 1:, :-1] + up[:, 1:, 1:]) * 0.25

    z = jnp.concatenate([a, skip], axis=-1)
    y1 = jnp.maximum(conv(z, p["c1_w"]) * p["c1_scale"] + p["c1_bias"], 0.0)
    y2 = jnp.maximum(conv(y1, p["c2_w"]) * p["c2_scale"] + p["c2_bias"], 0.0)

    pooled = y2.mean(axis=(1, 2), keepdims=True)
    h = jnp.maximum(jnp.einsum("bijc,cr->bijr", pooled, p["cse_w1"]) + p["cse_b1"], 0.0)
    c_att = jax.nn.sigmoid(jnp.einsum("bijr,rc->bijc", h, p["cse_w2"]) + p["cse_b2"])
    s_att = jax.nn.sigmoid(jnp.einsum("bhwc,co->bhwo", y2, p["sse_w"]) + p["sse_b"])
    out = y2 * c_att + y2 * s_att
    return jnp.transpose(out, (0, 3, 1, 2))


# ----------------------------------------------------------------------------
# main
# ----------------------------------------------------------------------------
if __name__ == "__main__":
    B = 2
    IN_CH, SKIP_CH, OUT_CH = 8, 8, 32
    H = W = 8                      # decoder input spatial; upsampled to 16x16
    REDUCTION = 16
    CR = OUT_CH // REDUCTION       # = 2

    keys = iter(jax.random.split(jax.random.PRNGKey(0), 32))

    def nrm(shape, s=0.1):
        return s * jax.random.normal(next(keys), shape, jnp.float32)

    def pos(shape):
        return jax.random.uniform(next(keys), shape, jnp.float32, 0.5, 1.5)

    # inputs (NCHW, like the PyTorch module)
    x = jax.random.normal(next(keys), (B, IN_CH, H, W), jnp.float32)
    skip = jax.random.normal(next(keys), (B, SKIP_CH, 2 * H, 2 * W), jnp.float32)

    # SubpixelUpsample conv: in -> in * 2^2, 3x3, bias=True (HWIO; out channel
    # ordering (c, fh, fw) as consumed by PixelShuffle)
    up_w = nrm((3, 3, IN_CH, IN_CH * 4))
    up_b = nrm((IN_CH * 4,))

    # ConvBnAct 1: (in + skip) -> out ; ConvBnAct 2: out -> out (BN folded)
    c1_w = nrm((3, 3, IN_CH + SKIP_CH, OUT_CH))
    c1_scale, c1_bias = fold_bn(pos((OUT_CH,)), nrm((OUT_CH,)),
                                nrm((OUT_CH,)), pos((OUT_CH,)))
    c2_w = nrm((3, 3, OUT_CH, OUT_CH))
    c2_scale, c2_bias = fold_bn(pos((OUT_CH,)), nrm((OUT_CH,)),
                                nrm((OUT_CH,)), pos((OUT_CH,)))

    # SCSE
    cse_w1, cse_b1 = nrm((OUT_CH, CR)), nrm((CR,))
    cse_w2, cse_b2 = nrm((CR, OUT_CH)), nrm((OUT_CH,))
    sse_w, sse_b = nrm((OUT_CH, 1)), nrm((1,))

    params = dict(up_w=up_w, up_b=up_b,
                  c1_w=c1_w, c1_scale=c1_scale, c1_bias=c1_bias,
                  c2_w=c2_w, c2_scale=c2_scale, c2_bias=c2_bias,
                  cse_w1=cse_w1, cse_b1=cse_b1, cse_w2=cse_w2, cse_b2=cse_b2,
                  sse_w=sse_w, sse_b=sse_b)

    out = jax.jit(decoder_block_forward)(x, skip, params)
    out = jax.block_until_ready(out)
    assert out.shape == (B, OUT_CH, 2 * H, 2 * W), out.shape
    assert bool(jnp.all(jnp.isfinite(out)))

    # Tolerance check vs. a pure-JAX f32 reference (kernel uses bf16 MXU inputs).
    ref = jax.jit(reference_forward)(x, skip, params)
    ref = jax.block_until_ready(ref)
    max_err = float(jnp.max(jnp.abs(out - ref)))
    scale = float(jnp.max(jnp.abs(ref))) + 1e-6
    assert max_err / scale < 3e-2, (max_err, scale)

    print("KERNEL_OK")
</pallas_src>

<mosaic_0001>
module attributes {stable_mosaic.version = 11 : i64} {
  func.func @_decoder_block_kernel(%arg0: i32, %arg1: memref<1x8x8x8xf32, #tpu.memory_space<vmem>>, %arg2: memref<1x2x2x8x8x8xf32, #tpu.memory_space<vmem>>, %arg3: memref<72x32xbf16, #tpu.memory_space<vmem>>, %arg4: memref<1x32xf32, #tpu.memory_space<vmem>>, %arg5: memref<576x128xbf16, #tpu.memory_space<vmem>>, %arg6: memref<1x128xf32, #tpu.memory_space<vmem>>, %arg7: memref<1x128xf32, #tpu.memory_space<vmem>>, %arg8: memref<1152x128xbf16, #tpu.memory_space<vmem>>, %arg9: memref<1x128xf32, #tpu.memory_space<vmem>>, %arg10: memref<1x128xf32, #tpu.memory_space<vmem>>, %arg11: memref<2x32xf32, #tpu.memory_space<vmem>>, %arg12: memref<2x1xf32, #tpu.memory_space<vmem>>, %arg13: memref<2x128xf32, #tpu.memory_space<vmem>>, %arg14: memref<1x128xf32, #tpu.memory_space<vmem>>, %arg15: memref<128x128xbf16, #tpu.memory_space<vmem>>, %arg16: memref<1x1xf32, #tpu.memory_space<vmem>>, %arg17: memref<1x64x128xf32, #tpu.memory_space<vmem>>, %arg18: memref<10x10x8xf32, #tpu.memory_space<vmem>>, %arg19: memref<2x2x9x9x8xf32, #tpu.memory_space<vmem>>, %arg20: memref<2x2x9x9x16xf32, #tpu.memory_space<vmem>>, %arg21: memref<2x2x9x9x32xf32, #tpu.memory_space<vmem>>) attributes {dimension_semantics = [#tpu.dimension_semantics<parallel>], iteration_bounds = array<i64: 2>, scalar_prefetch = 0 : i64, scratch_operands = 4 : i64, tpu.core_type = #tpu.core_type<tc>, window_params = [{transform_indices = @transform_0, window_bounds = array<i64: 1, 8, 8, 8>}, {transform_indices = @transform_1, window_bounds = array<i64: 1, 2, 2, 8, 8, 8>}, {pipeline_mode = #tpu.pipeline_mode<synchronous>, transform_indices = @transform_2, window_bounds = array<i64: 72, 32>}, {pipeline_mode = #tpu.pipeline_mode<synchronous>, transform_indices = @transform_3, window_bounds = array<i64: 1, 32>}, {pipeline_mode = #tpu.pipeline_mode<synchronous>, transform_indices = @transform_4, window_bounds = array<i64: 576, 128>}, {pipeline_mode = #tpu.pipeline_mode<synchronous>, transform_indices = @transform_5, window_bounds = array<i64: 1, 128>}, {pipeline_mode = #tpu.pipeline_mode<synchronous>, transform_indices = @transform_6, window_bounds = array<i64: 1, 128>}, {pipeline_mode = #tpu.pipeline_mode<synchronous>, transform_indices = @transform_7, window_bounds = array<i64: 1152, 128>}, {pipeline_mode = #tpu.pipeline_mode<synchronous>, transform_indices = @transform_8, window_bounds = array<i64: 1, 128>}, {pipeline_mode = #tpu.pipeline_mode<synchronous>, transform_indices = @transform_9, window_bounds = array<i64: 1, 128>}, {pipeline_mode = #tpu.pipeline_mode<synchronous>, transform_indices = @transform_10, window_bounds = array<i64: 2, 32>}, {pipeline_mode = #tpu.pipeline_mode<synchronous>, transform_indices = @transform_11, window_bounds = array<i64: 2, 1>}, {pipeline_mode = #tpu.pipeline_mode<synchronous>, transform_indices = @transform_12, window_bounds = array<i64: 2, 128>}, {pipeline_mode = #tpu.pipeline_mode<synchronous>, transform_indices = @transform_13, window_bounds = array<i64: 1, 128>}, {pipeline_mode = #tpu.pipeline_mode<synchronous>, transform_indices = @transform_14, window_bounds = array<i64: 128, 128>}, {pipeline_mode = #tpu.pipeline_mode<synchronous>, transform_indices = @transform_15, window_bounds = array<i64: 1, 1>}, {transform_indices = @transform_16, window_bounds = array<i64: 1, 64, 128>}]} {
    %cst = arith.constant 0.000000e+00 : f32
    %0 = vector.broadcast %cst : f32 to vector<1x10x8xf32>
    %c0 = arith.constant 0 : index
    %c0_0 = arith.constant 0 : index
    %c0_1 = arith.constant 0 : index
    %1 = vector.load %arg18[%c0, %c0_0, %c0_1] : memref<10x10x8xf32, #tpu.memory_space<vmem>>, vector<1x10x8xf32>
    tpu.vector_store %arg18[%c0, %c0_0, %c0_1], %0 {strides = array<i32>} : memref<10x10x8xf32, #tpu.memory_space<vmem>>, vector<1x10x8xf32>,
    %cst_2 = arith.constant 0.000000e+00 : f32
    %2 = vector.broadcast %cst_2 : f32 to vector<1x10x8xf32>
    %c9 = arith.constant 9 : index
    %c0_3 = arith.constant 0 : index
    %c0_4 = arith.constant 0 : index
    %3 = vector.load %arg18[%c9, %c0_3, %c0_4] : memref<10x10x8xf32, #tpu.memory_space<vmem>>, vector<1x10x8xf32>
    tpu.vector_store %arg18[%c9, %c0_3, %c0_4], %2 {strides = array<i32>} : memref<10x10x8xf32, #tpu.memory_space<vmem>>, vector<1x10x8xf32>,
    %cst_5 = arith.constant 0.000000e+00 : f32
    %4 = vector.broadcast %cst_5 : f32 to vector<10x1x8xf32>
    %c0_6 = arith.constant 0 : index
    %c0_7 = arith.constant 0 : index
    %c0_8 = arith.constant 0 : index
    %5 = vector.load %arg18[%c0_6, %c0_7, %c0_8] : memref<10x10x8xf32, #tpu.memory_space<vmem>>, vector<10x1x8xf32>
    tpu.vector_store %arg18[%c0_6, %c0_7, %c0_8], %4 {strides = array<i32>} : memref<10x10x8xf32, #tpu.memory_space<vmem>>, vector<10x1x8xf32>,
    %cst_9 = arith.constant 0.000000e+00 : f32
    %6 = vector.broadcast %cst_9 : f32 to vector<10x1x8xf32>
    %c0_10 = arith.constant 0 : index
    %c9_11 = arith.constant 9 : index
    %c0_12 = arith.constant 0 : index
    %7 = vector.load %arg18[%c0_10, %c9_11, %c0_12] : memref<10x10x8xf32, #tpu.memory_space<vmem>>, vector<10x1x8xf32>
    tpu.vector_store %arg18[%c0_10, %c9_11, %c0_12], %6 {strides = array<i32>} : memref<10x10x8xf32, #tpu.memory_space<vmem>>, vector<10x1x8xf32>,
    %cst_13 = arith.constant 0.000000e+00 : f32
    %8 = vector.broadcast %cst_13 : f32 to vector<1x9x8xf32>
    %c0_14 = arith.constant 0 : index
    %c0_15 = arith.constant 0 : index
    %c0_16 = arith.constant 0 : index
    %c0_17 = arith.constant 0 : index
    %c0_18 = arith.constant 0 : index
    %9 = vector.load %arg19[%c0_14, %c0_15, %c0_16, %c0_17, %c0_18] : memref<2x2x9x9x8xf32, #tpu.memory_space<vmem>>, vector<1x1x1x9x8xf32>
    %10 = vector.shape_cast %9 : vector<1x1x1x9x8xf32> to vector<1x9x8xf32>
    %11 = vector.shape_cast %8 : vector<1x9x8xf32> to vector<1x1x1x9x8xf32>
    tpu.vector_store %arg19[%c0_14, %c0_15, %c0_16, %c0_17, %c0_18], %11 {strides = array<i32>} : memref<2x2x9x9x8xf32, #tpu.memory_space<vmem>>, vector<1x1x1x9x8xf32>,
    %cst_19 = arith.constant 0.000000e+00 : f32
    %12 = vector.broadcast %cst_19 : f32 to vector<9x1x8xf32>
    %c0_20 = arith.constant 0 : index
    %c0_21 = arith.constant 0 : index
    %c0_22 = arith.constant 0 : index
    %c0_23 = arith.constant 0 : index
    %c0_24 = arith.constant 0 : index
    %13 = vector.load %arg19[%c0_20, %c0_21, %c0_22, %c0_23, %c0_24] : memref<2x2x9x9x8xf32, #tpu.memory_space<vmem>>, vector<1x1x9x1x8xf32>
    %14 = vector.shape_cast %13 : vector<1x1x9x1x8xf32> to vector<9x1x8xf32>
    %15 = vector.shape_cast %12 : vector<9x1x8xf32> to vector<1x1x9x1x8xf32>
    tpu.vector_store %arg19[%c0_20, %c0_21, %c0_22, %c0_23, %c0_24], %15 {strides = array<i32>} : memref<2x2x9x9x8xf32, #tpu.memory_space<vmem>>, vector<1x1x9x1x8xf32>,
    %cst_25 = arith.constant 0.000000e+00 : f32
    %16 = vector.broadcast %cst_25 : f32 to vector<1x9x8xf32>
    %c0_26 = arith.constant 0 : index
    %c1 = arith.constant 1 : index
    %c0_27 = arith.constant 0 : index
    %c0_28 = arith.constant 0 : index
    %c0_29 = arith.constant 0 : index
    %17 = vector.load %arg19[%c0_26, %c1, %c0_27, %c0_28, %c0_29] : memref<2x2x9x9x8xf32, #tpu.memory_space<vmem>>, vector<1x1x1x9x8xf32>
    %18 = vector.shape_cast %17 : vector<1x1x1x9x8xf32> to vector<1x9x8xf32>
    %19 = vector.shape_cast %16 : vector<1x9x8xf32> to vector<1x1x1x9x8xf32>
    tpu.vector_store %arg19[%c0_26, %c1, %c0_27, %c0_28, %c0_29], %19 {strides = array<i32>} : memref<2x2x9x9x8xf32, #tpu.memory_space<vmem>>, vector<1x1x1x9x8xf32>,
    %cst_30 = arith.constant 0.000000e+00 : f32
    %20 = vector.broadcast %cst_30 : f32 to vector<9x1x8xf32>
    %c0_31 = arith.constant 0 : index
    %c1_32 = arith.constant 1 : index
    %c0_33 = arith.constant 0 : index
    %c8 = arith.constant 8 : index
    %c0_34 = arith.constant 0 : index
    %21 = vector.load %arg19[%c0_31, %c1_32, %c0_33, %c8, %c0_34] : memref<2x2x9x9x8xf32, #tpu.memory_space<vmem>>, vector<1x1x9x1x8xf32>
    %22 = vector.shape_cast %21 : vector<1x1x9x1x8xf32> to vector<9x1x8xf32>
    %23 = vector.shape_cast %20 : vector<9x1x8xf32> to vector<1x1x9x1x8xf32>
    tpu.vector_store %arg19[%c0_31, %c1_32, %c0_33, %c8, %c0_34], %23 {strides = array<i32>} : memref<2x2x9x9x8xf32, #tpu.memory_space<vmem>>, vector<1x1x9x1x8xf32>,
    %cst_35 = arith.constant 0.000000e+00 : f32
    %24 = vector.broadcast %cst_35 : f32 to vector<1x9x8xf32>
    %c1_36 = arith.constant 1 : index
    %c0_37 = arith.constant 0 : index
    %c8_38 = arith.constant 8 : index
    %c0_39 = arith.constant 0 : index
    %c0_40 = arith.constant 0 : index
    %25 = vector.load %arg19[%c1_36, %c0_37, %c8_38, %c0_39, %c0_40] : memref<2x2x9x9x8xf32, #tpu.memory_space<vmem>>, vector<1x1x1x9x8xf32>
    %26 = vector.shape_cast %25 : vector<1x1x1x9x8xf32> to vector<1x9x8xf32>
    %27 = vector.shape_cast %24 : vector<1x9x8xf32> to vector<1x1x1x9x8xf32>
    tpu.vector_store %arg19[%c1_36, %c0_37, %c8_38, %c0_39, %c0_40], %27 {strides = array<i32>} : memref<2x2x9x9x8xf32, #tpu.memory_space<vmem>>, vector<1x1x1x9x8xf32>,
    %cst_41 = arith.constant 0.000000e+00 : f32
    %28 = vector.broadcast %cst_41 : f32 to vector<9x1x8xf32>
    %c1_42 = arith.constant 1 : index
    %c0_43 = arith.constant 0 : index
    %c0_44 = arith.constant 0 : index
    %c0_45 = arith.constant 0 : index
    %c0_46 = arith.constant 0 : index
    %29 = vector.load %arg19[%c1_42, %c0_43, %c0_44, %c0_45, %c0_46] : memref<2x2x9x9x8xf32, #tpu.memory_space<vmem>>, vector<1x1x9x1x8xf32>
    %30 = vector.shape_cast %29 : vector<1x1x9x1x8xf32> to vector<9x1x8xf32>
    %31 = vector.shape_cast %28 : vector<9x1x8xf32> to vector<1x1x9x1x8xf32>
    tpu.vector_store %arg19[%c1_42, %c0_43, %c0_44, %c0_45, %c0_46], %31 {strides = array<i32>} : memref<2x2x9x9x8xf32, #tpu.memory_space<vmem>>, vector<1x1x9x1x8xf32>,
    %cst_47 = arith.constant 0.000000e+00 : f32
    %32 = vector.broadcast %cst_47 : f32 to vector<1x9x8xf32>
    %c1_48 = arith.constant 1 : index
    %c1_49 = arith.constant 1 : index
    %c8_50 = arith.constant 8 : index
    %c0_51 = arith.constant 0 : index
    %c0_52 = arith.constant 0 : index
    %33 = vector.load %arg19[%c1_48, %c1_49, %c8_50, %c0_51, %c0_52] : memref<2x2x9x9x8xf32, #tpu.memory_space<vmem>>, vector<1x1x1x9x8xf32>
    %34 = vector.shape_cast %33 : vector<1x1x1x9x8xf32> to vector<1x9x8xf32>
    %35 = vector.shape_cast %32 : vector<1x9x8xf32> to vector<1x1x1x9x8xf32>
    tpu.vector_store %arg19[%c1_48, %c1_49, %c8_50, %c0_51, %c0_52], %35 {strides = array<i32>} : memref<2x2x9x9x8xf32, #tpu.memory_space<vmem>>, vector<1x1x1x9x8xf32>,
    %cst_53 = arith.constant 0.000000e+00 : f32
    %36 = vector.broadcast %cst_53 : f32 to vector<9x1x8xf32>
    %c1_54 = arith.constant 1 : index
    %c1_55 = arith.constant 1 : index
    %c0_56 = arith.constant 0 : index
    %c8_57 = arith.constant 8 : index
    %c0_58 = arith.constant 0 : index
    %37 = vector.load %arg19[%c1_54, %c1_55, %c0_56, %c8_57, %c0_58] : memref<2x2x9x9x8xf32, #tpu.memory_space<vmem>>, vector<1x1x9x1x8xf32>
    %38 = vector.shape_cast %37 : vector<1x1x9x1x8xf32> to vector<9x1x8xf32>
    %39 = vector.shape_cast %36 : vector<9x1x8xf32> to vector<1x1x9x1x8xf32>
    tpu.vector_store %arg19[%c1_54, %c1_55, %c0_56, %c8_57, %c0_58], %39 {strides = array<i32>} : memref<2x2x9x9x8xf32, #tpu.memory_space<vmem>>, vector<1x1x9x1x8xf32>,
    %cst_59 = arith.constant 0.000000e+00 : f32
    %40 = vector.broadcast %cst_59 : f32 to vector<1x9x16xf32>
    %c0_60 = arith.constant 0 : index
    %c0_61 = arith.constant 0 : index
    %c0_62 = arith.constant 0 : index
    %c0_63 = arith.constant 0 : index
    %c0_64 = arith.constant 0 : index
    %41 = vector.load %arg20[%c0_60, %c0_61, %c0_62, %c0_63, %c0_64] : memref<2x2x9x9x16xf32, #tpu.memory_space<vmem>>, vector<1x1x1x9x16xf32>
    %42 = vector.shape_cast %41 : vector<1x1x1x9x16xf32> to vector<1x9x16xf32>
    %43 = vector.shape_cast %40 : vector<1x9x16xf32> to vector<1x1x1x9x16xf32>
    tpu.vector_store %arg20[%c0_60, %c0_61, %c0_62, %c0_63, %c0_64], %43 {strides = array<i32>} : memref<2x2x9x9x16xf32, #tpu.memory_space<vmem>>, vector<1x1x1x9x16xf32>,
    %cst_65 = arith.constant 0.000000e+00 : f32
    %44 = vector.broadcast %cst_65 : f32 to vector<9x1x16xf32>
    %c0_66 = arith.constant 0 : index
    %c0_67 = arith.constant 0 : index
    %c0_68 = arith.constant 0 : index
    %c0_69 = arith.constant 0 : index
    %c0_70 = arith.constant 0 : index
    %45 = vector.load %arg20[%c0_66, %c0_67, %c0_68, %c0_69, %c0_70] : memref<2x2x9x9x16xf32, #tpu.memory_space<vmem>>, vector<1x1x9x1x16xf32>
    %46 = vector.shape_cast %45 : vector<1x1x9x1x16xf32> to vector<9x1x16xf32>
    %47 = vector.shape_cast %44 : vector<9x1x16xf32> to vector<1x1x9x1x16xf32>
    tpu.vector_store %arg20[%c0_66, %c0_67, %c0_68, %c0_69, %c0_70], %47 {strides = array<i32>} : memref<2x2x9x9x16xf32, #tpu.memory_space<vmem>>, vector<1x1x9x1x16xf32>,
    %cst_71 = arith.constant 0.000000e+00 : f32
    %48 = vector.broadcast %cst_71 : f32 to vector<1x9x16xf32>
    %c0_72 = arith.constant 0 : index
    %c1_73 = arith.constant 1 : index
    %c0_74 = arith.constant 0 : index
    %c0_75 = arith.constant 0 : index
    %c0_76 = arith.constant 0 : index
    %49 = vector.load %arg20[%c0_72, %c1_73, %c0_74, %c0_75, %c0_76] : memref<2x2x9x9x16xf32, #tpu.memory_space<vmem>>, vector<1x1x1x9x16xf32>
    %50 = vector.shape_cast %49 : vector<1x1x1x9x16xf32> to vector<1x9x16xf32>
    %51 = vector.shape_cast %48 : vector<1x9x16xf32> to vector<1x1x1x9x16xf32>
    tpu.vector_store %arg20[%c0_72, %c1_73, %c0_74, %c0_75, %c0_76], %51 {strides = array<i32>} : memref<2x2x9x9x16xf32, #tpu.memory_space<vmem>>, vector<1x1x1x9x16xf32>,
    %cst_77 = arith.constant 0.000000e+00 : f32
    %52 = vector.broadcast %cst_77 : f32 to vector<9x1x16xf32>
    %c0_78 = arith.constant 0 : index
    %c1_79 = arith.constant 1 : index
    %c0_80 = arith.constant 0 : index
    %c8_81 = arith.constant 8 : index
    %c0_82 = arith.constant 0 : index
    %53 = vector.load %arg20[%c0_78, %c1_79, %c0_80, %c8_81, %c0_82] : memref<2x2x9x9x16xf32, #tpu.memory_space<vmem>>, vector<1x1x9x1x16xf32>
    %54 = vector.shape_cast %53 : vector<1x1x9x1x16xf32> to vector<9x1x16xf32>
    %55 = vector.shape_cast %52 : vector<9x1x16xf32> to vector<1x1x9x1x16xf32>
    tpu.vector_store %arg20[%c0_78, %c1_79, %c0_80, %c8_81, %c0_82], %55 {strides = array<i32>} : memref<2x2x9x9x16xf32, #tpu.memory_space<vmem>>, vector<1x1x9x1x16xf32>,
    %cst_83 = arith.constant 0.000000e+00 : f32
    %56 = vector.broadcast %cst_83 : f32 to vector<1x9x16xf32>
    %c1_84 = arith.constant 1 : index
    %c0_85 = arith.constant 0 : index
    %c8_86 = arith.constant 8 : index
    %c0_87 = arith.constant 0 : index
    %c0_88 = arith.constant 0 : index
    %57 = vector.load %arg20[%c1_84, %c0_85, %c8_86, %c0_87, %c0_88] : memref<2x2x9x9x16xf32, #tpu.memory_space<vmem>>, vector<1x1x1x9x16xf32>
    %58 = vector.shape_cast %57 : vector<1x1x1x9x16xf32> to vector<1x9x16xf32>
    %59 = vector.shape_cast %56 : vector<1x9x16xf32> to vector<1x1x1x9x16xf32>
    tpu.vector_store %arg20[%c1_84, %c0_85, %c8_86, %c0_87, %c0_88], %59 {strides = array<i32>} : memref<2x2x9x9x16xf32, #tpu.memory_space<vmem>>, vector<1x1x1x9x16xf32>,
    %cst_89 = arith.constant 0.000000e+00 : f32
    %60 = vector.broadcast %cst_89 : f32 to vector<9x1x16xf32>
    %c1_90 = arith.constant 1 : index
    %c0_91 = arith.constant 0 : index
    %c0_92 = arith.constant 0 : index
    %c0_93 = arith.constant 0 : index
    %c0_94 = arith.constant 0 : index
    %61 = vector.load %arg20[%c1_90, %c0_91, %c0_92, %c0_93, %c0_94] : memref<2x2x9x9x16xf32, #tpu.memory_space<vmem>>, vector<1x1x9x1x16xf32>
    %62 = vector.shape_cast %61 : vector<1x1x9x1x16xf32> to vector<9x1x16xf32>
    %63 = vector.shape_cast %60 : vector<9x1x16xf32> to vector<1x1x9x1x16xf32>
    tpu.vector_store %arg20[%c1_90, %c0_91, %c0_92, %c0_93, %c0_94], %63 {strides = array<i32>} : memref<2x2x9x9x16xf32, #tpu.memory_space<vmem>>, vector<1x1x9x1x16xf32>,
    %cst_95 = arith.constant 0.000000e+00 : f32
    %64 = vector.broadcast %cst_95 : f32 to vector<1x9x16xf32>
    %c1_96 = arith.constant 1 : index
    %c1_97 = arith.constant 1 : index
    %c8_98 = arith.constant 8 : index
    %c0_99 = arith.constant 0 : index
    %c0_100 = arith.constant 0 : index
    %65 = vector.load %arg20[%c1_96, %c1_97, %c8_98, %c0_99, %c0_100] : memref<2x2x9x9x16xf32, #tpu.memory_space<vmem>>, vector<1x1x1x9x16xf32>
    %66 = vector.shape_cast %65 : vector<1x1x1x9x16xf32> to vector<1x9x16xf32>
    %67 = vector.shape_cast %64 : vector<1x9x16xf32> to vector<1x1x1x9x16xf32>
    tpu.vector_store %arg20[%c1_96, %c1_97, %c8_98, %c0_99, %c0_100], %67 {strides = array<i32>} : memref<2x2x9x9x16xf32, #tpu.memory_space<vmem>>, vector<1x1x1x9x16xf32>,
    %cst_101 = arith.constant 0.000000e+00 : f32
    %68 = vector.broadcast %cst_101 : f32 to vector<9x1x16xf32>
    %c1_102 = arith.constant 1 : index
    %c1_103 = arith.constant 1 : index
    %c0_104 = arith.constant 0 : index
    %c8_105 = arith.constant 8 : index
    %c0_106 = arith.constant 0 : index
    %69 = vector.load %arg20[%c1_102, %c1_103, %c0_104, %c8_105, %c0_106] : memref<2x2x9x9x16xf32, #tpu.memory_space<vmem>>, vector<1x1x9x1x16xf32>
    %70 = vector.shape_cast %69 : vector<1x1x9x1x16xf32> to vector<9x1x16xf32>
    %71 = vector.shape_cast %68 : vector<9x1x16xf32> to vector<1x1x9x1x16xf32>
    tpu.vector_store %arg20[%c1_102, %c1_103, %c0_104, %c8_105, %c0_106], %71 {strides = array<i32>} : memref<2x2x9x9x16xf32, #tpu.memory_space<vmem>>, vector<1x1x9x1x16xf32>,
    %cst_107 = arith.constant 0.000000e+00 : f32
    %72 = vector.broadcast %cst_107 : f32 to vector<1x9x32xf32>
    %c0_108 = arith.constant 0 : index
    %c0_109 = arith.constant 0 : index
    %c0_110 = arith.constant 0 : index
    %c0_111 = arith.constant 0 : index
    %c0_112 = arith.constant 0 : index
    %73 = vector.load %arg21[%c0_108, %c0_109, %c0_110, %c0_111, %c0_112] : memref<2x2x9x9x32xf32, #tpu.memory_space<vmem>>, vector<1x1x1x9x32xf32>
    %74 = vector.shape_cast %73 : vector<1x1x1x9x32xf32> to vector<1x9x32xf32>
    %75 = vector.shape_cast %72 : vector<1x9x32xf32> to vector<1x1x1x9x32xf32>
    tpu.vector_store %arg21[%c0_108, %c0_109, %c0_110, %c0_111, %c0_112], %75 {strides = array<i32>} : memref<2x2x9x9x32xf32, #tpu.memory_space<vmem>>, vector<1x1x1x9x32xf32>,
    %cst_113 = arith.constant 0.000000e+00 : f32
    %76 = vector.broadcast %cst_113 : f32 to vector<9x1x32xf32>
    %c0_114 = arith.constant 0 : index
    %c0_115 = arith.constant 0 : index
    %c0_116 = arith.constant 0 : index
    %c0_117 = arith.constant 0 : index
    %c0_118 = arith.constant 0 : index
    %77 = vector.load %arg21[%c0_114, %c0_115, %c0_116, %c0_117, %c0_118] : memref<2x2x9x9x32xf32, #tpu.memory_space<vmem>>, vector<1x1x9x1x32xf32>
    %78 = vector.shape_cast %77 : vector<1x1x9x1x32xf32> to vector<9x1x32xf32>
    %79 = vector.shape_cast %76 : vector<9x1x32xf32> to vector<1x1x9x1x32xf32>
    tpu.vector_store %arg21[%c0_114, %c0_115, %c0_116, %c0_117, %c0_118], %79 {strides = array<i32>} : memref<2x2x9x9x32xf32, #tpu.memory_space<vmem>>, vector<1x1x9x1x32xf32>,
    %cst_119 = arith.constant 0.000000e+00 : f32
    %80 = vector.broadcast %cst_119 : f32 to vector<1x9x32xf32>
    %c0_120 = arith.constant 0 : index
    %c1_121 = arith.constant 1 : index
    %c0_122 = arith.constant 0 : index
    %c0_123 = arith.constant 0 : index
    %c0_124 = arith.constant 0 : index
    %81 = vector.load %arg21[%c0_120, %c1_121, %c0_122, %c0_123, %c0_124] : memref<2x2x9x9x32xf32, #tpu.memory_space<vmem>>, vector<1x1x1x9x32xf32>
    %82 = vector.shape_cast %81 : vector<1x1x1x9x32xf32> to vector<1x9x32xf32>
    %83 = vector.shape_cast %80 : vector<1x9x32xf32> to vector<1x1x1x9x32xf32>
    tpu.vector_store %arg21[%c0_120, %c1_121, %c0_122, %c0_123, %c0_124], %83 {strides = array<i32>} : memref<2x2x9x9x32xf32, #tpu.memory_space<vmem>>, vector<1x1x1x9x32xf32>,
    %cst_125 = arith.constant 0.000000e+00 : f32
    %84 = vector.broadcast %cst_125 : f32 to vector<9x1x32xf32>
    %c0_126 = arith.constant 0 : index
    %c1_127 = arith.constant 1 : index
    %c0_128 = arith.constant 0 : index
    %c8_129 = arith.constant 8 : index
    %c0_130 = arith.constant 0 : index
    %85 = vector.load %arg21[%c0_126, %c1_127, %c0_128, %c8_129, %c0_130] : memref<2x2x9x9x32xf32, #tpu.memory_space<vmem>>, vector<1x1x9x1x32xf32>
    %86 = vector.shape_cast %85 : vector<1x1x9x1x32xf32> to vector<9x1x32xf32>
    %87 = vector.shape_cast %84 : vector<9x1x32xf32> to vector<1x1x9x1x32xf32>
    tpu.vector_store %arg21[%c0_126, %c1_127, %c0_128, %c8_129, %c0_130], %87 {strides = array<i32>} : memref<2x2x9x9x32xf32, #tpu.memory_space<vmem>>, vector<1x1x9x1x32xf32>,
    %cst_131 = arith.constant 0.000000e+00 : f32
    %88 = vector.broadcast %cst_131 : f32 to vector<1x9x32xf32>
    %c1_132 = arith.constant 1 : index
    %c0_133 = arith.constant 0 : index
    %c8_134 = arith.constant 8 : index
    %c0_135 = arith.constant 0 : index
    %c0_136 = arith.constant 0 : index
    %89 = vector.load %arg21[%c1_132, %c0_133, %c8_134, %c0_135, %c0_136] : memref<2x2x9x9x32xf32, #tpu.memory_space<vmem>>, vector<1x1x1x9x32xf32>
    %90 = vector.shape_cast %89 : vector<1x1x1x9x32xf32> to vector<1x9x32xf32>
    %91 = vector.shape_cast %88 : vector<1x9x32xf32> to vector<1x1x1x9x32xf32>
    tpu.vector_store %arg21[%c1_132, %c0_133, %c8_134, %c0_135, %c0_136], %91 {strides = array<i32>} : memref<2x2x9x9x32xf32, #tpu.memory_space<vmem>>, vector<1x1x1x9x32xf32>,
    %cst_137 = arith.constant 0.000000e+00 : f32
    %92 = vector.broadcast %cst_137 : f32 to vector<9x1x32xf32>
    %c1_138 = arith.constant 1 : index
    %c0_139 = arith.constant 0 : index
    %c0_140 = arith.constant 0 : index
    %c0_141 = arith.constant 0 : index
    %c0_142 = arith.constant 0 : index
    %93 = vector.load %arg21[%c1_138, %c0_139, %c0_140, %c0_141, %c0_142] : memref<2x2x9x9x32xf32, #tpu.memory_space<vmem>>, vector<1x1x9x1x32xf32>
    %94 = vector.shape_cast %93 : vector<1x1x9x1x32xf32> to vector<9x1x32xf32>
    %95 = vector.shape_cast %92 : vector<9x1x32xf32> to vector<1x1x9x1x32xf32>
    tpu.vector_store %arg21[%c1_138, %c0_139, %c0_140, %c0_141, %c0_142], %95 {strides = array<i32>} : memref<2x2x9x9x32xf32, #tpu.memory_space<vmem>>, vector<1x1x9x1x32xf32>,
    %cst_143 = arith.constant 0.000000e+00 : f32
    %96 = vector.broadcast %cst_143 : f32 to vector<1x9x32xf32>
    %c1_144 = arith.constant 1 : index
    %c1_145 = arith.constant 1 : index
    %c8_146 = arith.constant 8 : index
    %c0_147 = arith.constant 0 : index
    %c0_148 = arith.constant 0 : index
    %97 = vector.load %arg21[%c1_144, %c1_145, %c8_146, %c0_147, %c0_148] : memref<2x2x9x9x32xf32, #tpu.memory_space<vmem>>, vector<1x1x1x9x32xf32>
    %98 = vector.shape_cast %97 : vector<1x1x1x9x32xf32> to vector<1x9x32xf32>
    %99 = vector.shape_cast %96 : vector<1x9x32xf32> to vector<1x1x1x9x32xf32>
    tpu.vector_store %arg21[%c1_144, %c1_145, %c8_146, %c0_147, %c0_148], %99 {strides = array<i32>} : memref<2x2x9x9x32xf32, #tpu.memory_space<vmem>>, vector<1x1x1x9x32xf32>,
    %cst_149 = arith.constant 0.000000e+00 : f32
    %100 = vector.broadcast %cst_149 : f32 to vector<9x1x32xf32>
    %c1_150 = arith.constant 1 : index
    %c1_151 = arith.constant 1 : index
    %c0_152 = arith.constant 0 : index
    %c8_153 = arith.constant 8 : index
    %c0_154 = arith.constant 0 : index
    %101 = vector.load %arg21[%c1_150, %c1_151, %c0_152, %c8_153, %c0_154] : memref<2x2x9x9x32xf32, #tpu.memory_space<vmem>>, vector<1x1x9x1x32xf32>
    %102 = vector.shape_cast %101 : vector<1x1x9x1x32xf32> to vector<9x1x32xf32>
    %103 = vector.shape_cast %100 : vector<9x1x32xf32> to vector<1x1x9x1x32xf32>
    tpu.vector_store %arg21[%c1_150, %c1_151, %c0_152, %c8_153, %c0_154], %103 {strides = array<i32>} : memref<2x2x9x9x32xf32, #tpu.memory_space<vmem>>, vector<1x1x9x1x32xf32>,
    %c0_155 = arith.constant 0 : index
    %c0_156 = arith.constant 0 : index
    %c0_157 = arith.constant 0 : index
    %c0_158 = arith.constant 0 : index
    %104 = vector.load %arg1[%c0_155, %c0_156, %c0_157, %c0_158] : memref<1x8x8x8xf32, #tpu.memory_space<vmem>>, vector<1x8x8x8xf32>
    %105 = vector.shape_cast %104 : vector<1x8x8x8xf32> to vector<8x8x8xf32>
    %c1_159 = arith.constant 1 : index
    %c1_160 = arith.constant 1 : index
    %c0_161 = arith.constant 0 : index
    %106 = vector.load %arg18[%c1_159, %c1_160, %c0_161] : memref<10x10x8xf32, #tpu.memory_space<vmem>>, vector<8x8x8xf32>
    tpu.vector_store %arg18[%c1_159, %c1_160, %c0_161], %105 {strides = array<i32>} : memref<10x10x8xf32, #tpu.memory_space<vmem>>, vector<8x8x8xf32>,
    %c0_162 = arith.constant 0 : index
    %c0_163 = arith.constant 0 : index
    %c0_164 = arith.constant 0 : index
    %107 = vector.load %arg18[%c0_162, %c0_163, %c0_164] : memref<10x10x8xf32, #tpu.memory_space<vmem>>, vector<8x8x8xf32>
    %108 = arith.truncf %107 : vector<8x8x8xf32> to vector<8x8x8xbf16>
    %c0_165 = arith.constant 0 : index
    %c1_166 = arith.constant 1 : index
    %c0_167 = arith.constant 0 : index
    %109 = vector.load %arg18[%c0_165, %c1_166, %c0_167] : memref<10x10x8xf32, #tpu.memory_space<vmem>>, vector<8x8x8xf32>
    %110 = arith.truncf %109 : vector<8x8x8xf32> to vector<8x8x8xbf16>
    %c0_168 = arith.constant 0 : index
    %c2 = arith.constant 2 : index
    %c0_169 = arith.constant 0 : index
    %111 = vector.load %arg18[%c0_168, %c2, %c0_169] : memref<10x10x8xf32, #tpu.memory_space<vmem>>, vector<8x8x8xf32>
    %112 = arith.truncf %111 : vector<8x8x8xf32> to vector<8x8x8xbf16>
    %c1_170 = arith.constant 1 : index
    %c0_171 = arith.constant 0 : index
    %c0_172 = arith.constant 0 : index
    %113 = vector.load %arg18[%c1_170, %c0_171, %c0_172] : memref<10x10x8xf32, #tpu.memory_space<vmem>>, vector<8x8x8xf32>
    %114 = arith.truncf %113 : vector<8x8x8xf32> to vector<8x8x8xbf16>
    %c1_173 = arith.constant 1 : index
    %c1_174 = arith.constant 1 : index
    %c0_175 = arith.constant 0 : index
    %115 = vector.load %arg18[%c1_173, %c1_174, %c0_175] : memref<10x10x8xf32, #tpu.memory_space<vmem>>, vector<8x8x8xf32>
    %116 = arith.truncf %115 : vector<8x8x8xf32> to vector<8x8x8xbf16>
    %c1_176 = arith.constant 1 : index
    %c2_177 = arith.constant 2 : index
    %c0_178 = arith.constant 0 : index
    %117 = vector.load %arg18[%c1_176, %c2_177, %c0_178] : memref<10x10x8xf32, #tpu.memory_space<vmem>>, vector<8x8x8xf32>
    %118 = arith.truncf %117 : vector<8x8x8xf32> to vector<8x8x8xbf16>
    %c2_179 = arith.constant 2 : index
    %c0_180 = arith.constant 0 : index
    %c0_181 = arith.constant 0 : index
    %119 = vector.load %arg18[%c2_179, %c0_180, %c0_181] : memref<10x10x8xf32, #tpu.memory_space<vmem>>, vector<8x8x8xf32>
    %120 = arith.truncf %119 : vector<8x8x8xf32> to vector<8x8x8xbf16>
    %c2_182 = arith.constant 2 : index
    %c1_183 = arith.constant 1 : index
    %c0_184 = arith.constant 0 : index
    %121 = vector.load %arg18[%c2_182, %c1_183, %c0_184] : memref<10x10x8xf32, #tpu.memory_space<vmem>>, vector<8x8x8xf32>
    %122 = arith.truncf %121 : vector<8x8x8xf32> to vector<8x8x8xbf16>
    %c2_185 = arith.constant 2 : index
    %c2_186 = arith.constant 2 : index
    %c0_187 = arith.constant 0 : index
    %123 = vector.load %arg18[%c2_185, %c2_186, %c0_187] : memref<10x10x8xf32, #tpu.memory_space<vmem>>, vector<8x8x8xf32>
    %124 = arith.truncf %123 : vector<8x8x8xf32> to vector<8x8x8xbf16>
    %125 = tpu.concatenate %108, %110, %112, %114, %116, %118, %120, %122, %124 in 2 : vector<8x8x8xbf16>, vector<8x8x8xbf16>, vector<8x8x8xbf16>, vector<8x8x8xbf16>, vector<8x8x8xbf16>, vector<8x8x8xbf16>, vector<8x8x8xbf16>, vector<8x8x8xbf16>, vector<8x8x8xbf16> -> vector<8x8x72xbf16>
    %126 = vector.shape_cast %125 : vector<8x8x72xbf16> to vector<64x72xbf16>
    %c0_188 = arith.constant 0 : index
    %c0_189 = arith.constant 0 : index
    %127 = vector.load %arg3[%c0_188, %c0_189] : memref<72x32xbf16, #tpu.memory_space<vmem>>, vector<72x32xbf16>
    %cst_190 = arith.constant dense<0.000000e+00> : vector<64x32xf32>
    %128 = tpu.matmul %126, %127, %cst_190 {dimension_numbers = #tpu.dot_dimension_numbers<[1], [0], [0], [1], [0, 0, 1, 1], [], []>} : vector<64x72xbf16>, vector<72x32xbf16>, vector<64x32xf32> -> vector<64x32xf32>
    %c0_191 = arith.constant 0 : index
    %c0_192 = arith.constant 0 : index
    %129 = vector.load %arg4[%c0_191, %c0_192] : memref<1x32xf32, #tpu.memory_space<vmem>>, vector<1x32xf32>
    %130 = vector.broadcast %129 : vector<1x32xf32> to vector<64x32xf32>
    %131 = arith.addf %128, %130 : vector<64x32xf32>
    %132 = vector.extract_strided_slice %131 {offsets = [0, 0], sizes = [64, 8], strides = [1, 1]} : vector<64x32xf32> to vector<64x8xf32>
    %133 = vector.shape_cast %132 : vector<64x8xf32> to vector<8x8x8xf32>
    %c1_193 = arith.constant 1 : index
    %c1_194 = arith.constant 1 : index
    %c0_195 = arith.constant 0 : index
    %c0_196 = arith.constant 0 : index
    %c0_197 = arith.constant 0 : index
    %134 = vector.load %arg19[%c1_193, %c1_194, %c0_195, %c0_196, %c0_197] : memref<2x2x9x9x8xf32, #tpu.memory_space<vmem>>, vector<1x1x8x8x8xf32>
    %135 = vector.shape_cast %134 : vector<1x1x8x8x8xf32> to vector<8x8x8xf32>
    %136 = vector.shape_cast %133 : vector<8x8x8xf32> to vector<1x1x8x8x8xf32>
    tpu.vector_store %arg19[%c1_193, %c1_194, %c0_195, %c0_196, %c0_197], %136 {strides = array<i32>} : memref<2x2x9x9x8xf32, #tpu.memory_space<vmem>>, vector<1x1x8x8x8xf32>,
    %137 = vector.extract_strided_slice %131 {offsets = [0, 8], sizes = [64, 8], strides = [1, 1]} : vector<64x32xf32> to vector<64x8xf32>
    %138 = vector.shape_cast %137 : vector<64x8xf32> to vector<8x8x8xf32>
    %c1_198 = arith.constant 1 : index
    %c0_199 = arith.constant 0 : index
    %c0_200 = arith.constant 0 : index
    %c1_201 = arith.constant 1 : index
    %c0_202 = arith.constant 0 : index
    %139 = vector.load %arg19[%c1_198, %c0_199, %c0_200, %c1_201, %c0_202] : memref<2x2x9x9x8xf32, #tpu.memory_space<vmem>>, vector<1x1x8x8x8xf32>
    %140 = vector.shape_cast %139 : vector<1x1x8x8x8xf32> to vector<8x8x8xf32>
    %141 = vector.shape_cast %138 : vector<8x8x8xf32> to vector<1x1x8x8x8xf32>
    tpu.vector_store %arg19[%c1_198, %c0_199, %c0_200, %c1_201, %c0_202], %141 {strides = array<i32>} : memref<2x2x9x9x8xf32, #tpu.memory_space<vmem>>, vector<1x1x8x8x8xf32>,
    %142 = vector.extract_strided_slice %131 {offsets = [0, 16], sizes = [64, 8], strides = [1, 1]} : vector<64x32xf32> to vector<64x8xf32>
    %143 = vector.shape_cast %142 : vector<64x8xf32> to vector<8x8x8xf32>
    %c0_203 = arith.constant 0 : index
    %c1_204 = arith.constant 1 : index
    %c1_205 = arith.constant 1 : index
    %c0_206 = arith.constant 0 : index
    %c0_207 = arith.constant 0 : index
    %144 = vector.load %arg19[%c0_203, %c1_204, %c1_205, %c0_206, %c0_207] : memref<2x2x9x9x8xf32, #tpu.memory_space<vmem>>, vector<1x1x8x8x8xf32>
    %145 = vector.shape_cast %144 : vector<1x1x8x8x8xf32> to vector<8x8x8xf32>
    %146 = vector.shape_cast %143 : vector<8x8x8xf32> to vector<1x1x8x8x8xf32>
    tpu.vector_store %arg19[%c0_203, %c1_204, %c1_205, %c0_206, %c0_207], %146 {strides = array<i32>} : memref<2x2x9x9x8xf32, #tpu.memory_space<vmem>>, vector<1x1x8x8x8xf32>,
    %147 = vector.extract_strided_slice %131 {offsets = [0, 24], sizes = [64, 8], strides = [1, 1]} : vector<64x32xf32> to vector<64x8xf32>
    %148 = vector.shape_cast %147 : vector<64x8xf32> to vector<8x8x8xf32>
    %c0_208 = arith.constant 0 : index
    %c0_209 = arith.constant 0 : index
    %c1_210 = arith.constant 1 : index
    %c1_211 = arith.constant 1 : index
    %c0_212 = arith.constant 0 : index
    %149 = vector.load %arg19[%c0_208, %c0_209, %c1_210, %c1_211, %c0_212] : memref<2x2x9x9x8xf32, #tpu.memory_space<vmem>>, vector<1x1x8x8x8xf32>
    %150 = vector.shape_cast %149 : vector<1x1x8x8x8xf32> to vector<8x8x8xf32>
    %151 = vector.shape_cast %148 : vector<8x8x8xf32> to vector<1x1x8x8x8xf32>
    tpu.vector_store %arg19[%c0_208, %c0_209, %c1_210, %c1_211, %c0_212], %151 {strides = array<i32>} : memref<2x2x9x9x8xf32, #tpu.memory_space<vmem>>, vector<1x1x8x8x8xf32>,
    %c0_213 = arith.constant 0 : index
    %c0_214 = arith.constant 0 : index
    %c0_215 = arith.constant 0 : index
    %c0_216 = arith.constant 0 : index
    %c0_217 = arith.constant 0 : index
    %152 = vector.load %arg19[%c0_213, %c0_214, %c0_215, %c0_216, %c0_217] : memref<2x2x9x9x8xf32, #tpu.memory_space<vmem>>, vector<1x1x8x8x8xf32>
    %153 = vector.shape_cast %152 : vector<1x1x8x8x8xf32> to vector<8x8x8xf32>
    %c0_218 = arith.constant 0 : index
    %c1_219 = arith.constant 1 : index
    %c0_220 = arith.constant 0 : index
    %c0_221 = arith.constant 0 : index
    %c0_222 = arith.constant 0 : index
    %154 = vector.load %arg19[%c0_218, %c1_219, %c0_220, %c0_221, %c0_222] : memref<2x2x9x9x8xf32, #tpu.memory_space<vmem>>, vector<1x1x8x8x8xf32>
    %155 = vector.shape_cast %154 : vector<1x1x8x8x8xf32> to vector<8x8x8xf32>
    %156 = arith.addf %153, %155 : vector<8x8x8xf32>
    %c1_223 = arith.constant 1 : index
    %c0_224 = arith.constant 0 : index
    %c0_225 = arith.constant 0 : index
    %c0_226 = arith.constant 0 : index
    %c0_227 = arith.constant 0 : index
    %157 = vector.load %arg19[%c1_223, %c0_224, %c0_225, %c0_226, %c0_227] : memref<2x2x9x9x8xf32, #tpu.memory_space<vmem>>, vector<1x1x8x8x8xf32>
    %158 = vector.shape_cast %157 : vector<1x1x8x8x8xf32> to vector<8x8x8xf32>
    %159 = arith.addf %156, %158 : vector<8x8x8xf32>
    %c1_228 = arith.constant 1 : index
    %c1_229 = arith.constant 1 : index
    %c0_230 = arith.constant 0 : index
    %c0_231 = arith.constant 0 : index
    %c0_232 = arith.constant 0 : index
    %160 = vector.load %arg19[%c1_228, %c1_229, %c0_230, %c0_231, %c0_232] : memref<2x2x9x9x8xf32, #tpu.memory_space<vmem>>, vector<1x1x8x8x8xf32>
    %161 = vector.shape_cast %160 : vector<1x1x8x8x8xf32> to vector<8x8x8xf32>
    %162 = arith.addf %159, %161 : vector<8x8x8xf32>
    %cst_233 = arith.constant 2.500000e-01 : f32
    %163 = vector.broadcast %cst_233 : f32 to vector<8x8x8xf32>
    %164 = arith.mulf %162, %163 : vector<8x8x8xf32>
    %c0_234 = arith.constant 0 : index
    %c0_235 = arith.constant 0 : index
    %c0_236 = arith.constant 0 : index
    %c0_237 = arith.constant 0 : index
    %c0_238 = arith.constant 0 : index
    %c0_239 = arith.constant 0 : index
    %165 = vector.load %arg2[%c0_234, %c0_235, %c0_236, %c0_237, %c0_238, %c0_239] : memref<1x2x2x8x8x8xf32, #tpu.memory_space<vmem>>, vector<1x1x1x8x8x8xf32>
    %166 = vector.shape_cast %165 : vector<1x1x1x8x8x8xf32> to vector<8x8x8xf32>
    %167 = tpu.concatenate %164, %166 in 2 : vector<8x8x8xf32>, vector<8x8x8xf32> -> vector<8x8x16xf32>
    %c1_240 = arith.constant 1 : index
    %c1_241 = arith.constant 1 : index
    %c0_242 = arith.constant 0 : index
    %c0_243 = arith.constant 0 : index
    %c0_244 = arith.constant 0 : index
    %168 = vector.load %arg20[%c1_240, %c1_241, %c0_242, %c0_243, %c0_244] : memref<2x2x9x9x16xf32, #tpu.memory_space<vmem>>, vector<1x1x8x8x16xf32>
    %169 = vector.shape_cast %168 : vector<1x1x8x8x16xf32> to vector<8x8x16xf32>
    %170 = vector.shape_cast %167 : vector<8x8x16xf32> to vector<1x1x8x8x16xf32>
    tpu.vector_store %arg20[%c1_240, %c1_241, %c0_242, %c0_243, %c0_244], %170 {strides = array<i32>} : memref<2x2x9x9x16xf32, #tpu.memory_space<vmem>>, vector<1x1x8x8x16xf32>,
    %c0_245 = arith.constant 0 : index
    %c1_246 = arith.constant 1 : index
    %c0_247 = arith.constant 0 : index
    %c0_248 = arith.constant 0 : index
    %c0_249 = arith.constant 0 : index
    %171 = vector.load %arg19[%c0_245, %c1_246, %c0_247, %c0_248, %c0_249] : memref<2x2x9x9x8xf32, #tpu.memory_space<vmem>>, vector<1x1x8x8x8xf32>
    %172 = vector.shape_cast %171 : vector<1x1x8x8x8xf32> to vector<8x8x8xf32>
    %c0_250 = arith.constant 0 : index
    %c0_251 = arith.constant 0 : index
    %c0_252 = arith.constant 0 : index
    %c1_253 = arith.constant 1 : index
    %c0_254 = arith.constant 0 : index
    %173 = vector.load %arg19[%c0_250, %c0_251, %c0_252, %c1_253, %c0_254] : memref<2x2x9x9x8xf32, #tpu.memory_space<vmem>>, vector<1x1x8x8x8xf32>
    %174 = vector.shape_cast %173 : vector<1x1x8x8x8xf32> to vector<8x8x8xf32>
    %175 = arith.addf %172, %174 : vector<8x8x8xf32>
    %c1_255 = arith.constant 1 : index
    %c1_256 = arith.constant 1 : index
    %c0_257 = arith.constant 0 : index
    %c0_258 = arith.constant 0 : index
    %c0_259 = arith.constant 0 : index
    %176 = vector.load %arg19[%c1_255, %c1_256, %c0_257, %c0_258, %c0_259] : memref<2x2x9x9x8xf32, #tpu.memory_space<vmem>>, vector<1x1x8x8x8xf32>
    %177 = vector.shape_cast %176 : vector<1x1x8x8x8xf32> to vector<8x8x8xf32>
    %178 = arith.addf %175, %177 : vector<8x8x8xf32>
    %c1_260 = arith.constant 1 : index
    %c0_261 = arith.constant 0 : index
    %c0_262 = arith.constant 0 : index
    %c1_263 = arith.constant 1 : index
    %c0_264 = arith.constant 0 : index
    %179 = vector.load %arg19[%c1_260, %c0_261, %c0_262, %c1_263, %c0_264] : memref<2x2x9x9x8xf32, #tpu.memory_space<vmem>>, vector<1x1x8x8x8xf32>
    %180 = vector.shape_cast %179 : vector<1x1x8x8x8xf32> to vector<8x8x8xf32>
    %181 = arith.addf %178, %180 : vector<8x8x8xf32>
    %cst_265 = arith.constant 2.500000e-01 : f32
    %182 = vector.broadcast %cst_265 : f32 to vector<8x8x8xf32>
    %183 = arith.mulf %181, %182 : vector<8x8x8xf32>
    %c0_266 = arith.constant 0 : index
    %c0_267 = arith.constant 0 : index
    %c1_268 = arith.constant 1 : index
    %c0_269 = arith.constant 0 : index
    %c0_270 = arith.constant 0 : index
    %c0_271 = arith.constant 0 : index
    %184 = vector.load %arg2[%c0_266, %c0_267, %c1_268, %c0_269, %c0_270, %c0_271] : memref<1x2x2x8x8x8xf32, #tpu.memory_space<vmem>>, vector<1x1x1x8x8x8xf32>
    %185 = vector.shape_cast %184 : vector<1x1x1x8x8x8xf32> to vector<8x8x8xf32>
    %186 = tpu.concatenate %183, %185 in 2 : vector<8x8x8xf32>, vector<8x8x8xf32> -> vector<8x8x16xf32>
    %c1_272 = arith.constant 1 : index
    %c0_273 = arith.constant 0 : index
    %c0_274 = arith.constant 0 : index
    %c1_275 = arith.constant 1 : index
    %c0_276 = arith.constant 0 : index
    %187 = vector.load %arg20[%c1_272, %c0_273, %c0_274, %c1_275, %c0_276] : memref<2x2x9x9x16xf32, #tpu.memory_space<vmem>>, vector<1x1x8x8x16xf32>
    %188 = vector.shape_cast %187 : vector<1x1x8x8x16xf32> to vector<8x8x16xf32>
    %189 = vector.shape_cast %186 : vector<8x8x16xf32> to vector<1x1x8x8x16xf32>
    tpu.vector_store %arg20[%c1_272, %c0_273, %c0_274, %c1_275, %c0_276], %189 {strides = array<i32>} : memref<2x2x9x9x16xf32, #tpu.memory_space<vmem>>, vector<1x1x8x8x16xf32>,
    %c1_277 = arith.constant 1 : index
    %c0_278 = arith.constant 0 : index
    %c0_279 = arith.constant 0 : index
    %c0_280 = arith.constant 0 : index
    %c0_281 = arith.constant 0 : index
    %190 = vector.load %arg19[%c1_277, %c0_278, %c0_279, %c0_280, %c0_281] : memref<2x2x9x9x8xf32, #tpu.memory_space<vmem>>, vector<1x1x8x8x8xf32>
    %191 = vector.shape_cast %190 : vector<1x1x8x8x8xf32> to vector<8x8x8xf32>
    %c1_282 = arith.constant 1 : index
    %c1_283 = arith.constant 1 : index
    %c0_284 = arith.constant 0 : index
    %c0_285 = arith.constant 0 : index
    %c0_286 = arith.constant 0 : index
    %192 = vector.load %arg19[%c1_282, %c1_283, %c0_284, %c0_285, %c0_286] : memref<2x2x9x9x8xf32, #tpu.memory_space<vmem>>, vector<1x1x8x8x8xf32>
    %193 = vector.shape_cast %192 : vector<1x1x8x8x8xf32> to vector<8x8x8xf32>
    %194 = arith.addf %191, %193 : vector<8x8x8xf32>
    %c0_287 = arith.constant 0 : index
    %c0_288 = arith.constant 0 : index
    %c1_289 = arith.constant 1 : index
    %c0_290 = arith.constant 0 : index
    %c0_291 = arith.constant 0 : index
    %195 = vector.load %arg19[%c0_287, %c0_288, %c1_289, %c0_290, %c0_291] : memref<2x2x9x9x8xf32, #tpu.memory_space<vmem>>, vector<1x1x8x8x8xf32>
    %196 = vector.shape_cast %195 : vector<1x1x8x8x8xf32> to vector<8x8x8xf32>
    %197 = arith.addf %194, %196 : vector<8x8x8xf32>
    %c0_292 = arith.constant 0 : index
    %c1_293 = arith.constant 1 : index
    %c1_294 = arith.constant 1 : index
    %c0_295 = arith.constant 0 : index
    %c0_296 = arith.constant 0 : index
    %198 = vector.load %arg19[%c0_292, %c1_293, %c1_294, %c0_295, %c0_296] : memref<2x2x9x9x8xf32, #tpu.memory_space<vmem>>, vector<1x1x8x8x8xf32>
    %199 = vector.shape_cast %198 : vector<1x1x8x8x8xf32> to vector<8x8x8xf32>
    %200 = arith.addf %197, %199 : vector<8x8x8xf32>
    %cst_297 = arith.constant 2.500000e-01 : f32
    %201 = vector.broadcast %cst_297 : f32 to vector<8x8x8xf32>
    %202 = arith.mulf %200, %201 : vector<8x8x8xf32>
    %c0_298 = arith.constant 0 : index
    %c1_299 = arith.constant 1 : index
    %c0_300 = arith.constant 0 : index
    %c0_301 = arith.constant 0 : index
    %c0_302 = arith.constant 0 : index
    %c0_303 = arith.constant 0 : index
    %203 = vector.load %arg2[%c0_298, %c1_299, %c0_300, %c0_301, %c0_302, %c0_303] : memref<1x2x2x8x8x8xf32, #tpu.memory_space<vmem>>, vector<1x1x1x8x8x8xf32>
    %204 = vector.shape_cast %203 : vector<1x1x1x8x8x8xf32> to vector<8x8x8xf32>
    %205 = tpu.concatenate %202, %204 in 2 : vector<8x8x8xf32>, vector<8x8x8xf32> -> vector<8x8x16xf32>
    %c0_304 = arith.constant 0 : index
    %c1_305 = arith.constant 1 : index
    %c1_306 = arith.constant 1 : index
    %c0_307 = arith.constant 0 : index
    %c0_308 = arith.constant 0 : index
    %206 = vector.load %arg20[%c0_304, %c1_305, %c1_306, %c0_307, %c0_308] : memref<2x2x9x9x16xf32, #tpu.memory_space<vmem>>, vector<1x1x8x8x16xf32>
    %207 = vector.shape_cast %206 : vector<1x1x8x8x16xf32> to vector<8x8x16xf32>
    %208 = vector.shape_cast %205 : vector<8x8x16xf32> to vector<1x1x8x8x16xf32>
    tpu.vector_store %arg20[%c0_304, %c1_305, %c1_306, %c0_307, %c0_308], %208 {strides = array<i32>} : memref<2x2x9x9x16xf32, #tpu.memory_space<vmem>>, vector<1x1x8x8x16xf32>,
    %c1_309 = arith.constant 1 : index
    %c1_310 = arith.constant 1 : index
    %c0_311 = arith.constant 0 : index
    %c0_312 = arith.constant 0 : index
    %c0_313 = arith.constant 0 : index
    %209 = vector.load %arg19[%c1_309, %c1_310, %c0_311, %c0_312, %c0_313] : memref<2x2x9x9x8xf32, #tpu.memory_space<vmem>>, vector<1x1x8x8x8xf32>
    %210 = vector.shape_cast %209 : vector<1x1x8x8x8xf32> to vector<8x8x8xf32>
    %c1_314 = arith.constant 1 : index
    %c0_315 = arith.constant 0 : index
    %c0_316 = arith.constant 0 : index
    %c1_317 = arith.constant 1 : index
    %c0_318 = arith.constant 0 : index
    %211 = vector.load %arg19[%c1_314, %c0_315, %c0_316, %c1_317, %c0_318] : memref<2x2x9x9x8xf32, #tpu.memory_space<vmem>>, vector<1x1x8x8x8xf32>
    %212 = vector.shape_cast %211 : vector<1x1x8x8x8xf32> to vector<8x8x8xf32>
    %213 = arith.addf %210, %212 : vector<8x8x8xf32>
    %c0_319 = arith.constant 0 : index
    %c1_320 = arith.constant 1 : index
    %c1_321 = arith.constant 1 : index
    %c0_322 = arith.constant 0 : index
    %c0_323 = arith.constant 0 : index
    %214 = vector.load %arg19[%c0_319, %c1_320, %c1_321, %c0_322, %c0_323] : memref<2x2x9x9x8xf32, #tpu.memory_space<vmem>>, vector<1x1x8x8x8xf32>
    %215 = vector.shape_cast %214 : vector<1x1x8x8x8xf32> to vector<8x8x8xf32>
    %216 = arith.addf %213, %215 : vector<8x8x8xf32>
    %c0_324 = arith.constant 0 : index
    %c0_325 = arith.constant 0 : index
    %c1_326 = arith.constant 1 : index
    %c1_327 = arith.constant 1 : index
    %c0_328 = arith.constant 0 : index
    %217 = vector.load %arg19[%c0_324, %c0_325, %c1_326, %c1_327, %c0_328] : memref<2x2x9x9x8xf32, #tpu.memory_space<vmem>>, vector<1x1x8x8x8xf32>
    %218 = vector.shape_cast %217 : vector<1x1x8x8x8xf32> to vector<8x8x8xf32>
    %219 = arith.addf %216, %218 : vector<8x8x8xf32>
    %cst_329 = arith.constant 2.500000e-01 : f32
    %220 = vector.broadcast %cst_329 : f32 to vector<8x8x8xf32>
    %221 = arith.mulf %219, %220 : vector<8x8x8xf32>
    %c0_330 = arith.constant 0 : index
    %c1_331 = arith.constant 1 : index
    %c1_332 = arith.constant 1 : index
    %c0_333 = arith.constant 0 : index
    %c0_334 = arith.constant 0 : index
    %c0_335 = arith.constant 0 : index
    %222 = vector.load %arg2[%c0_330, %c1_331, %c1_332, %c0_333, %c0_334, %c0_335] : memref<1x2x2x8x8x8xf32, #tpu.memory_space<vmem>>, vector<1x1x1x8x8x8xf32>
    %223 = vector.shape_cast %222 : vector<1x1x1x8x8x8xf32> to vector<8x8x8xf32>
    %224 = tpu.concatenate %221, %223 in 2 : vector<8x8x8xf32>, vector<8x8x8xf32> -> vector<8x8x16xf32>
    %c0_336 = arith.constant 0 : index
    %c0_337 = arith.constant 0 : index
    %c1_338 = arith.constant 1 : index
    %c1_339 = arith.constant 1 : index
    %c0_340 = arith.constant 0 : index
    %225 = vector.load %arg20[%c0_336, %c0_337, %c1_338, %c1_339, %c0_340] : memref<2x2x9x9x16xf32, #tpu.memory_space<vmem>>, vector<1x1x8x8x16xf32>
    %226 = vector.shape_cast %225 : vector<1x1x8x8x16xf32> to vector<8x8x16xf32>
    %227 = vector.shape_cast %224 : vector<8x8x16xf32> to vector<1x1x8x8x16xf32>
    tpu.vector_store %arg20[%c0_336, %c0_337, %c1_338, %c1_339, %c0_340], %227 {strides = array<i32>} : memref<2x2x9x9x16xf32, #tpu.memory_space<vmem>>, vector<1x1x8x8x16xf32>,
    %c0_341 = arith.constant 0 : index
    %c0_342 = arith.constant 0 : index
    %c0_343 = arith.constant 0 : index
    %c0_344 = arith.constant 0 : index
    %c0_345 = arith.constant 0 : index
    %228 = vector.load %arg20[%c0_341, %c0_342, %c0_343, %c0_344, %c0_345] : memref<2x2x9x9x16xf32, #tpu.memory_space<vmem>>, vector<1x1x8x8x16xf32>
    %229 = vector.shape_cast %228 : vector<1x1x8x8x16xf32> to vector<8x8x16xf32>
    %230 = arith.truncf %229 : vector<8x8x16xf32> to vector<8x8x16xbf16>
    %c0_346 = arith.constant 0 : index
    %c1_347 = arith.constant 1 : index
    %c0_348 = arith.constant 0 : index
    %c0_349 = arith.constant 0 : index
    %c0_350 = arith.constant 0 : index
    %231 = vector.load %arg20[%c0_346, %c1_347, %c0_348, %c0_349, %c0_350] : memref<2x2x9x9x16xf32, #tpu.memory_space<vmem>>, vector<1x1x8x8x16xf32>
    %232 = vector.shape_cast %231 : vector<1x1x8x8x16xf32> to vector<8x8x16xf32>
    %233 = arith.truncf %232 : vector<8x8x16xf32> to vector<8x8x16xbf16>
    %c0_351 = arith.constant 0 : index
    %c0_352 = arith.constant 0 : index
    %c0_353 = arith.constant 0 : index
    %c1_354 = arith.constant 1 : index
    %c0_355 = arith.constant 0 : index
    %234 = vector.load %arg20[%c0_351, %c0_352, %c0_353, %c1_354, %c0_355] : memref<2x2x9x9x16xf32, #tpu.memory_space<vmem>>, vector<1x1x8x8x16xf32>
    %235 = vector.shape_cast %234 : vector<1x1x8x8x16xf32> to vector<8x8x16xf32>
    %236 = arith.truncf %235 : vector<8x8x16xf32> to vector<8x8x16xbf16>
    %c1_356 = arith.constant 1 : index
    %c0_357 = arith.constant 0 : index
    %c0_358 = arith.constant 0 : index
    %c0_359 = arith.constant 0 : index
    %c0_360 = arith.constant 0 : index
    %237 = vector.load %arg20[%c1_356, %c0_357, %c0_358, %c0_359, %c0_360] : memref<2x2x9x9x16xf32, #tpu.memory_space<vmem>>, vector<1x1x8x8x16xf32>
    %238 = vector.shape_cast %237 : vector<1x1x8x8x16xf32> to vector<8x8x16xf32>
    %239 = arith.truncf %238 : vector<8x8x16xf32> to vector<8x8x16xbf16>
    %c1_361 = arith.constant 1 : index
    %c1_362 = arith.constant 1 : index
    %c0_363 = arith.constant 0 : index
    %c0_364 = arith.constant 0 : index
    %c0_365 = arith.constant 0 : index
    %240 = vector.load %arg20[%c1_361, %c1_362, %c0_363, %c0_364, %c0_365] : memref<2x2x9x9x16xf32, #tpu.memory_space<vmem>>, vector<1x1x8x8x16xf32>
    %241 = vector.shape_cast %240 : vector<1x1x8x8x16xf32> to vector<8x8x16xf32>
    %242 = arith.truncf %241 : vector<8x8x16xf32> to vector<8x8x16xbf16>
    %c1_366 = arith.constant 1 : index
    %c0_367 = arith.constant 0 : index
    %c0_368 = arith.constant 0 : index
    %c1_369 = arith.constant 1 : index
    %c0_370 = arith.constant 0 : index
    %243 = vector.load %arg20[%c1_366, %c0_367, %c0_368, %c1_369, %c0_370] : memref<2x2x9x9x16xf32, #tpu.memory_space<vmem>>, vector<1x1x8x8x16xf32>
    %244 = vector.shape_cast %243 : vector<1x1x8x8x16xf32> to vector<8x8x16xf32>
    %245 = arith.truncf %244 : vector<8x8x16xf32> to vector<8x8x16xbf16>
    %c0_371 = arith.constant 0 : index
    %c0_372 = arith.constant 0 : index
    %c1_373 = arith.constant 1 : index
    %c0_374 = arith.constant 0 : index
    %c0_375 = arith.constant 0 : index
    %246 = vector.load %arg20[%c0_371, %c0_372, %c1_373, %c0_374, %c0_375] : memref<2x2x9x9x16xf32, #tpu.memory_space<vmem>>, vector<1x1x8x8x16xf32>
    %247 = vector.shape_cast %246 : vector<1x1x8x8x16xf32> to vector<8x8x16xf32>
    %248 = arith.truncf %247 : vector<8x8x16xf32> to vector<8x8x16xbf16>
    %c0_376 = arith.constant 0 : index
    %c1_377 = arith.constant 1 : index
    %c1_378 = arith.constant 1 : index
    %c0_379 = arith.constant 0 : index
    %c0_380 = arith.constant 0 : index
    %249 = vector.load %arg20[%c0_376, %c1_377, %c1_378, %c0_379, %c0_380] : memref<2x2x9x9x16xf32, #tpu.memory_space<vmem>>, vector<1x1x8x8x16xf32>
    %250 = vector.shape_cast %249 : vector<1x1x8x8x16xf32> to vector<8x8x16xf32>
    %251 = arith.truncf %250 : vector<8x8x16xf32> to vector<8x8x16xbf16>
    %c0_381 = arith.constant 0 : index
    %c0_382 = arith.constant 0 : index
    %c1_383 = arith.constant 1 : index
    %c1_384 = arith.constant 1 : index
    %c0_385 = arith.constant 0 : index
    %252 = vector.load %arg20[%c0_381, %c0_382, %c1_383, %c1_384, %c0_385] : memref<2x2x9x9x16xf32, #tpu.memory_space<vmem>>, vector<1x1x8x8x16xf32>
    %253 = vector.shape_cast %252 : vector<1x1x8x8x16xf32> to vector<8x8x16xf32>
    %254 = arith.truncf %253 : vector<8x8x16xf32> to vector<8x8x16xbf16>
    %c0_386 = arith.constant 0 : index
    %c1_387 = arith.constant 1 : index
    %c0_388 = arith.constant 0 : index
    %c0_389 = arith.constant 0 : index
    %c0_390 = arith.constant 0 : index
    %255 = vector.load %arg20[%c0_386, %c1_387, %c0_388, %c0_389, %c0_390] : memref<2x2x9x9x16xf32, #tpu.memory_space<vmem>>, vector<1x1x8x8x16xf32>
    %256 = vector.shape_cast %255 : vector<1x1x8x8x16xf32> to vector<8x8x16xf32>
    %257 = arith.truncf %256 : vector<8x8x16xf32> to vector<8x8x16xbf16>
    %c0_391 = arith.constant 0 : index
    %c0_392 = arith.constant 0 : index
    %c0_393 = arith.constant 0 : index
    %c1_394 = arith.constant 1 : index
    %c0_395 = arith.constant 0 : index
    %258 = vector.load %arg20[%c0_391, %c0_392, %c0_393, %c1_394, %c0_395] : memref<2x2x9x9x16xf32, #tpu.memory_space<vmem>>, vector<1x1x8x8x16xf32>
    %259 = vector.shape_cast %258 : vector<1x1x8x8x16xf32> to vector<8x8x16xf32>
    %260 = arith.truncf %259 : vector<8x8x16xf32> to vector<8x8x16xbf16>
    %c0_396 = arith.constant 0 : index
    %c1_397 = arith.constant 1 : index
    %c0_398 = arith.constant 0 : index
    %c1_399 = arith.constant 1 : index
    %c0_400 = arith.constant 0 : index
    %261 = vector.load %arg20[%c0_396, %c1_397, %c0_398, %c1_399, %c0_400] : memref<2x2x9x9x16xf32, #tpu.memory_space<vmem>>, vector<1x1x8x8x16xf32>
    %262 = vector.shape_cast %261 : vector<1x1x8x8x16xf32> to vector<8x8x16xf32>
    %263 = arith.truncf %262 : vector<8x8x16xf32> to vector<8x8x16xbf16>
    %c1_401 = arith.constant 1 : index
    %c1_402 = arith.constant 1 : index
    %c0_403 = arith.constant 0 : index
    %c0_404 = arith.constant 0 : index
    %c0_405 = arith.constant 0 : index
    %264 = vector.load %arg20[%c1_401, %c1_402, %c0_403, %c0_404, %c0_405] : memref<2x2x9x9x16xf32, #tpu.memory_space<vmem>>, vector<1x1x8x8x16xf32>
    %265 = vector.shape_cast %264 : vector<1x1x8x8x16xf32> to vector<8x8x16xf32>
    %266 = arith.truncf %265 : vector<8x8x16xf32> to vector<8x8x16xbf16>
    %c1_406 = arith.constant 1 : index
    %c0_407 = arith.constant 0 : index
    %c0_408 = arith.constant 0 : index
    %c1_409 = arith.constant 1 : index
    %c0_410 = arith.constant 0 : index
    %267 = vector.load %arg20[%c1_406, %c0_407, %c0_408, %c1_409, %c0_410] : memref<2x2x9x9x16xf32, #tpu.memory_space<vmem>>, vector<1x1x8x8x16xf32>
    %268 = vector.shape_cast %267 : vector<1x1x8x8x16xf32> to vector<8x8x16xf32>
    %269 = arith.truncf %268 : vector<8x8x16xf32> to vector<8x8x16xbf16>
    %c1_411 = arith.constant 1 : index
    %c1_412 = arith.constant 1 : index
    %c0_413 = arith.constant 0 : index
    %c1_414 = arith.constant 1 : index
    %c0_415 = arith.constant 0 : index
    %270 = vector.load %arg20[%c1_411, %c1_412, %c0_413, %c1_414, %c0_415] : memref<2x2x9x9x16xf32, #tpu.memory_space<vmem>>, vector<1x1x8x8x16xf32>
    %271 = vector.shape_cast %270 : vector<1x1x8x8x16xf32> to vector<8x8x16xf32>
    %272 = arith.truncf %271 : vector<8x8x16xf32> to vector<8x8x16xbf16>
    %c0_416 = arith.constant 0 : index
    %c1_417 = arith.constant 1 : index
    %c1_418 = arith.constant 1 : index
    %c0_419 = arith.constant 0 : index
    %c0_420 = arith.constant 0 : index
    %273 = vector.load %arg20[%c0_416, %c1_417, %c1_418, %c0_419, %c0_420] : memref<2x2x9x9x16xf32, #tpu.memory_space<vmem>>, vector<1x1x8x8x16xf32>
    %274 = vector.shape_cast %273 : vector<1x1x8x8x16xf32> to vector<8x8x16xf32>
    %275 = arith.truncf %274 : vector<8x8x16xf32> to vector<8x8x16xbf16>
    %c0_421 = arith.constant 0 : index
    %c0_422 = arith.constant 0 : index
    %c1_423 = arith.constant 1 : index
    %c1_424 = arith.constant 1 : index
    %c0_425 = arith.constant 0 : index
    %276 = vector.load %arg20[%c0_421, %c0_422, %c1_423, %c1_424, %c0_425] : memref<2x2x9x9x16xf32, #tpu.memory_space<vmem>>, vector<1x1x8x8x16xf32>
    %277 = vector.shape_cast %276 : vector<1x1x8x8x16xf32> to vector<8x8x16xf32>
    %278 = arith.truncf %277 : vector<8x8x16xf32> to vector<8x8x16xbf16>
    %c0_426 = arith.constant 0 : index
    %c1_427 = arith.constant 1 : index
    %c1_428 = arith.constant 1 : index
    %c1_429 = arith.constant 1 : index
    %c0_430 = arith.constant 0 : index
    %279 = vector.load %arg20[%c0_426, %c1_427, %c1_428, %c1_429, %c0_430] : memref<2x2x9x9x16xf32, #tpu.memory_space<vmem>>, vector<1x1x8x8x16xf32>
    %280 = vector.shape_cast %279 : vector<1x1x8x8x16xf32> to vector<8x8x16xf32>
    %281 = arith.truncf %280 : vector<8x8x16xf32> to vector<8x8x16xbf16>
    %c1_431 = arith.constant 1 : index
    %c0_432 = arith.constant 0 : index
    %c0_433 = arith.constant 0 : index
    %c0_434 = arith.constant 0 : index
    %c0_435 = arith.constant 0 : index
    %282 = vector.load %arg20[%c1_431, %c0_432, %c0_433, %c0_434, %c0_435] : memref<2x2x9x9x16xf32, #tpu.memory_space<vmem>>, vector<1x1x8x8x16xf32>
    %283 = vector.shape_cast %282 : vector<1x1x8x8x16xf32> to vector<8x8x16xf32>
    %284 = arith.truncf %283 : vector<8x8x16xf32> to vector<8x8x16xbf16>
    %c1_436 = arith.constant 1 : index
    %c1_437 = arith.constant 1 : index
    %c0_438 = arith.constant 0 : index
    %c0_439 = arith.constant 0 : index
    %c0_440 = arith.constant 0 : index
    %285 = vector.load %arg20[%c1_436, %c1_437, %c0_438, %c0_439, %c0_440] : memref<2x2x9x9x16xf32, #tpu.memory_space<vmem>>, vector<1x1x8x8x16xf32>
    %286 = vector.shape_cast %285 : vector<1x1x8x8x16xf32> to vector<8x8x16xf32>
    %287 = arith.truncf %286 : vector<8x8x16xf32> to vector<8x8x16xbf16>
    %c1_441 = arith.constant 1 : index
    %c0_442 = arith.constant 0 : index
    %c0_443 = arith.constant 0 : index
    %c1_444 = arith.constant 1 : index
    %c0_445 = arith.constant 0 : index
    %288 = vector.load %arg20[%c1_441, %c0_442, %c0_443, %c1_444, %c0_445] : memref<2x2x9x9x16xf32, #tpu.memory_space<vmem>>, vector<1x1x8x8x16xf32>
    %289 = vector.shape_cast %288 : vector<1x1x8x8x16xf32> to vector<8x8x16xf32>
    %290 = arith.truncf %289 : vector<8x8x16xf32> to vector<8x8x16xbf16>
    %c0_446 = arith.constant 0 : index
    %c0_447 = arith.constant 0 : index
    %c1_448 = arith.constant 1 : index
    %c0_449 = arith.constant 0 : index
    %c0_450 = arith.constant 0 : index
    %291 = vector.load %arg20[%c0_446, %c0_447, %c1_448, %c0_449, %c0_450] : memref<2x2x9x9x16xf32, #tpu.memory_space<vmem>>, vector<1x1x8x8x16xf32>
    %292 = vector.shape_cast %291 : vector<1x1x8x8x16xf32> to vector<8x8x16xf32>
    %293 = arith.truncf %292 : vector<8x8x16xf32> to vector<8x8x16xbf16>
    %c0_451 = arith.constant 0 : index
    %c1_452 = arith.constant 1 : index
    %c1_453 = arith.constant 1 : index
    %c0_454 = arith.constant 0 : index
    %c0_455 = arith.constant 0 : index
    %294 = vector.load %arg20[%c0_451, %c1_452, %c1_453, %c0_454, %c0_455] : memref<2x2x9x9x16xf32, #tpu.memory_space<vmem>>, vector<1x1x8x8x16xf32>
    %295 = vector.shape_cast %294 : vector<1x1x8x8x16xf32> to vector<8x8x16xf32>
    %296 = arith.truncf %295 : vector<8x8x16xf32> to vector<8x8x16xbf16>
    %c0_456 = arith.constant 0 : index
    %c0_457 = arith.constant 0 : index
    %c1_458 = arith.constant 1 : index
    %c1_459 = arith.constant 1 : index
    %c0_460 = arith.constant 0 : index
    %297 = vector.load %arg20[%c0_456, %c0_457, %c1_458, %c1_459, %c0_460] : memref<2x2x9x9x16xf32, #tpu.memory_space<vmem>>, vector<1x1x8x8x16xf32>
    %298 = vector.shape_cast %297 : vector<1x1x8x8x16xf32> to vector<8x8x16xf32>
    %299 = arith.truncf %298 : vector<8x8x16xf32> to vector<8x8x16xbf16>
    %c1_461 = arith.constant 1 : index
    %c0_462 = arith.constant 0 : index
    %c1_463 = arith.constant 1 : index
    %c0_464 = arith.constant 0 : index
    %c0_465 = arith.constant 0 : index
    %300 = vector.load %arg20[%c1_461, %c0_462, %c1_463, %c0_464, %c0_465] : memref<2x2x9x9x16xf32, #tpu.memory_space<vmem>>, vector<1x1x8x8x16xf32>
    %301 = vector.shape_cast %300 : vector<1x1x8x8x16xf32> to vector<8x8x16xf32>
    %302 = arith.truncf %301 : vector<8x8x16xf32> to vector<8x8x16xbf16>
    %c1_466 = arith.constant 1 : index
    %c1_467 = arith.constant 1 : index
    %c1_468 = arith.constant 1 : index
    %c0_469 = arith.constant 0 : index
    %c0_470 = arith.constant 0 : index
    %303 = vector.load %arg20[%c1_466, %c1_467, %c1_468, %c0_469, %c0_470] : memref<2x2x9x9x16xf32, #tpu.memory_space<vmem>>, vector<1x1x8x8x16xf32>
    %304 = vector.shape_cast %303 : vector<1x1x8x8x16xf32> to vector<8x8x16xf32>
    %305 = arith.truncf %304 : vector<8x8x16xf32> to vector<8x8x16xbf16>
    %c1_471 = arith.constant 1 : index
    %c0_472 = arith.constant 0 : index
    %c1_473 = arith.constant 1 : index
    %c1_474 = arith.constant 1 : index
    %c0_475 = arith.constant 0 : index
    %306 = vector.load %arg20[%c1_471, %c0_472, %c1_473, %c1_474, %c0_475] : memref<2x2x9x9x16xf32, #tpu.memory_space<vmem>>, vector<1x1x8x8x16xf32>
    %307 = vector.shape_cast %306 : vector<1x1x8x8x16xf32> to vector<8x8x16xf32>
    %308 = arith.truncf %307 : vector<8x8x16xf32> to vector<8x8x16xbf16>
    %c1_476 = arith.constant 1 : index
    %c1_477 = arith.constant 1 : index
    %c0_478 = arith.constant 0 : index
    %c0_479 = arith.constant 0 : index
    %c0_480 = arith.constant 0 : index
    %309 = vector.load %arg20[%c1_476, %c1_477, %c0_478, %c0_479, %c0_480] : memref<2x2x9x9x16xf32, #tpu.memory_space<vmem>>, vector<1x1x8x8x16xf32>
    %310 = vector.shape_cast %309 : vector<1x1x8x8x16xf32> to vector<8x8x16xf32>
    %311 = arith.truncf %310 : vector<8x8x16xf32> to vector<8x8x16xbf16>
    %c1_481 = arith.constant 1 : index
    %c0_482 = arith.constant 0 : index
    %c0_483 = arith.constant 0 : index
    %c1_484 = arith.constant 1 : index
    %c0_485 = arith.constant 0 : index
    %312 = vector.load %arg20[%c1_481, %c0_482, %c0_483, %c1_484, %c0_485] : memref<2x2x9x9x16xf32, #tpu.memory_space<vmem>>, vector<1x1x8x8x16xf32>
    %313 = vector.shape_cast %312 : vector<1x1x8x8x16xf32> to vector<8x8x16xf32>
    %314 = arith.truncf %313 : vector<8x8x16xf32> to vector<8x8x16xbf16>
    %c1_486 = arith.constant 1 : index
    %c1_487 = arith.constant 1 : index
    %c0_488 = arith.constant 0 : index
    %c1_489 = arith.constant 1 : index
    %c0_490 = arith.constant 0 : index
    %315 = vector.load %arg20[%c1_486, %c1_487, %c0_488, %c1_489, %c0_490] : memref<2x2x9x9x16xf32, #tpu.memory_space<vmem>>, vector<1x1x8x8x16xf32>
    %316 = vector.shape_cast %315 : vector<1x1x8x8x16xf32> to vector<8x8x16xf32>
    %317 = arith.truncf %316 : vector<8x8x16xf32> to vector<8x8x16xbf16>
    %c0_491 = arith.constant 0 : index
    %c1_492 = arith.constant 1 : index
    %c1_493 = arith.constant 1 : index
    %c0_494 = arith.constant 0 : index
    %c0_495 = arith.constant 0 : index
    %318 = vector.load %arg20[%c0_491, %c1_492, %c1_493, %c0_494, %c0_495] : memref<2x2x9x9x16xf32, #tpu.memory_space<vmem>>, vector<1x1x8x8x16xf32>
    %319 = vector.shape_cast %318 : vector<1x1x8x8x16xf32> to vector<8x8x16xf32>
    %320 = arith.truncf %319 : vector<8x8x16xf32> to vector<8x8x16xbf16>
    %c0_496 = arith.constant 0 : index
    %c0_497 = arith.constant 0 : index
    %c1_498 = arith.constant 1 : index
    %c1_499 = arith.constant 1 : index
    %c0_500 = arith.constant 0 : index
    %321 = vector.load %arg20[%c0_496, %c0_497, %c1_498, %c1_499, %c0_500] : memref<2x2x9x9x16xf32, #tpu.memory_space<vmem>>, vector<1x1x8x8x16xf32>
    %322 = vector.shape_cast %321 : vector<1x1x8x8x16xf32> to vector<8x8x16xf32>
    %323 = arith.truncf %322 : vector<8x8x16xf32> to vector<8x8x16xbf16>
    %c0_501 = arith.constant 0 : index
    %c1_502 = arith.constant 1 : index
    %c1_503 = arith.constant 1 : index
    %c1_504 = arith.constant 1 : index
    %c0_505 = arith.constant 0 : index
    %324 = vector.load %arg20[%c0_501, %c1_502, %c1_503, %c1_504, %c0_505] : memref<2x2x9x9x16xf32, #tpu.memory_space<vmem>>, vector<1x1x8x8x16xf32>
    %325 = vector.shape_cast %324 : vector<1x1x8x8x16xf32> to vector<8x8x16xf32>
    %326 = arith.truncf %325 : vector<8x8x16xf32> to vector<8x8x16xbf16>
    %c1_506 = arith.constant 1 : index
    %c1_507 = arith.constant 1 : index
    %c1_508 = arith.constant 1 : index
    %c0_509 = arith.constant 0 : index
    %c0_510 = arith.constant 0 : index
    %327 = vector.load %arg20[%c1_506, %c1_507, %c1_508, %c0_509, %c0_510] : memref<2x2x9x9x16xf32, #tpu.memory_space<vmem>>, vector<1x1x8x8x16xf32>
    %328 = vector.shape_cast %327 : vector<1x1x8x8x16xf32> to vector<8x8x16xf32>
    %329 = arith.truncf %328 : vector<8x8x16xf32> to vector<8x8x16xbf16>
    %c1_511 = arith.constant 1 : index
    %c0_512 = arith.constant 0 : index
    %c1_513 = arith.constant 1 : index
    %c1_514 = arith.constant 1 : index
    %c0_515 = arith.constant 0 : index
    %330 = vector.load %arg20[%c1_511, %c0_512, %c1_513, %c1_514, %c0_515] : memref<2x2x9x9x16xf32, #tpu.memory_space<vmem>>, vector<1x1x8x8x16xf32>
    %331 = vector.shape_cast %330 : vector<1x1x8x8x16xf32> to vector<8x8x16xf32>
    %332 = arith.truncf %331 : vector<8x8x16xf32> to vector<8x8x16xbf16>
    %c1_516 = arith.constant 1 : index
    %c1_517 = arith.constant 1 : index
    %c1_518 = arith.constant 1 : index
    %c1_519 = arith.constant 1 : index
    %c0_520 = arith.constant 0 : index
    %333 = vector.load %arg20[%c1_516, %c1_517, %c1_518, %c1_519, %c0_520] : memref<2x2x9x9x16xf32, #tpu.memory_space<vmem>>, vector<1x1x8x8x16xf32>
    %334 = vector.shape_cast %333 : vector<1x1x8x8x16xf32> to vector<8x8x16xf32>
    %335 = arith.truncf %334 : vector<8x8x16xf32> to vector<8x8x16xbf16>
    %336 = tpu.concatenate %230, %233, %236, %239, %242, %245, %248, %251, %254, %257, %260, %263, %266, %269, %272, %275 in 2 : vector<8x8x16xbf16>, vector<8x8x16xbf16>, vector<8x8x16xbf16>, vector<8x8x16xbf16>, vector<8x8x16xbf16>, vector<8x8x16xbf16>, vector<8x8x16xbf16>, vector<8x8x16xbf16>, vector<8x8x16xbf16>, vector<8x8x16xbf16>, vector<8x8x16xbf16>, vector<8x8x16xbf16>, vector<8x8x16xbf16>, vector<8x8x16xbf16>, vector<8x8x16xbf16>, vector<8x8x16xbf16> -> vector<8x8x256xbf16>
    %337 = tpu.concatenate %278, %281, %284, %287, %290, %293, %296, %299, %302, %305, %308, %311, %314, %317, %320, %323 in 2 : vector<8x8x16xbf16>, vector<8x8x16xbf16>, vector<8x8x16xbf16>, vector<8x8x16xbf16>, vector<8x8x16xbf16>, vector<8x8x16xbf16>, vector<8x8x16xbf16>, vector<8x8x16xbf16>, vector<8x8x16xbf16>, vector<8x8x16xbf16>, vector<8x8x16xbf16>, vector<8x8x16xbf16>, vector<8x8x16xbf16>, vector<8x8x16xbf16>, vector<8x8x16xbf16>, vector<8x8x16xbf16> -> vector<8x8x256xbf16>
    %338 = tpu.concatenate %326, %329, %332, %335 in 2 : vector<8x8x16xbf16>, vector<8x8x16xbf16>, vector<8x8x16xbf16>, vector<8x8x16xbf16> -> vector<8x8x64xbf16>
    %339 = tpu.concatenate %336, %337, %338 in 2 : vector<8x8x256xbf16>, vector<8x8x256xbf16>, vector<8x8x64xbf16> -> vector<8x8x576xbf16>
    %340 = vector.shape_cast %339 : vector<8x8x576xbf16> to vector<64x576xbf16>
    %c0_521 = arith.constant 0 : index
    %c0_522 = arith.constant 0 : index
    %341 = vector.load %arg5[%c0_521, %c0_522] : memref<576x128xbf16, #tpu.memory_space<vmem>>, vector<576x128xbf16>
    %cst_523 = arith.constant dense<0.000000e+00> : vector<64x128xf32>
    %342 = tpu.matmul %340, %341, %cst_523 {dimension_numbers = #tpu.dot_dimension_numbers<[1], [0], [0], [1], [0, 0, 1, 1], [], []>} : vector<64x576xbf16>, vector<576x128xbf16>, vector<64x128xf32> -> vector<64x128xf32>
    %c0_524 = arith.constant 0 : index
    %c0_525 = arith.constant 0 : index
    %343 = vector.load %arg6[%c0_524, %c0_525] : memref<1x128xf32, #tpu.memory_space<vmem>>, vector<1x128xf32>
    %344 = vector.broadcast %343 : vector<1x128xf32> to vector<64x128xf32>
    %345 = arith.mulf %342, %344 : vector<64x128xf32>
    %c0_526 = arith.constant 0 : index
    %c0_527 = arith.constant 0 : index
    %346 = vector.load %arg7[%c0_526, %c0_527] : memref<1x128xf32, #tpu.memory_space<vmem>>, vector<1x128xf32>
    %347 = vector.broadcast %346 : vector<1x128xf32> to vector<64x128xf32>
    %348 = arith.addf %345, %347 : vector<64x128xf32>
    %cst_528 = arith.constant 0.000000e+00 : f32
    %349 = vector.broadcast %cst_528 : f32 to vector<64x128xf32>
    %350 = arith.maximumf %348, %349 : vector<64x128xf32>
    %351 = vector.extract_strided_slice %350 {offsets = [0, 0], sizes = [64, 32], strides = [1, 1]} : vector<64x128xf32> to vector<64x32xf32>
    %352 = vector.shape_cast %351 : vector<64x32xf32> to vector<8x8x32xf32>
    %c1_529 = arith.constant 1 : index
    %c1_530 = arith.constant 1 : index
    %c0_531 = arith.constant 0 : index
    %c0_532 = arith.constant 0 : index
    %c0_533 = arith.constant 0 : index
    %353 = vector.load %arg21[%c1_529, %c1_530, %c0_531, %c0_532, %c0_533] : memref<2x2x9x9x32xf32, #tpu.memory_space<vmem>>, vector<1x1x8x8x32xf32>
    %354 = vector.shape_cast %353 : vector<1x1x8x8x32xf32> to vector<8x8x32xf32>
    %355 = vector.shape_cast %352 : vector<8x8x32xf32> to vector<1x1x8x8x32xf32>
    tpu.vector_store %arg21[%c1_529, %c1_530, %c0_531, %c0_532, %c0_533], %355 {strides = array<i32>} : memref<2x2x9x9x32xf32, #tpu.memory_space<vmem>>, vector<1x1x8x8x32xf32>,
    %356 = vector.extract_strided_slice %350 {offsets = [0, 32], sizes = [64, 32], strides = [1, 1]} : vector<64x128xf32> to vector<64x32xf32>
    %357 = vector.shape_cast %356 : vector<64x32xf32> to vector<8x8x32xf32>
    %c1_534 = arith.constant 1 : index
    %c0_535 = arith.constant 0 : index
    %c0_536 = arith.constant 0 : index
    %c1_537 = arith.constant 1 : index
    %c0_538 = arith.constant 0 : index
    %358 = vector.load %arg21[%c1_534, %c0_535, %c0_536, %c1_537, %c0_538] : memref<2x2x9x9x32xf32, #tpu.memory_space<vmem>>, vector<1x1x8x8x32xf32>
    %359 = vector.shape_cast %358 : vector<1x1x8x8x32xf32> to vector<8x8x32xf32>
    %360 = vector.shape_cast %357 : vector<8x8x32xf32> to vector<1x1x8x8x32xf32>
    tpu.vector_store %arg21[%c1_534, %c0_535, %c0_536, %c1_537, %c0_538], %360 {strides = array<i32>} : memref<2x2x9x9x32xf32, #tpu.memory_space<vmem>>, vector<1x1x8x8x32xf32>,
    %361 = vector.extract_strided_slice %350 {offsets = [0, 64], sizes = [64, 32], strides = [1, 1]} : vector<64x128xf32> to vector<64x32xf32>
    %362 = vector.shape_cast %361 : vector<64x32xf32> to vector<8x8x32xf32>
    %c0_539 = arith.constant 0 : index
    %c1_540 = arith.constant 1 : index
    %c1_541 = arith.constant 1 : index
    %c0_542 = arith.constant 0 : index
    %c0_543 = arith.constant 0 : index
    %363 = vector.load %arg21[%c0_539, %c1_540, %c1_541, %c0_542, %c0_543] : memref<2x2x9x9x32xf32, #tpu.memory_space<vmem>>, vector<1x1x8x8x32xf32>
    %364 = vector.shape_cast %363 : vector<1x1x8x8x32xf32> to vector<8x8x32xf32>
    %365 = vector.shape_cast %362 : vector<8x8x32xf32> to vector<1x1x8x8x32xf32>
    tpu.vector_store %arg21[%c0_539, %c1_540, %c1_541, %c0_542, %c0_543], %365 {strides = array<i32>} : memref<2x2x9x9x32xf32, #tpu.memory_space<vmem>>, vector<1x1x8x8x32xf32>,
    %366 = vector.extract_strided_slice %350 {offsets = [0, 96], sizes = [64, 32], strides = [1, 1]} : vector<64x128xf32> to vector<64x32xf32>
    %367 = vector.shape_cast %366 : vector<64x32xf32> to vector<8x8x32xf32>
    %c0_544 = arith.constant 0 : index
    %c0_545 = arith.constant 0 : index
    %c1_546 = arith.constant 1 : index
    %c1_547 = arith.constant 1 : index
    %c0_548 = arith.constant 0 : index
    %368 = vector.load %arg21[%c0_544, %c0_545, %c1_546, %c1_547, %c0_548] : memref<2x2x9x9x32xf32, #tpu.memory_space<vmem>>, vector<1x1x8x8x32xf32>
    %369 = vector.shape_cast %368 : vector<1x1x8x8x32xf32> to vector<8x8x32xf32>
    %370 = vector.shape_cast %367 : vector<8x8x32xf32> to vector<1x1x8x8x32xf32>
    tpu.vector_store %arg21[%c0_544, %c0_545, %c1_546, %c1_547, %c0_548], %370 {strides = array<i32>} : memref<2x2x9x9x32xf32, #tpu.memory_space<vmem>>, vector<1x1x8x8x32xf32>,
    %c0_549 = arith.constant 0 : index
    %c0_550 = arith.constant 0 : index
    %c0_551 = arith.constant 0 : index
    %c0_552 = arith.constant 0 : index
    %c0_553 = arith.constant 0 : index
    %371 = vector.load %arg21[%c0_549, %c0_550, %c0_551, %c0_552, %c0_553] : memref<2x2x9x9x32xf32, #tpu.memory_space<vmem>>, vector<1x1x8x8x32xf32>
    %372 = vector.shape_cast %371 : vector<1x1x8x8x32xf32> to vector<8x8x32xf32>
    %373 = arith.truncf %372 : vector<8x8x32xf32> to vector<8x8x32xbf16>
    %c0_554 = arith.constant 0 : index
    %c1_555 = arith.constant 1 : index
    %c0_556 = arith.constant 0 : index
    %c0_557 = arith.constant 0 : index
    %c0_558 = arith.constant 0 : index
    %374 = vector.load %arg21[%c0_554, %c1_555, %c0_556, %c0_557, %c0_558] : memref<2x2x9x9x32xf32, #tpu.memory_space<vmem>>, vector<1x1x8x8x32xf32>
    %375 = vector.shape_cast %374 : vector<1x1x8x8x32xf32> to vector<8x8x32xf32>
    %376 = arith.truncf %375 : vector<8x8x32xf32> to vector<8x8x32xbf16>
    %c0_559 = arith.constant 0 : index
    %c0_560 = arith.constant 0 : index
    %c0_561 = arith.constant 0 : index
    %c1_562 = arith.constant 1 : index
    %c0_563 = arith.constant 0 : index
    %377 = vector.load %arg21[%c0_559, %c0_560, %c0_561, %c1_562, %c0_563] : memref<2x2x9x9x32xf32, #tpu.memory_space<vmem>>, vector<1x1x8x8x32xf32>
    %378 = vector.shape_cast %377 : vector<1x1x8x8x32xf32> to vector<8x8x32xf32>
    %379 = arith.truncf %378 : vector<8x8x32xf32> to vector<8x8x32xbf16>
    %c1_564 = arith.constant 1 : index
    %c0_565 = arith.constant 0 : index
    %c0_566 = arith.constant 0 : index
    %c0_567 = arith.constant 0 : index
    %c0_568 = arith.constant 0 : index
    %380 = vector.load %arg21[%c1_564, %c0_565, %c0_566, %c0_567, %c0_568] : memref<2x2x9x9x32xf32, #tpu.memory_space<vmem>>, vector<1x1x8x8x32xf32>
    %381 = vector.shape_cast %380 : vector<1x1x8x8x32xf32> to vector<8x8x32xf32>
    %382 = arith.truncf %381 : vector<8x8x32xf32> to vector<8x8x32xbf16>
    %c1_569 = arith.constant 1 : index
    %c1_570 = arith.constant 1 : index
    %c0_571 = arith.constant 0 : index
    %c0_572 = arith.constant 0 : index
    %c0_573 = arith.constant 0 : index
    %383 = vector.load %arg21[%c1_569, %c1_570, %c0_571, %c0_572, %c0_573] : memref<2x2x9x9x32xf32, #tpu.memory_space<vmem>>, vector<1x1x8x8x32xf32>
    %384 = vector.shape_cast %383 : vector<1x1x8x8x32xf32> to vector<8x8x32xf32>
    %385 = arith.truncf %384 : vector<8x8x32xf32> to vector<8x8x32xbf16>
    %c1_574 = arith.constant 1 : index
    %c0_575 = arith.constant 0 : index
    %c0_576 = arith.constant 0 : index
    %c1_577 = arith.constant 1 : index
    %c0_578 = arith.constant 0 : index
    %386 = vector.load %arg21[%c1_574, %c0_575, %c0_576, %c1_577, %c0_578] : memref<2x2x9x9x32xf32, #tpu.memory_space<vmem>>, vector<1x1x8x8x32xf32>
    %387 = vector.shape_cast %386 : vector<1x1x8x8x32xf32> to vector<8x8x32xf32>
    %388 = arith.truncf %387 : vector<8x8x32xf32> to vector<8x8x32xbf16>
    %c0_579 = arith.constant 0 : index
    %c0_580 = arith.constant 0 : index
    %c1_581 = arith.constant 1 : index
    %c0_582 = arith.constant 0 : index
    %c0_583 = arith.constant 0 : index
    %389 = vector.load %arg21[%c0_579, %c0_580, %c1_581, %c0_582, %c0_583] : memref<2x2x9x9x32xf32, #tpu.memory_space<vmem>>, vector<1x1x8x8x32xf32>
    %390 = vector.shape_cast %389 : vector<1x1x8x8x32xf32> to vector<8x8x32xf32>
    %391 = arith.truncf %390 : vector<8x8x32xf32> to vector<8x8x32xbf16>
    %c0_584 = arith.constant 0 : index
    %c1_585 = arith.constant 1 : index
    %c1_586 = arith.constant 1 : index
    %c0_587 = arith.constant 0 : index
    %c0_588 = arith.constant 0 : index
    %392 = vector.load %arg21[%c0_584, %c1_585, %c1_586, %c0_587, %c0_588] : memref<2x2x9x9x32xf32, #tpu.memory_space<vmem>>, vector<1x1x8x8x32xf32>
    %393 = vector.shape_cast %392 : vector<1x1x8x8x32xf32> to vector<8x8x32xf32>
    %394 = arith.truncf %393 : vector<8x8x32xf32> to vector<8x8x32xbf16>
    %c0_589 = arith.constant 0 : index
    %c0_590 = arith.constant 0 : index
    %c1_591 = arith.constant 1 : index
    %c1_592 = arith.constant 1 : index
    %c0_593 = arith.constant 0 : index
    %395 = vector.load %arg21[%c0_589, %c0_590, %c1_591, %c1_592, %c0_593] : memref<2x2x9x9x32xf32, #tpu.memory_space<vmem>>, vector<1x1x8x8x32xf32>
    %396 = vector.shape_cast %395 : vector<1x1x8x8x32xf32> to vector<8x8x32xf32>
    %397 = arith.truncf %396 : vector<8x8x32xf32> to vector<8x8x32xbf16>
    %c0_594 = arith.constant 0 : index
    %c1_595 = arith.constant 1 : index
    %c0_596 = arith.constant 0 : index
    %c0_597 = arith.constant 0 : index
    %c0_598 = arith.constant 0 : index
    %398 = vector.load %arg21[%c0_594, %c1_595, %c0_596, %c0_597, %c0_598] : memref<2x2x9x9x32xf32, #tpu.memory_space<vmem>>, vector<1x1x8x8x32xf32>
    %399 = vector.shape_cast %398 : vector<1x1x8x8x32xf32> to vector<8x8x32xf32>
    %400 = arith.truncf %399 : vector<8x8x32xf32> to vector<8x8x32xbf16>
    %c0_599 = arith.constant 0 : index
    %c0_600 = arith.constant 0 : index
    %c0_601 = arith.constant 0 : index
    %c1_602 = arith.constant 1 : index
    %c0_603 = arith.constant 0 : index
    %401 = vector.load %arg21[%c0_599, %c0_600, %c0_601, %c1_602, %c0_603] : memref<2x2x9x9x32xf32, #tpu.memory_space<vmem>>, vector<1x1x8x8x32xf32>
    %402 = vector.shape_cast %401 : vector<1x1x8x8x32xf32> to vector<8x8x32xf32>
    %403 = arith.truncf %402 : vector<8x8x32xf32> to vector<8x8x32xbf16>
    %c0_604 = arith.constant 0 : index
    %c1_605 = arith.constant 1 : index
    %c0_606 = arith.constant 0 : index
    %c1_607 = arith.constant 1 : index
    %c0_608 = arith.constant 0 : index
    %404 = vector.load %arg21[%c0_604, %c1_605, %c0_606, %c1_607, %c0_608] : memref<2x2x9x9x32xf32, #tpu.memory_space<vmem>>, vector<1x1x8x8x32xf32>
    %405 = vector.shape_cast %404 : vector<1x1x8x8x32xf32> to vector<8x8x32xf32>
    %406 = arith.truncf %405 : vector<8x8x32xf32> to vector<8x8x32xbf16>
    %c1_609 = arith.constant 1 : index
    %c1_610 = arith.constant 1 : index
    %c0_611 = arith.constant 0 : index
    %c0_612 = arith.constant 0 : index
    %c0_613 = arith.constant 0 : index
    %407 = vector.load %arg21[%c1_609, %c1_610, %c0_611, %c0_612, %c0_613] : memref<2x2x9x9x32xf32, #tpu.memory_space<vmem>>, vector<1x1x8x8x32xf32>
    %408 = vector.shape_cast %407 : vector<1x1x8x8x32xf32> to vector<8x8x32xf32>
    %409 = arith.truncf %408 : vector<8x8x32xf32> to vector<8x8x32xbf16>
    %c1_614 = arith.constant 1 : index
    %c0_615 = arith.constant 0 : index
    %c0_616 = arith.constant 0 : index
    %c1_617 = arith.constant 1 : index
    %c0_618 = arith.constant 0 : index
    %410 = vector.load %arg21[%c1_614, %c0_615, %c0_616, %c1_617, %c0_618] : memref<2x2x9x9x32xf32, #tpu.memory_space<vmem>>, vector<1x1x8x8x32xf32>
    %411 = vector.shape_cast %410 : vector<1x1x8x8x32xf32> to vector<8x8x32xf32>
    %412 = arith.truncf %411 : vector<8x8x32xf32> to vector<8x8x32xbf16>
    %c1_619 = arith.constant 1 : index
    %c1_620 = arith.constant 1 : index
    %c0_621 = arith.constant 0 : index
    %c1_622 = arith.constant 1 : index
    %c0_623 = arith.constant 0 : index
    %413 = vector.load %arg21[%c1_619, %c1_620, %c0_621, %c1_622, %c0_623] : memref<2x2x9x9x32xf32, #tpu.memory_space<vmem>>, vector<1x1x8x8x32xf32>
    %414 = vector.shape_cast %413 : vector<1x1x8x8x32xf32> to vector<8x8x32xf32>
    %415 = arith.truncf %414 : vector<8x8x32xf32> to vector<8x8x32xbf16>
    %c0_624 = arith.constant 0 : index
    %c1_625 = arith.constant 1 : index
    %c1_626 = arith.constant 1 : index
    %c0_627 = arith.constant 0 : index
    %c0_628 = arith.constant 0 : index
    %416 = vector.load %arg21[%c0_624, %c1_625, %c1_626, %c0_627, %c0_628] : memref<2x2x9x9x32xf32, #tpu.memory_space<vmem>>, vector<1x1x8x8x32xf32>
    %417 = vector.shape_cast %416 : vector<1x1x8x8x32xf32> to vector<8x8x32xf32>
    %418 = arith.truncf %417 : vector<8x8x32xf32> to vector<8x8x32xbf16>
    %c0_629 = arith.constant 0 : index
    %c0_630 = arith.constant 0 : index
    %c1_631 = arith.constant 1 : index
    %c1_632 = arith.constant 1 : index
    %c0_633 = arith.constant 0 : index
    %419 = vector.load %arg21[%c0_629, %c0_630, %c1_631, %c1_632, %c0_633] : memref<2x2x9x9x32xf32, #tpu.memory_space<vmem>>, vector<1x1x8x8x32xf32>
    %420 = vector.shape_cast %419 : vector<1x1x8x8x32xf32> to vector<8x8x32xf32>
    %421 = arith.truncf %420 : vector<8x8x32xf32> to vector<8x8x32xbf16>
    %c0_634 = arith.constant 0 : index
    %c1_635 = arith.constant 1 : index
    %c1_636 = arith.constant 1 : index
    %c1_637 = arith.constant 1 : index
    %c0_638 = arith.constant 0 : index
    %422 = vector.load %arg21[%c0_634, %c1_635, %c1_636, %c1_637, %c0_638] : memref<2x2x9x9x32xf32, #tpu.memory_space<vmem>>, vector<1x1x8x8x32xf32>
    %423 = vector.shape_cast %422 : vector<1x1x8x8x32xf32> to vector<8x8x32xf32>
    %424 = arith.truncf %423 : vector<8x8x32xf32> to vector<8x8x32xbf16>
    %c1_639 = arith.constant 1 : index
    %c0_640 = arith.constant 0 : index
    %c0_641 = arith.constant 0 : index
    %c0_642 = arith.constant 0 : index
    %c0_643 = arith.constant 0 : index
    %425 = vector.load %arg21[%c1_639, %c0_640, %c0_641, %c0_642, %c0_643] : memref<2x2x9x9x32xf32, #tpu.memory_space<vmem>>, vector<1x1x8x8x32xf32>
    %426 = vector.shape_cast %425 : vector<1x1x8x8x32xf32> to vector<8x8x32xf32>
    %427 = arith.truncf %426 : vector<8x8x32xf32> to vector<8x8x32xbf16>
    %c1_644 = arith.constant 1 : index
    %c1_645 = arith.constant 1 : index
    %c0_646 = arith.constant 0 : index
    %c0_647 = arith.constant 0 : index
    %c0_648 = arith.constant 0 : index
    %428 = vector.load %arg21[%c1_644, %c1_645, %c0_646, %c0_647, %c0_648] : memref<2x2x9x9x32xf32, #tpu.memory_space<vmem>>, vector<1x1x8x8x32xf32>
    %429 = vector.shape_cast %428 : vector<1x1x8x8x32xf32> to vector<8x8x32xf32>
    %430 = arith.truncf %429 : vector<8x8x32xf32> to vector<8x8x32xbf16>
    %c1_649 = arith.constant 1 : index
    %c0_650 = arith.constant 0 : index
    %c0_651 = arith.constant 0 : index
    %c1_652 = arith.constant 1 : index
    %c0_653 = arith.constant 0 : index
    %431 = vector.load %arg21[%c1_649, %c0_650, %c0_651, %c1_652, %c0_653] : memref<2x2x9x9x32xf32, #tpu.memory_space<vmem>>, vector<1x1x8x8x32xf32>
    %432 = vector.shape_cast %431 : vector<1x1x8x8x32xf32> to vector<8x8x32xf32>
    %433 = arith.truncf %432 : vector<8x8x32xf32> to vector<8x8x32xbf16>
    %c0_654 = arith.constant 0 : index
    %c0_655 = arith.constant 0 : index
    %c1_656 = arith.constant 1 : index
    %c0_657 = arith.constant 0 : index
    %c0_658 = arith.constant 0 : index
    %434 = vector.load %arg21[%c0_654, %c0_655, %c1_656, %c0_657, %c0_658] : memref<2x2x9x9x32xf32, #tpu.memory_space<vmem>>, vector<1x1x8x8x32xf32>
    %435 = vector.shape_cast %434 : vector<1x1x8x8x32xf32> to vector<8x8x32xf32>
    %436 = arith.truncf %435 : vector<8x8x32xf32> to vector<8x8x32xbf16>
    %c0_659 = arith.constant 0 : index
    %c1_660 = arith.constant 1 : index
    %c1_661 = arith.constant 1 : index
    %c0_662 = arith.constant 0 : index
    %c0_663 = arith.constant 0 : index
    %437 = vector.load %arg21[%c0_659, %c1_660, %c1_661, %c0_662, %c0_663] : memref<2x2x9x9x32xf32, #tpu.memory_space<vmem>>, vector<1x1x8x8x32xf32>
    %438 = vector.shape_cast %437 : vector<1x1x8x8x32xf32> to vector<8x8x32xf32>
    %439 = arith.truncf %438 : vector<8x8x32xf32> to vector<8x8x32xbf16>
    %c0_664 = arith.constant 0 : index
    %c0_665 = arith.constant 0 : index
    %c1_666 = arith.constant 1 : index
    %c1_667 = arith.constant 1 : index
    %c0_668 = arith.constant 0 : index
    %440 = vector.load %arg21[%c0_664, %c0_665, %c1_666, %c1_667, %c0_668] : memref<2x2x9x9x32xf32, #tpu.memory_space<vmem>>, vector<1x1x8x8x32xf32>
    %441 = vector.shape_cast %440 : vector<1x1x8x8x32xf32> to vector<8x8x32xf32>
    %442 = arith.truncf %441 : vector<8x8x32xf32> to vector<8x8x32xbf16>
    %c1_669 = arith.constant 1 : index
    %c0_670 = arith.constant 0 : index
    %c1_671 = arith.constant 1 : index
    %c0_672 = arith.constant 0 : index
    %c0_673 = arith.constant 0 : index
    %443 = vector.load %arg21[%c1_669, %c0_670, %c1_671, %c0_672, %c0_673] : memref<2x2x9x9x32xf32, #tpu.memory_space<vmem>>, vector<1x1x8x8x32xf32>
    %444 = vector.shape_cast %443 : vector<1x1x8x8x32xf32> to vector<8x8x32xf32>
    %445 = arith.truncf %444 : vector<8x8x32xf32> to vector<8x8x32xbf16>
    %c1_674 = arith.constant 1 : index
    %c1_675 = arith.constant 1 : index
    %c1_676 = arith.constant 1 : index
    %c0_677 = arith.constant 0 : index
    %c0_678 = arith.constant 0 : index
    %446 = vector.load %arg21[%c1_674, %c1_675, %c1_676, %c0_677, %c0_678] : memref<2x2x9x9x32xf32, #tpu.memory_space<vmem>>, vector<1x1x8x8x32xf32>
    %447 = vector.shape_cast %446 : vector<1x1x8x8x32xf32> to vector<8x8x32xf32>
    %448 = arith.truncf %447 : vector<8x8x32xf32> to vector<8x8x32xbf16>
    %c1_679 = arith.constant 1 : index
    %c0_680 = arith.constant 0 : index
    %c1_681 = arith.constant 1 : index
    %c1_682 = arith.constant 1 : index
    %c0_683 = arith.constant 0 : index
    %449 = vector.load %arg21[%c1_679, %c0_680, %c1_681, %c1_682, %c0_683] : memref<2x2x9x9x32xf32, #tpu.memory_space<vmem>>, vector<1x1x8x8x32xf32>
    %450 = vector.shape_cast %449 : vector<1x1x8x8x32xf32> to vector<8x8x32xf32>
    %451 = arith.truncf %450 : vector<8x8x32xf32> to vector<8x8x32xbf16>
    %c1_684 = arith.constant 1 : index
    %c1_685 = arith.constant 1 : index
    %c0_686 = arith.constant 0 : index
    %c0_687 = arith.constant 0 : index
    %c0_688 = arith.constant 0 : index
    %452 = vector.load %arg21[%c1_684, %c1_685, %c0_686, %c0_687, %c0_688] : memref<2x2x9x9x32xf32, #tpu.memory_space<vmem>>, vector<1x1x8x8x32xf32>
    %453 = vector.shape_cast %452 : vector<1x1x8x8x32xf32> to vector<8x8x32xf32>
    %454 = arith.truncf %453 : vector<8x8x32xf32> to vector<8x8x32xbf16>
    %c1_689 = arith.constant 1 : index
    %c0_690 = arith.constant 0 : index
    %c0_691 = arith.constant 0 : index
    %c1_692 = arith.constant 1 : index
    %c0_693 = arith.constant 0 : index
    %455 = vector.load %arg21[%c1_689, %c0_690, %c0_691, %c1_692, %c0_693] : memref<2x2x9x9x32xf32, #tpu.memory_space<vmem>>, vector<1x1x8x8x32xf32>
    %456 = vector.shape_cast %455 : vector<1x1x8x8x32xf32> to vector<8x8x32xf32>
    %457 = arith.truncf %456 : vector<8x8x32xf32> to vector<8x8x32xbf16>
    %c1_694 = arith.constant 1 : index
    %c1_695 = arith.constant 1 : index
    %c0_696 = arith.constant 0 : index
    %c1_697 = arith.constant 1 : index
    %c0_698 = arith.constant 0 : index
    %458 = vector.load %arg21[%c1_694, %c1_695, %c0_696, %c1_697, %c0_698] : memref<2x2x9x9x32xf32, #tpu.memory_space<vmem>>, vector<1x1x8x8x32xf32>
    %459 = vector.shape_cast %458 : vector<1x1x8x8x32xf32> to vector<8x8x32xf32>
    %460 = arith.truncf %459 : vector<8x8x32xf32> to vector<8x8x32xbf16>
    %c0_699 = arith.constant 0 : index
    %c1_700 = arith.constant 1 : index
    %c1_701 = arith.constant 1 : index
    %c0_702 = arith.constant 0 : index
    %c0_703 = arith.constant 0 : index
    %461 = vector.load %arg21[%c0_699, %c1_700, %c1_701, %c0_702, %c0_703] : memref<2x2x9x9x32xf32, #tpu.memory_space<vmem>>, vector<1x1x8x8x32xf32>
    %462 = vector.shape_cast %461 : vector<1x1x8x8x32xf32> to vector<8x8x32xf32>
    %463 = arith.truncf %462 : vector<8x8x32xf32> to vector<8x8x32xbf16>
    %c0_704 = arith.constant 0 : index
    %c0_705 = arith.constant 0 : index
    %c1_706 = arith.constant 1 : index
    %c1_707 = arith.constant 1 : index
    %c0_708 = arith.constant 0 : index
    %464 = vector.load %arg21[%c0_704, %c0_705, %c1_706, %c1_707, %c0_708] : memref<2x2x9x9x32xf32, #tpu.memory_space<vmem>>, vector<1x1x8x8x32xf32>
    %465 = vector.shape_cast %464 : vector<1x1x8x8x32xf32> to vector<8x8x32xf32>
    %466 = arith.truncf %465 : vector<8x8x32xf32> to vector<8x8x32xbf16>
    %c0_709 = arith.constant 0 : index
    %c1_710 = arith.constant 1 : index
    %c1_711 = arith.constant 1 : index
    %c1_712 = arith.constant 1 : index
    %c0_713 = arith.constant 0 : index
    %467 = vector.load %arg21[%c0_709, %c1_710, %c1_711, %c1_712, %c0_713] : memref<2x2x9x9x32xf32, #tpu.memory_space<vmem>>, vector<1x1x8x8x32xf32>
    %468 = vector.shape_cast %467 : vector<1x1x8x8x32xf32> to vector<8x8x32xf32>
    %469 = arith.truncf %468 : vector<8x8x32xf32> to vector<8x8x32xbf16>
    %c1_714 = arith.constant 1 : index
    %c1_715 = arith.constant 1 : index
    %c1_716 = arith.constant 1 : index
    %c0_717 = arith.constant 0 : index
    %c0_718 = arith.constant 0 : index
    %470 = vector.load %arg21[%c1_714, %c1_715, %c1_716, %c0_717, %c0_718] : memref<2x2x9x9x32xf32, #tpu.memory_space<vmem>>, vector<1x1x8x8x32xf32>
    %471 = vector.shape_cast %470 : vector<1x1x8x8x32xf32> to vector<8x8x32xf32>
    %472 = arith.truncf %471 : vector<8x8x32xf32> to vector<8x8x32xbf16>
    %c1_719 = arith.constant 1 : index
    %c0_720 = arith.constant 0 : index
    %c1_721 = arith.constant 1 : index
    %c1_722 = arith.constant 1 : index
    %c0_723 = arith.constant 0 : index
    %473 = vector.load %arg21[%c1_719, %c0_720, %c1_721, %c1_722, %c0_723] : memref<2x2x9x9x32xf32, #tpu.memory_space<vmem>>, vector<1x1x8x8x32xf32>
    %474 = vector.shape_cast %473 : vector<1x1x8x8x32xf32> to vector<8x8x32xf32>
    %475 = arith.truncf %474 : vector<8x8x32xf32> to vector<8x8x32xbf16>
    %c1_724 = arith.constant 1 : index
    %c1_725 = arith.constant 1 : index
    %c1_726 = arith.constant 1 : index
    %c1_727 = arith.constant 1 : index
    %c0_728 = arith.constant 0 : index
    %476 = vector.load %arg21[%c1_724, %c1_725, %c1_726, %c1_727, %c0_728] : memref<2x2x9x9x32xf32, #tpu.memory_space<vmem>>, vector<1x1x8x8x32xf32>
    %477 = vector.shape_cast %476 : vector<1x1x8x8x32xf32> to vector<8x8x32xf32>
    %478 = arith.truncf %477 : vector<8x8x32xf32> to vector<8x8x32xbf16>
    %479 = tpu.concatenate %373, %376, %379, %382, %385, %388, %391, %394, %397, %400, %403, %406, %409, %412, %415, %418 in 2 : vector<8x8x32xbf16>, vector<8x8x32xbf16>, vector<8x8x32xbf16>, vector<8x8x32xbf16>, vector<8x8x32xbf16>, vector<8x8x32xbf16>, vector<8x8x32xbf16>, vector<8x8x32xbf16>, vector<8x8x32xbf16>, vector<8x8x32xbf16>, vector<8x8x32xbf16>, vector<8x8x32xbf16>, vector<8x8x32xbf16>, vector<8x8x32xbf16>, vector<8x8x32xbf16>, vector<8x8x32xbf16> -> vector<8x8x512xbf16>
    %480 = tpu.concatenate %421, %424, %427, %430, %433, %436, %439, %442, %445, %448, %451, %454, %457, %460, %463, %466 in 2 : vector<8x8x32xbf16>, vector<8x8x32xbf16>, vector<8x8x32xbf16>, vector<8x8x32xbf16>, vector<8x8x32xbf16>, vector<8x8x32xbf16>, vector<8x8x32xbf16>, vector<8x8x32xbf16>, vector<8x8x32xbf16>, vector<8x8x32xbf16>, vector<8x8x32xbf16>, vector<8x8x32xbf16>, vector<8x8x32xbf16>, vector<8x8x32xbf16>, vector<8x8x32xbf16>, vector<8x8x32xbf16> -> vector<8x8x512xbf16>
    %481 = tpu.concatenate %469, %472, %475, %478 in 2 : vector<8x8x32xbf16>, vector<8x8x32xbf16>, vector<8x8x32xbf16>, vector<8x8x32xbf16> -> vector<8x8x128xbf16>
    %482 = tpu.concatenate %479, %480, %481 in 2 : vector<8x8x512xbf16>, vector<8x8x512xbf16>, vector<8x8x128xbf16> -> vector<8x8x1152xbf16>
    %483 = vector.shape_cast %482 : vector<8x8x1152xbf16> to vector<64x1152xbf16>
    %c0_729 = arith.constant 0 : index
    %c0_730 = arith.constant 0 : index
    %484 = vector.load %arg8[%c0_729, %c0_730] : memref<1152x128xbf16, #tpu.memory_space<vmem>>, vector<1152x128xbf16>
    %cst_731 = arith.constant dense<0.000000e+00> : vector<64x128xf32>
    %485 = tpu.matmul %483, %484, %cst_731 {dimension_numbers = #tpu.dot_dimension_numbers<[1], [0], [0], [1], [0, 0, 1, 1], [], []>} : vector<64x1152xbf16>, vector<1152x128xbf16>, vector<64x128xf32> -> vector<64x128xf32>
    %c0_732 = arith.constant 0 : index
    %c0_733 = arith.constant 0 : index
    %486 = vector.load %arg9[%c0_732, %c0_733] : memref<1x128xf32, #tpu.memory_space<vmem>>, vector<1x128xf32>
    %487 = vector.broadcast %486 : vector<1x128xf32> to vector<64x128xf32>
    %488 = arith.mulf %485, %487 : vector<64x128xf32>
    %c0_734 = arith.constant 0 : index
    %c0_735 = arith.constant 0 : index
    %489 = vector.load %arg10[%c0_734, %c0_735] : memref<1x128xf32, #tpu.memory_space<vmem>>, vector<1x128xf32>
    %490 = vector.broadcast %489 : vector<1x128xf32> to vector<64x128xf32>
    %491 = arith.addf %488, %490 : vector<64x128xf32>
    %cst_736 = arith.constant 0.000000e+00 : f32
    %492 = vector.broadcast %cst_736 : f32 to vector<64x128xf32>
    %493 = arith.maximumf %491, %492 : vector<64x128xf32>
    %cst_737 = arith.constant dense<0.000000e+00> : vector<128xf32>
    %494 = vector.multi_reduction <add>, %493, %cst_737 [0] : vector<64x128xf32> to vector<128xf32>
    %495 = vector.shape_cast %494 : vector<128xf32> to vector<1x128xf32>
    %496 = vector.extract_strided_slice %495 {offsets = [0, 0], sizes = [1, 32], strides = [1, 1]} : vector<1x128xf32> to vector<1x32xf32>
    %497 = vector.extract_strided_slice %495 {offsets = [0, 32], sizes = [1, 32], strides = [1, 1]} : vector<1x128xf32> to vector<1x32xf32>
    %498 = arith.addf %496, %497 : vector<1x32xf32>
    %499 = vector.extract_strided_slice %495 {offsets = [0, 64], sizes = [1, 32], strides = [1, 1]} : vector<1x128xf32> to vector<1x32xf32>
    %500 = arith.addf %498, %499 : vector<1x32xf32>
    %501 = vector.extract_strided_slice %495 {offsets = [0, 96], sizes = [1, 32], strides = [1, 1]} : vector<1x128xf32> to vector<1x32xf32>
    %502 = arith.addf %500, %501 : vector<1x32xf32>
    %cst_738 = arith.constant 3.906250e-03 : f32
    %503 = vector.broadcast %cst_738 : f32 to vector<1x32xf32>
    %504 = arith.mulf %502, %503 : vector<1x32xf32>
    %c0_739 = arith.constant 0 : index
    %c0_740 = arith.constant 0 : index
    %505 = vector.load %arg11[%c0_739, %c0_740] : memref<2x32xf32, #tpu.memory_space<vmem>>, vector<2x32xf32>
    %506 = vector.broadcast %504 : vector<1x32xf32> to vector<2x32xf32>
    %507 = arith.mulf %506, %505 : vector<2x32xf32>
    %cst_741 = arith.constant dense<0.000000e+00> : vector<2xf32>
    %508 = vector.multi_reduction <add>, %507, %cst_741 [1] : vector<2x32xf32> to vector<2xf32>
    %509 = vector.shape_cast %508 : vector<2xf32> to vector<2x1xf32>
    %c0_742 = arith.constant 0 : index
    %c0_743 = arith.constant 0 : index
    %510 = vector.load %arg12[%c0_742, %c0_743] : memref<2x1xf32, #tpu.memory_space<vmem>>, vector<2x1xf32>
    %511 = arith.addf %509, %510 : vector<2x1xf32>
    %cst_744 = arith.constant 0.000000e+00 : f32
    %512 = vector.broadcast %cst_744 : f32 to vector<2x1xf32>
    %513 = arith.maximumf %511, %512 : vector<2x1xf32>
    %c0_745 = arith.constant 0 : index
    %c0_746 = arith.constant 0 : index
    %514 = vector.load %arg13[%c0_745, %c0_746] : memref<2x128xf32, #tpu.memory_space<vmem>>, vector<2x128xf32>
    %515 = vector.broadcast %513 : vector<2x1xf32> to vector<2x128xf32>
    %516 = arith.mulf %515, %514 : vector<2x128xf32>
    %cst_747 = arith.constant dense<0.000000e+00> : vector<128xf32>
    %517 = vector.multi_reduction <add>, %516, %cst_747 [0] : vector<2x128xf32> to vector<128xf32>
    %518 = vector.shape_cast %517 : vector<128xf32> to vector<1x128xf32>
    %c0_748 = arith.constant 0 : index
    %c0_749 = arith.constant 0 : index
    %519 = vector.load %arg14[%c0_748, %c0_749] : memref<1x128xf32, #tpu.memory_space<vmem>>, vector<1x128xf32>
    %520 = arith.addf %518, %519 : vector<1x128xf32>
    %521 = arith.negf %520 : vector<1x128xf32>
    %522 = math.exp %521 : vector<1x128xf32>
    %cst_750 = arith.constant 1.000000e+00 : f32
    %523 = vector.broadcast %cst_750 : f32 to vector<1x128xf32>
    %524 = arith.addf %523, %522 : vector<1x128xf32>
    %525 = arith.divf %523, %524 : vector<1x128xf32>
    %526 = arith.truncf %493 : vector<64x128xf32> to vector<64x128xbf16>
    %c0_751 = arith.constant 0 : index
    %c0_752 = arith.constant 0 : index
    %527 = vector.load %arg15[%c0_751, %c0_752] : memref<128x128xbf16, #tpu.memory_space<vmem>>, vector<128x128xbf16>
    %cst_753 = arith.constant dense<0.000000e+00> : vector<64x128xf32>
    %528 = tpu.matmul %526, %527, %cst_753 {dimension_numbers = #tpu.dot_dimension_numbers<[1], [0], [0], [1], [0, 0, 1, 1], [], []>} : vector<64x128xbf16>, vector<128x128xbf16>, vector<64x128xf32> -> vector<64x128xf32>
    %c0_754 = arith.constant 0 : index
    %c0_755 = arith.constant 0 : index
    %529 = vector.load %arg16[%c0_754, %c0_755] : memref<1x1xf32, #tpu.memory_space<vmem>>, vector<1x1xf32>
    %530 = vector.broadcast %529 : vector<1x1xf32> to vector<64x128xf32>
    %531 = arith.addf %528, %530 : vector<64x128xf32>
    %532 = arith.negf %531 : vector<64x128xf32>
    %533 = math.exp %532 : vector<64x128xf32>
    %cst_756 = arith.constant 1.000000e+00 : f32
    %534 = vector.broadcast %cst_756 : f32 to vector<64x128xf32>
    %535 = arith.addf %534, %533 : vector<64x128xf32>
    %536 = arith.divf %534, %535 : vector<64x128xf32>
    %537 = vector.broadcast %525 : vector<1x128xf32> to vector<64x128xf32>
    %538 = arith.addf %537, %536 : vector<64x128xf32>
    %539 = arith.mulf %493, %538 : vector<64x128xf32>
    %c0_757 = arith.constant 0 : index
    %c0_758 = arith.constant 0 : index
    %c0_759 = arith.constant 0 : index
    %540 = vector.load %arg17[%c0_757, %c0_758, %c0_759] : memref<1x64x128xf32, #tpu.memory_space<vmem>>, vector<1x64x128xf32>
    %541 = vector.shape_cast %540 : vector<1x64x128xf32> to vector<64x128xf32>
    %542 = vector.shape_cast %539 : vector<64x128xf32> to vector<1x64x128xf32>
    tpu.vector_store %arg17[%c0_757, %c0_758, %c0_759], %542 {strides = array<i32>} : memref<1x64x128xf32, #tpu.memory_space<vmem>>, vector<1x64x128xf32>,
    return
  }
  func.func @transform_0(%arg0: i32) -> (i32, i32, i32, i32) {
    %c0_i32 = arith.constant 0 : i32
    %c0_i32_0 = arith.constant 0 : i32
    %c0_i32_1 = arith.constant 0 : i32
    %c0_i32_2 = arith.constant 0 : i32
    return %arg0, %c0_i32, %c0_i32_0, %c0_i32_1 : i32, i32, i32, i32
  }
  func.func @transform_1(%arg0: i32) -> (i32, i32, i32, i32, i32, i32) {
    %c0_i32 = arith.constant 0 : i32
    %c0_i32_0 = arith.constant 0 : i32
    %c0_i32_1 = arith.constant 0 : i32
    %c0_i32_2 = arith.constant 0 : i32
    %c0_i32_3 = arith.constant 0 : i32
    %c0_i32_4 = arith.constant 0 : i32
    return %arg0, %c0_i32, %c0_i32_0, %c0_i32_1, %c0_i32_2, %c0_i32_3 : i32, i32, i32, i32, i32, i32
  }
  func.func @transform_2(%arg0: i32) -> (i32, i32) {
    %c0_i32 = arith.constant 0 : i32
    %c0_i32_0 = arith.constant 0 : i32
    %c0_i32_1 = arith.constant 0 : i32
    return %c0_i32, %c0_i32_0 : i32, i32
  }
  func.func @transform_3(%arg0: i32) -> (i32, i32) {
    %c0_i32 = arith.constant 0 : i32
    %c0_i32_0 = arith.constant 0 : i32
    %c0_i32_1 = arith.constant 0 : i32
    return %c0_i32, %c0_i32_0 : i32, i32
  }
  func.func @transform_4(%arg0: i32) -> (i32, i32) {
    %c0_i32 = arith.constant 0 : i32
    %c0_i32_0 = arith.constant 0 : i32
    %c0_i32_1 = arith.constant 0 : i32
    return %c0_i32, %c0_i32_0 : i32, i32
  }
  func.func @transform_5(%arg0: i32) -> (i32, i32) {
    %c0_i32 = arith.constant 0 : i32
    %c0_i32_0 = arith.constant 0 : i32
    %c0_i32_1 = arith.constant 0 : i32
    return %c0_i32, %c0_i32_0 : i32, i32
  }
  func.func @transform_6(%arg0: i32) -> (i32, i32) {
    %c0_i32 = arith.constant 0 : i32
    %c0_i32_0 = arith.constant 0 : i32
    %c0_i32_1 = arith.constant 0 : i32
    return %c0_i32, %c0_i32_0 : i32, i32
  }
  func.func @transform_7(%arg0: i32) -> (i32, i32) {
    %c0_i32 = arith.constant 0 : i32
    %c0_i32_0 = arith.constant 0 : i32
    %c0_i32_1 = arith.constant 0 : i32
    return %c0_i32, %c0_i32_0 : i32, i32
  }
  func.func @transform_8(%arg0: i32) -> (i32, i32) {
    %c0_i32 = arith.constant 0 : i32
    %c0_i32_0 = arith.constant 0 : i32
    %c0_i32_1 = arith.constant 0 : i32
    return %c0_i32, %c0_i32_0 : i32, i32
  }
  func.func @transform_9(%arg0: i32) -> (i32, i32) {
    %c0_i32 = arith.constant 0 : i32
    %c0_i32_0 = arith.constant 0 : i32
    %c0_i32_1 = arith.constant 0 : i32
    return %c0_i32, %c0_i32_0 : i32, i32
  }
  func.func @transform_10(%arg0: i32) -> (i32, i32) {
    %c0_i32 = arith.constant 0 : i32
    %c0_i32_0 = arith.constant 0 : i32
    %c0_i32_1 = arith.constant 0 : i32
    return %c0_i32, %c0_i32_0 : i32, i32
  }
  func.func @transform_11(%arg0: i32) -> (i32, i32) {
    %c0_i32 = arith.constant 0 : i32
    %c0_i32_0 = arith.constant 0 : i32
    %c0_i32_1 = arith.constant 0 : i32
    return %c0_i32, %c0_i32_0 : i32, i32
  }
  func.func @transform_12(%arg0: i32) -> (i32, i32) {
    %c0_i32 = arith.constant 0 : i32
    %c0_i32_0 = arith.constant 0 : i32
    %c0_i32_1 = arith.constant 0 : i32
    return %c0_i32, %c0_i32_0 : i32, i32
  }
  func.func @transform_13(%arg0: i32) -> (i32, i32) {
    %c0_i32 = arith.constant 0 : i32
    %c0_i32_0 = arith.constant 0 : i32
    %c0_i32_1 = arith.constant 0 : i32
    return %c0_i32, %c0_i32_0 : i32, i32
  }
  func.func @transform_14(%arg0: i32) -> (i32, i32) {
    %c0_i32 = arith.constant 0 : i32
    %c0_i32_0 = arith.constant 0 : i32
    %c0_i32_1 = arith.constant 0 : i32
    return %c0_i32, %c0_i32_0 : i32, i32
  }
  func.func @transform_15(%arg0: i32) -> (i32, i32) {
    %c0_i32 = arith.constant 0 : i32
    %c0_i32_0 = arith.constant 0 : i32
    %c0_i32_1 = arith.constant 0 : i32
    return %c0_i32, %c0_i32_0 : i32, i32
  }
  func.func @transform_16(%arg0: i32) -> (i32, i32, i32) {
    %c0_i32 = arith.constant 0 : i32
    %c0_i32_0 = arith.constant 0 : i32
    %c0_i32_1 = arith.constant 0 : i32
    return %arg0, %c0_i32, %c0_i32_0 : i32, i32, i32
  }
}

</mosaic_0001>

<bundles_post_ra>
// kernel: tile.50
= control target key start
LH: loop header
LB: loop body
LE: loop exit
PB: predicated region body
PF: predicated region fallthrough
CT: control target
= control target key end

     0   :  { %s29_s10 = smov 3  ;;  %s10_s11 = smov 3  ;;  %vm12_vm0 = vcmask 261120   ;;  %vm19_vm1 = vcmask 1048320   ;;  %vm26_vm2 = vcmask 785920   ;;  %vm33_vm3 = vcmask 523520   ;;  %s67_s0 = inlined_call_operand.vmem [shape: f32[2,4,32], index: 0, kind: input, shape index: {}]   ;;  %s68_s1 = inlined_call_operand.vmem [shape: f32[2,128], index: 1, kind: output, shape index: {}]  }
   0x1   :  { %v41_v0 = vld [vmem:[%s67_s0 + $0x4] sm:$0xf]  ;;  %v8_v1 = vld [vmem:[%s67_s0] sm:$0xf]  ;;  %s15_s0 = smov 3  ;;  %s22_s12 = smov 3 }
   0x2   :  { %7 = vst [vmem:[#allocation1 + $0x8] sm:$0xf] %v41_v0  ;;  %9 = vst [vmem:[#allocation1] sm:$0xf] %v8_v1  ;;  %s45_s13 = smov 96   ;;  %s46_s14 = smov 32  }
   0x3   :  { %s47_s15 = smov 64  }
   0x9   :  { %v16_v2 = vld [vmem:[#allocation1 + $0x3] ss:$8 sm:%s15_s0]   ;;  %v30_v3 = vld [vmem:[#allocation1 + $0x1] ss:$8 sm:%s29_s10]   ;;  %v11_v4 = vld [vmem:[#allocation1] ss:$8 sm:%s10_s11]  }
   0xa   :  { %17 = vrot.lane.b32.xlu0 %v16_v2, %s45_s13  ;;  %31 = vrot.lane.b32.xlu1 %v30_v3, %s46_s14  ;;  %v23_v5 = vld [vmem:[#allocation1 + $0x2] ss:$8 sm:%s22_s12]   ;;  %13 = vst.msk [vmem:[#allocation0] sm:$0x3] %vm12_vm0, %v11_v4  }
   0xe   :  { %24 = vrot.lane.b32.xlu0 %v23_v5, %s47_s15 }
  0x7c   :  { %v18_v6 = vpop.permute.xlu0 %17   ;;  %v32_v7 = vpop.permute.xlu1 %31  }
  0x7d   :  { %20 = vst.msk [vmem:[#allocation0] sm:$0x3] %vm19_vm1, %v18_v6  }
  0x80   :  { %v25_v8 = vpop.permute.xlu0 %24  }
  0x81   :  { %27 = vst.msk [vmem:[#allocation0] sm:$0x3] %vm26_vm2, %v25_v8  }
  0x82   :  { %34 = vst.msk [vmem:[#allocation0] sm:$0x3] %vm33_vm3, %v32_v7  }
  0x89   :  { %v38_v9 = vld [vmem:[#allocation0] sm:$0x3] }
  0x8a   :  { %40 = vst [vmem:[%s68_s1] sm:$0x3] %v38_v9 }

// kernel: decoder_block_forward.1
= control target key start
LH: loop header
LB: loop body
LE: loop exit
PB: predicated region body
PF: predicated region fallthrough
CT: control target
= control target key end

     0   :  { %s7321_s23 = smov 0   ;;  %s10732_s0 = inlined_call_operand.vmem [shape: f32[2,8,8,8], index: 0, kind: input, shape index: {}]   ;;  %s10733_s1 = inlined_call_operand.vmem [shape: f32[2,2,2,8,8,8], index: 1, kind: input, shape index: {}]   ;;  %s10734_s2 = inlined_call_operand.vmem [shape: bf16[72,32], index: 2, kind: input, shape index: {}]   ;;  %s10735_s3 = inlined_call_operand.vmem [shape: f32[1,32], index: 3, kind: input, shape index: {}]   ;;  %s10736_s4 = inlined_call_operand.vmem [shape: bf16[576,128], index: 4, kind: input, shape index: {}]   ;;  %s10737_s5 = inlined_call_operand.vmem [shape: f32[1,128], index: 5, kind: input, shape index: {}]   ;;  %s10738_s6 = inlined_call_operand.vmem [shape: f32[1,128], index: 6, kind: input, shape index: {}]   ;;  %s10739_s7 = inlined_call_operand.vmem [shape: bf16[1152,128], index: 7, kind: input, shape index: {}]   ;;  %s10740_s8 = inlined_call_operand.vmem [shape: f32[1,128], index: 8, kind: input, shape index: {}]   ;;  %s10741_s9 = inlined_call_operand.vmem [shape: f32[1,128], index: 9, kind: input, shape index: {}]   ;;  %s10742_s10 = inlined_call_operand.vmem [shape: f32[2,32], index: 10, kind: input, shape index: {}]   ;;  %s10743_s11 = inlined_call_operand.vmem [shape: f32[2,1], index: 11, kind: input, shape index: {}]   ;;  %s10744_s12 = inlined_call_operand.vmem [shape: f32[2,128], index: 12, kind: input, shape index: {}]   ;;  %s10745_s13 = inlined_call_operand.vmem [shape: f32[1,128], index: 13, kind: input, shape index: {}]   ;;  %s10746_s14 = inlined_call_operand.vmem [shape: bf16[128,128], index: 14, kind: input, shape index: {}]   ;;  %s10747_s15 = inlined_call_operand.<no memory space> [shape: f32[1,1], index: 15, kind: input, shape index: {}]   ;;  %s10748_s16 = inlined_call_operand.vmem [shape: f32[2,64,128], index: 16, kind: output, shape index: {}]  }
   0x1   :  { %10842 = sst [smem:[#allocation60_spill]] %s10732_s0  ;;  %v21_v0 = vstv %s10747_s15 }
   0x2   :  { %22 = vst [vmem:[#allocation6] sm:$0x1] %v21_v0 }
   0x3 LB: > { %s6421_s24 = sadd.s32 4294967295, %s7216_s23   ;;  %p6425_p0 = scmp.ge.s32.totalorder %s7216_s23, 1  ;;  %s7216_s23 = sphi %s7321_s23, %s28_s23  }
   0x4   : > { %p474_p1 = scmp.lt.s32.totalorder %s7216_s23, 3 }
   0x6   : > { %p475_p2 = pnand %p6425_p0, %p474_p1 }
   0x8   : > { %478 = sbr.rel (%p475_p2) target bundleno = 2378 (0x94a), region = 84 }
   0xf   : > { %vm545_vm0 = vcmask 64512   ;;  %vm547_vm1 = vcmask 58368   ;;  %vm552_vm2 = vcmask 57344   ;;  %v10749_v1 = vmov 0.0   ;;  %p529_p3 = scmp.lt.s32.totalorder %s6421_s24, 1  ;;  %s10843_s27 = sld [smem:[#allocation60_spill]] }
  0x10   : > { %546 = vst.msk [vmem:[#allocation2] sm:$0xff] %vm545_vm0, %v10749_v1  ;;  %550 = vst.msk [vmem:[#allocation2 + $0x90] sm:$0xff] %vm545_vm0, %v10749_v1  ;;  %vm622_vm3 = vcmask 130048   ;;  %s7219_s29 = smov 8   ;;  %s7220_s30 = smov 16   ;;  %vm673_vm4 = vcmask 261120  }
  0x11   : > { %548 = vst.msk [vmem:[#allocation2 + $0x8] sm:$0x3] %vm547_vm1, %v10749_v1  ;;  %551 = vst.msk [vmem:[#allocation2 + $0x98] sm:$0x3] %vm547_vm1, %v10749_v1  ;;  %s11045_s24 = smov (!%p529_p3, %s6421_s24), 1  ;;  %s7221_s0 = smov 24  }
  0x12   : > { %554 = vst.msk [vmem:[#allocation2 + $0x10] sm:$0x1] %vm552_vm2, %v10749_v1  ;;  %555 = vst.msk [vmem:[#allocation2 + $0x20] sm:$0x1] %vm552_vm2, %v10749_v1  ;;  %s10752_s15 = sshll.u32 %s11045_s24, 6  ;;  %s7222_s17 = smov 32  }
  0x13   : > { %556 = vst.msk [vmem:[#allocation2 + $0x30] sm:$0x1] %vm552_vm2, %v10749_v1  ;;  %557 = vst.msk [vmem:[#allocation2 + $0x40] sm:$0x1] %vm552_vm2, %v10749_v1  ;;  %s7223_s18 = smov 40   ;;  %v7053_v37 = vld [vmem:[%s10734_s2] sm:$0xff]  }
  0x14   : > { %558 = vst.msk [vmem:[#allocation2 + $0x50] sm:$0x1] %vm552_vm2, %v10749_v1  ;;  %559 = vst.msk [vmem:[#allocation2 + $0x60] sm:$0x1] %vm552_vm2, %v10749_v1  ;;  %6946 = vmatprep.subr.bf16.mxu0 %v7053_v37  ;;  %v7054_v39 = vld [vmem:[%s10734_s2 + $0x8] sm:$0xff]   ;;  %s10753_s25 = smov 48  }
  0x15   : > { %560 = vst.msk [vmem:[#allocation2 + $0x70] sm:$0x1] %vm552_vm2, %v10749_v1  ;;  %561 = vst.msk [vmem:[#allocation2 + $0x80] sm:$0x1] %vm552_vm2, %v10749_v1  ;;  %s533_s28 = scalar_lea.vmem %s10843_s27, %s10752_s15  ;;  %6947 = vmatpush3.bf16.msra.mxu0 %v7053_v37  ;;  %v7055_v41 = vld [vmem:[%s10734_s2 + $0x10] sm:$0xff]   ;;  %v7056_v43 = vld [vmem:[%s10734_s2 + $0x18] sm:$0xff]  }
  0x16   : > { %564 = vst.msk [vmem:[#allocation2 + $0x19] sm:$0x1] %vm552_vm2, %v10749_v1  ;;  %565 = vst.msk [vmem:[#allocation2 + $0x29] sm:$0x1] %vm552_vm2, %v10749_v1  ;;  %v725_v2 = vld [vmem:[%s533_s28 + $0x8] sm:$0xff]  ;;  %v724_v3 = vld [vmem:[%s533_s28] sm:$0xff]  ;;  %6948 = vmatprep.subr.bf16.mxu0 %v7054_v39 }
  0x17   : > { %566 = vst.msk [vmem:[#allocation2 + $0x39] sm:$0x1] %vm552_vm2, %v10749_v1  ;;  %567 = vst.msk [vmem:[#allocation2 + $0x49] sm:$0x1] %vm552_vm2, %v10749_v1  ;;  %v726_v4 = vld [vmem:[%s533_s28 + $0x10] sm:$0xff]  ;;  %v727_v6 = vld [vmem:[%s533_s28 + $0x18] sm:$0xff] }
  0x18   : > { %568 = vst.msk [vmem:[#allocation2 + $0x59] sm:$0x1] %vm552_vm2, %v10749_v1  ;;  %569 = vst.msk [vmem:[#allocation2 + $0x69] sm:$0x1] %vm552_vm2, %v10749_v1  ;;  %v757_v5 = vld [vmem:[#allocation2 + $0x1] sm:$0xff]  ;;  %v730_v10 = vld [vmem:[%s533_s28 + $0x30] sm:$0xff] }
  0x19   : > { %570 = vst.msk [vmem:[#allocation2 + $0x79] sm:$0x1] %vm552_vm2, %v10749_v1  ;;  %571 = vst.msk [vmem:[#allocation2 + $0x89] sm:$0x1] %vm552_vm2, %v10749_v1  ;;  %v728_v7 = vld [vmem:[%s533_s28 + $0x20] sm:$0xff]  ;;  %v765_v8 = vpack.c.bf16 %v757_v5, %v757_v5  ;;  %v729_v11 = vld [vmem:[%s533_s28 + $0x28] sm:$0xff]  ;;  %6949 = vmatpush3.bf16.msra.mxu0 %v7054_v39 }
  0x1a   : > { %573 = vst.msk [vmem:[#allocation3] sm:$0xff] %vm545_vm0, %v10749_v1  ;;  %585 = vst.msk [vmem:[#allocation3 + $0x90] sm:$0xff] %vm545_vm0, %v10749_v1  ;;  %v731_v12 = vld [vmem:[%s533_s28 + $0x38] sm:$0xff]  ;;  %6950 = vmatprep.subr.bf16.mxu0 %v7055_v41  ;;  %s7225_s20 = smov 56   ;;  %v7057_v44 = vld [vmem:[%s10734_s2 + $0x20] ss:$0 sps:$4 sm:$0xff]  }
  0x1b   : > { %574 = vst.msk [vmem:[#allocation3 + $0x8] sm:$0x1] %vm552_vm2, %v10749_v1  ;;  %576 = vst.msk [vmem:[#allocation3 + $0x10] sm:$0x1] %vm552_vm2, %v10749_v1  ;;  %894 = vrot.lane.b32.xlu0 %v765_v8, %s7219_s29  ;;  %vm1295_vm5 = vcmask 1043456   ;;  %s10755_s26 = smov 64  }
  0x1c   : > { %577 = vst.msk [vmem:[#allocation3 + $0x20] sm:$0x1] %vm552_vm2, %v10749_v1  ;;  %578 = vst.msk [vmem:[#allocation3 + $0x30] sm:$0x1] %vm552_vm2, %v10749_v1  ;;  %v1297_v46 = vsel %vm1295_vm5, %v7057_v44, 0  ;;  %v861_v8 = vld [vmem:[#allocation2 + $0x91] sm:$0xff] }
  0x1d   : > { %579 = vst.msk [vmem:[#allocation3 + $0x40] sm:$0x1] %vm552_vm2, %v10749_v1  ;;  %580 = vst.msk [vmem:[#allocation3 + $0x50] sm:$0x1] %vm552_vm2, %v10749_v1  ;;  %6951 = vmatpush3.bf16.msra.mxu0 %v7055_v41  ;;  %vm624_vm6 = vcmask 122880   ;;  %vm1118_vm7 = vcmask 195584  }
  0x1e   : > { %581 = vst.msk [vmem:[#allocation3 + $0x60] sm:$0x1] %vm552_vm2, %v10749_v1  ;;  %582 = vst.msk [vmem:[#allocation3 + $0x70] sm:$0x1] %vm552_vm2, %v10749_v1  ;;  %6952 = vmatprep.subr.bf16.mxu0 %v7056_v43  ;;  %vm1151_vm8 = vcmask 326656   ;;  %vm1168_vm9 = vcmask 392192  }
  0x1f   : > { %583 = vst.msk [vmem:[#allocation3 + $0x80] sm:$0x1] %vm552_vm2, %v10749_v1  ;;  %600 = vst.msk [vmem:[#allocation3 + $0x120] sm:$0x1] %vm552_vm2, %v10749_v1  ;;  %vm1185_vm10 = vcmask 457728   ;;  %vm1202_vm11 = vcmask 523264  }
  0x20   : > { %601 = vst.msk [vmem:[#allocation3 + $0x130] sm:$0x1] %vm552_vm2, %v10749_v1  ;;  %602 = vst.msk [vmem:[#allocation3 + $0x140] sm:$0x1] %vm552_vm2, %v10749_v1  ;;  %vm1282_vm12 = vcmask 588800   ;;  %s7228_s21 = smov 120  }
  0x21   : > { %603 = vst.msk [vmem:[#allocation3 + $0x150] sm:$0x1] %vm552_vm2, %v10749_v1  ;;  %604 = vst.msk [vmem:[#allocation3 + $0x160] sm:$0x1] %vm552_vm2, %v10749_v1  ;;  %6953 = vmatpush3.bf16.msra.mxu0 %v7056_v43  ;;  %s7229_s22 = smov 112   ;;  %s10853_s27 = smov 64  }
  0x22   : > { %605 = vst.msk [vmem:[#allocation3 + $0x170] sm:$0x1] %vm552_vm2, %v10749_v1  ;;  %606 = vst.msk [vmem:[#allocation3 + $0x180] sm:$0x1] %vm552_vm2, %v10749_v1  ;;  %7028 = vmatprep.subr.msk.bf16.mxu0 %vm1295_vm5, %v7057_v44  ;;  %vm2509_vm13 = vcmask 654336   ;;  %vm2526_vm14 = vcmask 785408  }
  0x23   : > { %607 = vst.msk [vmem:[#allocation3 + $0x190] sm:$0x1] %vm552_vm2, %v10749_v1  ;;  %563 = vst.msk [vmem:[#allocation2 + $0x9] sm:$0x1] %vm552_vm2, %v10749_v1  ;;  %vm2543_vm15 = vcmask 916480   ;;  %vm6105_vm1 = vcmask 254976  }
  0x24   : > { %553 = vst.msk [vmem:[#allocation2] sm:$0x1] %vm552_vm2, %v10749_v1  ;;  %572 = vst.msk [vmem:[#allocation2 + $0x99] sm:$0x1] %vm552_vm2, %v10749_v1 }
  0x25   : > { %562 = vst.msk [vmem:[#allocation2 + $0x90] sm:$0x1] %vm552_vm2, %v10749_v1  ;;  %575 = vst.msk [vmem:[#allocation3] sm:$0x1] %vm552_vm2, %v10749_v1  ;;  %6955 = vmatpush3.bf16.msra.mxu0 %v1297_v46  ;;  %vm6119_vm2 = vcmask 1041408  }
  0x26   : > { %623 = vst.msk [vmem:[#allocation4] sm:$0xff] %vm622_vm3, %v10749_v1  ;;  %636 = vst.msk [vmem:[#allocation4 + $0x90] sm:$0xff] %vm622_vm3, %v10749_v1 }
  0x27   : > { %648 = vst.msk [vmem:[#allocation4 + $0x1a0] sm:$0xff] %vm622_vm3, %v10749_v1  ;;  %661 = vst.msk [vmem:[#allocation4 + $0x230] sm:$0xff] %vm622_vm3, %v10749_v1 }
  0x28   : > { %734 = vst.msk [vmem:[#allocation2 + $0x21] sm:$0xff] %vm545_vm0, %v725_v2  ;;  %733 = vst.msk [vmem:[#allocation2 + $0x11] sm:$0xff] %vm545_vm0, %v724_v3 }
  0x29   : > { %735 = vst.msk [vmem:[#allocation2 + $0x31] sm:$0xff] %vm545_vm0, %v726_v4  ;;  %736 = vst.msk [vmem:[#allocation2 + $0x41] sm:$0xff] %vm545_vm0, %v727_v6 }
  0x2a   : > { %v773_v9 = vld [vmem:[#allocation2 + $0x2] sm:$0xff]  ;;  %737 = vst.msk [vmem:[#allocation2 + $0x51] sm:$0xff] %vm545_vm0, %v728_v7  ;;  %739 = vst.msk [vmem:[#allocation2 + $0x71] sm:$0xff] %vm545_vm0, %v730_v10  ;;  %v869_v10 = vpack.c.bf16 %v861_v8, %v861_v8 }
  0x2b   : > { %738 = vst.msk [vmem:[#allocation2 + $0x61] sm:$0xff] %vm545_vm0, %v729_v11  ;;  %v781_v13 = vpack.c.bf16 %v773_v9, %v773_v9  ;;  %740 = vst.msk [vmem:[#allocation2 + $0x81] sm:$0xff] %vm545_vm0, %v731_v12 }
  0x2c   : > { %674 = vst.msk [vmem:[#allocation5] sm:$0xff] %vm673_vm4, %v10749_v1  ;;  %687 = vst.msk [vmem:[#allocation5 + $0x90] sm:$0xff] %vm673_vm4, %v10749_v1  ;;  %v845_v5 = vld [vmem:[#allocation2 + $0x90] sm:$0xff] }
  0x2d   : > { %918 = vrot.lane.b32.xlu0 %v781_v13, %s7220_s30  ;;  %699 = vst.msk [vmem:[#allocation5 + $0x1a0] sm:$0xff] %vm673_vm4, %v10749_v1  ;;  %712 = vst.msk [vmem:[#allocation5 + $0x230] sm:$0xff] %vm673_vm4, %v10749_v1  ;;  %v853_v6 = vpack.c.bf16 %v845_v5, %v845_v5  ;;  %v877_v13 = vld [vmem:[#allocation2 + $0x92] sm:$0xff] }
  0x2e   : > { %625 = vst.msk [vmem:[#allocation4 + $0x8] sm:$0x1] %vm624_vm6, %v10749_v1  ;;  %626 = vst.msk [vmem:[#allocation4] sm:$0x1] %vm624_vm6, %v10749_v1 }
  0x2f   : > { %v759_v14 = vld [vmem:[#allocation2 + $0x21] sm:$0xff]  ;;  %v758_v15 = vld [vmem:[#allocation2 + $0x11] sm:$0xff]  ;;  %627 = vst.msk [vmem:[#allocation4 + $0x10] sm:$0x1] %vm624_vm6, %v10749_v1  ;;  %628 = vst.msk [vmem:[#allocation4 + $0x20] sm:$0x1] %vm624_vm6, %v10749_v1 }
  0x30   : > { %v760_v16 = vld [vmem:[#allocation2 + $0x31] sm:$0xff]  ;;  %v7445_v17 = vpack.c.bf16 %v759_v14, %v759_v14  ;;  %v766_v18 = vpack.c.bf16 %v758_v15, %v758_v15  ;;  %v775_v19 = vld [vmem:[#allocation2 + $0x22] sm:$0xff]  ;;  %629 = vst.msk [vmem:[#allocation4 + $0x30] sm:$0x1] %vm624_vm6, %v10749_v1  ;;  %630 = vst.msk [vmem:[#allocation4 + $0x40] sm:$0x1] %vm624_vm6, %v10749_v1 }
  0x31   : > { %v7449_v20 = vpack.c.bf16 %v760_v16, %v760_v16  ;;  %v7452_v21 = vpack.c.bf16 %v775_v19, %v775_v19  ;;  %v774_v22 = vld [vmem:[#allocation2 + $0x12] sm:$0xff]  ;;  %v790_v28 = vld [vmem:[#allocation2 + $0x20] sm:$0xff]  ;;  %631 = vst.msk [vmem:[#allocation4 + $0x50] sm:$0x1] %vm624_vm6, %v10749_v1  ;;  %632 = vst.msk [vmem:[#allocation4 + $0x60] sm:$0x1] %vm624_vm6, %v10749_v1 }
  0x32   : > { %898 = vrot.lane.b32.xlu1 %v7445_v17, %s7219_s29  ;;  %896 = vrot.lane.b32.xlu0 %v766_v18, %s7219_s29  ;;  %v789_v23 = vld [vmem:[#allocation2 + $0x10] sm:$0xff]  ;;  %v782_v24 = vpack.c.bf16 %v774_v22, %v774_v22  ;;  %v792_v31 = vld [vmem:[#allocation2 + $0x40] sm:$0xff]  ;;  %v7474_v32 = vpack.c.bf16 %v790_v28, %v790_v28  ;;  %633 = vst.msk [vmem:[#allocation4 + $0x70] sm:$0x1] %vm624_vm6, %v10749_v1  ;;  %634 = vst.msk [vmem:[#allocation4 + $0x80] sm:$0x1] %vm624_vm6, %v10749_v1 }
  0x33   : > { %v776_v25 = vld [vmem:[#allocation2 + $0x32] sm:$0xff]  ;;  %v7466_v27 = vpack.c.bf16 %v789_v23, %v789_v23  ;;  %v7480_v33 = vpack.c.bf16 %v792_v31, %v792_v31  ;;  %v808_v34 = vld [vmem:[#allocation2 + $0x41] sm:$0xff]  ;;  %637 = vst.msk [vmem:[#allocation4 + $0x98] sm:$0x1] %vm624_vm6, %v10749_v1  ;;  %639 = vst.msk [vmem:[#allocation4 + $0xa8] sm:$0x1] %vm624_vm6, %v10749_v1 }
  0x34   : > { %v791_v26 = vld [vmem:[#allocation2 + $0x30] sm:$0xff]  ;;  %v784_v29 = vpack.c.bf16 %v776_v25, %v776_v25  ;;  %v816_v35 = vpack.c.bf16 %v808_v34, %v808_v34  ;;  %v824_v36 = vld [vmem:[#allocation2 + $0x42] sm:$0xff]  ;;  %640 = vst.msk [vmem:[#allocation4 + $0xb8] sm:$0x1] %vm624_vm6, %v10749_v1  ;;  %641 = vst.msk [vmem:[#allocation4 + $0xc8] sm:$0x1] %vm624_vm6, %v10749_v1 }
  0x35   : > { %v7471_v30 = vpack.c.bf16 %v791_v26, %v791_v26  ;;  %v832_v38 = vpack.c.bf16 %v824_v36, %v824_v36  ;;  %v841_v40 = vld [vmem:[#allocation2 + $0x50] sm:$0xff]  ;;  %v763_v49 = vld [vmem:[#allocation2 + $0x61] sm:$0xff]  ;;  %642 = vst.msk [vmem:[#allocation4 + $0xd8] sm:$0x1] %vm624_vm6, %v10749_v1  ;;  %643 = vst.msk [vmem:[#allocation4 + $0xe8] sm:$0x1] %vm624_vm6, %v10749_v1 }
  0x36   : > { %900 = vrot.lane.b32.xlu1 %v7449_v20, %s7219_s29  ;;  %922 = vrot.lane.b32.xlu0 %v7452_v21, %s7220_s30  ;;  %v7510_v42 = vpack.c.bf16 %v841_v40, %v841_v40  ;;  %v857_v45 = vld [vmem:[#allocation2 + $0x51] sm:$0xff]  ;;  %v771_v51 = vpack.c.bf16 %v763_v49, %v763_v49  ;;  %v779_v53 = vld [vmem:[#allocation2 + $0x62] sm:$0xff]  ;;  %644 = vst.msk [vmem:[#allocation4 + $0xf8] sm:$0x1] %vm624_vm6, %v10749_v1  ;;  %645 = vst.msk [vmem:[#allocation4 + $0x108] sm:$0x1] %vm624_vm6, %v10749_v1 }
  0x37   : > { %v865_v47 = vpack.c.bf16 %v857_v45, %v857_v45  ;;  %v873_v48 = vld [vmem:[#allocation2 + $0x52] sm:$0xff]  ;;  %v787_v55 = vpack.c.bf16 %v779_v53, %v779_v53  ;;  %v794_v58 = vld [vmem:[#allocation2 + $0x60] sm:$0xff]  ;;  %646 = vst.msk [vmem:[#allocation4 + $0x118] sm:$0x1] %vm624_vm6, %v10749_v1  ;;  %649 = vst.msk [vmem:[#allocation4 + $0x1a8] sm:$0x1] %vm624_vm6, %v10749_v1 }
  0x38   : > { %v881_v50 = vpack.c.bf16 %v873_v48, %v873_v48  ;;  %v764_v52 = vld [vmem:[#allocation2 + $0x71] sm:$0xff]  ;;  %v796_v61 = vld [vmem:[#allocation2 + $0x80] sm:$0xff]  ;;  %v7546_v62 = vpack.c.bf16 %v794_v58, %v794_v58  ;;  %651 = vst.msk [vmem:[#allocation4 + $0x120] sm:$0x1] %vm624_vm6, %v10749_v1  ;;  %652 = vst.msk [vmem:[#allocation4 + $0x130] sm:$0x1] %vm624_vm6, %v10749_v1 }
  0x39   : > { %v772_v54 = vpack.c.bf16 %v764_v52, %v764_v52  ;;  %v780_v56 = vld [vmem:[#allocation2 + $0x72] sm:$0xff]  ;;  %v804_v63 = vpack.c.bf16 %v796_v61, %v796_v61  ;;  %v812_v0 = vld [vmem:[#allocation2 + $0x81] sm:$0xff]  ;;  %653 = vst.msk [vmem:[#allocation4 + $0x140] sm:$0x1] %vm624_vm6, %v10749_v1  ;;  %654 = vst.msk [vmem:[#allocation4 + $0x150] sm:$0x1] %vm624_vm6, %v10749_v1 }
  0x3a   : > { %920 = vrot.lane.b32.xlu1 %v782_v24, %s7220_s30  ;;  %942 = vrot.lane.b32.xlu0 %v7466_v27, %s7221_s0  ;;  %v795_v57 = vld [vmem:[#allocation2 + $0x70] sm:$0xff]  ;;  %v7538_v59 = vpack.c.bf16 %v780_v56, %v780_v56  ;;  %v820_v2 = vpack.c.bf16 %v812_v0, %v812_v0  ;;  %v828_v3 = vld [vmem:[#allocation2 + $0x82] sm:$0xff]  ;;  %655 = vst.msk [vmem:[#allocation4 + $0x160] sm:$0x1] %vm624_vm6, %v10749_v1  ;;  %656 = vst.msk [vmem:[#allocation4 + $0x170] sm:$0x1] %vm624_vm6, %v10749_v1 }
  0x3b   : > { %v7542_v60 = vpack.c.bf16 %v795_v57, %v795_v57  ;;  %v836_v4 = vpack.c.bf16 %v828_v3, %v828_v3  ;;  %657 = vst.msk [vmem:[#allocation4 + $0x180] sm:$0x1] %vm624_vm6, %v10749_v1  ;;  %658 = vst.msk [vmem:[#allocation4 + $0x190] sm:$0x1] %vm624_vm6, %v10749_v1  ;;  %v741_v57 = vld [vmem:[#allocation2] sm:$0xff] }
  0x3c   : > { %659 = vst.msk [vmem:[#allocation4 + $0x1a0] sm:$0x1] %vm624_vm6, %v10749_v1  ;;  %662 = vst.msk [vmem:[#allocation4 + $0x238] sm:$0x1] %vm624_vm6, %v10749_v1  ;;  %v749_v61 = vpack.c.bf16 %v741_v57, %v741_v57 }
  0x3d   : > { %664 = vst.msk [vmem:[#allocation4 + $0x1b8] sm:$0x1] %vm624_vm6, %v10749_v1  ;;  %665 = vst.msk [vmem:[#allocation4 + $0x1c8] sm:$0x1] %vm624_vm6, %v10749_v1 }
  0x3e   : > { %924 = vrot.lane.b32.xlu1 %v784_v29, %s7220_s30  ;;  %946 = vrot.lane.b32.xlu0 %v7471_v30, %s7221_s0  ;;  %666 = vst.msk [vmem:[#allocation4 + $0x1d8] sm:$0x1] %vm624_vm6, %v10749_v1  ;;  %667 = vst.msk [vmem:[#allocation4 + $0x1e8] sm:$0x1] %vm624_vm6, %v10749_v1 }
  0x3f   : > { %668 = vst.msk [vmem:[#allocation4 + $0x1f8] sm:$0x1] %vm624_vm6, %v10749_v1  ;;  %669 = vst.msk [vmem:[#allocation4 + $0x208] sm:$0x1] %vm624_vm6, %v10749_v1 }
  0x40   : > { %670 = vst.msk [vmem:[#allocation4 + $0x218] sm:$0x1] %vm624_vm6, %v10749_v1  ;;  %671 = vst.msk [vmem:[#allocation4 + $0x228] sm:$0x1] %vm624_vm6, %v10749_v1 }
  0x41   : > { %638 = vst.msk [vmem:[#allocation4 + $0x98] sm:$0x1] %vm624_vm6, %v10749_v1  ;;  %672 = vst.msk [vmem:[#allocation4 + $0x238] sm:$0x1] %vm624_vm6, %v10749_v1 }
  0x42   : > { %944 = vrot.lane.b32.xlu1 %v7474_v32, %s7221_s0  ;;  %966 = vrot.lane.b32.xlu0 %v766_v18, %s7222_s17 }
  0x46   : > { %948 = vrot.lane.b32.xlu1 %v7480_v33, %s7221_s0  ;;  %970 = vrot.lane.b32.xlu0 %v7449_v20, %s7222_s17 }
  0x4a   : > { %968 = vrot.lane.b32.xlu1 %v7445_v17, %s7222_s17  ;;  %990 = vrot.lane.b32.xlu0 %v782_v24, %s7223_s18 }
  0x4e   : > { %972 = vrot.lane.b32.xlu1 %v816_v35, %s7222_s17  ;;  %994 = vrot.lane.b32.xlu0 %v784_v29, %s7223_s18 }
  0x52   : > { %992 = vrot.lane.b32.xlu1 %v7452_v21, %s7223_s18  ;;  %1014 = vrot.lane.b32.xlu0 %v7474_v32, %s10753_s25 }
  0x56   : > { %996 = vrot.lane.b32.xlu1 %v832_v38, %s7223_s18  ;;  %1018 = vrot.lane.b32.xlu0 %v7480_v33, %s10753_s25 }
  0x5a   : > { %1016 = vrot.lane.b32.xlu1 %v7471_v30, %s10753_s25  ;;  %1038 = vrot.lane.b32.xlu0 %v7445_v17, %s7225_s20  ;;  %v885_v17 = vpack.c.bf16 %v877_v13, %v877_v13 }
  0x5e   : > { %1020 = vrot.lane.b32.xlu1 %v7510_v42, %s10753_s25  ;;  %1042 = vrot.lane.b32.xlu0 %v816_v35, %s7225_s20 }
  0x62   : > { %1040 = vrot.lane.b32.xlu1 %v7449_v20, %s7225_s20  ;;  %1062 = vrot.lane.b32.xlu0 %v7452_v21, %s10755_s26 }
  0x66   : > { %1044 = vrot.lane.b32.xlu1 %v865_v47, %s7225_s20  ;;  %1066 = vrot.lane.b32.xlu0 %v832_v38, %s10755_s26 }
  0x6a   : > { %1064 = vrot.lane.b32.xlu1 %v784_v29, %s10755_s26  ;;  %902 = vrot.lane.b32.xlu0 %v816_v35, %s7219_s29 }
  0x6e   : > { %1068 = vrot.lane.b32.xlu1 %v881_v50, %s10755_s26  ;;  %906 = vrot.lane.b32.xlu0 %v771_v51, %s7219_s29 }
  0x72   : > { %904 = vrot.lane.b32.xlu1 %v865_v47, %s7219_s29  ;;  %926 = vrot.lane.b32.xlu0 %v832_v38, %s7220_s30 }
  0x76   : > { %908 = vrot.lane.b32.xlu1 %v772_v54, %s7219_s29  ;;  %930 = vrot.lane.b32.xlu0 %v787_v55, %s7220_s30 }
  0x7a   : > { %928 = vrot.lane.b32.xlu1 %v881_v50, %s7220_s30  ;;  %950 = vrot.lane.b32.xlu0 %v7510_v42, %s7221_s0 }
  0x7e   : > { %932 = vrot.lane.b32.xlu1 %v7538_v59, %s7220_s30  ;;  %954 = vrot.lane.b32.xlu0 %v7542_v60, %s7221_s0 }
  0x82   : > { %952 = vrot.lane.b32.xlu1 %v7546_v62, %s7221_s0  ;;  %974 = vrot.lane.b32.xlu0 %v865_v47, %s7222_s17 }
  0x86   : > { %956 = vrot.lane.b32.xlu1 %v804_v63, %s7221_s0  ;;  %978 = vrot.lane.b32.xlu0 %v772_v54, %s7222_s17  ;;  %s6663_s0 = sshll.u32 %s11045_s24, 8 }
  0x87   : > { %s7582_s28 = scalar_lea.vmem %s10733_s1, %s6663_s0  ;;  %s7230_s0 = smov 80  }
  0x88   : > { %v6462_v15 = vld [vmem:[%s7582_s28 + $0xc0] sm:$0xff]  ;;  %v1543_v19 = vld [vmem:[%s7582_s28 + $0x8] sm:$0xff]  ;;  %v6464_v35 = vld [vmem:[%s7582_s28 + $0xd0] sm:$0xff] }
  0x89   : > { %v6454_v21 = vld [vmem:[%s7582_s28 + $0x80] sm:$0xff]  ;;  %v6447_v23 = vld [vmem:[%s7582_s28 + $0x48] sm:$0xff]  ;;  %v1545_v39 = vld [vmem:[%s7582_s28 + $0x18] sm:$0xff] }
  0x8a   : > { %976 = vrot.lane.b32.xlu1 %v771_v51, %s7222_s17  ;;  %998 = vrot.lane.b32.xlu0 %v881_v50, %s7223_s18  ;;  %v1542_v25 = vld [vmem:[%s7582_s28] sm:$0xff]  ;;  %v6455_v28 = vld [vmem:[%s7582_s28 + $0x88] sm:$0xff] }
  0x8b   : > { %v6446_v31 = vld [vmem:[%s7582_s28 + $0x40] sm:$0xff]  ;;  %v6463_v37 = vld [vmem:[%s7582_s28 + $0xc8] sm:$0xff]  ;;  %v6456_v41 = vld [vmem:[%s7582_s28 + $0x90] sm:$0xff] }
  0x8c   : > { %v6449_v44 = vld [vmem:[%s7582_s28 + $0x58] sm:$0xff]  ;;  %v1544_v46 = vld [vmem:[%s7582_s28 + $0x10] sm:$0xff]  ;;  %v6458_v52 = vld [vmem:[%s7582_s28 + $0xa0] sm:$0xff] }
  0x8d   : > { %v7568_v7 = vpop.permute.xlu0 %894  ;;  %v6457_v48 = vld [vmem:[%s7582_s28 + $0x98] sm:$0xff]  ;;  %v6448_v50 = vld [vmem:[%s7582_s28 + $0x50] sm:$0xff]  ;;  %v1546_v56 = vld [vmem:[%s7582_s28 + $0x20] sm:$0xff] }
  0x8e   : > { %980 = vrot.lane.b32.xlu1 %v820_v2, %s7222_s17  ;;  %1002 = vrot.lane.b32.xlu0 %v7538_v59, %s7223_s18  ;;  %v6450_v0 = vld [vmem:[%s7582_s28 + $0x60] sm:$0xff]  ;;  %v1547_v3 = vld [vmem:[%s7582_s28 + $0x28] sm:$0xff] }
  0x8f   : > { %v6459_v8 = vld [vmem:[%s7582_s28 + $0xa8] sm:$0xff]  ;;  %v6461_v57 = vld [vmem:[%s7582_s28 + $0xb8] sm:$0xff] }
  0x92   : > { %1000 = vrot.lane.b32.xlu1 %v787_v55, %s7223_s18  ;;  %1022 = vrot.lane.b32.xlu0 %v7546_v62, %s10753_s25 }
  0x96   : > { %1004 = vrot.lane.b32.xlu1 %v836_v4, %s7223_s18  ;;  %1026 = vrot.lane.b32.xlu0 %v804_v63, %s10753_s25  ;;  %s7231_s18 = smov 96  }
  0x9a   : > { %1024 = vrot.lane.b32.xlu1 %v7542_v60, %s10753_s25  ;;  %1046 = vrot.lane.b32.xlu0 %v771_v51, %s7225_s20 }
  0x9e   : > { %1028 = vrot.lane.b32.xlu1 %v853_v6, %s10753_s25  ;;  %1050 = vrot.lane.b32.xlu0 %v820_v2, %s7225_s20 }
  0x9f   : > { %v7572_v9 = vpop.permute.xlu0 %918 }
  0xa2   : > { %1048 = vrot.lane.b32.xlu1 %v772_v54, %s7225_s20  ;;  %1070 = vrot.lane.b32.xlu0 %v787_v55, %s10755_s26  ;;  %v6465_v54 = vld [vmem:[%s7582_s28 + $0xd8] sm:$0xff] }
  0xa4   : > { %v7577_v11 = vpop.permute.xlu1 %898  ;;  %v7584_v12 = vpop.permute.xlu0 %896 }
  0xa5   : > { %v1083_v5 = vsel %vm545_vm0, %v7466_v27, %v7584_v12 }
  0xa6   : > { %1052 = vrot.lane.b32.xlu1 %v869_v10, %s7225_s20  ;;  %1074 = vrot.lane.b32.xlu0 %v836_v4, %s10755_s26  ;;  %v1080_v4 = vsel %vm545_vm0, %v749_v61, %v7568_v7  ;;  %v6451_v7 = vld [vmem:[%s7582_s28 + $0x68] sm:$0xff]  ;;  %s7227_s20 = smov 104  }
  0xa7   : > { %v1103_v13 = vsel %vm622_vm3, %v1080_v4, %v7572_v9 }
  0xa8   : > { %v7668_v14 = vpop.permute.xlu1 %900  ;;  %v7671_v16 = vpop.permute.xlu0 %922 }
  0xaa   : > { %1072 = vrot.lane.b32.xlu1 %v7538_v59, %s10755_s26  ;;  %1922 = vrot.lane.b32.xlu0 %v6462_v15, %s7219_s29  ;;  %v6466_v59 = vld [vmem:[%s7582_s28 + $0xe0] sm:$0xff] }
  0xac   : > { %v7676_v18 = vpop.permute.xlu1 %920  ;;  %v7679_v20 = vpop.permute.xlu0 %942 }
  0xad   : > { %v1105_v15 = vsel %vm622_vm3, %v1083_v5, %v7676_v18  ;;  %v1120_v27 = vsel %vm1118_vm7, %v1103_v13, %v7679_v20  ;;  %v1086_v20 = vsel %vm545_vm0, %v7474_v32, %v7577_v11  ;;  %v6467_v11 = vld [vmem:[%s7582_s28 + $0xe8] sm:$0xff]  ;;  %v6469_v5 = vld [vmem:[%s7582_s28 + $0xf8] sm:$0xff] }
  0xae   : > { %1076 = vrot.lane.b32.xlu1 %v885_v17, %s10755_s26  ;;  %1560 = vrot.lane.b32.xlu0 %v1543_v19, %s7219_s29  ;;  %v6460_v19 = vld [vmem:[%s7582_s28 + $0xb0] sm:$0xff] }
  0xb0   : > { %v7684_v22 = vpop.permute.xlu1 %924  ;;  %v7687_v24 = vpop.permute.xlu0 %946 }
  0xb2   : > { %1800 = vrot.lane.b32.xlu1 %v6454_v21, %s7219_s29  ;;  %1681 = vrot.lane.b32.xlu0 %v6447_v23, %s7219_s29  ;;  %v1089_v23 = vsel %vm545_vm0, %v7471_v30, %v7668_v14 }
  0xb4   : > { %v7692_v26 = vpop.permute.xlu1 %944  ;;  %v7695_v29 = vpop.permute.xlu0 %966 }
  0xb5   : > { %v1122_v12 = vsel %vm1118_vm7, %v1105_v15, %v7692_v26  ;;  %v1136_v9 = vsel %vm673_vm4, %v1120_v27, %v7695_v29  ;;  %v1109_v29 = vsel %vm622_vm3, %v1089_v23, %v7684_v22  ;;  %v1548_v22 = vld [vmem:[%s7582_s28 + $0x30] sm:$0xff] }
  0xb6   : > { %1558 = vrot.lane.b32.xlu1 %v1542_v25, %s7219_s29  ;;  %1802 = vrot.lane.b32.xlu0 %v6455_v28, %s7219_s29  ;;  %v1107_v28 = vsel %vm622_vm3, %v1086_v20, %v7671_v16 }
  0xb7   : > { %v1124_v30 = vsel %vm1118_vm7, %v1107_v28, %v7687_v24 }
  0xb8   : > { %v7700_v34 = vpop.permute.xlu1 %948  ;;  %v7703_v36 = vpop.permute.xlu0 %970 }
  0xb9   : > { %v1126_v14 = vsel %vm1118_vm7, %v1109_v29, %v7700_v34 }
  0xba   : > { %1679 = vrot.lane.b32.xlu1 %v6446_v31, %s7219_s29  ;;  %1926 = vrot.lane.b32.xlu0 %v6464_v35, %s7219_s29 }
  0xbc   : > { %v969_v38 = vpop.permute.xlu1 %968  ;;  %v991_v40 = vpop.permute.xlu0 %990 }
  0xbd   : > { %v1138_v18 = vsel %vm673_vm4, %v1122_v12, %v969_v38  ;;  %v1153_v25 = vsel %vm1151_vm8, %v1136_v9, %v991_v40  ;;  %v1140_v38 = vsel %vm673_vm4, %v1124_v30, %v7703_v36 }
  0xbe   : > { %1924 = vrot.lane.b32.xlu1 %v6463_v37, %s7219_s29  ;;  %1564 = vrot.lane.b32.xlu0 %v1545_v39, %s7219_s29 }
  0xc0   : > { %v7712_v43 = vpop.permute.xlu1 %972  ;;  %v7715_v45 = vpop.permute.xlu0 %994 }
  0xc1   : > { %v1142_v39 = vsel %vm673_vm4, %v1126_v14, %v7712_v43  ;;  %v1157_v34 = vsel %vm1151_vm8, %v1140_v38, %v7715_v45 }
  0xc2   : > { %1804 = vrot.lane.b32.xlu1 %v6456_v41, %s7219_s29  ;;  %1685 = vrot.lane.b32.xlu0 %v6449_v44, %s7219_s29 }
  0xc4   : > { %v993_v47 = vpop.permute.xlu1 %992  ;;  %v1015_v49 = vpop.permute.xlu0 %1014 }
  0xc5   : > { %v1155_v26 = vsel %vm1151_vm8, %v1138_v18, %v993_v47  ;;  %v1170_v31 = vsel %vm1168_vm9, %v1153_v25, %v1015_v49  ;;  %v6468_v47 = vld [vmem:[%s7582_s28 + $0xf0] sm:$0xff] }
  0xc6   : > { %1562 = vrot.lane.b32.xlu1 %v1544_v46, %s7219_s29  ;;  %1806 = vrot.lane.b32.xlu0 %v6457_v48, %s7219_s29 }
  0xc8   : > { %v7724_v51 = vpop.permute.xlu1 %996  ;;  %v7727_v53 = vpop.permute.xlu0 %1018 }
  0xc9   : > { %v1159_v44 = vsel %vm1151_vm8, %v1142_v39, %v7724_v51  ;;  %v1174_v36 = vsel %vm1168_vm9, %v1157_v34, %v7727_v53 }
  0xca   : > { %1683 = vrot.lane.b32.xlu1 %v6448_v50, %s7219_s29  ;;  %1808 = vrot.lane.b32.xlu0 %v6458_v52, %s7219_s29  ;;  %v6452_v50 = vld [vmem:[%s7582_s28 + $0x70] sm:$0xff] }
  0xcc   : > { %v1017_v55 = vpop.permute.xlu1 %1016  ;;  %v1039_v58 = vpop.permute.xlu0 %1038 }
  0xcd   : > { %v1172_v32 = vsel %vm1168_vm9, %v1155_v26, %v1017_v55  ;;  %v1187_v35 = vsel %vm1185_vm10, %v1170_v31, %v1039_v58  ;;  %v1549_v55 = vld [vmem:[%s7582_s28 + $0x38] sm:$0xff]  ;;  %v1979_v58 = vld [vmem:[#allocation4 + $0x90] sm:$0xff] }
  0xce   : > { %1928 = vrot.lane.b32.xlu1 %v6465_v54, %s7219_s29  ;;  %1566 = vrot.lane.b32.xlu0 %v1546_v56, %s7219_s29  ;;  %v1987_v61 = vpack.c.bf16 %v1979_v58, %v1979_v58 }
  0xd0   : > { %v1021_v63 = vpop.permute.xlu1 %1020  ;;  %v1043_v2 = vpop.permute.xlu0 %1042 }
  0xd1   : > { %v1176_v43 = vsel %vm1168_vm9, %v1159_v44, %v1021_v63  ;;  %v1191_v48 = vsel %vm1185_vm10, %v1174_v36, %v1043_v2  ;;  %v6453_v63 = vld [vmem:[%s7582_s28 + $0x78] sm:$0xff]  ;;  %v1995_v2 = vld [vmem:[#allocation4 + $0x1] sm:$0xff] }
  0xd2   : > { %1930 = vrot.lane.b32.xlu1 %v6466_v59, %s7219_s29  ;;  %1687 = vrot.lane.b32.xlu0 %v6450_v0, %s7219_s29  ;;  %v2003_v4 = vpack.c.bf16 %v1995_v2, %v1995_v2 }
  0xd4   : > { %v1041_v6 = vpop.permute.xlu1 %1040  ;;  %v1063_v10 = vpop.permute.xlu0 %1062 }
  0xd5   : > { %v1189_v16 = vsel %vm1185_vm10, %v1172_v32, %v1041_v6  ;;  %v1204_v40 = vsel %vm1202_vm11, %v1187_v35, %v1063_v10 }
  0xd6   : > { %1568 = vrot.lane.b32.xlu1 %v1547_v3, %s7219_s29  ;;  %1810 = vrot.lane.b32.xlu0 %v6459_v8, %s7219_s29  ;;  %v2107_v8 = vld [vmem:[#allocation4 + $0x91] sm:$0xff] }
  0xd7   : > { %v2115_v13 = vpack.c.bf16 %v2107_v8, %v2107_v8 }
  0xd8   : > { %v1045_v17 = vpop.permute.xlu1 %1044  ;;  %v1067_v21 = vpop.permute.xlu0 %1066 }
  0xd9   : > { %v1193_v45 = vsel %vm1185_vm10, %v1176_v43, %v1045_v17  ;;  %v1208_v51 = vsel %vm1202_vm11, %v1191_v48, %v1067_v21 }
  0xda   : > { %1689 = vrot.lane.b32.xlu1 %v6451_v7, %s7219_s29  ;;  %1812 = vrot.lane.b32.xlu0 %v6460_v19, %s7219_s29 }
  0xdc   : > { %v1065_v37 = vpop.permute.xlu1 %1064  ;;  %v903_v41 = vpop.permute.xlu0 %902 }
  0xdd   : > { %v1206_v24 = vsel %vm1202_vm11, %v1189_v16, %v1065_v37  ;;  %v1092_v26 = vsel %vm545_vm0, %v7480_v33, %v903_v41 }
  0xde   : > { %v6433_v46 = vcombine.low %v1204_v40, %v1206_v24  ;;  %1932 = vrot.lane.b32.xlu1 %v6467_v11, %s7219_s29  ;;  %1570 = vrot.lane.b32.xlu0 %v1548_v22, %s7219_s29 }
  0xe0   : > { %v1069_v49 = vpop.permute.xlu1 %1068  ;;  %6956 = vmatprep.mubr.msk.bf16.mxu0 %vm1282_vm12, %v6433_v46  ;;  %v907_v53 = vpop.permute.xlu0 %906 }
  0xe1   : > { %v1210_v52 = vsel %vm1202_vm11, %v1193_v45, %v1069_v49  ;;  %v1098_v11 = vsel %vm545_vm0, %v7546_v62, %v907_v53 }
  0xe2   : > { %v6434_v54 = vcombine.low %v1208_v51, %v1210_v52  ;;  %1934 = vrot.lane.b32.xlu1 %v6468_v47, %s7219_s29  ;;  %1691 = vrot.lane.b32.xlu0 %v6452_v50, %s7219_s29 }
  0xe4   : > { %v905_v56 = vpop.permute.xlu1 %904  ;;  %6957 = vmatmul.mubr.msk.bf16.vlgmr.msra.gmra.mrb[0].mxu0 %vm1282_vm12, %v6434_v54  ;;  %v927_v59 = vpop.permute.xlu0 %926 }
  0xe5   : > { %v1095_v28 = vsel %vm545_vm0, %v7510_v42, %v905_v56  ;;  %v1111_v31 = vsel %vm622_vm3, %v1092_v26, %v927_v59 }
  0xe6   : > { %1572 = vrot.lane.b32.xlu1 %v1549_v55, %s7219_s29  ;;  %1814 = vrot.lane.b32.xlu0 %v6461_v57, %s7219_s29 }
  0xe8   : > { %v909_v0 = vpop.permute.xlu1 %908  ;;  %v931_v3 = vpop.permute.xlu0 %930 }
  0xe9   : > { %v1101_v14 = vsel %vm545_vm0, %v7542_v60, %v909_v0  ;;  %v1115_v33 = vsel %vm622_vm3, %v1098_v11, %v931_v3 }
  0xea   : > { %1693 = vrot.lane.b32.xlu1 %v6453_v63, %s7219_s29  ;;  %2229 = vrot.lane.b32.xlu0 %v1987_v61, %s7220_s30 }
  0xec   : > { %v929_v6 = vpop.permute.xlu1 %928  ;;  %v951_v10 = vpop.permute.xlu0 %950 }
  0xed   : > { %v1113_v30 = vsel %vm622_vm3, %v1095_v28, %v929_v6  ;;  %v1128_v35 = vsel %vm1118_vm7, %v1111_v31, %v951_v10 }
  0xee   : > { %1936 = vrot.lane.b32.xlu1 %v6469_v5, %s7219_s29  ;;  %2253 = vrot.lane.b32.xlu0 %v2003_v4, %s7222_s17  ;;  %v6432_v5 = vld [vmem:[%s10735_s3] ss:$0 sm:$0xff] }
  0xf0   : > { %v933_v15 = vpop.permute.xlu1 %932  ;;  %v955_v7 = vpop.permute.xlu0 %954 }
  0xf1   : > { %v1117_v22 = vsel %vm622_vm3, %v1101_v14, %v933_v15  ;;  %v1132_v39 = vsel %vm1118_vm7, %v1115_v33, %v955_v7 }
  0xf2   : > { %2397 = vrot.lane.b32.xlu0 %v2115_v13, %s10753_s25 }
  0xf4   : > { %v953_v27 = vpop.permute.xlu1 %952  ;;  %v975_v12 = vpop.permute.xlu0 %974 }
  0xf5   : > { %v1130_v42 = vsel %vm1118_vm7, %v1113_v30, %v953_v27  ;;  %v1144_v38 = vsel %vm673_vm4, %v1128_v35, %v975_v12 }
  0xf8   : > { %v957_v17 = vpop.permute.xlu1 %956  ;;  %v979_v19 = vpop.permute.xlu0 %978 }
  0xf9   : > { %v1134_v60 = vsel %vm1118_vm7, %v1117_v22, %v957_v17  ;;  %v1148_v34 = vsel %vm673_vm4, %v1132_v39, %v979_v19 }
  0xfc   : > { %v977_v9 = vpop.permute.xlu1 %976  ;;  %v999_v18 = vpop.permute.xlu0 %998 }
  0xfd   : > { %v1146_v40 = vsel %vm673_vm4, %v1130_v42, %v977_v9  ;;  %v1161_v41 = vsel %vm1151_vm8, %v1144_v38, %v999_v18 }
 0x100   : > { %v981_v21 = vpop.permute.xlu1 %980  ;;  %v1003_v20 = vpop.permute.xlu0 %1002 }
 0x101   : > { %v1150_v36 = vsel %vm673_vm4, %v1134_v60, %v981_v21  ;;  %v1165_v47 = vsel %vm1151_vm8, %v1148_v34, %v1003_v20 }
 0x104   : > { %v1001_v23 = vpop.permute.xlu1 %1000  ;;  %v1023_v25 = vpop.permute.xlu0 %1022 }
 0x105   : > { %v1163_v44 = vsel %vm1151_vm8, %v1146_v40, %v1001_v23  ;;  %v1178_v43 = vsel %vm1168_vm9, %v1161_v41, %v1023_v25 }
 0x108   : > { %v1005_v29 = vpop.permute.xlu1 %1004  ;;  %v1027_v32 = vpop.permute.xlu0 %1026 }
 0x109   : > { %v1167_v49 = vsel %vm1151_vm8, %v1150_v36, %v1005_v29  ;;  %v1182_v52 = vsel %vm1168_vm9, %v1165_v47, %v1027_v32 }
 0x10c   : > { %v1025_v16 = vpop.permute.xlu1 %1024  ;;  %v1047_v37 = vpop.permute.xlu0 %1046 }
 0x10d   : > { %v1180_v45 = vsel %vm1168_vm9, %v1163_v44, %v1025_v16  ;;  %v1195_v50 = vsel %vm1185_vm10, %v1178_v43, %v1047_v37 }
 0x110   : > { %v1029_v62 = vpop.permute.xlu1 %1028  ;;  %v1051_v24 = vpop.permute.xlu0 %1050 }
 0x111   : > { %v1184_v54 = vsel %vm1168_vm9, %v1167_v49, %v1029_v62  ;;  %v1199_v56 = vsel %vm1185_vm10, %v1182_v52, %v1051_v24 }
 0x114   : > { %v1049_v46 = vpop.permute.xlu1 %1048  ;;  %v1071_v48 = vpop.permute.xlu0 %1070 }
 0x115   : > { %v1197_v53 = vsel %vm1185_vm10, %v1180_v45, %v1049_v46  ;;  %v1212_v55 = vsel %vm1202_vm11, %v1195_v50, %v1071_v48 }
 0x118   : > { %v1053_v51 = vpop.permute.xlu1 %1052  ;;  %v1075_v58 = vpop.permute.xlu0 %1074 }
 0x119   : > { %v1201_v61 = vsel %vm1185_vm10, %v1184_v54, %v1053_v51  ;;  %v1216_v0 = vsel %vm1202_vm11, %v1199_v56, %v1075_v58 }
 0x11c   : > { %v1073_v57 = vpop.permute.xlu1 %1072  ;;  %v7867_v17 = vpop.permute.xlu0 %1922 }
 0x11d   : > { %v1214_v59 = vsel %vm1202_vm11, %v1197_v53, %v1073_v57 }
 0x11e   : > { %v6435_v63 = vcombine.low %v1212_v55, %v1214_v59 }
 0x120   : > { %v1077_v2 = vpop.permute.xlu1 %1076  ;;  %6960 = vmatprep.mubr.msk.bf16.mxu0 %vm1282_vm12, %v6435_v63  ;;  %v7874_v19 = vpop.permute.xlu0 %1560 }
 0x121   : > { %v1218_v3 = vsel %vm1202_vm11, %v1201_v61, %v1077_v2 }
 0x122   : > { %v6436_v4 = vcombine.low %v1216_v0, %v1218_v3 }
 0x124   : > { %6961 = vmatmul.mubr.msk.bf16.gmra.mrb[4].mxu0 %vm1282_vm12, %v6436_v4  ;;  %v7878_v9 = vpop.permute.xlu0 %1681  ;;  %v7882_v18 = vpop.permute.xlu1 %1800  ;;  %v1486_v4 = vld [vmem:[#allocation3 + $0x90] sm:$0xff] }
 0x128   : > { %v7886_v21 = vpop.permute.xlu0 %1802  ;;  %v7888_v20 = vpop.permute.xlu1 %1558 }
 0x12c   : > { %v7890_v23 = vpop.permute.xlu0 %1926  ;;  %v7892_v25 = vpop.permute.xlu1 %1679 }
 0x130   : > { %v7894_v26 = vpop.permute.xlu0 %1564  ;;  %v7896_v28 = vpop.permute.xlu1 %1924 }
 0x134   : > { %v7898_v29 = vpop.permute.xlu0 %1685  ;;  %v7900_v31 = vpop.permute.xlu1 %1804 }
 0x138   : > { %v7902_v32 = vpop.permute.xlu0 %1806  ;;  %v7904_v11 = vpop.permute.xlu1 %1562 }
 0x13c   : > { %v7906_v30 = vpop.permute.xlu0 %1808  ;;  %v7908_v14 = vpop.permute.xlu1 %1683 }
 0x140   : > { %v7910_v35 = vpop.permute.xlu0 %1566  ;;  %v7912_v16 = vpop.permute.xlu1 %1928 }
 0x144   : > { %v7914_v22 = vpop.permute.xlu0 %1687  ;;  %v7921_v60 = vpop.permute.xlu1 %1930 }
 0x148   : > { %v7926_v41 = vpop.permute.xlu0 %1810  ;;  %v7930_v34 = vpop.permute.xlu1 %1568 }
 0x14c   : > { %v7932_v44 = vpop.permute.xlu0 %1812  ;;  %v7936_v46 = vpop.permute.xlu1 %1689 }
 0x150   : > { %v7940_v36 = vpop.permute.xlu0 %1570  ;;  %v7944_v43 = vpop.permute.xlu1 %1932 }
 0x154   : > { %v7946_v47 = vpop.permute.xlu0 %1691  ;;  %v7948_v48 = vpop.permute.xlu1 %1934 }
 0x158   : > { %v7950_v45 = vpop.permute.xlu0 %1814  ;;  %v7952_v49 = vpop.permute.xlu1 %1572 }
 0x15c   : > { %v7954_v50 = vpop.permute.xlu0 %2229  ;;  %v7956_v51 = vpop.permute.xlu1 %1693 }
 0x160   : > { %v7958_v52 = vpop.permute.xlu0 %2253  ;;  %v7960_v53 = vpop.permute.xlu1 %1936 }
 0x161   : > { %10844 = vst [vmem:[#allocation7_spill] sm:$0xff] %v7958_v52 }
 0x164   : > { %v7962_v54 = vpop.permute.xlu0 %2397 }
 0x165   : > { %10845 = vst [vmem:[#allocation8_spill] sm:$0xff] %v7962_v54 }
 0x1b7   : > { %v6958_v6 = vpop.f32.mrb[0].mxu0 }
 0x1b8   : > { %v1342_v8 = vadd.f32 %v6958_v6, %v6432_v5  ;;  %v1333_v10 = vpop.f32.mrb[1].mxu0 }
 0x1b9   : > { %v1334_v13 = vadd.f32 %v6432_v5, %v1333_v10  ;;  %v6959_v15 = vpop.f32.mrb[2].mxu0 }
 0x1ba   : > { %1366 = vst.msk [vmem:[#allocation3 + $0x1d0] sm:$0xff] %vm545_vm0, %v1342_v8  ;;  %v1345_v7 = vadd.f32 %v6959_v15, %v6432_v5  ;;  %1449 = vrot.lane.b32.xlu1 %v1342_v8, %s7227_s20  ;;  %1384 = vrot.lane.b32.xlu0 %v1342_v8, %s7228_s21  ;;  %v1336_v27 = vpop.f32.mrb[3].mxu0 }
 0x1bb   : > { %1364 = vst.msk [vmem:[#allocation3 + $0x1b0] sm:$0xff] %vm545_vm0, %v1334_v13  ;;  %v1337_v12 = vadd.f32 %v6432_v5, %v1336_v27 }
 0x1bc   : > { %1367 = vst.msk [vmem:[#allocation3 + $0x1e0] sm:$0xff] %vm545_vm0, %v1345_v7 }
 0x1bd   : > { %1365 = vst.msk [vmem:[#allocation3 + $0x1c0] sm:$0xff] %vm545_vm0, %v1337_v12 }
 0x1be   : > { %1416 = vrot.lane.b32.xlu0 %v1342_v8, %s7229_s22  ;;  %1445 = vrot.lane.b32.xlu1 %v1334_v13, %s7227_s20 }
 0x1c1   : > { %v7970_v61 = vld [vmem:[#allocation3 + $0x1d0] sm:$0xff] }
 0x1c2   : > { %1386 = vrot.lane.b32.xlu1 %v1345_v7, %s7228_s21  ;;  %1380 = vrot.lane.b32.xlu0 %v1334_v13, %s7228_s21 }
 0x1c6   : > { %1418 = vrot.lane.b32.xlu1 %v1345_v7, %s7229_s22  ;;  %1412 = vrot.lane.b32.xlu0 %v1334_v13, %s7229_s22  ;;  %v1478_v13 = vld [vmem:[#allocation3] sm:$0xff] }
 0x1ca   : > { %1382 = vrot.lane.b32.xlu1 %v1337_v12, %s7228_s21  ;;  %1451 = vrot.lane.b32.xlu0 %v1345_v7, %s7227_s20 }
 0x1ce   : > { %1414 = vrot.lane.b32.xlu1 %v1337_v12, %s7229_s22  ;;  %1447 = vrot.lane.b32.xlu0 %v1337_v12, %s7227_s20 }
 0x1f7   : > { %v6962_v33 = vpop.f32.mrb[4].mxu0 }
 0x1f8   : > { %v1358_v37 = vadd.f32 %v6962_v33, %v6432_v5  ;;  %v1349_v42 = vpop.f32.mrb[5].mxu0 }
 0x1f9   : > { %v1350_v38 = vadd.f32 %v6432_v5, %v1349_v42  ;;  %v6963_v39 = vpop.f32.mrb[6].mxu0 }
 0x1fa   : > { %1370 = vst.msk [vmem:[#allocation3 + $0x210] sm:$0xff] %vm545_vm0, %v1358_v37  ;;  %1457 = vrot.lane.b32.xlu1 %v1358_v37, %s7227_s20  ;;  %1392 = vrot.lane.b32.xlu0 %v1358_v37, %s7228_s21  ;;  %v1361_v62 = vadd.f32 %v6963_v39, %v6432_v5  ;;  %v1352_v40 = vpop.f32.mrb[7].mxu0  ;;  %v1518_v39 = vld [vmem:[#allocation3 + $0x1b0] sm:$0xff] }
 0x1fb   : > { %1368 = vst.msk [vmem:[#allocation3 + $0x1f0] sm:$0xff] %vm545_vm0, %v1350_v38  ;;  %v1353_v24 = vadd.f32 %v6432_v5, %v1352_v40  ;;  %v1606_v5 = vld [vmem:[#allocation3 + $0x1] sm:$0xff]  ;;  %v1494_v40 = vadd.f32 %v1486_v4, %v1478_v13 }
 0x1fc   : > { %1371 = vst.msk [vmem:[#allocation3 + $0x220] sm:$0xff] %vm545_vm0, %v1361_v62  ;;  %v1614_v27 = vadd.f32 %v1606_v5, %v1486_v4 }
 0x1fd   : > { %1369 = vst.msk [vmem:[#allocation3 + $0x200] sm:$0xff] %vm545_vm0, %v1353_v24 }
 0x1fe   : > { %1453 = vrot.lane.b32.xlu1 %v1350_v38, %s7227_s20  ;;  %1424 = vrot.lane.b32.xlu0 %v1358_v37, %s7229_s22 }
 0x202   : > { %1394 = vrot.lane.b32.xlu1 %v1361_v62, %s7228_s21  ;;  %1388 = vrot.lane.b32.xlu0 %v1350_v38, %s7228_s21 }
 0x206   : > { %1459 = vrot.lane.b32.xlu1 %v1361_v62, %s7227_s20  ;;  %1420 = vrot.lane.b32.xlu0 %v1350_v38, %s7229_s22 }
 0x20a   : > { %1390 = vrot.lane.b32.xlu1 %v1353_v24, %s7228_s21  ;;  %1426 = vrot.lane.b32.xlu0 %v1361_v62, %s7229_s22  ;;  %v1521_v62 = vld [vmem:[#allocation3 + $0x1e0] sm:$0xff] }
 0x20e   : > { %1422 = vrot.lane.b32.xlu1 %v1353_v24, %s7229_s22  ;;  %1455 = vrot.lane.b32.xlu0 %v1353_v24, %s7227_s20  ;;  %s10851_s20 = smov 48  }
 0x22c   : > { %v1450_v55 = vpop.permute.xlu1 %1449  ;;  %v1385_v56 = vpop.permute.xlu0 %1384 }
 0x22d   : > { %1472 = vst.msk [vmem:[#allocation3 + $0x31] sm:$0xff] %vm545_vm0, %v1450_v55  ;;  %1406 = vst.msk [vmem:[#allocation3 + $0x141] sm:$0xff] %vm545_vm0, %v1385_v56 }
 0x230   : > { %v1417_v57 = vpop.permute.xlu0 %1416  ;;  %v1446_v58 = vpop.permute.xlu1 %1445 }
 0x231   : > { %1439 = vst.msk [vmem:[#allocation3 + $0xc0] sm:$0xff] %vm545_vm0, %v1417_v57  ;;  %1470 = vst.msk [vmem:[#allocation3 + $0x11] sm:$0xff] %vm545_vm0, %v1446_v58 }
 0x234   : > { %v7968_v59 = vld [vmem:[#allocation3 + $0x140] sm:$0xff]  ;;  %v1387_v63 = vpop.permute.xlu1 %1386  ;;  %v1381_v0 = vpop.permute.xlu0 %1380  ;;  %v1481_v6 = vld [vmem:[#allocation3 + $0x30] sm:$0xff] }
 0x235   : > { %v7972_v2 = vld [vmem:[#allocation3 + $0x141] sm:$0xff]  ;;  %v1737_v3 = vadd.f32 %v7970_v61, %v7968_v59  ;;  %1407 = vst.msk [vmem:[#allocation3 + $0x151] sm:$0xff] %vm545_vm0, %v1387_v63  ;;  %1404 = vst.msk [vmem:[#allocation3 + $0x121] sm:$0xff] %vm545_vm0, %v1381_v0  ;;  %v1609_v15 = vld [vmem:[#allocation3 + $0x31] sm:$0xff] }
 0x236   : > { %v1859_v8 = vadd.f32 %v7970_v61, %v7972_v2 }
 0x237   : > { %v1753_v10 = vadd.f32 %v1737_v3, %v1481_v6  ;;  %v1630_v3 = vadd.f32 %v1614_v27, %v1518_v39 }
 0x238   : > { %v1489_v7 = vld [vmem:[#allocation3 + $0xc0] sm:$0xff]  ;;  %v1419_v12 = vpop.permute.xlu1 %1418  ;;  %v1413_v33 = vpop.permute.xlu0 %1412 }
 0x239   : > { %v1617_v37 = vadd.f32 %v1609_v15, %v1489_v7  ;;  %v1769_v42 = vadd.f32 %v1753_v10, %v1489_v7  ;;  %v1875_v38 = vadd.f32 %v1859_v8, %v1489_v7  ;;  %1440 = vst.msk [vmem:[#allocation3 + $0xd0] sm:$0xff] %vm545_vm0, %v1419_v12  ;;  %1437 = vst.msk [vmem:[#allocation3 + $0xa0] sm:$0xff] %vm545_vm0, %v1413_v33 }
 0x23a   : > { %v1497_v24 = vadd.f32 %v1489_v7, %v1481_v6 }
 0x23b   : > { %v1777_v55 = vmul.f32 0.25, %v1769_v42  ;;  %v1891_v56 = vadd.f32 %v1875_v38, %v1609_v15  ;;  %v1633_v57 = vadd.f32 %v1617_v37, %v1521_v62 }
 0x23c   : > { %v1505_v58 = vld [vmem:[#allocation3 + $0x150] sm:$0xff]  ;;  %v1502_v0 = vld [vmem:[#allocation3 + $0x120] sm:$0xff]  ;;  %v1383_v5 = vpop.permute.xlu1 %1382  ;;  %v1452_v1 = vpop.permute.xlu0 %1451 }
 0x23d   : > { %v1641_v63 = vld [vmem:[#allocation3 + $0x151] sm:$0xff]  ;;  %v1826_v8 = vsel %vm545_vm0, %v1777_v55, %v7900_v31  ;;  %v1899_v10 = vmul.f32 0.25, %v1891_v56  ;;  %v1513_v54 = vadd.f32 %v1505_v58, %v1497_v24  ;;  %v1638_v52 = vld [vmem:[#allocation3 + $0x121] sm:$0xff]  ;;  %1405 = vst.msk [vmem:[#allocation3 + $0x131] sm:$0xff] %vm545_vm0, %v1383_v5  ;;  %1473 = vst.msk [vmem:[#allocation3 + $0x41] sm:$0xff] %vm545_vm0, %v1452_v1  ;;  %v1510_v4 = vadd.f32 %v1502_v0, %v1494_v40 }
 0x23e   : > { %v1649_v12 = vadd.f32 %v1641_v63, %v1633_v57  ;;  %1835 = vst.msk [vmem:[#allocation4 + $0xc0] sm:$0xff] %vm622_vm3, %v1826_v8  ;;  %v1646_v6 = vadd.f32 %v1638_v52, %v1630_v3  ;;  %v1735_v7 = vadd.f32 %v1518_v39, %v1502_v0  ;;  %v1479_v24 = vld [vmem:[#allocation3 + $0x10] sm:$0xff]  ;;  %v1857_v57 = vadd.f32 %v1638_v52, %v1518_v39 }
 0x23f   : > { %v1529_v13 = vadd.f32 %v1521_v62, %v1513_v54  ;;  %v1526_v27 = vadd.f32 %v1518_v39, %v1510_v4  ;;  %v1948_v38 = vsel %vm545_vm0, %v1899_v10, %v7890_v23  ;;  %v1607_v55 = vld [vmem:[#allocation3 + $0x11] sm:$0xff]  ;;  %v1860_v5 = vadd.f32 %v1641_v63, %v1521_v62  ;;  %v1519_v39 = vld [vmem:[#allocation3 + $0x1c0] sm:$0xff] }
 0x240   : > { %v1657_v15 = vmul.f32 0.25, %v1649_v12  ;;  %v1654_v33 = vmul.f32 0.25, %v1646_v6  ;;  %v1487_v37 = vld [vmem:[#allocation3 + $0xa0] sm:$0xff]  ;;  %v1415_v42 = vpop.permute.xlu1 %1414  ;;  %v1448_v31 = vpop.permute.xlu0 %1447  ;;  %1957 = vst.msk [vmem:[#allocation4 + $0x31] sm:$0xff] %vm622_vm3, %v1948_v38  ;;  %v7997_v23 = vld [vmem:[#allocation3 + $0xd0] sm:$0xff]  ;;  %v1751_v3 = vadd.f32 %v1735_v7, %v1479_v24  ;;  %v1738_v63 = vadd.f32 %v1521_v62, %v1505_v58 }
 0x241   : > { %v1537_v56 = vmul.f32 0.25, %v1529_v13  ;;  %1438 = vst.msk [vmem:[#allocation3 + $0xb0] sm:$0xff] %vm545_vm0, %v1415_v42  ;;  %1471 = vst.msk [vmem:[#allocation3 + $0x21] sm:$0xff] %vm545_vm0, %v1448_v31  ;;  %v1534_v54 = vmul.f32 0.25, %v1526_v27  ;;  %v1615_v0 = vadd.f32 %v1607_v55, %v1487_v37  ;;  %v1873_v52 = vadd.f32 %v1857_v57, %v1487_v37 }
 0x242   : > { %v1706_v1 = vsel %vm545_vm0, %v1657_v15, %v7898_v29  ;;  %v1703_v40 = vsel %vm545_vm0, %v1654_v33, %v7892_v25  ;;  %v1495_v29 = vadd.f32 %v1487_v37, %v1479_v24  ;;  %v1767_v10 = vadd.f32 %v1751_v3, %v1487_v37 }
 0x243   : > { %1714 = vst.msk [vmem:[#allocation4 + $0x151] sm:$0xff] %vm622_vm3, %v1706_v1  ;;  %1711 = vst.msk [vmem:[#allocation4 + $0x121] sm:$0xff] %vm622_vm3, %v1703_v40  ;;  %v1585_v8 = vsel %vm545_vm0, %v1537_v56, %v7894_v26  ;;  %v1631_v4 = vadd.f32 %v1615_v0, %v1519_v39  ;;  %v1582_v25 = vsel %vm545_vm0, %v1534_v54, %v7888_v20 }
 0x244   : > { %v1503_v12 = vld [vmem:[#allocation3 + $0x130] sm:$0xff]  ;;  %v8002_v13 = vld [vmem:[#allocation3 + $0x40] sm:$0xff]  ;;  %1593 = vst.msk [vmem:[#allocation4 + $0x1e0] sm:$0xff] %vm622_vm3, %v1585_v8  ;;  %v1876_v15 = vadd.f32 %v1860_v5, %v7997_v23  ;;  %1590 = vst.msk [vmem:[#allocation4 + $0x1b0] sm:$0xff] %vm622_vm3, %v1582_v25  ;;  %v1775_v26 = vmul.f32 0.25, %v1767_v10  ;;  %v1889_v42 = vadd.f32 %v1873_v52, %v1607_v55 }
 0x245   : > { %v1639_v6 = vld [vmem:[#allocation3 + $0x131] sm:$0xff]  ;;  %v1511_v7 = vadd.f32 %v1503_v12, %v1495_v29  ;;  %v8008_v27 = vld [vmem:[#allocation3 + $0x41] sm:$0xff]  ;;  %v1754_v38 = vadd.f32 %v1738_v63, %v8002_v13  ;;  %v1736_v58 = vadd.f32 %v1519_v39, %v1503_v12 }
 0x246   : > { %v1982_v33 = vld [vmem:[#allocation4 + $0xc0] sm:$0xff]  ;;  %v1647_v37 = vadd.f32 %v1639_v6, %v1631_v4  ;;  %v1858_v31 = vadd.f32 %v1639_v6, %v1519_v39  ;;  %v1892_v24 = vadd.f32 %v1876_v15, %v8008_v27  ;;  %v1824_v20 = vsel %vm545_vm0, %v1775_v26, %v7882_v18 }
 0x247   : > { %v8015_v54 = vpack.c.bf16 %v1982_v33, %v1982_v33  ;;  %1833 = vst.msk [vmem:[#allocation4 + $0xa0] sm:$0xff] %vm622_vm3, %v1824_v20  ;;  %v1527_v40 = vadd.f32 %v1519_v39, %v1511_v7  ;;  %v1770_v55 = vadd.f32 %v1754_v38, %v7997_v23  ;;  %v1998_v5 = vld [vmem:[#allocation4 + $0x31] sm:$0xff]  ;;  %v1897_v15 = vmul.f32 0.25, %v1889_v42  ;;  %v2110_v26 = vld [vmem:[#allocation4 + $0xc1] sm:$0xff] }
 0x248   : > { %v1655_v62 = vmul.f32 0.25, %v1647_v37  ;;  %v1488_v56 = vld [vmem:[#allocation3 + $0xb0] sm:$0xff]  ;;  %v1480_v1 = vld [vmem:[#allocation3 + $0x20] sm:$0xff]  ;;  %v1900_v0 = vmul.f32 0.25, %v1892_v24  ;;  %v8026_v4 = vpack.c.bf16 %v1998_v5, %v1998_v5 }
 0x249   : > { %v1608_v57 = vld [vmem:[#allocation3 + $0x21] sm:$0xff]  ;;  %v1874_v3 = vadd.f32 %v1858_v31, %v1488_v56  ;;  %v1496_v52 = vadd.f32 %v1488_v56, %v1480_v1  ;;  %v1752_v8 = vadd.f32 %v1736_v58, %v1480_v1  ;;  %2235 = vrot.lane.b32.xlu1 %v8015_v54, %s7220_s30  ;;  %v1535_v7 = vmul.f32 0.25, %v1527_v40 }
 0x24a   : > { %v1704_v29 = vsel %vm545_vm0, %v1655_v62, %v7878_v9  ;;  %v1616_v18 = vadd.f32 %v1608_v57, %v1488_v56  ;;  %v2011_v10 = vld [vmem:[#allocation4 + $0x120] sm:$0xff]  ;;  %v1949_v39 = vsel %vm545_vm0, %v1900_v0, %v7912_v16  ;;  %v1778_v31 = vmul.f32 0.25, %v1770_v55 }
 0x24b   : > { %1712 = vst.msk [vmem:[#allocation4 + $0x131] sm:$0xff] %vm622_vm3, %v1704_v29  ;;  %v1890_v12 = vadd.f32 %v1874_v3, %v1608_v57  ;;  %1958 = vst.msk [vmem:[#allocation4 + $0x41] sm:$0xff] %vm622_vm3, %v1949_v39  ;;  %v1512_v6 = vadd.f32 %v7968_v59, %v1496_v52  ;;  %v1768_v25 = vadd.f32 %v1752_v8, %v1488_v56  ;;  %v2043_v37 = vld [vmem:[#allocation4 + $0x121] sm:$0xff]  ;;  %v2014_v56 = vld [vmem:[#allocation4 + $0x150] sm:$0xff] }
 0x24c   : > { %v1632_v9 = vadd.f32 %v7970_v61, %v1616_v18  ;;  %v2019_v63 = vpack.c.bf16 %v2011_v10, %v2011_v10  ;;  %v8039_v62 = vpack.c.bf16 %v2110_v26, %v2110_v26  ;;  %v2051_v58 = vpack.c.bf16 %v2043_v37, %v2043_v37  ;;  %v2027_v40 = vld [vmem:[#allocation4 + $0x1b0] sm:$0xff]  ;;  %v2126_v0 = vld [vmem:[#allocation4 + $0x1e1] sm:$0xff] }
 0x24d   : > { %v1898_v33 = vmul.f32 0.25, %v1890_v12  ;;  %v1528_v38 = vadd.f32 %v7970_v61, %v1512_v6  ;;  %v1776_v24 = vmul.f32 0.25, %v1768_v25  ;;  %2259 = vrot.lane.b32.xlu1 %v8026_v4, %s7222_s17  ;;  %v1946_v61 = vsel %vm545_vm0, %v1897_v15, %v7867_v17  ;;  %v2123_v3 = vld [vmem:[#allocation4 + $0x1b1] sm:$0xff] }
 0x24e   : > { %v1648_v16 = vadd.f32 %v7972_v2, %v1632_v9  ;;  %2277 = vrot.lane.b32.xlu0 %v2019_v63, %s10753_s25  ;;  %10846 = vst [vmem:[#allocation9_spill] sm:$0xff] %v8039_v62  ;;  %v1583_v2 = vsel %vm545_vm0, %v1535_v7, %v7874_v19  ;;  %1955 = vst.msk [vmem:[#allocation4 + $0x11] sm:$0xff] %vm622_vm3, %v1946_v61  ;;  %v8061_v57 = vpack.c.bf16 %v2014_v56, %v2014_v56  ;;  %v2061_v52 = vld [vmem:[#allocation4 + $0x30] sm:$0xff]  ;;  %v1980_v6 = vld [vmem:[#allocation4 + $0xa0] sm:$0xff] }
 0x24f   : > { %v1947_v59 = vsel %vm545_vm0, %v1898_v33, %v7896_v28  ;;  %v1536_v20 = vmul.f32 0.25, %v1528_v38  ;;  %1591 = vst.msk [vmem:[#allocation4 + $0x1c0] sm:$0xff] %vm622_vm3, %v1583_v2  ;;  %v1827_v28 = vsel %vm545_vm0, %v1778_v31, %v7902_v32  ;;  %v1825_v1 = vsel %vm545_vm0, %v1776_v24, %v7886_v21  ;;  %v2030_v32 = vld [vmem:[#allocation4 + $0x1e0] sm:$0xff]  ;;  %v8098_v25 = vld [vmem:[#allocation3 + $0x210] sm:$0xff] }
 0x250   : > { %v1656_v42 = vmul.f32 0.25, %v1648_v16  ;;  %1956 = vst.msk [vmem:[#allocation4 + $0x21] sm:$0xff] %vm622_vm3, %v1947_v59  ;;  %1836 = vst.msk [vmem:[#allocation4 + $0xd0] sm:$0xff] %vm622_vm3, %v1827_v28  ;;  %v2038_v21 = vpack.c.bf16 %v2030_v32, %v2030_v32  ;;  %v8074_v5 = vpack.c.bf16 %v2126_v0, %v2126_v0  ;;  %v2131_v29 = vpack.c.bf16 %v2123_v3, %v2123_v3 }
 0x251   : > { %2403 = vrot.lane.b32.xlu1 %v8039_v62, %s10753_s25  ;;  %v1584_v17 = vsel %vm545_vm0, %v1536_v20, %v7904_v11  ;;  %1834 = vst.msk [vmem:[#allocation4 + $0xb0] sm:$0xff] %vm622_vm3, %v1825_v1  ;;  %10847 = vst [vmem:[#allocation10_spill] sm:$0xff] %v8061_v57  ;;  %v2046_v11 = vld [vmem:[#allocation4 + $0x151] sm:$0xff]  ;;  %v8084_v10 = vpack.c.bf16 %v2061_v52, %v2061_v52  ;;  %v8102_v33 = vpack.c.bf16 %v1980_v6, %v1980_v6 }
 0x252   : > { %2325 = vrot.lane.b32.xlu0 %v2051_v58, %s7230_s0  ;;  %1592 = vst.msk [vmem:[#allocation4 + $0x1d0] sm:$0xff] %vm622_vm3, %v1584_v17  ;;  %v1705_v19 = vsel %vm545_vm0, %v1656_v42, %v7908_v14  ;;  %v8069_v55 = vpack.c.bf16 %v2046_v11, %v2046_v11  ;;  %v2035_v14 = vpack.c.bf16 %v2027_v40, %v2027_v40  ;;  %v2108_v17 = vld [vmem:[#allocation4 + $0xa1] sm:$0xff]  ;;  %v1522_v11 = vld [vmem:[#allocation3 + $0x1f0] sm:$0xff] }
 0x253   : > { %1713 = vst.msk [vmem:[#allocation4 + $0x141] sm:$0xff] %vm622_vm3, %v1705_v19  ;;  %v1618_v59 = vadd.f32 %v8008_v27, %v7997_v23  ;;  %v8121_v19 = vld [vmem:[#allocation3 + $0x220] sm:$0xff]  ;;  %v2012_v40 = vld [vmem:[#allocation4 + $0x130] sm:$0xff] }
 0x255   : > { %2283 = vrot.lane.b32.xlu1 %v8061_v57, %s10753_s25  ;;  %v1996_v31 = vld [vmem:[#allocation4 + $0x11] sm:$0xff] }
 0x256   : > { %2664 = vrot.lane.b32.xlu0 %v2019_v63, %s7222_s17  ;;  %v8117_v56 = vpack.c.bf16 %v1996_v31, %v1996_v31 }
 0x259   : > { %2307 = vrot.lane.b32.xlu1 %v2038_v21, %s10755_s26 }
 0x25a   : > { %2696 = vrot.lane.b32.xlu0 %v2051_v58, %s10755_s26 }
 0x25d   : > { %2331 = vrot.lane.b32.xlu1 %v8069_v55, %s7230_s0 }
 0x25e   : > { %2301 = vrot.lane.b32.xlu0 %v2035_v14, %s10755_s26 }
 0x261   : > { %2427 = vrot.lane.b32.xlu1 %v8074_v5, %s7231_s18 }
 0x262   : > { %2421 = vrot.lane.b32.xlu0 %v2131_v29, %s7231_s18 }
 0x265   : > { %2670 = vrot.lane.b32.xlu1 %v8061_v57, %s7222_s17 }
 0x266   : > { %2680 = vrot.lane.b32.xlu0 %v2035_v14, %s10753_s25  ;;  %v1498_v14 = vadd.f32 %v7997_v23, %v8002_v13  ;;  %v2028_v23 = vld [vmem:[#allocation4 + $0x1c0] sm:$0xff] }
 0x269   : > { %2686 = vrot.lane.b32.xlu1 %v2038_v21, %s10753_s25 }
 0x26a   : > { %2816 = vrot.lane.b32.xlu0 %v2131_v29, %s7230_s0  ;;  %v1634_v29 = vadd.f32 %v1618_v59, %v1522_v11 }
 0x26c   : > { %v1458_v18 = vpop.permute.xlu1 %1457  ;;  %v1393_v8 = vpop.permute.xlu0 %1392 }
 0x26d   : > { %1476 = vst.msk [vmem:[#allocation3 + $0x71] sm:$0xff] %vm545_vm0, %v1458_v18  ;;  %1410 = vst.msk [vmem:[#allocation3 + $0x181] sm:$0xff] %vm545_vm0, %v1393_v8  ;;  %2702 = vrot.lane.b32.xlu1 %v8069_v55, %s10755_s26 }
 0x26e   : > { %2353 = vrot.lane.b32.xlu0 %v8084_v10, %s7231_s18 }
 0x270   : > { %v1454_v39 = vpop.permute.xlu1 %1453  ;;  %v1425_v12 = vpop.permute.xlu0 %1424 }
 0x271   : > { %1474 = vst.msk [vmem:[#allocation3 + $0x51] sm:$0xff] %vm545_vm0, %v1454_v39  ;;  %1443 = vst.msk [vmem:[#allocation3 + $0x100] sm:$0xff] %vm545_vm0, %v1425_v12  ;;  %2822 = vrot.lane.b32.xlu1 %v8074_v5, %s7230_s0  ;;  %v8130_v39 = vpack.c.bf16 %v2108_v17, %v2108_v17 }
 0x272   : > { %2377 = vrot.lane.b32.xlu0 %v8015_v54, %s7229_s22 }
 0x273   : > { %10848 = vst [vmem:[#allocation11_spill] sm:$0xff] %v8130_v39 }
 0x274   : > { %v1485_v9 = vld [vmem:[#allocation3 + $0x70] sm:$0xff]  ;;  %v8100_v63 = vld [vmem:[#allocation3 + $0x180] sm:$0xff]  ;;  %v1395_v15 = vpop.permute.xlu1 %1394  ;;  %v1389_v7 = vpop.permute.xlu0 %1388 }
 0x275   : > { %v8104_v26 = vld [vmem:[#allocation3 + $0x181] sm:$0xff]  ;;  %v1741_v37 = vadd.f32 %v8098_v25, %v8100_v63  ;;  %1411 = vst.msk [vmem:[#allocation3 + $0x191] sm:$0xff] %vm545_vm0, %v1395_v15  ;;  %1408 = vst.msk [vmem:[#allocation3 + $0x161] sm:$0xff] %vm545_vm0, %v1389_v7  ;;  %v1613_v38 = vld [vmem:[#allocation3 + $0x71] sm:$0xff]  ;;  %2231 = vrot.lane.b32.xlu1 %v8102_v33, %s7220_s30 }
 0x276   : > { %2780 = vrot.lane.b32.xlu0 %v2038_v21, %s7220_s30  ;;  %v1863_v16 = vadd.f32 %v8098_v25, %v8104_v26 }
 0x277   : > { %v1757_v24 = vadd.f32 %v1741_v37, %v1485_v9 }
 0x278   : > { %v1493_v20 = vld [vmem:[#allocation3 + $0x100] sm:$0xff]  ;;  %v1460_v42 = vpop.permute.xlu1 %1459  ;;  %v1421_v58 = vpop.permute.xlu0 %1420  ;;  %v1483_v13 = vld [vmem:[#allocation3 + $0x50] sm:$0xff] }
 0x279   : > { %v1501_v61 = vadd.f32 %v1493_v20, %v1485_v9  ;;  %v1621_v2 = vadd.f32 %v1613_v38, %v1493_v20  ;;  %v1773_v28 = vadd.f32 %v1757_v24, %v1493_v20  ;;  %v1879_v1 = vadd.f32 %v1863_v16, %v1493_v20  ;;  %1477 = vst.msk [vmem:[#allocation3 + $0x81] sm:$0xff] %vm545_vm0, %v1460_v42 }
 0x27a   : > { %1441 = vst.msk [vmem:[#allocation3 + $0xe0] sm:$0xff] %vm545_vm0, %v1421_v58  ;;  %2255 = vrot.lane.b32.xlu1 %v8117_v56, %s7222_s17  ;;  %2652 = vrot.lane.b32.xlu0 %v8039_v62, %s7220_s30  ;;  %v8142_v24 = vpack.c.bf16 %v2012_v40, %v2012_v40 }
 0x27b   : > { %v1781_v27 = vmul.f32 0.25, %v1773_v28  ;;  %v1895_v32 = vadd.f32 %v1879_v1, %v1613_v38  ;;  %v1637_v21 = vadd.f32 %v1621_v2, %v8121_v19  ;;  %v8144_v2 = vpack.c.bf16 %v2028_v23, %v2028_v23  ;;  %v1611_v1 = vld [vmem:[#allocation3 + $0x51] sm:$0xff] }
 0x27c   : > { %v1509_v0 = vld [vmem:[#allocation3 + $0x190] sm:$0xff]  ;;  %v1506_v52 = vld [vmem:[#allocation3 + $0x160] sm:$0xff]  ;;  %v1391_v18 = vpop.permute.xlu1 %1390  ;;  %v1427_v8 = vpop.permute.xlu0 %1426 }
 0x27d   : > { %v1645_v3 = vld [vmem:[#allocation3 + $0x191] sm:$0xff]  ;;  %v1830_v12 = vsel %vm545_vm0, %v1781_v27, %v7932_v44  ;;  %v1903_v6 = vmul.f32 0.25, %v1895_v32  ;;  %v1517_v9 = vadd.f32 %v1509_v0, %v1501_v61  ;;  %v1642_v7 = vld [vmem:[#allocation3 + $0x161] sm:$0xff]  ;;  %1409 = vst.msk [vmem:[#allocation3 + $0x171] sm:$0xff] %vm545_vm0, %v1391_v18  ;;  %1444 = vst.msk [vmem:[#allocation3 + $0x110] sm:$0xff] %vm545_vm0, %v1427_v8  ;;  %v1514_v37 = vadd.f32 %v1506_v52, %v1498_v14 }
 0x27e   : > { %v1653_v15 = vadd.f32 %v1645_v3, %v1637_v21  ;;  %1839 = vst.msk [vmem:[#allocation4 + $0x100] sm:$0xff] %vm622_vm3, %v1830_v12  ;;  %v1650_v31 = vadd.f32 %v1642_v7, %v1634_v29  ;;  %2399 = vrot.lane.b32.xlu1 %v8130_v39, %s10753_s25  ;;  %v1739_v16 = vadd.f32 %v1522_v11, %v1506_v52  ;;  %v1523_v18 = vld [vmem:[#allocation3 + $0x200] sm:$0xff] }
 0x27f   : > { %v1533_v38 = vadd.f32 %v8121_v19, %v1517_v9  ;;  %2804 = vrot.lane.b32.xlu0 %v8069_v55, %s7222_s17  ;;  %v1530_v59 = vadd.f32 %v1522_v11, %v1514_v37  ;;  %v1952_v28 = vsel %vm545_vm0, %v1903_v6, %v7948_v48  ;;  %v1861_v32 = vadd.f32 %v1642_v7, %v1522_v11 }
 0x280   : > { %v1661_v44 = vmul.f32 0.25, %v1653_v15  ;;  %v1658_v20 = vmul.f32 0.25, %v1650_v31  ;;  %v1423_v58 = vpop.permute.xlu1 %1422  ;;  %v1456_v61 = vpop.permute.xlu0 %1455  ;;  %v1750_v21 = vld [vmem:[#allocation3 + $0x80] sm:$0xff]  ;;  %v1755_v55 = vadd.f32 %v1739_v16, %v1483_v13  ;;  %1961 = vst.msk [vmem:[#allocation4 + $0x71] sm:$0xff] %vm622_vm3, %v1952_v28  ;;  %v1742_v40 = vadd.f32 %v8121_v19, %v1509_v0  ;;  %v2044_v0 = vld [vmem:[#allocation4 + $0x131] sm:$0xff] }
 0x281   : > { %v1491_v42 = vld [vmem:[#allocation3 + $0xe0] sm:$0xff]  ;;  %v1541_v17 = vmul.f32 0.25, %v1533_v38  ;;  %1442 = vst.msk [vmem:[#allocation3 + $0xf0] sm:$0xff] %vm545_vm0, %v1423_v58  ;;  %1475 = vst.msk [vmem:[#allocation3 + $0x61] sm:$0xff] %vm545_vm0, %v1456_v61  ;;  %v1538_v14 = vmul.f32 0.25, %v1530_v59  ;;  %v1864_v12 = vadd.f32 %v1645_v3, %v8121_v19 }
 0x282   : > { %v1710_v27 = vsel %vm545_vm0, %v1661_v44, %v7956_v51  ;;  %v1707_v48 = vsel %vm545_vm0, %v1658_v20, %v7914_v22  ;;  %v1619_v29 = vadd.f32 %v1611_v1, %v1491_v42  ;;  %2279 = vrot.lane.b32.xlu1 %v8142_v24, %s10753_s25  ;;  %v1499_v51 = vadd.f32 %v1491_v42, %v1483_v13 }
 0x283   : > { %1718 = vst.msk [vmem:[#allocation4 + $0x191] sm:$0xff] %vm622_vm3, %v1710_v27  ;;  %1715 = vst.msk [vmem:[#allocation4 + $0x161] sm:$0xff] %vm622_vm3, %v1707_v48  ;;  %v1771_v11 = vadd.f32 %v1755_v55, %v1491_v42  ;;  %v1877_v52 = vadd.f32 %v1861_v32, %v1491_v42  ;;  %3044 = vrot.lane.b32.xlu0 %v8074_v5, %s10753_s25  ;;  %v1589_v8 = vsel %vm545_vm0, %v1541_v17, %v7952_v49  ;;  %v1888_v49 = vld [vmem:[#allocation3 + $0x81] sm:$0xff] }
 0x284   : > { %v1758_v22 = vadd.f32 %v1750_v21, %v1742_v40  ;;  %v1507_v6 = vld [vmem:[#allocation3 + $0x170] sm:$0xff]  ;;  %v1635_v9 = vadd.f32 %v1619_v29, %v1523_v18  ;;  %v1586_v23 = vsel %vm545_vm0, %v1538_v14, %v7910_v35  ;;  %1597 = vst.msk [vmem:[#allocation4 + $0x220] sm:$0xff] %vm622_vm3, %v1589_v8  ;;  %v8175_v35 = vpack.c.bf16 %v2044_v0, %v2044_v0 }
 0x285   : > { %v1643_v15 = vld [vmem:[#allocation3 + $0x171] sm:$0xff]  ;;  %v1779_v13 = vmul.f32 0.25, %v1771_v11  ;;  %v1515_v37 = vadd.f32 %v1507_v6, %v1499_v51  ;;  %1594 = vst.msk [vmem:[#allocation4 + $0x1f0] sm:$0xff] %vm622_vm3, %v1586_v23  ;;  %v1893_v3 = vadd.f32 %v1877_v52, %v1611_v1  ;;  %v1740_v20 = vadd.f32 %v1523_v18, %v1507_v6  ;;  %v2124_v1 = vld [vmem:[#allocation4 + $0x1c1] sm:$0xff] }
 0x286   : > { %v1766_v7 = vld [vmem:[#allocation3 + $0x110] sm:$0xff]  ;;  %v1651_v5 = vadd.f32 %v1643_v15, %v1635_v9  ;;  %2303 = vrot.lane.b32.xlu1 %v8144_v2, %s10755_s26  ;;  %v1862_v44 = vadd.f32 %v1643_v15, %v1523_v18 }
 0x287   : > { %v1774_v31 = vadd.f32 %v1766_v7, %v1758_v22  ;;  %v1880_v38 = vadd.f32 %v1864_v12, %v1766_v7  ;;  %v1828_v19 = vsel %vm545_vm0, %v1779_v13, %v7906_v30  ;;  %2716 = vrot.lane.b32.xlu0 %v8084_v10, %s7230_s0  ;;  %v1531_v16 = vadd.f32 %v1523_v18, %v1515_v37  ;;  %v2062_v7 = vld [vmem:[#allocation4 + $0x40] sm:$0xff]  ;;  %v7062_v23 = vld [vmem:[%s10736_s4 + $0x50] sm:$0xff]  }
 0x288   : > { %1837 = vst.msk [vmem:[#allocation4 + $0xe0] sm:$0xff] %vm622_vm3, %v1828_v19  ;;  %v1659_v59 = vmul.f32 0.25, %v1651_v5  ;;  %v1492_v58 = vld [vmem:[#allocation3 + $0xf0] sm:$0xff]  ;;  %v1484_v61 = vld [vmem:[#allocation3 + $0x60] sm:$0xff]  ;;  %v8255_v37 = vpack.c.bf16 %v2062_v7, %v2062_v7  ;;  %v7064_v5 = vld [vmem:[%s10736_s4 + $0x58] sm:$0xff]  }
 0x289   : > { %v1782_v42 = vmul.f32 0.25, %v1774_v31  ;;  %v1612_v28 = vld [vmem:[#allocation3 + $0x61] sm:$0xff]  ;;  %v1896_v17 = vadd.f32 %v1888_v49, %v1880_v38  ;;  %v1878_v27 = vadd.f32 %v1862_v44, %v1492_v58  ;;  %v1500_v32 = vadd.f32 %v1492_v58, %v1484_v61  ;;  %v7063_v13 = vld [vmem:[%s10736_s4 + $0x10] sm:$0xff]   ;;  %v7065_v31 = vld [vmem:[%s10736_s4 + $0x18] sm:$0xff]  }
 0x28a   : > { %v1620_v30 = vadd.f32 %v1612_v28, %v1492_v58  ;;  %v1708_v21 = vsel %vm545_vm0, %v1659_v59, %v7936_v46  ;;  %v1756_v40 = vadd.f32 %v1740_v20, %v1484_v61  ;;  %2327 = vrot.lane.b32.xlu1 %v8175_v35, %s7230_s0  ;;  %v1901_v46 = vmul.f32 0.25, %v1893_v3  ;;  %10849 = vst [vmem:[#allocation12_spill] sm:$0xff] %v8255_v37  ;;  %v2142_v49 = vld [vmem:[#allocation4 + $0xd1] sm:$0xff]  ;;  %v7066_v19 = vld [vmem:[%s10736_s4 + $0x60] sm:$0xff]  }
 0x28b   : > { %v1831_v55 = vsel %vm545_vm0, %v1782_v42, %v7950_v45  ;;  %1716 = vst.msk [vmem:[#allocation4 + $0x171] sm:$0xff] %vm622_vm3, %v1708_v21  ;;  %v1516_v14 = vadd.f32 %v8100_v63, %v1500_v32  ;;  %v1894_v29 = vadd.f32 %v1878_v27, %v1612_v28  ;;  %2732 = vrot.lane.b32.xlu0 %v8015_v54, %s7231_s18  ;;  %v1539_v51 = vmul.f32 0.25, %v1531_v16  ;;  %v2059_v63 = vld [vmem:[#allocation4 + $0x10] sm:$0xff]  ;;  %v7067_v3 = vld [vmem:[%s10736_s4 + $0x20] sm:$0xff]   ;;  %v7069_v16 = vld [vmem:[%s10736_s4 + $0x28] sm:$0xff]  }
 0x28c   : > { %1840 = vst.msk [vmem:[#allocation4 + $0x110] sm:$0xff] %vm622_vm3, %v1831_v55  ;;  %v1636_v48 = vadd.f32 %v8098_v25, %v1620_v30  ;;  %v1772_v11 = vadd.f32 %v1756_v40, %v1492_v58  ;;  %v8190_v45 = vpack.c.bf16 %v2124_v1, %v2124_v1  ;;  %v1904_v52 = vmul.f32 0.25, %v1896_v17  ;;  %v7070_v59 = vld [vmem:[%s10736_s4 + $0x70] sm:$0xff]   ;;  %v7071_v20 = vld [vmem:[%s10736_s4 + $0xc0] sm:$0xff]   ;;  %v7074_v61 = vld [vmem:[%s10736_s4 + $0x78] sm:$0xff]  }
 0x28d   : > { %v1532_v18 = vadd.f32 %v8098_v25, %v1516_v14  ;;  %v1902_v8 = vmul.f32 0.25, %v1894_v29  ;;  %v1950_v25 = vsel %vm545_vm0, %v1901_v46, %v7921_v60  ;;  %v1587_v9 = vsel %vm545_vm0, %v1539_v51, %v7930_v34  ;;  %v7072_v42 = vld [vmem:[%s10736_s4 + $0x30] sm:$0xff]   ;;  %6714 = vmatprep.subr.bf16.mxu0 %v7071_v20  ;;  %v2094_v58 = vld [vmem:[#allocation4 + $0x41] sm:$0xff]  ;;  %v7076_v17 = vld [vmem:[%s10736_s4 + $0x38] sm:$0xff]  }
 0x28e   : > { %v1652_v0 = vadd.f32 %v8104_v26, %v1636_v48  ;;  %v1780_v12 = vmul.f32 0.25, %v1772_v11  ;;  %2423 = vrot.lane.b32.xlu1 %v8190_v45, %s7231_s18  ;;  %v8203_v26 = vpack.c.bf16 %v2059_v63, %v2059_v63  ;;  %1959 = vst.msk [vmem:[#allocation4 + $0x51] sm:$0xff] %vm622_vm3, %v1950_v25  ;;  %v1953_v15 = vsel %vm545_vm0, %v1904_v52, %v7960_v53  ;;  %v7061_v53 = vld [vmem:[%s10736_s4 + $0x8] sm:$0xff]   ;;  %v2060_v30 = vld [vmem:[#allocation4 + $0x20] sm:$0xff]  ;;  %v7078_v1 = vld [vmem:[%s10736_s4 + $0xd0] sm:$0xff]  }
 0x28f   : > { %v1540_v22 = vmul.f32 0.25, %v1532_v18  ;;  %v1951_v54 = vsel %vm545_vm0, %v1902_v8, %v7944_v43  ;;  %2756 = vrot.lane.b32.xlu0 %v8026_v4, %s7229_s22  ;;  %1595 = vst.msk [vmem:[#allocation4 + $0x200] sm:$0xff] %vm622_vm3, %v1587_v9  ;;  %1962 = vst.msk [vmem:[#allocation4 + $0x81] sm:$0xff] %vm622_vm3, %v1953_v15  ;;  %v8276_v44 = vpack.c.bf16 %v2142_v49, %v2142_v49  ;;  %v7075_v28 = vld [vmem:[%s10736_s4 + $0xc8] sm:$0xff]   ;;  %v7079_v21 = vld [vmem:[%s10736_s4 + $0x90] sm:$0xff]  }
 0x290   : > { %v1660_v6 = vmul.f32 0.25, %v1652_v0  ;;  %1960 = vst.msk [vmem:[#allocation4 + $0x61] sm:$0xff] %vm622_vm3, %v1951_v54  ;;  %v1829_v43 = vsel %vm545_vm0, %v1780_v12, %v7926_v41  ;;  %v7058_v41 = vld [vmem:[%s10736_s4 + $0x40] sm:$0xff]   ;;  %v7077_v27 = vld [vmem:[%s10736_s4 + $0x88] sm:$0xff]   ;;  %v8319_v32 = vpack.c.bf16 %v2094_v58, %v2094_v58  ;;  %v8330_v55 = vpack.c.bf16 %v2060_v30, %v2060_v30  ;;  %v2076_v40 = vld [vmem:[#allocation4 + $0xb0] sm:$0xff] }
 0x291   : > { %1838 = vst.msk [vmem:[#allocation4 + $0xf0] sm:$0xff] %vm622_vm3, %v1829_v43  ;;  %v1588_v60 = vsel %vm545_vm0, %v1540_v22, %v7940_v36  ;;  %v7059_v36 = vld [vmem:[%s10736_s4] sm:$0xff]   ;;  %6674 = vmatprep.subr.bf16.mxu1 %v7058_v41  ;;  %10850 = vst [vmem:[#allocation13_spill] sm:$0xff] %v8276_v44  ;;  %v7080_v14 = vld [vmem:[%s10736_s4 + $0xd8] sm:$0xff]   ;;  %v2084_v46 = vpack.c.bf16 %v2076_v40, %v2076_v40 }
 0x292   : > { %2666 = vrot.lane.b32.xlu1 %v8142_v24, %s7222_s17  ;;  %v1709_v34 = vsel %vm545_vm0, %v1660_v6, %v7946_v47  ;;  %1596 = vst.msk [vmem:[#allocation4 + $0x210] sm:$0xff] %vm622_vm3, %v1588_v60  ;;  %6675 = vmatpush3.bf16.msra.mxu1 %v7059_v36  ;;  %v7060_v47 = vld [vmem:[%s10736_s4 + $0x48] sm:$0xff]   ;;  %v7081_v48 = vld [vmem:[%s10736_s4 + $0x98] sm:$0xff]   ;;  %v2174_v51 = vld [vmem:[#allocation4 + $0x1d0] sm:$0xff]  ;;  %vm675_vm0 = vcmask 253952  }
 0x293   : > { %2349 = vrot.lane.b32.xlu0 %v8203_v26, %s7231_s18  ;;  %1717 = vst.msk [vmem:[#allocation4 + $0x181] sm:$0xff] %vm622_vm3, %v1709_v34  ;;  %6676 = vmatprep.subr.bf16.mxu1 %v7060_v47  ;;  %v7082_v11 = vld [vmem:[%s10736_s4 + $0xe0] sm:$0xff]   ;;  %v2182_v0 = vpack.c.bf16 %v2174_v51, %v2174_v51  ;;  %v2140_v8 = vld [vmem:[#allocation4 + $0xb1] sm:$0xff]  ;;  %v7084_v63 = vld [vmem:[%s10736_s4 + $0xe8] sm:$0xff]  }
 0x294   : > { %v1997_v12 = vld [vmem:[#allocation4 + $0x21] sm:$0xff]  ;;  %v8369_v25 = vpack.c.bf16 %v2140_v8, %v2140_v8  ;;  %v7086_v43 = vld [vmem:[%s10736_s4 + $0xf0] sm:$0xff]   ;;  %v7089_v7 = vld [vmem:[%s10736_s4 + $0xb8] sm:$0xff]  }
 0x295   : > { %v7085_v22 = vld [vmem:[%s10736_s4 + $0xa8] sm:$0xff]   ;;  %v8371_v9 = vpack.c.bf16 %v1997_v12, %v1997_v12  ;;  %v7087_v60 = vld [vmem:[%s10736_s4 + $0xb0] sm:$0xff]   ;;  %v2013_v47 = vld [vmem:[#allocation4 + $0x140] sm:$0xff] }
 0x296   : > { %2682 = vrot.lane.b32.xlu1 %v8144_v2, %s10753_s25  ;;  %6677 = vmatpush3.bf16.msra.mxu1 %v7061_v53  ;;  %10852 = vst [vmem:[#allocation14_spill] sm:$0xff] %v8369_v25  ;;  %v2190_v15 = vld [vmem:[#allocation4 + $0x141] sm:$0xff]  ;;  %v7088_v53 = vld [vmem:[%s10736_s4 + $0xf8] sm:$0xff]   ;;  %v2176_v58 = vld [vmem:[#allocation4 + $0x1f0] sm:$0xff]  ;;  %s11043_s25 = sshll.u32 %s11045_s24, 6 }
 0x297   : > { %2373 = vrot.lane.b32.xlu0 %v8102_v33, %s7229_s22  ;;  %6678 = vmatprep.subr.bf16.mxu1 %v7062_v23  ;;  %v2198_v36 = vpack.c.bf16 %v2190_v15, %v2190_v15  ;;  %v1986_v40 = vld [vmem:[#allocation4 + $0x100] sm:$0xff]  ;;  %v2002_v51 = vld [vmem:[#allocation4 + $0x71] sm:$0xff] }
 0x298   : > { %v2010_v8 = vpack.c.bf16 %v2002_v51, %v2002_v51  ;;  %v2000_v62 = vld [vmem:[#allocation4 + $0x51] sm:$0xff] }
 0x29a   : > { %2698 = vrot.lane.b32.xlu1 %v8175_v35, %s10755_s26  ;;  %6679 = vmatpush3.bf16.msra.mxu1 %v7063_v13 }
 0x29b   : > { %2776 = vrot.lane.b32.xlu0 %v8144_v2, %s7220_s30  ;;  %v2078_v2 = vld [vmem:[#allocation4 + $0xd0] sm:$0xff]  ;;  %6680 = vmatprep.subr.bf16.mxu1 %v7064_v5 }
 0x29c   : > { %v2086_v38 = vpack.c.bf16 %v2078_v2, %v2078_v2  ;;  %v8400_v2 = vpack.c.bf16 %v2013_v47, %v2013_v47 }
 0x29e   : > { %2818 = vrot.lane.b32.xlu1 %v8190_v45, %s7230_s0  ;;  %6681 = vmatpush3.bf16.msra.mxu1 %v7065_v31 }
 0x29f   : > { %2648 = vrot.lane.b32.xlu0 %v8130_v39, %s7220_s30  ;;  %6682 = vmatprep.subr.bf16.mxu1 %v7066_v19  ;;  %v2206_v19 = vld [vmem:[#allocation4 + $0x1d1] sm:$0xff]  ;;  %v2112_v39 = vld [vmem:[#allocation4 + $0xe1] sm:$0xff] }
 0x2a2   : > { %2355 = vrot.lane.b32.xlu1 %v8255_v37, %s7231_s18  ;;  %6683 = vmatpush3.bf16.msra.mxu1 %v7067_v3 }
 0x2a3   : > { %2800 = vrot.lane.b32.xlu0 %v8175_v35, %s7222_s17  ;;  %v7068_v35 = vld [vmem:[%s10736_s4 + $0x68] sm:$0xff]  }
 0x2a4   : > { %6684 = vmatprep.subr.bf16.mxu1 %v7068_v35 }
 0x2a6   : > { %2379 = vrot.lane.b32.xlu1 %v2086_v38, %s7229_s22  ;;  %6685 = vmatpush3.bf16.msra.mxu1 %v7069_v16  ;;  %v2214_v16 = vpack.c.bf16 %v2206_v19, %v2206_v19 }
 0x2a7   : > { %2712 = vrot.lane.b32.xlu0 %v8203_v26, %s7230_s0  ;;  %6686 = vmatprep.subr.bf16.mxu1 %v7070_v59  ;;  %v2192_v59 = vld [vmem:[#allocation4 + $0x161] sm:$0xff] }
 0x2aa   : > { %2654 = vrot.lane.b32.xlu1 %v8276_v44, %s7220_s30  ;;  %6687 = vmatpush3.bf16.msra.mxu1 %v7072_v42 }
 0x2ab   : > { %2728 = vrot.lane.b32.xlu0 %v8102_v33, %s7231_s18  ;;  %v7073_v33 = vld [vmem:[%s10736_s4 + $0x80] sm:$0xff]   ;;  %6688 = vmatprep.subr.bf16.mxu1 %v7074_v61 }
 0x2ac   : > { %6715 = vmatpush3.bf16.msra.mxu0 %v7073_v33  ;;  %v2200_v33 = vpack.c.bf16 %v2192_v59, %v2192_v59 }
 0x2ad   : > { %6716 = vmatprep.subr.bf16.mxu0 %v7075_v28 }
 0x2ae   : > { %2718 = vrot.lane.b32.xlu1 %v8255_v37, %s7230_s0  ;;  %6689 = vmatpush3.bf16.msra.mxu1 %v7076_v17  ;;  %v2184_v17 = vpack.c.bf16 %v2176_v58, %v2176_v58  ;;  %v2050_v58 = vld [vmem:[#allocation4 + $0x191] sm:$0xff] }
 0x2af   : > { %2752 = vrot.lane.b32.xlu0 %v8117_v56, %s7229_s22 }
 0x2b0   : > { %6717 = vmatpush3.bf16.msra.mxu0 %v7077_v27  ;;  %v2208_v27 = vld [vmem:[#allocation4 + $0x1f1] sm:$0xff] }
 0x2b1   : > { %6718 = vmatprep.subr.bf16.mxu0 %v7078_v1 }
 0x2b2   : > { %2734 = vrot.lane.b32.xlu1 %v2086_v38, %s7231_s18 }
 0x2b3   : > { %3040 = vrot.lane.b32.xlu0 %v8190_v45, %s10851_s20  ;;  %v7083_v45 = vld [vmem:[%s10736_s4 + $0xa0] sm:$0xff]  }
 0x2b4   : > { %6719 = vmatpush3.bf16.msra.mxu0 %v7079_v21  ;;  %v2216_v21 = vpack.c.bf16 %v2208_v27, %v2208_v27 }
 0x2b5   : > { %6720 = vmatprep.subr.bf16.mxu0 %v7080_v14 }
 0x2b6   : > { %2758 = vrot.lane.b32.xlu1 %v8319_v32, %s7229_s22 }
 0x2b7   : > { %2237 = vrot.lane.b32.xlu0 %v2086_v38, %s7220_s30 }
 0x2b8   : > { %6721 = vmatpush3.bf16.msra.mxu0 %v7081_v48 }
 0x2b9   : > { %6722 = vmatprep.subr.bf16.mxu0 %v7082_v11  ;;  %v2015_v11 = vld [vmem:[#allocation4 + $0x160] sm:$0xff] }
 0x2ba   : > { %2351 = vrot.lane.b32.xlu1 %v8330_v55, %s7231_s18  ;;  %v8457_v12 = vpack.c.bf16 %v2015_v11, %v2015_v11  ;;  %v2130_v11 = vld [vmem:[#allocation4 + $0x221] sm:$0xff] }
 0x2bb   : > { %2261 = vrot.lane.b32.xlu0 %v8319_v32, %s7222_s17  ;;  %v8342_v29 = vpop.permute.xlu1 %2235 }
 0x2bc   : > { %6723 = vmatpush3.bf16.msra.mxu0 %v7083_v45  ;;  %10861 = vst [vmem:[#allocation22_spill] sm:$0xff] %v8457_v12 }
 0x2bd   : > { %6724 = vmatprep.subr.bf16.mxu0 %v7084_v63  ;;  %v2114_v63 = vld [vmem:[#allocation4 + $0x101] sm:$0xff] }
 0x2be   : > { %2375 = vrot.lane.b32.xlu1 %v2084_v46, %s7229_s22  ;;  %v8464_v15 = vpack.c.bf16 %v2114_v63, %v2114_v63  ;;  %v8501_v63 = vpack.c.bf16 %v2130_v11, %v2130_v11 }
 0x2bf   : > { %2405 = vrot.lane.b32.xlu0 %v8276_v44, %s10851_s20  ;;  %v8353_v52 = vpop.permute.xlu1 %2259  ;;  %v8519_v44 = vpack.c.bf16 %v2000_v62, %v2000_v62 }
 0x2c0   : > { %v8355_v18 = vpop.permute.xlu0 %2277  ;;  %6725 = vmatpush3.bf16.msra.mxu0 %v7085_v22  ;;  %10862 = vst [vmem:[#allocation23_spill] sm:$0xff] %v8464_v15  ;;  %10870 = vst [vmem:[#allocation31_spill] sm:$0xff] %v8501_v63 }
 0x2c1   : > { %6726 = vmatprep.subr.bf16.mxu0 %v7086_v43 }
 0x2c2   : > { %2778 = vrot.lane.b32.xlu1 %v2182_v0, %s7220_s30 }
 0x2c3   : > { %2233 = vrot.lane.b32.xlu0 %v2084_v46, %s7220_s30  ;;  %v8365_v6 = vpop.permute.xlu1 %2403 }
 0x2c4   : > { %v8367_v54 = vpop.permute.xlu0 %2325  ;;  %6727 = vmatpush3.bf16.msra.mxu0 %v7087_v60  ;;  %v2018_v60 = vld [vmem:[#allocation4 + $0x190] sm:$0xff] }
 0x2c5   : > { %6728 = vmatprep.subr.bf16.mxu0 %v7088_v53  ;;  %v8473_v47 = vpack.c.bf16 %v2018_v60, %v2018_v60 }
 0x2c6   : > { %2650 = vrot.lane.b32.xlu1 %v8369_v25, %s7220_s30 }
 0x2c7   : > { %2257 = vrot.lane.b32.xlu0 %v8371_v9, %s7222_s17  ;;  %v8383_v34 = vpop.permute.xlu1 %2283  ;;  %10864 = vst [vmem:[#allocation25_spill] sm:$0xff] %v8473_v47 }
 0x2c8   : > { %v8385_v41 = vpop.permute.xlu0 %2664  ;;  %6729 = vmatpush3.bf16.msra.mxu0 %v7089_v7  ;;  %v2034_v7 = vld [vmem:[#allocation4 + $0x220] sm:$0xff] }
 0x2ca   : > { %2802 = vrot.lane.b32.xlu1 %v2198_v36, %s7222_s17 }
 0x2cb   : > { %2401 = vrot.lane.b32.xlu0 %v8369_v25, %s10851_s20  ;;  %v8396_v23 = vpop.permute.xlu1 %2307 }
 0x2cc   : > { %v8398_v13 = vpop.permute.xlu0 %2696 }
 0x2ce   : > { %2714 = vrot.lane.b32.xlu1 %v8330_v55, %s7230_s0 }
 0x2cf   : > { %2281 = vrot.lane.b32.xlu0 %v8400_v2, %s10851_s20  ;;  %v8406_v5 = vpop.permute.xlu1 %2331 }
 0x2d0   : > { %v8408_v31 = vpop.permute.xlu0 %2301 }
 0x2d2   : > { %2730 = vrot.lane.b32.xlu1 %v2084_v46, %s7231_s18  ;;  %v8448_v46 = vpack.c.bf16 %v1986_v40, %v1986_v40  ;;  %v8492_v40 = vpack.c.bf16 %v2050_v58, %v2050_v58 }
 0x2d3   : > { %2305 = vrot.lane.b32.xlu0 %v2182_v0, %s10853_s27  ;;  %v8412_v38 = vpop.permute.xlu1 %2427 }
 0x2d4   : > { %v8414_v49 = vpop.permute.xlu0 %2421  ;;  %10859 = vst [vmem:[#allocation20_spill] sm:$0xff] %v8448_v46  ;;  %10868 = vst [vmem:[#allocation29_spill] sm:$0xff] %v8492_v40 }
 0x2d6   : > { %2754 = vrot.lane.b32.xlu1 %v8371_v9, %s7229_s22 }
 0x2d7   : > { %2329 = vrot.lane.b32.xlu0 %v2198_v36, %s7230_s0  ;;  %v8419_v3 = vpop.permute.xlu1 %2670 }
 0x2d8   : > { %10854 = vst [vmem:[#allocation15_spill] sm:$0xff] %v8419_v3  ;;  %v8421_v35 = vpop.permute.xlu0 %2680  ;;  %v2561_v3 = vsel %vm622_vm3, %v8117_v56, %v7954_v50 }
 0x2da   : > { %3042 = vrot.lane.b32.xlu1 %v2214_v16, %s10851_s20 }
 0x2db   : > { %2425 = vrot.lane.b32.xlu0 %v2214_v16, %s7231_s18  ;;  %v8425_v20 = vpop.permute.xlu1 %2686 }
 0x2dc   : > { %10855 = vst [vmem:[#allocation16_spill] sm:$0xff] %v8425_v20  ;;  %v8427_v42 = vpop.permute.xlu0 %2816 }
 0x2de   : > { %2806 = vrot.lane.b32.xlu1 %v2200_v33, %s7222_s17 }
 0x2df   : > { %2668 = vrot.lane.b32.xlu0 %v8400_v2, %s7222_s17  ;;  %v8432_v61 = vpop.permute.xlu1 %2702 }
 0x2e0   : > { %10856 = vst [vmem:[#allocation17_spill] sm:$0xff] %v8432_v61  ;;  %v8434_v28 = vpop.permute.xlu0 %2353  ;;  %v2128_v61 = vld [vmem:[#allocation4 + $0x201] sm:$0xff] }
 0x2e2   : > { %2782 = vrot.lane.b32.xlu1 %v2184_v17, %s7220_s30 }
 0x2e3   : > { %2684 = vrot.lane.b32.xlu0 %v2182_v0, %s10851_s20  ;;  %v8438_v30 = vpop.permute.xlu1 %2822 }
 0x2e4   : > { %10857 = vst [vmem:[#allocation18_spill] sm:$0xff] %v8438_v30  ;;  %v8440_v1 = vpop.permute.xlu0 %2377  ;;  %v2048_v30 = vld [vmem:[#allocation4 + $0x171] sm:$0xff] }
 0x2e5   : > { %v2056_v57 = vpack.c.bf16 %v2048_v30, %v2048_v30  ;;  %v1963_v30 = vld [vmem:[#allocation4] sm:$0xff] }
 0x2e6   : > { %3046 = vrot.lane.b32.xlu1 %v2216_v21, %s10851_s20 }
 0x2e7   : > { %2700 = vrot.lane.b32.xlu0 %v2198_v36, %s10853_s27  ;;  %v8444_v14 = vpop.permute.xlu1 %2231 }
 0x2e8   : > { %v8446_v48 = vpop.permute.xlu0 %2780 }
 0x2e9   : > { %10858 = vst [vmem:[#allocation19_spill] sm:$0xff] %v8446_v48 }
 0x2ea   : > { %2243 = vrot.lane.b32.xlu1 %v8448_v46, %s7220_s30 }
 0x2eb   : > { %2820 = vrot.lane.b32.xlu0 %v2214_v16, %s7230_s0  ;;  %v8483_v16 = vpack.c.bf16 %v2034_v7, %v2034_v7  ;;  %v1984_v7 = vld [vmem:[#allocation4 + $0xe0] sm:$0xff] }
 0x2ec   : > { %v8453_v45 = vpop.permute.xlu1 %2255  ;;  %v8455_v0 = vpop.permute.xlu0 %2652  ;;  %v8510_v58 = vpack.c.bf16 %v1984_v7, %v1984_v7  ;;  %v2065_v7 = vld [vmem:[#allocation4 + $0x70] sm:$0xff] }
 0x2ed   : > { %10860 = vst [vmem:[#allocation21_spill] sm:$0xff] %v8455_v0  ;;  %10866 = vst [vmem:[#allocation27_spill] sm:$0xff] %v8483_v16  ;;  %v1971_v0 = vpack.c.bf16 %v1963_v30, %v1963_v30 }
 0x2ee   : > { %2267 = vrot.lane.b32.xlu1 %v2010_v8, %s7222_s17 }
 0x2ef   : > { %2285 = vrot.lane.b32.xlu0 %v8457_v12, %s10851_s20 }
 0x2f0   : > { %v8462_v22 = vpop.permute.xlu1 %2399 }
 0x2f1   : > { %v8466_v43 = vpop.permute.xlu0 %2804 }
 0x2f2   : > { %10863 = vst [vmem:[#allocation24_spill] sm:$0xff] %v8466_v43  ;;  %2411 = vrot.lane.b32.xlu1 %v8464_v15, %s10851_s20 }
 0x2f3   : > { %2333 = vrot.lane.b32.xlu0 %v2200_v33, %s7230_s0 }
 0x2f4   : > { %v8471_v36 = vpop.permute.xlu1 %2279 }
 0x2f5   : > { %v8475_v53 = vpop.permute.xlu0 %3044 }
 0x2f6   : > { %10865 = vst [vmem:[#allocation26_spill] sm:$0xff] %v8475_v53  ;;  %2291 = vrot.lane.b32.xlu1 %v8473_v47, %s10851_s20 }
 0x2f7   : > { %2672 = vrot.lane.b32.xlu0 %v8457_v12, %s7222_s17 }
 0x2f8   : > { %v8481_v19 = vpop.permute.xlu1 %2303 }
 0x2f9   : > { %v8485_v59 = vpop.permute.xlu0 %2716 }
 0x2fa   : > { %10867 = vst [vmem:[#allocation28_spill] sm:$0xff] %v8485_v59  ;;  %2315 = vrot.lane.b32.xlu1 %v8483_v16, %s10853_s27 }
 0x2fb   : > { %2704 = vrot.lane.b32.xlu0 %v2200_v33, %s10853_s27 }
 0x2fc   : > { %v8490_v27 = vpop.permute.xlu1 %2327 }
 0x2fd   : > { %v8494_v51 = vpop.permute.xlu0 %2732 }
 0x2fe   : > { %10869 = vst [vmem:[#allocation30_spill] sm:$0xff] %v8494_v51  ;;  %2339 = vrot.lane.b32.xlu1 %v8492_v40, %s7230_s0  ;;  %v2032_v40 = vld [vmem:[#allocation4 + $0x200] sm:$0xff] }
 0x2ff   : > { %2309 = vrot.lane.b32.xlu0 %v2184_v17, %s10853_s27  ;;  %v2040_v59 = vpack.c.bf16 %v2032_v40, %v2032_v40 }
 0x300   : > { %v8499_v8 = vpop.permute.xlu1 %2423 }
 0x301   : > { %v8503_v60 = vpop.permute.xlu0 %2756 }
 0x302   : > { %10871 = vst [vmem:[#allocation32_spill] sm:$0xff] %v8503_v60  ;;  %2435 = vrot.lane.b32.xlu1 %v8501_v63, %s7231_s18  ;;  %v8528_v63 = vpack.c.bf16 %v2112_v39, %v2112_v39  ;;  %v2016_v60 = vld [vmem:[#allocation4 + $0x170] sm:$0xff] }
 0x303   : > { %2429 = vrot.lane.b32.xlu0 %v2216_v21, %s7231_s18  ;;  %v8540_v51 = vpack.c.bf16 %v2016_v60, %v2016_v60  ;;  %v2063_v39 = vld [vmem:[#allocation4 + $0x50] sm:$0xff] }
 0x304   : > { %v8508_v33 = vpop.permute.xlu1 %2666  ;;  %10872 = vst [vmem:[#allocation33_spill] sm:$0xff] %v8528_v63 }
 0x305   : > { %v8512_v53 = vpop.permute.xlu0 %2349  ;;  %10874 = vst [vmem:[#allocation35_spill] sm:$0xff] %v8540_v51 }
 0x306   : > { %2239 = vrot.lane.b32.xlu1 %v8510_v58, %s7220_s30 }
 0x307   : > { %2688 = vrot.lane.b32.xlu0 %v2184_v17, %s10851_s20  ;;  %v8532_v17 = vpack.c.bf16 %v2065_v7, %v2065_v7 }
 0x308   : > { %v8517_v11 = vpop.permute.xlu1 %2682 }
 0x309   : > { %v8521_v25 = vpop.permute.xlu0 %2373  ;;  %10873 = vst [vmem:[#allocation34_spill] sm:$0xff] %v8532_v17 }
 0x30a   : > { %2263 = vrot.lane.b32.xlu1 %v8519_v44, %s7222_s17 }
 0x30b   : > { %2824 = vrot.lane.b32.xlu0 %v2216_v21, %s7230_s0 }
 0x30c   : > { %v8526_v37 = vpop.permute.xlu1 %2698 }
 0x30d   : > { %v8530_v47 = vpop.permute.xlu0 %2776 }
 0x30e   : > { %2407 = vrot.lane.b32.xlu1 %v8528_v63, %s10851_s20 }
 0x30f   : > { %2361 = vrot.lane.b32.xlu0 %v8532_v17, %s7231_s18  ;;  %v8552_v17 = vpack.c.bf16 %v2063_v39, %v2063_v39  ;;  %v8566_v39 = vpack.c.bf16 %v2128_v61, %v2128_v61 }
 0x310   : > { %v8538_v62 = vpop.permute.xlu1 %2818 }
 0x311   : > { %v8542_v21 = vpop.permute.xlu0 %2648 }
 0x312   : > { %2287 = vrot.lane.b32.xlu1 %v8540_v51, %s10851_s20 }
 0x313   : > { %2385 = vrot.lane.b32.xlu0 %v8448_v46, %s7229_s22 }
 0x314   : > { %v8548_v7 = vpop.permute.xlu1 %2355 }
 0x315   : > { %v8550_v43 = vpop.permute.xlu0 %2800 }
 0x316   : > { %2311 = vrot.lane.b32.xlu1 %v2040_v59, %s10853_s27 }
 0x317   : > { %2357 = vrot.lane.b32.xlu0 %v8552_v17, %s7231_s18 }
 0x318   : > { %v8557_v60 = vpop.permute.xlu1 %2379 }
 0x319   : > { %v8559_v48 = vpop.permute.xlu0 %2712 }
 0x31a   : > { %2335 = vrot.lane.b32.xlu1 %v2056_v57, %s7230_s0 }
 0x31b   : > { %2381 = vrot.lane.b32.xlu0 %v8510_v58, %s7229_s22 }
 0x31c   : > { %v8564_v40 = vpop.permute.xlu1 %2654 }
 0x31d   : > { %v8568_v46 = vpop.permute.xlu0 %2728 }
 0x31e   : > { %2431 = vrot.lane.b32.xlu1 %v8566_v39, %s7231_s18 }
 0x31f   : > { %2784 = vrot.lane.b32.xlu0 %v2040_v59, %s7220_s30 }
 0x320   : > { %v8573_v15 = vpop.permute.xlu1 %2718 }
 0x321   : > { %10875 = vst [vmem:[#allocation36_spill] sm:$0xff] %v8573_v15  ;;  %v8575_v20 = vpop.permute.xlu0 %2752  ;;  %v2439_v15 = vsel %vm622_vm3, %v1971_v0, %v7954_v50  ;;  %v2563_v0 = vsel %vm622_vm3, %v8371_v9, %v8444_v14 }
 0x322   : > { %2674 = vrot.lane.b32.xlu1 %v8540_v51, %s7222_s17  ;;  %v10878_v51 = vld [vmem:[#allocation7_spill] sm:$0xff] }
 0x323   : > { %2656 = vrot.lane.b32.xlu0 %v8528_v63, %s7220_s30  ;;  %v2576_v30 = vsel %vm673_vm4, %v2561_v3, %v10878_v51  ;;  %v2442_v3 = vsel %vm622_vm3, %v8203_v26, %v8444_v14  ;;  %v2577_v26 = vsel %vm673_vm4, %v2563_v0, %v8453_v45 }
 0x324   : > { %v8581_v61 = vpop.permute.xlu1 %2734  ;;  %v2587_v14 = vsel %vm1168_vm9, %v2577_v26, %v8462_v22  ;;  %v7090_v22 = vld [vmem:[%s10736_s4 + $0x100] sm:$0xff]  }
 0x325   : > { %10876 = vst [vmem:[#allocation37_spill] sm:$0xff] %v8581_v61  ;;  %v8586_v12 = vpop.permute.xlu0 %3040  ;;  %v2462_v61 = vsel %vm673_vm4, %v2439_v15, %v10878_v51  ;;  %v2066_v15 = vld [vmem:[#allocation4 + $0x80] sm:$0xff]  ;;  %6964 = vmatprep.subr.bf16.mxu1 %v7090_v22 }
 0x326   : > { %10877 = vst [vmem:[#allocation38_spill] sm:$0xff] %v8586_v12  ;;  %2690 = vrot.lane.b32.xlu1 %v2040_v59, %s10851_s20  ;;  %v2478_v59 = vsel %vm1168_vm9, %v2462_v61, %v8355_v18  ;;  %v10879_v12 = vld [vmem:[#allocation8_spill] sm:$0xff] }
 0x327   : > { %2808 = vrot.lane.b32.xlu0 %v2056_v57, %s7222_s17  ;;  %v2585_v50 = vsel %vm1168_vm9, %v2576_v30, %v10879_v12  ;;  %v2464_v12 = vsel %vm673_vm4, %v2442_v3, %v8453_v45  ;;  %v8633_v45 = vpack.c.bf16 %v2066_v15, %v2066_v15 }
 0x328   : > { %v8594_v16 = vpop.permute.xlu1 %2758  ;;  %v2600_v18 = vsel %vm1202_vm11, %v2585_v50, %v8408_v31  ;;  %v2480_v61 = vsel %vm1168_vm9, %v2464_v12, %v8471_v36 }
 0x329   : > { %v8596_v63 = vpop.permute.xlu0 %2237  ;;  %v2608_v36 = vsel %vm2509_vm13, %v2600_v18, %v8367_v54 }
 0x32a   : > { %2706 = vrot.lane.b32.xlu1 %v2056_v57, %s10853_s27  ;;  %v2494_v57 = vsel %vm1202_vm11, %v2478_v59, %v8408_v31  ;;  %v2496_v59 = vsel %vm1202_vm11, %v2480_v61, %v8481_v19  ;;  %v2601_v31 = vsel %vm1202_vm11, %v2587_v14, %v8481_v19  ;;  %v2617_v0 = vsel %vm2526_vm14, %v2608_v36, %v8414_v49  ;;  %v1985_v14 = vld [vmem:[#allocation4 + $0xf0] sm:$0xff]  ;;  %v2064_v36 = vld [vmem:[#allocation4 + $0x60] sm:$0xff] }
 0x32b   : > { %2720 = vrot.lane.b32.xlu0 %v8552_v17, %s7230_s0  ;;  %v2513_v50 = vsel %vm2509_vm13, %v2496_v59, %v8490_v27  ;;  %v2609_v3 = vsel %vm2509_vm13, %v2601_v31, %v8490_v27  ;;  %v2511_v19 = vsel %vm2509_vm13, %v2494_v57, %v8367_v54  ;;  %v2632_v49 = vsel %vm2543_vm15, %v2617_v0, %v8521_v25 }
 0x32c   : > { %v2352_v51 = vpop.permute.xlu1 %2351  ;;  %v2619_v15 = vsel %vm2526_vm14, %v2609_v3, %v8499_v8  ;;  %v2528_v18 = vsel %vm2526_vm14, %v2511_v19, %v8512_v53  ;;  %v2082_v8 = vld [vmem:[#allocation4 + $0x110] sm:$0xff]  ;;  %v7091_v3 = vld [vmem:[%s10736_s4 + $0x108] sm:$0xff]   ;;  %v8682_v0 = vpack.c.bf16 %v2064_v36, %v2064_v36 }
 0x32d   : > { %v8625_v30 = vpop.permute.xlu0 %2261  ;;  %v2530_v12 = vsel %vm2526_vm14, %v2513_v50, %v2352_v51  ;;  %v2545_v27 = vsel %vm2543_vm15, %v2528_v18, %v8521_v25  ;;  %v8669_v59 = vpack.c.bf16 %v2082_v8, %v2082_v8  ;;  %v8673_v25 = vpack.c.bf16 %v1985_v14, %v1985_v14  ;;  %v2001_v50 = vld [vmem:[#allocation4 + $0x61] sm:$0xff] }
 0x32e   : > { %2826 = vrot.lane.b32.xlu1 %v8566_v39, %s7230_s0  ;;  %v8686_v18 = vpack.c.bf16 %v2001_v50, %v2001_v50 }
 0x32f   : > { %2736 = vrot.lane.b32.xlu0 %v8510_v58, %s7231_s18 }
 0x330   : > { %v2376_v26 = vpop.permute.xlu1 %2375 }
 0x331   : > { %v2547_v54 = vsel %vm2543_vm15, %v2530_v12, %v2376_v26  ;;  %v8658_v57 = vpop.permute.xlu0 %2405  ;;  %v2633_v58 = vsel %vm2543_vm15, %v2619_v15, %v2376_v26  ;;  %v2113_v12 = vld [vmem:[#allocation4 + $0xf1] sm:$0xff]  ;;  %v2833_v26 = vsel %vm622_vm3, %v8117_v56, %v8542_v21 }
 0x332   : > { %2363 = vrot.lane.b32.xlu1 %v8633_v45, %s7231_s18  ;;  %v6471_v53 = vcombine.low %v2632_v49, %v2633_v58  ;;  %v6470_v51 = vcombine.low %v2545_v27, %v2547_v54  ;;  %v8709_v8 = vpack.c.bf16 %v2113_v12, %v2113_v12  ;;  %v2178_v56 = vld [vmem:[#allocation4 + $0x210] sm:$0xff]  ;;  %v2849_v21 = vsel %vm673_vm4, %v2833_v26, %v8385_v41 }
 0x333   : > { %2760 = vrot.lane.b32.xlu0 %v8519_v44, %s7229_s22  ;;  %v8726_v36 = vpack.c.bf16 %v2178_v56, %v2178_v56  ;;  %v2865_v50 = vsel %vm1168_vm9, %v2849_v21, %v8421_v35 }
 0x334   : > { %v8667_v61 = vpop.permute.xlu1 %2778  ;;  %3544 = vmatprep.mubr.bf16.mxu1 %v6471_v53  ;;  %10880 = vst [vmem:[#allocation7_spill] sm:$0xff] %v8709_v8 }
 0x335   : > { %v8671_v31 = vpop.permute.xlu0 %2233  ;;  %3545 = vmatmul.mubr.bf16.vlgmr.msra.gmra.mrb[0].mxu1 %v6470_v51  ;;  %v2949_v49 = vsel %vm622_vm3, %v8400_v2, %v8667_v61  ;;  %v2017_v51 = vld [vmem:[#allocation4 + $0x180] sm:$0xff] }
 0x336   : > { %2387 = vrot.lane.b32.xlu1 %v8669_v59, %s7229_s22  ;;  %6965 = vmatpush3.bf16.msra.mxu1 %v7090_v22  ;;  %v2946_v22 = vsel %vm622_vm3, %v8142_v24, %v8530_v47  ;;  %v8732_v12 = vpack.c.bf16 %v2017_v51, %v2017_v51 }
 0x337   : > { %2241 = vrot.lane.b32.xlu0 %v8673_v25, %s7220_s30  ;;  %6966 = vmatprep.subr.bf16.mxu1 %v7091_v3  ;;  %v2969_v27 = vsel %vm673_vm4, %v2946_v22, %v8550_v43  ;;  %v2194_v22 = vld [vmem:[#allocation4 + $0x181] sm:$0xff] }
 0x338   : > { %v2651_v19 = vpop.permute.xlu1 %2650  ;;  %v2984_v2 = vsel %vm1168_vm9, %v2969_v27, %v8421_v35  ;;  %v2567_v35 = vsel %vm622_vm3, %v8319_v32, %v8342_v29  ;;  %v2881_v27 = vsel %vm1202_vm11, %v2865_v50, %v8398_v13  ;;  %v8749_v56 = vpack.c.bf16 %v2194_v22, %v2194_v22 }
 0x339   : > { %v8684_v15 = vpop.permute.xlu0 %2257  ;;  %v2835_v58 = vsel %vm622_vm3, %v8371_v9, %v2651_v19  ;;  %v7092_v9 = vld [vmem:[%s10736_s4 + $0x110] sm:$0xff]   ;;  %v2992_v26 = vsel %vm1202_vm11, %v2984_v2, %v8398_v13  ;;  %v2579_v21 = vsel %vm673_vm4, %v2567_v35, %v8353_v52 }
 0x33a   : > { %2359 = vrot.lane.b32.xlu1 %v8682_v0, %s7231_s18  ;;  %6967 = vmatpush3.bf16.msra.mxu1 %v7091_v3  ;;  %v2851_v41 = vsel %vm673_vm4, %v2835_v58, %v8508_v33  ;;  %v3001_v51 = vsel %vm2509_vm13, %v2992_v26, %v8427_v42  ;;  %v7093_v42 = vld [vmem:[%s10736_s4 + $0x118] sm:$0xff]  }
 0x33b   : > { %2265 = vrot.lane.b32.xlu0 %v8686_v18, %s7222_s17  ;;  %6968 = vmatprep.subr.bf16.mxu1 %v7092_v9  ;;  %v2867_v33 = vsel %vm1168_vm9, %v2851_v41, %v8517_v11 }
 0x33c   : > { %v8700_v54 = vpop.permute.xlu1 %2802 }
 0x33d   : > { %v8707_v24 = vpop.permute.xlu0 %2401  ;;  %v2971_v53 = vsel %vm673_vm4, %v2949_v49, %v8700_v54 }
 0x33e   : > { %2383 = vrot.lane.b32.xlu1 %v8673_v25, %s7229_s22  ;;  %v2985_v3 = vsel %vm1168_vm9, %v2971_v53, %v8517_v11  ;;  %6969 = vmatpush3.bf16.msra.mxu1 %v7092_v9  ;;  %v2448_v11 = vsel %vm622_vm3, %v8084_v10, %v8342_v29  ;;  %v2897_v53 = vsel %vm2509_vm13, %v2881_v27, %v8559_v48 }
 0x33f   : > { %2409 = vrot.lane.b32.xlu0 %v8709_v8, %s10851_s20  ;;  %v2993_v49 = vsel %vm1202_vm11, %v2985_v3, %v8526_v37  ;;  %v2913_v2 = vsel %vm2526_vm14, %v2897_v53, %v8568_v46  ;;  %v3016_v9 = vsel %vm2526_vm14, %v3001_v51, %v8568_v46  ;;  %v2445_v10 = vsel %vm622_vm3, %v8330_v55, %v8671_v31  ;;  %v2129_v53 = vld [vmem:[#allocation4 + $0x211] sm:$0xff] }
 0x340   : > { %v2715_v14 = vpop.permute.xlu1 %2714  ;;  %v2883_v29 = vsel %vm1202_vm11, %v2867_v33, %v8526_v37  ;;  %v2929_v48 = vsel %vm2543_vm15, %v2913_v2, %v8575_v20  ;;  %v2466_v46 = vsel %vm673_vm4, %v2445_v10, %v8684_v15  ;;  %v3003_v55 = vsel %vm2509_vm13, %v2993_v49, %v8538_v62  ;;  %6970 = vmatprep.subr.bf16.mxu1 %v7093_v42 }
 0x341   : > { %v2282_v19 = vpop.permute.xlu0 %2281  ;;  %v2899_v41 = vsel %vm2509_vm13, %v2883_v29, %v2715_v14  ;;  %v3024_v37 = vsel %vm2543_vm15, %v3016_v9, %v8575_v20  ;;  %v2565_v14 = vsel %vm622_vm3, %v8026_v4, %v8671_v31  ;;  %v2468_v31 = vsel %vm673_vm4, %v2448_v11, %v8353_v52 }
 0x342   : > { %2786 = vrot.lane.b32.xlu1 %v8726_v36, %s7220_s30  ;;  %v2482_v50 = vsel %vm1168_vm9, %v2466_v46, %v2282_v19  ;;  %6971 = vmatpush3.bf16.msra.mxu1 %v7093_v42  ;;  %v2578_v20 = vsel %vm673_vm4, %v2565_v14, %v8684_v15  ;;  %v2591_v51 = vsel %vm1168_vm9, %v2579_v21, %v8365_v6 }
 0x343   : > { %2289 = vrot.lane.b32.xlu0 %v8732_v12, %s10851_s20  ;;  %v2589_v2 = vsel %vm1168_vm9, %v2578_v20, %v8707_v24  ;;  %v2484_v9 = vsel %vm1168_vm9, %v2468_v31, %v8383_v34  ;;  %v2603_v10 = vsel %vm1202_vm11, %v2591_v51, %v8396_v23  ;;  %v8821_v29 = vpack.c.bf16 %v2129_v53, %v2129_v53 }
 0x344   : > { %v2731_v58 = vpop.permute.xlu1 %2730  ;;  %v2500_v6 = vsel %vm1202_vm11, %v2484_v9, %v8396_v23  ;;  %v10889_v9 = vld [vmem:[#allocation19_spill] sm:$0xff] }
 0x345   : > { %v2306_v13 = vpop.permute.xlu0 %2305  ;;  %v2915_v3 = vsel %vm2526_vm14, %v2899_v41, %v2731_v58  ;;  %v3017_v22 = vsel %vm2526_vm14, %v3003_v55, %v2731_v58  ;;  %v2517_v34 = vsel %vm2509_vm13, %v2500_v6, %v8406_v5 }
 0x346   : > { %2658 = vrot.lane.b32.xlu1 %v8709_v8, %s7220_s30  ;;  %v2498_v62 = vsel %vm1202_vm11, %v2482_v50, %v2306_v13  ;;  %v2602_v52 = vsel %vm1202_vm11, %v2589_v2, %v2306_v13 }
 0x347   : > { %2313 = vrot.lane.b32.xlu0 %v8726_v36, %s10853_s27 }
 0x348   : > { %v2755_v26 = vpop.permute.xlu1 %2754 }
 0x349   : > { %v2931_v33 = vsel %vm2543_vm15, %v2915_v3, %v2755_v26  ;;  %v3025_v35 = vsel %vm2543_vm15, %v3017_v22, %v2755_v26  ;;  %v2330_v27 = vpop.permute.xlu0 %2329  ;;  %v2180_v3 = vld [vmem:[#allocation4 + $0x230] sm:$0xff] }
 0x34a   : > { %v6472_v19 = vcombine.low %v2929_v48, %v2931_v33  ;;  %v2515_v49 = vsel %vm2509_vm13, %v2498_v62, %v2330_v27  ;;  %2810 = vrot.lane.b32.xlu1 %v8749_v56, %s7222_s17  ;;  %v6473_v58 = vcombine.low %v3024_v37, %v3025_v35  ;;  %v2610_v24 = vsel %vm2509_vm13, %v2602_v52, %v2330_v27  ;;  %v10883_v62 = vld [vmem:[#allocation15_spill] sm:$0xff]  ;;  %v10885_v27 = vld [vmem:[#allocation16_spill] sm:$0xff] }
 0x34b   : > { %v2532_v15 = vsel %vm2526_vm14, %v2515_v49, %v8434_v28  ;;  %2337 = vrot.lane.b32.xlu0 %v8749_v56, %s7230_s0  ;;  %v2611_v28 = vsel %vm2509_vm13, %v2603_v10, %v8406_v5  ;;  %v2534_v48 = vsel %vm2526_vm14, %v2517_v34, %v8548_v7  ;;  %v2839_v7 = vsel %vm622_vm3, %v8319_v32, %v8564_v40  ;;  %v10884_v40 = vld [vmem:[#allocation21_spill] sm:$0xff]  ;;  %v10890_v10 = vld [vmem:[#allocation10_spill] sm:$0xff] }
 0x34c   : > { %v8814_v11 = vpop.permute.xlu1 %3042  ;;  %3609 = vmatprep.mubr.bf16.mxu0 %v6473_v58  ;;  %v2623_v13 = vsel %vm2526_vm14, %v2611_v28, %v8412_v38  ;;  %v2549_v23 = vsel %vm2543_vm15, %v2532_v15, %v8440_v1  ;;  %v2551_v38 = vsel %vm2543_vm15, %v2534_v48, %v8557_v60  ;;  %v2855_v33 = vsel %vm673_vm4, %v2839_v7, %v10883_v62  ;;  %v10887_v58 = vld [vmem:[#allocation17_spill] sm:$0xff]  ;;  %v10891_v28 = vld [vmem:[#allocation18_spill] sm:$0xff]  ;;  %v2196_v48 = vld [vmem:[#allocation4 + $0x1a1] sm:$0xff] }
 0x34d   : > { %v2426_v21 = vpop.permute.xlu0 %2425  ;;  %3610 = vmatmul.mubr.bf16.vlgmr.msra.gmra.mrb[8].mxu0 %v6472_v19  ;;  %v2635_v46 = vsel %vm2543_vm15, %v2623_v13, %v8557_v60  ;;  %v6475_v50 = vcombine.low %v2549_v23, %v2551_v38  ;;  %v10882_v60 = vld [vmem:[#allocation22_spill] sm:$0xff]  ;;  %v2188_v32 = vpack.c.bf16 %v2180_v3, %v2180_v3  ;;  %v2837_v35 = vsel %vm622_vm3, %v8026_v4, %v10884_v40  ;;  %v10886_v19 = vld [vmem:[#allocation23_spill] sm:$0xff]  ;;  %v2146_v4 = vld [vmem:[#allocation4 + $0x111] sm:$0xff] }
 0x34e   : > { %v2621_v42 = vsel %vm2526_vm14, %v2610_v24, %v2426_v21  ;;  %2722 = vrot.lane.b32.xlu1 %v8682_v0, %s7230_s0  ;;  %v2871_v51 = vsel %vm1168_vm9, %v2855_v33, %v10885_v27  ;;  %v2952_v52 = vsel %vm622_vm3, %v10890_v10, %v10889_v9  ;;  %v10892_v21 = vld [vmem:[#allocation24_spill] sm:$0xff]  ;;  %v10894_v23 = vld [vmem:[#allocation29_spill] sm:$0xff]  ;;  %v2204_v33 = vpack.c.bf16 %v2196_v48, %v2196_v48  ;;  %v10902_v48 = vld [vmem:[#allocation34_spill] sm:$0xff] }
 0x34f   : > { %v2634_v5 = vsel %vm2543_vm15, %v2621_v42, %v8440_v1  ;;  %2433 = vrot.lane.b32.xlu0 %v8821_v29, %s7231_s18  ;;  %v10881_v1 = vld [vmem:[#allocation27_spill] sm:$0xff]  ;;  %v2973_v34 = vsel %vm673_vm4, %v2952_v52, %v10892_v21  ;;  %v10893_v13 = vld [vmem:[#allocation28_spill] sm:$0xff]  ;;  %v10900_v52 = vld [vmem:[#allocation25_spill] sm:$0xff] }
 0x350   : > { %v8842_v41 = vpop.permute.xlu1 %2806  ;;  %v6476_v55 = vcombine.low %v2634_v5, %v2635_v46  ;;  %v2887_v46 = vsel %vm1202_vm11, %v2871_v51, %v10887_v58  ;;  %v10899_v40 = vld [vmem:[#allocation32_spill] sm:$0xff] }
 0x351   : > { %v2669_v37 = vpop.permute.xlu0 %2668 }
 0x352   : > { %3552 = vmatprep.mubr.bf16.mxu1 %v6476_v55  ;;  %2738 = vrot.lane.b32.xlu1 %v8673_v25, %s7231_s18  ;;  %v2853_v49 = vsel %vm673_vm4, %v2837_v35, %v2669_v37  ;;  %v8895_v55 = vpack.c.bf16 %v2146_v4, %v2146_v4  ;;  %v10896_v37 = vld [vmem:[#allocation30_spill] sm:$0xff] }
 0x353   : > { %2788 = vrot.lane.b32.xlu0 %v10881_v1, %s7220_s30  ;;  %3553 = vmatmul.mubr.bf16.gmra.mrb[4].mxu1 %v6475_v50 }
 0x354   : > { %v8851_v22 = vpop.permute.xlu1 %2782  ;;  %10895 = vst [vmem:[#allocation27_spill] sm:$0xff] %v8895_v55 }
 0x355   : > { %v2955_v26 = vsel %vm622_vm3, %v10882_v60, %v8851_v22  ;;  %v2685_v14 = vpop.permute.xlu0 %2684  ;;  %v10897_v60 = vld [vmem:[#allocation37_spill] sm:$0xff] }
 0x356   : > { %v2975_v25 = vsel %vm673_vm4, %v2955_v26, %v8842_v41  ;;  %2762 = vrot.lane.b32.xlu1 %v8686_v18, %s7229_s22  ;;  %v2869_v2 = vsel %vm1168_vm9, %v2853_v49, %v2685_v14  ;;  %v2986_v5 = vsel %vm1168_vm9, %v2973_v34, %v2685_v14  ;;  %v10898_v14 = vld [vmem:[#allocation36_spill] sm:$0xff] }
 0x357   : > { %v2987_v20 = vsel %vm1168_vm9, %v2975_v25, %v10885_v27  ;;  %2660 = vrot.lane.b32.xlu0 %v10886_v19, %s7220_s30  ;;  %v2903_v25 = vsel %vm2509_vm13, %v2887_v46, %v10898_v14 }
 0x358   : > { %v2995_v53 = vsel %vm1202_vm11, %v2987_v20, %v10887_v58  ;;  %v8872_v31 = vpop.permute.xlu1 %3046  ;;  %v2919_v27 = vsel %vm2526_vm14, %v2903_v25, %v10897_v60 }
 0x359   : > { %10888 = vst [vmem:[#allocation8_spill] sm:$0xff] %v8872_v31  ;;  %v2701_v15 = vpop.permute.xlu0 %2700  ;;  %v3007_v24 = vsel %vm2509_vm13, %v2995_v53, %v10891_v28  ;;  %v2935_v53 = vsel %vm2543_vm15, %v2919_v27, %v8594_v16 }
 0x35a   : > { %v2885_v6 = vsel %vm1202_vm11, %v2869_v2, %v2701_v15  ;;  %2790 = vrot.lane.b32.xlu1 %v2188_v32, %s7220_s30  ;;  %v2994_v7 = vsel %vm1202_vm11, %v2986_v5, %v2701_v15  ;;  %v3019_v26 = vsel %vm2526_vm14, %v3007_v24, %v10897_v60  ;;  %v10901_v24 = vld [vmem:[#allocation31_spill] sm:$0xff] }
 0x35b   : > { %v2901_v42 = vsel %vm2509_vm13, %v2885_v6, %v10893_v13  ;;  %2812 = vrot.lane.b32.xlu0 %v10894_v23, %s7222_s17  ;;  %v3027_v58 = vsel %vm2543_vm15, %v3019_v26, %v8594_v16  ;;  %v2098_v60 = vld [vmem:[#allocation4 + $0x81] sm:$0xff] }
 0x35c   : > { %v8893_v38 = vpop.permute.xlu1 %2243  ;;  %v2917_v50 = vsel %vm2526_vm14, %v2901_v42, %v10896_v37 }
 0x35d   : > { %v2821_v3 = vpop.permute.xlu0 %2820  ;;  %v2933_v35 = vsel %vm2543_vm15, %v2917_v50, %v10899_v40 }
 0x35e   : > { %v3005_v62 = vsel %vm2509_vm13, %v2994_v7, %v2821_v3  ;;  %2662 = vrot.lane.b32.xlu1 %v8895_v55, %s7220_s30  ;;  %v6477_v15 = vcombine.low %v2933_v35, %v2935_v53  ;;  %v2569_v55 = vsel %vm622_vm3, %v8519_v44, %v8596_v63  ;;  %s543_s30 = scalar_lea.vmem %s10748_s16, %s11043_s25 }
 0x35f   : > { %v3018_v32 = vsel %vm2526_vm14, %v3005_v62, %v10896_v37  ;;  %2676 = vrot.lane.b32.xlu0 %v8732_v12, %s7222_s17  ;;  %v2097_v37 = vld [vmem:[#allocation4 + $0x71] sm:$0xff]  ;;  %v8981_v62 = vpack.c.bf16 %v2098_v60, %v2098_v60  ;;  %v2580_v21 = vsel %vm673_vm4, %v2569_v55, %v8625_v30 }
 0x360   : > { %v8915_v20 = vpop.permute.xlu1 %2267  ;;  %v3026_v49 = vsel %vm2543_vm15, %v3018_v32, %v10899_v40  ;;  %v8971_v7 = vpack.c.bf16 %v2097_v37, %v2097_v37  ;;  %v2593_v31 = vsel %vm1168_vm9, %v2580_v21, %v8658_v57 }
 0x361   : > { %v8923_v51 = vpop.permute.xlu0 %2285  ;;  %v6478_v2 = vcombine.low %v3026_v49, %v3027_v58 }
 0x362   : > { %2814 = vrot.lane.b32.xlu1 %v2204_v33, %s7222_s17 }
 0x363   : > { %2692 = vrot.lane.b32.xlu0 %v8726_v36, %s10851_s20  ;;  %3617 = vmatprep.mubr.bf16.mxu0 %v6478_v2 }
 0x364   : > { %3618 = vmatmul.mubr.bf16.gmra.mrb[12].mxu0 %v6477_v15  ;;  %v8928_v4 = vpop.permute.xlu1 %2411 }
 0x365   : > { %v8930_v10 = vpop.permute.xlu0 %2333 }
 0x366   : > { %2678 = vrot.lane.b32.xlu1 %v10900_v52, %s7222_s17 }
 0x367   : > { %3048 = vrot.lane.b32.xlu0 %v8566_v39, %s10851_s20  ;;  %v2212_v39 = vld [vmem:[#allocation4 + $0x231] sm:$0xff] }
 0x368   : > { %v8936_v16 = vpop.permute.xlu1 %2291 }
 0x369   : > { %v8938_v6 = vpop.permute.xlu0 %2672 }
 0x36a   : > { %2694 = vrot.lane.b32.xlu1 %v10881_v1, %s10851_s20  ;;  %v2220_v1 = vpack.c.bf16 %v2212_v39, %v2212_v39 }
 0x36b   : > { %2708 = vrot.lane.b32.xlu0 %v8749_v56, %s10853_s27 }
 0x36c   : > { %v8944_v36 = vpop.permute.xlu1 %2315 }
 0x36d   : > { %v8946_v28 = vpop.permute.xlu0 %2704 }
 0x36e   : > { %3050 = vrot.lane.b32.xlu1 %v8821_v29, %s10851_s20 }
 0x36f   : > { %3052 = vrot.lane.b32.xlu0 %v10901_v24, %s10851_s20 }
 0x370   : > { %v8952_v34 = vpop.permute.xlu1 %2339 }
 0x371   : > { %v2310_v13 = vpop.permute.xlu0 %2309 }
 0x372   : > { %2710 = vrot.lane.b32.xlu1 %v10894_v23, %s10853_s27  ;;  %v10903_v23 = vld [vmem:[#allocation20_spill] sm:$0xff] }
 0x373   : > { %2828 = vrot.lane.b32.xlu0 %v8821_v29, %s7230_s0 }
 0x374   : > { %v8958_v56 = vpop.permute.xlu1 %2435 }
 0x375   : > { %v2430_v42 = vpop.permute.xlu0 %2429 }
 0x376   : > { %3054 = vrot.lane.b32.xlu1 %v2220_v1, %s10851_s20 }
 0x377   : > { %2724 = vrot.lane.b32.xlu0 %v10902_v48, %s7230_s0 }
 0x378   : > { %v2240_v46 = vpop.permute.xlu1 %2239 }
 0x379   : > { %v8963_v5 = vpop.permute.xlu0 %2688 }
 0x37a   : > { %2830 = vrot.lane.b32.xlu1 %v10901_v24, %s7230_s0 }
 0x37b   : > { %2740 = vrot.lane.b32.xlu0 %v10903_v23, %s7231_s18  ;;  %v10906_v23 = vld [vmem:[#allocation12_spill] sm:$0xff] }
 0x37c   : > { %v2264_v50 = vpop.permute.xlu1 %2263  ;;  %v2451_v60 = vsel %vm622_vm3, %v10906_v23, %v8596_v63  ;;  %v2454_v23 = vsel %vm622_vm3, %v8552_v17, %v2240_v46 }
 0x37d   : > { %v8969_v29 = vpop.permute.xlu0 %2824  ;;  %v2470_v8 = vsel %vm673_vm4, %v2451_v60, %v8625_v30  ;;  %v2472_v60 = vsel %vm673_vm4, %v2454_v23, %v2264_v50 }
 0x37e   : > { %2726 = vrot.lane.b32.xlu1 %v8633_v45, %s7230_s0  ;;  %v2486_v9 = vsel %vm1168_vm9, %v2470_v8, %v8923_v51 }
 0x37f   : > { %2764 = vrot.lane.b32.xlu0 %v8971_v7, %s7229_s22  ;;  %v2502_v63 = vsel %vm1202_vm11, %v2486_v9, %v2310_v13 }
 0x380   : > { %v2408_v3 = vpop.permute.xlu1 %2407 }
 0x381   : > { %v8977_v26 = vpop.permute.xlu0 %2361 }
 0x382   : > { %2742 = vrot.lane.b32.xlu1 %v8669_v59, %s7231_s18 }
 0x384   : > { %v2288_v33 = vpop.permute.xlu1 %2287 }
 0x385   : > { %v8983_v14 = vpop.permute.xlu0 %2385  ;;  %v2488_v21 = vsel %vm1168_vm9, %v2472_v60, %v2288_v33 }
 0x386   : > { %2766 = vrot.lane.b32.xlu1 %v8981_v62, %s7229_s22 }
 0x388   : > { %v2312_v25 = vpop.permute.xlu1 %2311 }
 0x389   : > { %v2358_v45 = vpop.permute.xlu0 %2357  ;;  %v2504_v51 = vsel %vm1202_vm11, %v2488_v21, %v2312_v25 }
 0x38c   : > { %v2336_v32 = vpop.permute.xlu1 %2335 }
 0x38d   : > { %v2382_v40 = vpop.permute.xlu0 %2381  ;;  %v2521_v9 = vsel %vm2509_vm13, %v2504_v51, %v2336_v32 }
 0x390   : > { %v2432_v35 = vpop.permute.xlu1 %2431 }
 0x391   : > { %v8987_v27 = vpop.permute.xlu0 %2784 }
 0x394   : > { %v8989_v49 = vpop.permute.xlu1 %2674 }
 0x395   : > { %v8991_v58 = vpop.permute.xlu0 %2656 }
 0x398   : > { %v8993_v59 = vpop.permute.xlu1 %2690 }
 0x399   : > { %v8995_v53 = vpop.permute.xlu0 %2808 }
 0x39c   : > { %v8997_v2 = vpop.permute.xlu1 %2706 }
 0x39d   : > { %v8999_v15 = vpop.permute.xlu0 %2720 }
 0x3a0   : > { %v9001_v52 = vpop.permute.xlu1 %2826 }
 0x3a1   : > { %v9003_v24 = vpop.permute.xlu0 %2736 }
 0x3a2   : > { %10904 = vst [vmem:[#allocation22_spill] sm:$0xff] %v9003_v24  ;;  %v2604_v24 = vsel %vm1202_vm11, %v2593_v31, %v2310_v13  ;;  %v2519_v31 = vsel %vm2509_vm13, %v2502_v63, %v8930_v10 }
 0x3a4   : > { %v9005_v39 = vpop.permute.xlu1 %2363 }
 0x3a5   : > { %v9007_v1 = vpop.permute.xlu0 %2760 }
 0x3a6   : > { %10905 = vst [vmem:[#allocation15_spill] sm:$0xff] %v9007_v1  ;;  %v2571_v1 = vsel %vm622_vm3, %v8686_v18, %v2240_v46  ;;  %v2612_v46 = vsel %vm2509_vm13, %v2604_v24, %v8930_v10 }
 0x3a7   : > { %v2581_v30 = vsel %vm673_vm4, %v2571_v1, %v2264_v50  ;;  %v2625_v50 = vsel %vm2526_vm14, %v2612_v46, %v2430_v42  ;;  %v2575_v46 = vsel %vm622_vm3, %v8981_v62, %v8893_v38 }
 0x3a8   : > { %v9009_v37 = vpop.permute.xlu1 %2387  ;;  %v2595_v57 = vsel %vm1168_vm9, %v2581_v30, %v2408_v3  ;;  %v2536_v3 = vsel %vm2526_vm14, %v2519_v31, %v2358_v45  ;;  %v2636_v24 = vsel %vm2543_vm15, %v2625_v50, %v2382_v40  ;;  %v10907_v45 = vld [vmem:[#allocation11_spill] sm:$0xff] }
 0x3a9   : > { %v2242_v19 = vpop.permute.xlu0 %2241  ;;  %v2605_v17 = vsel %vm1202_vm11, %v2595_v57, %v2312_v25  ;;  %v2553_v25 = vsel %vm2543_vm15, %v2536_v3, %v2382_v40 }
 0x3aa   : > { %v2613_v13 = vsel %vm2509_vm13, %v2605_v17, %v2336_v32 }
 0x3ab   : > { %v2627_v33 = vsel %vm2526_vm14, %v2613_v13, %v2432_v35  ;;  %v3057_v35 = vsel %vm622_vm3, %v10907_v45, %v8530_v47  ;;  %v2460_v47 = vsel %vm622_vm3, %v10902_v48, %v8893_v38  ;;  %v10910_v48 = vld [vmem:[#allocation35_spill] sm:$0xff] }
 0x3ac   : > { %v2360_v55 = vpop.permute.xlu1 %2359  ;;  %v3072_v51 = vsel %vm673_vm4, %v3057_v35, %v8550_v43  ;;  %v2457_v43 = vsel %vm622_vm3, %v8682_v0, %v2242_v19  ;;  %v2476_v50 = vsel %vm673_vm4, %v2460_v47, %v8915_v20  ;;  %v2841_v0 = vsel %vm622_vm3, %v8519_v44, %v8991_v58 }
 0x3ad   : > { %v2266_v8 = vpop.permute.xlu0 %2265  ;;  %v2538_v1 = vsel %vm2526_vm14, %v2521_v9, %v2360_v55  ;;  %v10908_v55 = vld [vmem:[#allocation14_spill] sm:$0xff]  ;;  %v2492_v38 = vsel %vm1168_vm9, %v2476_v50, %v8936_v16 }
 0x3ae   : > { %v3059_v40 = vsel %vm622_vm3, %v10908_v55, %v8667_v61  ;;  %v2583_v61 = vsel %vm673_vm4, %v2575_v46, %v8915_v20  ;;  %v2474_v3 = vsel %vm673_vm4, %v2457_v43, %v2266_v8  ;;  %v2573_v20 = vsel %vm622_vm3, %v8971_v7, %v2242_v19  ;;  %v10911_v43 = vld [vmem:[#allocation38_spill] sm:$0xff] }
 0x3af   : > { %v3073_v17 = vsel %vm673_vm4, %v3059_v40, %v8700_v54  ;;  %v10909_v54 = vld [vmem:[#allocation13_spill] sm:$0xff]  ;;  %v2582_v58 = vsel %vm673_vm4, %v2573_v20, %v2266_v8 }
 0x3b0   : > { %v2384_v23 = vpop.permute.xlu1 %2383  ;;  %v9068_v9 = vsel %vm1168_vm9, %v3073_v17, %v8814_v11  ;;  %v3063_v13 = vsel %vm622_vm3, %v10909_v54, %v8851_v22  ;;  %v2599_v11 = vsel %vm1168_vm9, %v2583_v61, %v8928_v4  ;;  %v3081_v54 = vsel %vm1168_vm9, %v3072_v51, %v10911_v43  ;;  %v10921_v43 = vld [vmem:[#allocation23_spill] sm:$0xff] }
 0x3b1   : > { %v2555_v60 = vsel %vm2543_vm15, %v2538_v1, %v2384_v23  ;;  %v2637_v10 = vsel %vm2543_vm15, %v2627_v33, %v2384_v23  ;;  %v2410_v63 = vpop.permute.xlu0 %2409  ;;  %v2958_v33 = vsel %vm622_vm3, %v10910_v48, %v8987_v27 }
 0x3b2   : > { %v6481_v30 = vcombine.low %v2636_v24, %v2637_v10  ;;  %v6480_v32 = vcombine.low %v2553_v25, %v2555_v60  ;;  %v2977_v44 = vsel %vm673_vm4, %v2958_v33, %v8995_v53  ;;  %v2508_v60 = vsel %vm1202_vm11, %v2492_v38, %v8944_v36 }
 0x3b3   : > { %v2525_v8 = vsel %vm2509_vm13, %v2508_v60, %v8952_v34  ;;  %v10917_v60 = vld [vmem:[#allocation24_spill] sm:$0xff] }
 0x3b4   : > { %v9051_v57 = vpop.permute.xlu1 %2786  ;;  %3560 = vmatprep.mubr.bf16.mxu1 %v6481_v30  ;;  %v2607_v30 = vsel %vm1202_vm11, %v2599_v11, %v8944_v36  ;;  %v6474_v11 = vcombine.low %v3081_v54, %v9068_v9  ;;  %v10922_v54 = vld [vmem:[#allocation27_spill] sm:$0xff] }
 0x3b5   : > { %v2290_v42 = vpop.permute.xlu0 %2289  ;;  %3561 = vmatmul.mubr.bf16.gmra.mrb[8].mxu1 %v6480_v32  ;;  %v2961_v4 = vsel %vm622_vm3, %v8732_v12, %v9051_v57  ;;  %v2857_v12 = vsel %vm673_vm4, %v2841_v0, %v8938_v6  ;;  %v2615_v6 = vsel %vm2509_vm13, %v2607_v30, %v8952_v34 }
 0x3b6   : > { %v2490_v22 = vsel %vm1168_vm9, %v2474_v3, %v2290_v42  ;;  %v2631_v55 = vsel %vm2526_vm14, %v2615_v6, %v8958_v56 }
 0x3b7   : > { %v2639_v17 = vsel %vm2543_vm15, %v2631_v55, %v9009_v37 }
 0x3b8   : > { %v2659_v21 = vpop.permute.xlu1 %2658 }
 0x3b9   : > { %v2314_v31 = vpop.permute.xlu0 %2313  ;;  %v2843_v16 = vsel %vm622_vm3, %v8686_v18, %v2659_v21  ;;  %v2597_v18 = vsel %vm1168_vm9, %v2582_v58, %v2410_v63  ;;  %v2988_v63 = vsel %vm1168_vm9, %v2977_v44, %v8963_v5  ;;  %v2542_v21 = vsel %vm2526_vm14, %v2525_v8, %v9005_v39  ;;  %v10916_v44 = vld [vmem:[#allocation8_spill] sm:$0xff] }
 0x3ba   : > { %v2506_v23 = vsel %vm1202_vm11, %v2490_v22, %v2314_v31  ;;  %v2859_v32 = vsel %vm673_vm4, %v2843_v16, %v8989_v49  ;;  %v2606_v42 = vsel %vm1202_vm11, %v2597_v18, %v2314_v31  ;;  %v2873_v49 = vsel %vm1168_vm9, %v2857_v12, %v8963_v5  ;;  %v10914_v16 = vld [vmem:[#allocation19_spill] sm:$0xff]  ;;  %v10918_v18 = vld [vmem:[#allocation26_spill] sm:$0xff] }
 0x3bb   : > { %v2875_v46 = vsel %vm1168_vm9, %v2859_v32, %v8993_v59  ;;  %v2996_v5 = vsel %vm1202_vm11, %v2988_v63, %v8946_v28  ;;  %v2559_v31 = vsel %vm2543_vm15, %v2542_v21, %v9009_v37  ;;  %v2889_v3 = vsel %vm1202_vm11, %v2873_v49, %v8946_v28  ;;  %v10919_v49 = vld [vmem:[#allocation33_spill] sm:$0xff] }
 0x3bc   : > { %v9094_v1 = vpop.permute.xlu1 %2810  ;;  %v2891_v37 = vsel %vm1202_vm11, %v2875_v46, %v8997_v2  ;;  %v2905_v38 = vsel %vm2509_vm13, %v2889_v3, %v8999_v15  ;;  %v3009_v51 = vsel %vm2509_vm13, %v2996_v5, %v8969_v29  ;;  %v10913_v29 = vld [vmem:[#allocation15_spill] sm:$0xff] }
 0x3bd   : > { %v2338_v25 = vpop.permute.xlu0 %2337  ;;  %v2979_v24 = vsel %vm673_vm4, %v2961_v4, %v9094_v1 }
 0x3be   : > { %v2523_v19 = vsel %vm2509_vm13, %v2506_v23, %v2338_v25  ;;  %v2614_v36 = vsel %vm2509_vm13, %v2606_v42, %v2338_v25  ;;  %v10915_v23 = vld [vmem:[#allocation9_spill] sm:$0xff] }
 0x3bf   : > { %v2540_v10 = vsel %vm2526_vm14, %v2523_v19, %v8977_v26  ;;  %v2989_v26 = vsel %vm1168_vm9, %v2979_v24, %v8993_v59  ;;  %v3061_v25 = vsel %vm622_vm3, %v10915_v23, %v10914_v16 }
 0x3c0   : > { %v2723_v45 = vpop.permute.xlu1 %2722  ;;  %v2557_v34 = vsel %vm2543_vm15, %v2540_v10, %v8983_v14  ;;  %v2997_v47 = vsel %vm1202_vm11, %v2989_v26, %v8997_v2  ;;  %v3074_v12 = vsel %vm673_vm4, %v3061_v25, %v10917_v60 }
 0x3c1   : > { %v2434_v35 = vpop.permute.xlu0 %2433  ;;  %v6485_v59 = vcombine.low %v2557_v34, %v2559_v31  ;;  %v2907_v48 = vsel %vm2509_vm13, %v2891_v37, %v2723_v45  ;;  %v3011_v9 = vsel %vm2509_vm13, %v2997_v47, %v9001_v52  ;;  %v3085_v10 = vsel %vm1168_vm9, %v3074_v12, %v10918_v18  ;;  %v10920_v34 = vld [vmem:[#allocation7_spill] sm:$0xff] }
 0x3c2   : > { %v2629_v40 = vsel %vm2526_vm14, %v2614_v36, %v2434_v35  ;;  %v3067_v21 = vsel %vm622_vm3, %v10920_v34, %v9051_v57  ;;  %v2163_v37 = vld [vmem:[#allocation4 + $0x1a0] sm:$0xff] }
 0x3c3   : > { %v2638_v56 = vsel %vm2543_vm15, %v2629_v40, %v8983_v14  ;;  %v3075_v14 = vsel %vm673_vm4, %v3063_v13, %v8842_v41  ;;  %v10912_v41 = vld [vmem:[#allocation22_spill] sm:$0xff]  ;;  %v3065_v40 = vsel %vm622_vm3, %v10919_v49, %v8987_v27  ;;  %v3077_v46 = vsel %vm673_vm4, %v3067_v21, %v9094_v1 }
 0x3c4   : > { %v2739_v61 = vpop.permute.xlu1 %2738  ;;  %v6486_v39 = vcombine.low %v2638_v56, %v2639_v17  ;;  %v2921_v13 = vsel %vm2526_vm14, %v2905_v38, %v10912_v41  ;;  %v3020_v28 = vsel %vm2526_vm14, %v3009_v51, %v10912_v41  ;;  %v3087_v58 = vsel %vm1168_vm9, %v3075_v14, %v10916_v44  ;;  %v2162_v41 = vld [vmem:[#allocation4 + $0x190] sm:$0xff] }
 0x3c5   : > { %v9154_v50 = vpop.permute.xlu0 %2788  ;;  %v2923_v2 = vsel %vm2526_vm14, %v2907_v48, %v2739_v61  ;;  %v3021_v33 = vsel %vm2526_vm14, %v3011_v9, %v2739_v61  ;;  %v2937_v0 = vsel %vm2543_vm15, %v2921_v13, %v10913_v29  ;;  %v3028_v52 = vsel %vm2543_vm15, %v3020_v28, %v10913_v29 }
 0x3c6   : > { %3568 = vmatprep.mubr.bf16.mxu1 %v6486_v39  ;;  %v6479_v8 = vcombine.low %v3085_v10, %v3087_v58  ;;  %v3076_v17 = vsel %vm673_vm4, %v3065_v40, %v8995_v53  ;;  %v3069_v57 = vsel %vm622_vm3, %v10921_v43, %v9154_v50  ;;  %v2171_v9 = vpack.c.bf16 %v2163_v37, %v2163_v37 }
 0x3c7   : > { %3569 = vmatmul.mubr.bf16.gmra.mrb[12].mxu1 %v6485_v59 }
 0x3c8   : > { %6972 = vmatprep.mubr.msk.bf16.mxu1 %vm1202_vm11, %v6474_v11  ;;  %v2763_v15 = vpop.permute.xlu1 %2762 }
 0x3c9   : > { %v2939_v22 = vsel %vm2543_vm15, %v2923_v2, %v2763_v15  ;;  %v3029_v20 = vsel %vm2543_vm15, %v3021_v33, %v2763_v15  ;;  %v2661_v4 = vpop.permute.xlu0 %2660  ;;  %v2170_v2 = vpack.c.bf16 %v2162_v41, %v2162_v41 }
 0x3ca   : > { %v6483_v24 = vcombine.low %v3028_v52, %v3029_v20  ;;  %v6482_v19 = vcombine.low %v2937_v0, %v2939_v22  ;;  %v2845_v29 = vsel %vm622_vm3, %v8971_v7, %v2661_v4 }
 0x3cb   : > { %v2964_v15 = vsel %vm622_vm3, %v2170_v2, %v9154_v50 }
 0x3cc   : > { %v2791_v30 = vpop.permute.xlu1 %2790  ;;  %3625 = vmatprep.mubr.bf16.mxu0 %v6483_v24 }
 0x3cd   : > { %v2813_v32 = vpop.permute.xlu0 %2812  ;;  %3626 = vmatmul.mubr.bf16.gmra.mrb[16].mxu0 %v6482_v19  ;;  %v3071_v53 = vsel %vm622_vm3, %v10922_v54, %v2791_v30  ;;  %v2967_v33 = vsel %vm622_vm3, %v2171_v9, %v2791_v30 }
 0x3ce   : > { %v3078_v1 = vsel %vm673_vm4, %v3069_v57, %v2813_v32  ;;  %v2981_v52 = vsel %vm673_vm4, %v2964_v15, %v2813_v32 }
 0x3cf   : > { %6973 = vmatmul.mubr.msk.bf16.vlgmr.msra.gmra.mrb[16].mxu1 %vm1202_vm11, %v6479_v8 }
 0x3d0   : > { %v2663_v42 = vpop.permute.xlu1 %2662 }
 0x3d1   : > { %v2677_v45 = vpop.permute.xlu0 %2676  ;;  %v2847_v0 = vsel %vm622_vm3, %v8981_v62, %v2663_v42 }
 0x3d2   : > { %v2861_v22 = vsel %vm673_vm4, %v2845_v29, %v2677_v45 }
 0x3d4   : > { %v2815_v6 = vpop.permute.xlu1 %2814 }
 0x3d5   : > { %v2693_v63 = vpop.permute.xlu0 %2692  ;;  %v3079_v59 = vsel %vm673_vm4, %v3071_v53, %v2815_v6  ;;  %v2983_v20 = vsel %vm673_vm4, %v2967_v33, %v2815_v6 }
 0x3d6   : > { %v2877_v25 = vsel %vm1168_vm9, %v2861_v22, %v2693_v63  ;;  %v2990_v44 = vsel %vm1168_vm9, %v2981_v52, %v2693_v63 }
 0x3d8   : > { %v2679_v26 = vpop.permute.xlu1 %2678 }
 0x3d9   : > { %v3049_v36 = vpop.permute.xlu0 %3048  ;;  %v2863_v16 = vsel %vm673_vm4, %v2847_v0, %v2679_v26 }
 0x3da   : > { %v3089_v5 = vsel %vm1168_vm9, %v3076_v17, %v3049_v36 }
 0x3dc   : > { %v2695_v35 = vpop.permute.xlu1 %2694 }
 0x3dd   : > { %v2709_v55 = vpop.permute.xlu0 %2708  ;;  %v2879_v50 = vsel %vm1168_vm9, %v2863_v16, %v2695_v35  ;;  %v2991_v7 = vsel %vm1168_vm9, %v2983_v20, %v2695_v35 }
 0x3de   : > { %v2893_v4 = vsel %vm1202_vm11, %v2877_v25, %v2709_v55  ;;  %v2998_v62 = vsel %vm1202_vm11, %v2990_v44, %v2709_v55 }
 0x3e0   : > { %v3051_v56 = vpop.permute.xlu1 %3050 }
 0x3e1   : > { %v3091_v31 = vsel %vm1168_vm9, %v3077_v46, %v3051_v56  ;;  %v3053_v47 = vpop.permute.xlu0 %3052  ;;  %v3875_v56 = vld [vmem:[#allocation5 + $0x90] sm:$0xff] }
 0x3e2   : > { %v6484_v61 = vcombine.low %v3089_v5, %v3091_v31  ;;  %v3093_v14 = vsel %vm1168_vm9, %v3078_v1, %v3053_v47  ;;  %v3883_v5 = vpack.c.bf16 %v3875_v56, %v3875_v56  ;;  %v10923_v31 = vmov 0.0  }
 0x3e3   : > { %676 = vst.msk [vmem:[#allocation5 + $0x8] sm:$0x1] %vm675_vm0, %v10923_v31  ;;  %677 = vst.msk [vmem:[#allocation5] sm:$0x1] %vm675_vm0, %v10923_v31 }
 0x3e4   : > { %v2711_v39 = vpop.permute.xlu1 %2710  ;;  %6976 = vmatprep.mubr.msk.bf16.mxu1 %vm1202_vm11, %v6484_v61  ;;  %678 = vst.msk [vmem:[#allocation5 + $0x10] sm:$0x1] %vm675_vm0, %v10923_v31  ;;  %679 = vst.msk [vmem:[#allocation5 + $0x20] sm:$0x1] %vm675_vm0, %v10923_v31  ;;  %4125 = vrot.lane.b32.xlu0 %v3883_v5, %s7222_s17 }
 0x3e5   : > { %v2829_v27 = vpop.permute.xlu0 %2828  ;;  %v2895_v58 = vsel %vm1202_vm11, %v2879_v50, %v2711_v39  ;;  %v2999_v24 = vsel %vm1202_vm11, %v2991_v7, %v2711_v39  ;;  %680 = vst.msk [vmem:[#allocation5 + $0x30] sm:$0x1] %vm675_vm0, %v10923_v31  ;;  %681 = vst.msk [vmem:[#allocation5 + $0x40] sm:$0x1] %vm675_vm0, %v10923_v31 }
 0x3e6   : > { %v3013_v60 = vsel %vm2509_vm13, %v2998_v62, %v2829_v27  ;;  %682 = vst.msk [vmem:[#allocation5 + $0x50] sm:$0x1] %vm675_vm0, %v10923_v31  ;;  %683 = vst.msk [vmem:[#allocation5 + $0x60] sm:$0x1] %vm675_vm0, %v10923_v31 }
 0x3e7   : > { %684 = vst.msk [vmem:[#allocation5 + $0x70] sm:$0x1] %vm675_vm0, %v10923_v31  ;;  %685 = vst.msk [vmem:[#allocation5 + $0x80] sm:$0x1] %vm675_vm0, %v10923_v31 }
 0x3e8   : > { %v3055_v11 = vpop.permute.xlu1 %3054  ;;  %688 = vst.msk [vmem:[#allocation5 + $0x98] sm:$0x1] %vm675_vm0, %v10923_v31  ;;  %690 = vst.msk [vmem:[#allocation5 + $0xa8] sm:$0x1] %vm675_vm0, %v10923_v31 }
 0x3e9   : > { %v3095_v3 = vsel %vm1168_vm9, %v3079_v59, %v3055_v11  ;;  %v2725_v51 = vpop.permute.xlu0 %2724  ;;  %691 = vst.msk [vmem:[#allocation5 + $0xb8] sm:$0x1] %vm675_vm0, %v10923_v31  ;;  %692 = vst.msk [vmem:[#allocation5 + $0xc8] sm:$0x1] %vm675_vm0, %v10923_v31 }
 0x3ea   : > { %v6489_v38 = vcombine.low %v3093_v14, %v3095_v3  ;;  %v2909_v12 = vsel %vm2509_vm13, %v2893_v4, %v2725_v51  ;;  %693 = vst.msk [vmem:[#allocation5 + $0xd8] sm:$0x1] %vm675_vm0, %v10923_v31  ;;  %694 = vst.msk [vmem:[#allocation5 + $0xe8] sm:$0x1] %vm675_vm0, %v10923_v31  ;;  %v3891_v53 = vld [vmem:[#allocation5 + $0x1] sm:$0xff] }
 0x3eb   : > { %695 = vst.msk [vmem:[#allocation5 + $0xf8] sm:$0x1] %vm675_vm0, %v10923_v31  ;;  %696 = vst.msk [vmem:[#allocation5 + $0x108] sm:$0x1] %vm675_vm0, %v10923_v31  ;;  %v3899_v59 = vpack.c.bf16 %v3891_v53, %v3891_v53 }
 0x3ec   : > { %v2831_v48 = vpop.permute.xlu1 %2830  ;;  %6977 = vmatmul.mubr.msk.bf16.gmra.mrb[20].mxu1 %vm1202_vm11, %v6489_v38  ;;  %697 = vst.msk [vmem:[#allocation5 + $0x118] sm:$0x1] %vm675_vm0, %v10923_v31  ;;  %700 = vst.msk [vmem:[#allocation5 + $0x1a8] sm:$0x1] %vm675_vm0, %v10923_v31 }
 0x3ed   : > { %v2741_v13 = vpop.permute.xlu0 %2740  ;;  %v3015_v18 = vsel %vm2509_vm13, %v2999_v24, %v2831_v48  ;;  %702 = vst.msk [vmem:[#allocation5 + $0x120] sm:$0x1] %vm675_vm0, %v10923_v31  ;;  %703 = vst.msk [vmem:[#allocation5 + $0x130] sm:$0x1] %vm675_vm0, %v10923_v31  ;;  %4149 = vrot.lane.b32.xlu0 %v3899_v59, %s10853_s27 }
 0x3ee   : > { %v2925_v30 = vsel %vm2526_vm14, %v2909_v12, %v2741_v13  ;;  %v3022_v8 = vsel %vm2526_vm14, %v3013_v60, %v2741_v13  ;;  %704 = vst.msk [vmem:[#allocation5 + $0x140] sm:$0x1] %vm675_vm0, %v10923_v31  ;;  %705 = vst.msk [vmem:[#allocation5 + $0x150] sm:$0x1] %vm675_vm0, %v10923_v31 }
 0x3ef   : > { %706 = vst.msk [vmem:[#allocation5 + $0x160] sm:$0x1] %vm675_vm0, %v10923_v31  ;;  %707 = vst.msk [vmem:[#allocation5 + $0x170] sm:$0x1] %vm675_vm0, %v10923_v31 }
 0x3f0   : > { %v2727_v28 = vpop.permute.xlu1 %2726  ;;  %708 = vst.msk [vmem:[#allocation5 + $0x180] sm:$0x1] %vm675_vm0, %v10923_v31  ;;  %709 = vst.msk [vmem:[#allocation5 + $0x190] sm:$0x1] %vm675_vm0, %v10923_v31 }
 0x3f1   : > { %v2765_v19 = vpop.permute.xlu0 %2764  ;;  %v2911_v10 = vsel %vm2509_vm13, %v2895_v58, %v2727_v28  ;;  %710 = vst.msk [vmem:[#allocation5 + $0x1a0] sm:$0x1] %vm675_vm0, %v10923_v31  ;;  %713 = vst.msk [vmem:[#allocation5 + $0x238] sm:$0x1] %vm675_vm0, %v10923_v31 }
 0x3f2   : > { %v2941_v6 = vsel %vm2543_vm15, %v2925_v30, %v2765_v19  ;;  %v3030_v63 = vsel %vm2543_vm15, %v3022_v8, %v2765_v19  ;;  %715 = vst.msk [vmem:[#allocation5 + $0x1b8] sm:$0x1] %vm675_vm0, %v10923_v31  ;;  %716 = vst.msk [vmem:[#allocation5 + $0x1c8] sm:$0x1] %vm675_vm0, %v10923_v31 }
 0x3f3   : > { %717 = vst.msk [vmem:[#allocation5 + $0x1d8] sm:$0x1] %vm675_vm0, %v10923_v31  ;;  %718 = vst.msk [vmem:[#allocation5 + $0x1e8] sm:$0x1] %vm675_vm0, %v10923_v31 }
 0x3f4   : > { %v2743_v23 = vpop.permute.xlu1 %2742  ;;  %719 = vst.msk [vmem:[#allocation5 + $0x1f8] sm:$0x1] %vm675_vm0, %v10923_v31  ;;  %720 = vst.msk [vmem:[#allocation5 + $0x208] sm:$0x1] %vm675_vm0, %v10923_v31 }
 0x3f5   : > { %v2927_v32 = vsel %vm2526_vm14, %v2911_v10, %v2743_v23  ;;  %v3023_v42 = vsel %vm2526_vm14, %v3015_v18, %v2743_v23  ;;  %721 = vst.msk [vmem:[#allocation5 + $0x218] sm:$0x1] %vm675_vm0, %v10923_v31  ;;  %722 = vst.msk [vmem:[#allocation5 + $0x228] sm:$0x1] %vm675_vm0, %v10923_v31  ;;  %v9337_v18 = vld [vmem:[%s10737_s5] ss:$0 sm:$0xff] }
 0x3f6   : > { %689 = vst.msk [vmem:[#allocation5 + $0x98] sm:$0x1] %vm675_vm0, %v10923_v31  ;;  %723 = vst.msk [vmem:[#allocation5 + $0x238] sm:$0x1] %vm675_vm0, %v10923_v31 }
 0x3f8   : > { %v2767_v45 = vpop.permute.xlu1 %2766 }
 0x3f9   : > { %v2943_v26 = vsel %vm2543_vm15, %v2927_v32, %v2767_v45  ;;  %v3031_v36 = vsel %vm2543_vm15, %v3023_v42, %v2767_v45  ;;  %v9342_v42 = vld [vmem:[%s10738_s6] ss:$0 sm:$0xff] }
 0x3fa   : > { %v6488_v35 = vcombine.low %v3030_v63, %v3031_v36  ;;  %v6487_v55 = vcombine.low %v2941_v6, %v2943_v26 }
 0x3fc   : > { %3633 = vmatprep.mubr.bf16.mxu0 %v6488_v35 }
 0x3fd   : > { %3634 = vmatmul.mubr.bf16.gmra.mrb[20].mxu0 %v6487_v55  ;;  %v4003_v48 = vld [vmem:[#allocation5 + $0x91] sm:$0xff] }
 0x3fe   : > { %v4011_v9 = vpack.c.bf16 %v4003_v48, %v4003_v48 }
 0x400   : > { %4269 = vrot.lane.b32.xlu0 %v4011_v9, %s7231_s18 }
 0x408   : > { %v6690_v49 = vpop.f32.mrb[0].mxu1 }
 0x409   : > { %v6691_v40 = vpop.f32.mrb[1].mxu1 }
 0x40a   : > { %v6692_v34 = vadd.f32 %v6691_v40, %v6690_v49  ;;  %v6693_v21 = vpop.f32.mrb[2].mxu1 }
 0x40b   : > { %v6694_v17 = vpop.f32.mrb[3].mxu1 }
 0x40c   : > { %v6695_v46 = vadd.f32 %v6694_v17, %v6693_v21 }
 0x420   : > { %v6730_v47 = vpop.f32.mrb[8].mxu0 }
 0x421   : > { %v6731_v61 = vpop.f32.mrb[9].mxu0 }
 0x422   : > { %v6732_v39 = vadd.f32 %v6731_v61, %v6730_v47  ;;  %v6733_v27 = vpop.f32.mrb[10].mxu0 }
 0x423   : > { %v6734_v43 = vpop.f32.mrb[11].mxu0 }
 0x424   : > { %v6735_v57 = vadd.f32 %v6734_v43, %v6733_v27  ;;  %v3612_v54 = vadd.f32 %v6732_v39, %v6692_v34 }
 0x426   : > { %v6696_v1 = vpop.f32.mrb[4].mxu1  ;;  %v3615_v11 = vadd.f32 %v6735_v57, %v6695_v46 }
 0x427   : > { %v6697_v14 = vpop.f32.mrb[5].mxu1 }
 0x428   : > { %v6698_v3 = vadd.f32 %v6697_v14, %v6696_v1  ;;  %v6699_v37 = vpop.f32.mrb[6].mxu1 }
 0x429   : > { %v6700_v38 = vpop.f32.mrb[7].mxu1 }
 0x42a   : > { %v6701_v51 = vadd.f32 %v6700_v38, %v6699_v37 }
 0x437   : > { %v6736_v41 = vpop.f32.mrb[12].mxu0 }
 0x438   : > { %v6737_v13 = vpop.f32.mrb[13].mxu0 }
 0x439   : > { %v6738_v28 = vadd.f32 %v6737_v13, %v6736_v41  ;;  %v6739_v2 = vpop.f32.mrb[14].mxu0 }
 0x43a   : > { %v6740_v33 = vpop.f32.mrb[15].mxu0 }
 0x43b   : > { %v6741_v15 = vadd.f32 %v6740_v33, %v6739_v2  ;;  %v3620_v29 = vadd.f32 %v6738_v28, %v6698_v3 }
 0x43d   : > { %v3623_v0 = vadd.f32 %v6741_v15, %v6701_v51 }
 0x488   : > { %v6702_v52 = vpop.f32.mrb[8].mxu1 }
 0x489   : > { %v6703_v22 = vpop.f32.mrb[9].mxu1 }
 0x48a   : > { %v6704_v20 = vadd.f32 %v6703_v22, %v6702_v52  ;;  %v6705_v16 = vpop.f32.mrb[10].mxu1 }
 0x48b   : > { %v6706_v23 = vpop.f32.mrb[11].mxu1 }
 0x48c   : > { %v6707_v25 = vadd.f32 %v6706_v23, %v6705_v16 }
 0x49a   : > { %v6708_v44 = vpop.f32.mrb[12].mxu1 }
 0x49b   : > { %v6709_v50 = vpop.f32.mrb[13].mxu1 }
 0x49c   : > { %v9330_v7 = vadd.f32 %v6709_v50, %v6708_v44  ;;  %v6711_v4 = vpop.f32.mrb[14].mxu1 }
 0x49d   : > { %v6712_v62 = vpop.f32.mrb[15].mxu1 }
 0x49e   : > { %v9332_v58 = vadd.f32 %v6712_v62, %v6711_v4 }
 0x4a0   : > { %v6742_v24 = vpop.f32.mrb[16].mxu0 }
 0x4a1   : > { %v6743_v19 = vpop.f32.mrb[17].mxu0 }
 0x4a2   : > { %v6744_v60 = vadd.f32 %v6743_v19, %v6742_v24  ;;  %v6974_v12 = vpop.f32.mrb[16].mxu1  ;;  %v6745_v10 = vpop.f32.mrb[18].mxu0 }
 0x4a3   : > { %v3685_v30 = vadd.f32 %v6974_v12, %v3620_v29  ;;  %v3676_v8 = vpop.f32.mrb[17].mxu1  ;;  %v6746_v32 = vpop.f32.mrb[19].mxu0 }
 0x4a4   : > { %v3677_v45 = vadd.f32 %v3676_v8, %v3612_v54  ;;  %v6747_v6 = vadd.f32 %v6746_v32, %v6745_v10  ;;  %v6975_v63 = vpop.f32.mrb[18].mxu1  ;;  %v3628_v26 = vadd.f32 %v6744_v60, %v6704_v20 }
 0x4a5   : > { %v3716_v36 = vmul.f32 %v9337_v18, %v3685_v30  ;;  %v3688_v35 = vadd.f32 %v6975_v63, %v3623_v0  ;;  %v3679_v55 = vpop.f32.mrb[19].mxu1 }
 0x4a6   : > { %v3714_v49 = vmul.f32 %v9337_v18, %v3677_v45  ;;  %v3680_v40 = vadd.f32 %v3679_v55, %v3615_v11  ;;  %v3631_v34 = vadd.f32 %v6747_v6, %v6707_v25  ;;  %v9419_v45 = vpop.permute.xlu0 %4125 }
 0x4a7   : > { %v3731_v21 = vadd.f32 %v9342_v42, %v3716_v36  ;;  %v3717_v17 = vmul.f32 %v9337_v18, %v3688_v35 }
 0x4a8   : > { %v3729_v46 = vadd.f32 %v9342_v42, %v3714_v49  ;;  %v3715_v56 = vmul.f32 %v9337_v18, %v3680_v40 }
 0x4a9   : > { %v3739_v5 = vmax.f32 %v3731_v21, 0.0  ;;  %v3732_v31 = vadd.f32 %v9342_v42, %v3717_v17 }
 0x4aa   : > { %v3737_v47 = vmax.f32 %v3729_v46, 0.0  ;;  %v3730_v61 = vadd.f32 %v9342_v42, %v3715_v56  ;;  %v9430_v35 = vpop.permute.xlu0 %4149 }
 0x4ab   : > { %3747 = vst.msk [vmem:[#allocation5 + $0x1d0] sm:$0xff] %vm673_vm4, %v3739_v5  ;;  %v3740_v39 = vmax.f32 %v3732_v31, 0.0  ;;  %3830 = vrot.lane.b32.xlu1 %v3739_v5, %s7222_s17  ;;  %3765 = vrot.lane.b32.xlu0 %v3739_v5, %s7231_s18 }
 0x4ac   : > { %3745 = vst.msk [vmem:[#allocation5 + $0x1b0] sm:$0xff] %vm673_vm4, %v3737_v47  ;;  %v3738_v27 = vmax.f32 %v3730_v61, 0.0 }
 0x4ad   : > { %3748 = vst.msk [vmem:[#allocation5 + $0x1e0] sm:$0xff] %vm673_vm4, %v3740_v39 }
 0x4ae   : > { %3746 = vst.msk [vmem:[#allocation5 + $0x1c0] sm:$0xff] %vm673_vm4, %v3738_v27  ;;  %v9440_v21 = vpop.permute.xlu0 %4269 }
 0x4af   : > { %3797 = vrot.lane.b32.xlu0 %v3739_v5, %s10853_s27  ;;  %3826 = vrot.lane.b32.xlu1 %v3737_v47, %s7222_s17 }
 0x4b2   : > { %v4070_v44 = vld [vmem:[#allocation5 + $0x1d0] sm:$0xff] }
 0x4b3   : > { %3767 = vrot.lane.b32.xlu1 %v3740_v39, %s7231_s18  ;;  %3761 = vrot.lane.b32.xlu0 %v3737_v47, %s7231_s18  ;;  %v9390_v50 = vpack.c.bf16 %v4070_v44, %v4070_v44  ;;  %v4019_v60 = vld [vmem:[#allocation5 + $0x1b1] sm:$0xff] }
 0x4b4   : > { %v4022_v62 = vld [vmem:[#allocation5 + $0x1e1] sm:$0xff]  ;;  %v4027_v12 = vpack.c.bf16 %v4019_v60, %v4019_v60  ;;  %v3923_v10 = vld [vmem:[#allocation5 + $0x1b0] sm:$0xff] }
 0x4b5   : > { %v3926_v24 = vld [vmem:[#allocation5 + $0x1e0] sm:$0xff]  ;;  %v9409_v8 = vpack.c.bf16 %v3923_v10, %v3923_v10 }
 0x4b6   : > { %v9402_v19 = vpack.c.bf16 %v3926_v24, %v3926_v24  ;;  %v3924_v32 = vld [vmem:[#allocation5 + $0x1c0] sm:$0xff] }
 0x4b7   : > { %3799 = vrot.lane.b32.xlu1 %v3740_v39, %s10853_s27  ;;  %3793 = vrot.lane.b32.xlu0 %v3737_v47, %s10853_s27  ;;  %v7094_v24 = vld [vmem:[%s10739_s7 + $0xc0] sm:$0xff]  }
 0x4b8   : > { %v7095_v60 = vld [vmem:[%s10739_s7 + $0x80] sm:$0xff]   ;;  %6802 = vmatprep.subr.bf16.mxu1 %v7094_v24  ;;  %v7116_v24 = vld [vmem:[%s10739_s7 + $0x68] sm:$0xff]  }
 0x4b9   : > { %6803 = vmatpush3.bf16.msra.mxu1 %v7095_v60 }
 0x4bb   : > { %3763 = vrot.lane.b32.xlu1 %v3738_v27, %s7231_s18  ;;  %3832 = vrot.lane.b32.xlu0 %v3740_v39, %s7222_s17 }
 0x4bf   : > { %3795 = vrot.lane.b32.xlu1 %v3738_v27, %s10853_s27  ;;  %3828 = vrot.lane.b32.xlu0 %v3738_v27, %s7222_s17  ;;  %v6978_v43 = vpop.f32.mrb[20].mxu1 }
 0x4c0   : > { %v3692_v57 = vpop.f32.mrb[21].mxu1 }
 0x4c1   : > { %v3693_v54 = vadd.f32 %v3692_v57, %v3628_v26  ;;  %v6979_v53 = vpop.f32.mrb[22].mxu1 }
 0x4c2   : > { %v3695_v1 = vpop.f32.mrb[23].mxu1 }
 0x4c3   : > { %v3718_v59 = vmul.f32 %v9337_v18, %v3693_v54  ;;  %v3696_v11 = vadd.f32 %v3695_v1, %v3631_v34 }
 0x4c5   : > { %v3733_v14 = vadd.f32 %v9342_v42, %v3718_v59  ;;  %v3719_v3 = vmul.f32 %v9337_v18, %v3696_v11 }
 0x4c7   : > { %v3741_v37 = vmax.f32 %v3733_v14, 0.0  ;;  %v3734_v38 = vadd.f32 %v9342_v42, %v3719_v3 }
 0x4c9   : > { %3749 = vst.msk [vmem:[#allocation5 + $0x1f0] sm:$0xff] %vm673_vm4, %v3741_v37  ;;  %v3742_v51 = vmax.f32 %v3734_v38, 0.0 }
 0x4cb   : > { %3750 = vst.msk [vmem:[#allocation5 + $0x200] sm:$0xff] %vm673_vm4, %v3742_v51 }
 0x4d0   : > { %v6748_v48 = vpop.f32.mrb[20].mxu0  ;;  %v4072_v6 = vld [vmem:[#allocation5 + $0x1f0] sm:$0xff] }
 0x4d1   : > { %v6749_v9 = vpop.f32.mrb[21].mxu0  ;;  %v9424_v63 = vpack.c.bf16 %v4072_v6, %v4072_v6  ;;  %v4023_v34 = vld [vmem:[#allocation5 + $0x1f1] sm:$0xff]  ;;  %v7098_v6 = vld [vmem:[%s10739_s7 + $0xc8] sm:$0xff]  }
 0x4d2   : > { %v6750_v41 = vadd.f32 %v6749_v9, %v6748_v48  ;;  %v6751_v13 = vpop.f32.mrb[22].mxu0  ;;  %v4024_v40 = vld [vmem:[#allocation5 + $0x201] sm:$0xff]  ;;  %v9444_v46 = vpack.c.bf16 %v4023_v34, %v4023_v34  ;;  %6804 = vmatprep.subr.bf16.mxu1 %v7098_v6 }
 0x4d3   : > { %v6752_v28 = vpop.f32.mrb[23].mxu0  ;;  %10924 = vst [vmem:[#allocation21_spill] sm:$0xff] %v9424_v63  ;;  %v9442_v17 = vpack.c.bf16 %v4024_v40, %v4024_v40  ;;  %v3928_v56 = vld [vmem:[#allocation5 + $0x200] sm:$0xff]  ;;  %v7100_v34 = vld [vmem:[%s10739_s7 + $0x48] sm:$0xff]  }
 0x4d4   : > { %v3636_v2 = vadd.f32 %v6750_v41, %v9330_v7  ;;  %v6753_v33 = vadd.f32 %v6752_v28, %v6751_v13  ;;  %v4021_v7 = vld [vmem:[#allocation5 + $0x1d1] sm:$0xff]  ;;  %v9450_v5 = vpack.c.bf16 %v3928_v56, %v3928_v56 }
 0x4d5   : > { %v4029_v4 = vpack.c.bf16 %v4021_v7, %v4021_v7 }
 0x4d6   : > { %v3701_v15 = vadd.f32 %v6978_v43, %v3636_v2  ;;  %v3639_v29 = vadd.f32 %v6753_v33, %v9332_v58  ;;  %v4030_v58 = vpack.c.bf16 %v4022_v62, %v4022_v62  ;;  %10927 = vst [vmem:[#allocation10_spill] sm:$0xff] %v9450_v5 }
 0x4d8   : > { %v3720_v0 = vmul.f32 %v9337_v18, %v3701_v15  ;;  %v3704_v52 = vadd.f32 %v6979_v53, %v3639_v29 }
 0x4da   : > { %v3721_v22 = vmul.f32 %v9337_v18, %v3704_v52  ;;  %v3735_v20 = vadd.f32 %v9342_v42, %v3720_v0  ;;  %v4020_v18 = vld [vmem:[#allocation5 + $0x1c1] sm:$0xff] }
 0x4db   : > { %v4028_v30 = vpack.c.bf16 %v4020_v18, %v4020_v18 }
 0x4dc   : > { %v3743_v16 = vmax.f32 %v3735_v20, 0.0  ;;  %v3736_v23 = vadd.f32 %v9342_v42, %v3721_v22  ;;  %v9414_v42 = vpack.c.bf16 %v3924_v32, %v3924_v32  ;;  %v7097_v32 = vld [vmem:[%s10739_s7] sm:$0xff]  }
 0x4de   : > { %3838 = vrot.lane.b32.xlu1 %v3743_v16, %s7222_s17  ;;  %3751 = vst.msk [vmem:[#allocation5 + $0x210] sm:$0xff] %vm673_vm4, %v3743_v16  ;;  %3773 = vrot.lane.b32.xlu0 %v3743_v16, %s7231_s18  ;;  %v3744_v25 = vmax.f32 %v3736_v23, 0.0 }
 0x4e0   : > { %3752 = vst.msk [vmem:[#allocation5 + $0x220] sm:$0xff] %vm673_vm4, %v3744_v25 }
 0x4e2   : > { %3834 = vrot.lane.b32.xlu1 %v3741_v37, %s7222_s17  ;;  %3805 = vrot.lane.b32.xlu0 %v3743_v16, %s10853_s27 }
 0x4e5   : > { %v4025_v36 = vld [vmem:[#allocation5 + $0x211] sm:$0xff] }
 0x4e6   : > { %3775 = vrot.lane.b32.xlu1 %v3744_v25, %s7231_s18  ;;  %3769 = vrot.lane.b32.xlu0 %v3741_v37, %s7231_s18  ;;  %v9434_v49 = vpack.c.bf16 %v4025_v36, %v4025_v36 }
 0x4e7   : > { %v4026_v26 = vld [vmem:[#allocation5 + $0x221] sm:$0xff] }
 0x4e8   : > { %v9432_v55 = vpack.c.bf16 %v4026_v26, %v4026_v26  ;;  %10926 = vst [vmem:[#allocation17_spill] sm:$0xff] %v9434_v49  ;;  %v7099_v26 = vld [vmem:[%s10739_s7 + $0x88] sm:$0xff]  }
 0x4e9   : > { %6805 = vmatpush3.bf16.msra.mxu1 %v7099_v26  ;;  %v7119_v26 = vld [vmem:[%s10739_s7 + $0xb0] sm:$0xff]  }
 0x4ea   : > { %3807 = vrot.lane.b32.xlu1 %v3744_v25, %s10853_s27  ;;  %3801 = vrot.lane.b32.xlu0 %v3741_v37, %s10853_s27  ;;  %10925 = vst [vmem:[#allocation16_spill] sm:$0xff] %v9432_v55 }
 0x4ee   : > { %4615 = vrot.lane.b32.xlu1 %v9390_v50, %s7222_s17  ;;  %3840 = vrot.lane.b32.xlu0 %v3744_v25, %s7222_s17 }
 0x4f2   : > { %3771 = vrot.lane.b32.xlu1 %v3742_v51, %s7231_s18  ;;  %4297 = vrot.lane.b32.xlu0 %v4029_v4, %s10853_s27 }
 0x4f6   : > { %3803 = vrot.lane.b32.xlu1 %v3742_v51, %s10853_s27  ;;  %4537 = vrot.lane.b32.xlu0 %v9390_v50, %s7231_s18 }
 0x4fa   : > { %4299 = vrot.lane.b32.xlu1 %v4030_v58, %s10853_s27  ;;  %4657 = vrot.lane.b32.xlu0 %v4029_v4, %s7222_s17 }
 0x4fe   : > { %4539 = vrot.lane.b32.xlu1 %v9402_v19, %s7231_s18  ;;  %3836 = vrot.lane.b32.xlu0 %v3742_v51, %s7222_s17 }
 0x502   : > { %4659 = vrot.lane.b32.xlu1 %v4030_v58, %s7222_s17  ;;  %4293 = vrot.lane.b32.xlu0 %v4027_v12, %s10853_s27 }
 0x506   : > { %4295 = vrot.lane.b32.xlu1 %v4028_v30, %s10853_s27  ;;  %4533 = vrot.lane.b32.xlu0 %v9409_v8, %s7231_s18 }
 0x50a   : > { %4535 = vrot.lane.b32.xlu1 %v9414_v42, %s7231_s18  ;;  %4653 = vrot.lane.b32.xlu0 %v4027_v12, %s7222_s17  ;;  %v7096_v12 = vld [vmem:[%s10739_s7 + $0x40] sm:$0xff]  }
 0x50b   : > { %6762 = vmatprep.subr.bf16.mxu0 %v7096_v12  ;;  %v7117_v12 = vld [vmem:[%s10739_s7 + $0x28] sm:$0xff]  }
 0x50c   : > { %6763 = vmatpush3.bf16.msra.mxu0 %v7097_v32 }
 0x50d   : > { %6764 = vmatprep.subr.bf16.mxu0 %v7100_v34 }
 0x50e   : > { %4655 = vrot.lane.b32.xlu1 %v4028_v30, %s7222_s17  ;;  %4617 = vrot.lane.b32.xlu0 %v9402_v19, %s7222_s17 }
 0x512   : > { %4619 = vrot.lane.b32.xlu1 %v9424_v63, %s7222_s17  ;;  %4613 = vrot.lane.b32.xlu0 %v9414_v42, %s7222_s17 }
 0x516   : > { %4307 = vrot.lane.b32.xlu1 %v9432_v55, %s10853_s27  ;;  %4305 = vrot.lane.b32.xlu0 %v9434_v49, %s10853_s27 }
 0x51a   : > { %4303 = vrot.lane.b32.xlu1 %v9442_v17, %s10853_s27  ;;  %4301 = vrot.lane.b32.xlu0 %v9444_v46, %s10853_s27 }
 0x51d   : > { %v3831_v31 = vpop.permute.xlu1 %3830  ;;  %v3766_v47 = vpop.permute.xlu0 %3765 }
 0x51e   : > { %3853 = vst.msk [vmem:[#allocation5 + $0x31] sm:$0xff] %vm673_vm4, %v3831_v31  ;;  %3787 = vst.msk [vmem:[#allocation5 + $0x141] sm:$0xff] %vm673_vm4, %v3766_v47  ;;  %4543 = vrot.lane.b32.xlu1 %v9450_v5, %s7231_s18  ;;  %4541 = vrot.lane.b32.xlu0 %v9424_v63, %s7231_s18  ;;  %v7101_v47 = vld [vmem:[%s10739_s7 + $0x8] sm:$0xff]  }
 0x51f   : > { %6765 = vmatpush3.bf16.msra.mxu0 %v7101_v47  ;;  %v7121_v47 = vld [vmem:[%s10739_s7 + $0x30] sm:$0xff]  }
 0x521   : > { %v3827_v61 = vpop.permute.xlu1 %3826  ;;  %v3798_v39 = vpop.permute.xlu0 %3797 }
 0x522   : > { %3851 = vst.msk [vmem:[#allocation5 + $0x11] sm:$0xff] %vm673_vm4, %v3827_v61  ;;  %3820 = vst.msk [vmem:[#allocation5 + $0xc0] sm:$0xff] %vm673_vm4, %v3798_v39  ;;  %v7102_v61 = vld [vmem:[%s10739_s7 + $0xd0] sm:$0xff]  }
 0x523   : > { %v7103_v39 = vld [vmem:[%s10739_s7 + $0x90] sm:$0xff]   ;;  %6806 = vmatprep.subr.bf16.mxu1 %v7102_v61  ;;  %v7122_v61 = vld [vmem:[%s10739_s7 + $0xf8] sm:$0xff]  }
 0x524   : > { %6807 = vmatpush3.bf16.msra.mxu1 %v7103_v39  ;;  %v7123_v39 = vld [vmem:[%s10739_s7 + $0xb8] sm:$0xff]  }
 0x525   : > { %v3768_v27 = vpop.permute.xlu1 %3767  ;;  %v3762_v43 = vpop.permute.xlu0 %3761  ;;  %v3941_v57 = vld [vmem:[#allocation5 + $0x141] sm:$0xff]  ;;  %v3957_v53 = vld [vmem:[#allocation5 + $0x30] sm:$0xff] }
 0x526   : > { %3788 = vst.msk [vmem:[#allocation5 + $0x151] sm:$0xff] %vm673_vm4, %v3768_v27  ;;  %3785 = vst.msk [vmem:[#allocation5 + $0x121] sm:$0xff] %vm673_vm4, %v3762_v43  ;;  %v9462_v54 = vpack.c.bf16 %v3941_v57, %v3941_v57  ;;  %v9468_v14 = vpack.c.bf16 %v3957_v53, %v3957_v53  ;;  %v3894_v37 = vld [vmem:[#allocation5 + $0x31] sm:$0xff]  ;;  %v3909_v9 = vld [vmem:[#allocation5 + $0x140] sm:$0xff] }
 0x527   : > { %v9475_v48 = vpack.c.bf16 %v3894_v37, %v3894_v37  ;;  %v9482_v2 = vpack.c.bf16 %v3909_v9, %v3909_v9  ;;  %v7104_v57 = vld [vmem:[%s10739_s7 + $0x50] sm:$0xff]   ;;  %v7106_v37 = vld [vmem:[%s10739_s7 + $0xd8] sm:$0xff]  }
 0x528   : > { %10928 = vst [vmem:[#allocation18_spill] sm:$0xff] %v9462_v54  ;;  %4201 = vrot.lane.b32.xlu0 %v9462_v54, %s7222_s17  ;;  %6766 = vmatprep.subr.bf16.mxu0 %v7104_v57  ;;  %v7108_v9 = vld [vmem:[%s10739_s7 + $0x58] sm:$0xff]  }
 0x529   : > { %v3800_v1 = vpop.permute.xlu1 %3799  ;;  %v3794_v59 = vpop.permute.xlu0 %3793  ;;  %v3878_v11 = vld [vmem:[#allocation5 + $0xc0] sm:$0xff]  ;;  %v3892_v0 = vld [vmem:[#allocation5 + $0x11] sm:$0xff]  ;;  %6808 = vmatprep.subr.bf16.mxu1 %v7106_v37 }
 0x52a   : > { %3821 = vst.msk [vmem:[#allocation5 + $0xd0] sm:$0xff] %vm673_vm4, %v3800_v1  ;;  %3818 = vst.msk [vmem:[#allocation5 + $0xa0] sm:$0xff] %vm673_vm4, %v3794_v59  ;;  %v3886_v3 = vpack.c.bf16 %v3878_v11, %v3878_v11  ;;  %v4006_v41 = vld [vmem:[#allocation5 + $0xc1] sm:$0xff]  ;;  %v9500_v52 = vpack.c.bf16 %v3892_v0, %v3892_v0  ;;  %v3955_v62 = vld [vmem:[#allocation5 + $0x10] sm:$0xff] }
 0x52b   : > { %v9484_v33 = vpack.c.bf16 %v4006_v41, %v4006_v41  ;;  %v9534_v18 = vpack.c.bf16 %v3955_v62, %v3955_v62  ;;  %v7111_v0 = vld [vmem:[%s10739_s7 + $0xa0] sm:$0xff]  }
 0x52c   : > { %4225 = vrot.lane.b32.xlu0 %v9468_v14, %s10853_s27  ;;  %4131 = vrot.lane.b32.xlu1 %v3886_v3, %s7222_s17 }
 0x52d   : > { %v3764_v38 = vpop.permute.xlu1 %3763  ;;  %v3833_v51 = vpop.permute.xlu0 %3832  ;;  %10929 = vst [vmem:[#allocation28_spill] sm:$0xff] %v9484_v33  ;;  %v3942_v16 = vld [vmem:[#allocation5 + $0x151] sm:$0xff]  ;;  %v3939_v25 = vld [vmem:[#allocation5 + $0x121] sm:$0xff] }
 0x52e   : > { %3786 = vst.msk [vmem:[#allocation5 + $0x131] sm:$0xff] %vm673_vm4, %v3764_v38  ;;  %3854 = vst.msk [vmem:[#allocation5 + $0x41] sm:$0xff] %vm673_vm4, %v3833_v51  ;;  %v9511_v23 = vpack.c.bf16 %v3942_v16, %v3942_v16  ;;  %v9517_v7 = vpack.c.bf16 %v3939_v25, %v3939_v25  ;;  %v3910_v30 = vld [vmem:[#allocation5 + $0x150] sm:$0xff]  ;;  %v3907_v31 = vld [vmem:[#allocation5 + $0x120] sm:$0xff] }
 0x52f   : > { %v9556_v56 = vpack.c.bf16 %v3910_v30, %v3910_v30  ;;  %v3915_v53 = vpack.c.bf16 %v3907_v31, %v3907_v31  ;;  %v7107_v51 = vld [vmem:[%s10739_s7 + $0x98] sm:$0xff]   ;;  %v7113_v16 = vld [vmem:[%s10739_s7 + $0x20] sm:$0xff]   ;;  %v7114_v25 = vld [vmem:[%s10739_s7 + $0xe8] sm:$0xff]  }
 0x530   : > { %4249 = vrot.lane.b32.xlu0 %v3886_v3, %s7231_s18  ;;  %4155 = vrot.lane.b32.xlu1 %v9475_v48, %s10853_s27  ;;  %10931 = vst [vmem:[#allocation30_spill] sm:$0xff] %v9511_v23  ;;  %v7118_v30 = vld [vmem:[%s10739_s7 + $0xf0] sm:$0xff]  }
 0x531   : > { %v3796_v13 = vpop.permute.xlu1 %3795  ;;  %v3829_v28 = vpop.permute.xlu0 %3828  ;;  %v3876_v15 = vld [vmem:[#allocation5 + $0xa0] sm:$0xff]  ;;  %v3974_v58 = vld [vmem:[#allocation5 + $0xd0] sm:$0xff]  ;;  %10932 = vst [vmem:[#allocation37_spill] sm:$0xff] %v9556_v56  ;;  %6809 = vmatpush3.bf16.msra.mxu1 %v7107_v51 }
 0x532   : > { %3819 = vst.msk [vmem:[#allocation5 + $0xb0] sm:$0xff] %vm673_vm4, %v3796_v13  ;;  %3852 = vst.msk [vmem:[#allocation5 + $0x21] sm:$0xff] %vm673_vm4, %v3829_v28  ;;  %v9494_v29 = vpack.c.bf16 %v3876_v15, %v3876_v15  ;;  %v4004_v22 = vld [vmem:[#allocation5 + $0xa1] sm:$0xff]  ;;  %v9536_v10 = vpack.c.bf16 %v3974_v58, %v3974_v58  ;;  %v4038_v1 = vld [vmem:[#allocation5 + $0xd1] sm:$0xff] }
 0x533   : > { %v9505_v20 = vpack.c.bf16 %v4004_v22, %v4004_v22  ;;  %v9587_v38 = vpack.c.bf16 %v4038_v1, %v4038_v1  ;;  %v7109_v28 = vld [vmem:[%s10739_s7 + $0x18] sm:$0xff]   ;;  %v7110_v15 = vld [vmem:[%s10739_s7 + $0xe0] sm:$0xff]   ;;  %v7115_v58 = vld [vmem:[%s10739_s7 + $0xa8] sm:$0xff]  }
 0x534   : > { %4177 = vrot.lane.b32.xlu0 %v9482_v2, %s7231_s18  ;;  %4275 = vrot.lane.b32.xlu1 %v9484_v33, %s7231_s18  ;;  %v7112_v22 = vld [vmem:[%s10739_s7 + $0x60] sm:$0xff]  }
 0x535   : > { %10930 = vst [vmem:[#allocation29_spill] sm:$0xff] %v9505_v20  ;;  %v3958_v44 = vld [vmem:[#allocation5 + $0x40] sm:$0xff]  ;;  %10933 = vst [vmem:[#allocation36_spill] sm:$0xff] %v9587_v38  ;;  %6810 = vmatprep.subr.bf16.mxu1 %v7110_v15 }
 0x536   : > { %v9519_v4 = vpack.c.bf16 %v3958_v44, %v3958_v44  ;;  %6811 = vmatpush3.bf16.msra.mxu1 %v7111_v0  ;;  %v3990_v60 = vld [vmem:[#allocation5 + $0x41] sm:$0xff] }
 0x537   : > { %6812 = vmatprep.subr.bf16.mxu1 %v7114_v25 }
 0x538   : > { %4553 = vrot.lane.b32.xlu0 %v9468_v14, %s7222_s17  ;;  %4639 = vrot.lane.b32.xlu1 %v9462_v54, %s10853_s27 }
 0x539   : > { %v3956_v57 = vld [vmem:[#allocation5 + $0x20] sm:$0xff] }
 0x53a   : > { %6813 = vmatpush3.bf16.msra.mxu1 %v7115_v58 }
 0x53b   : > { %6814 = vmatprep.subr.bf16.mxu1 %v7118_v30 }
 0x53c   : > { %4497 = vrot.lane.b32.xlu0 %v9484_v33, %s7222_s17  ;;  %4127 = vrot.lane.b32.xlu1 %v9494_v29, %s7222_s17 }
 0x53e   : > { %6815 = vmatpush3.bf16.msra.mxu1 %v7119_v26 }
 0x53f   : > { %6816 = vmatprep.subr.bf16.mxu1 %v7122_v61 }
 0x540   : > { %4569 = vrot.lane.b32.xlu0 %v3886_v3, %s10853_s27  ;;  %4151 = vrot.lane.b32.xlu1 %v9500_v52, %s10853_s27  ;;  %v7105_v3 = vld [vmem:[%s10739_s7 + $0x10] sm:$0xff]  }
 0x541   : > { %6767 = vmatpush3.bf16.msra.mxu0 %v7105_v3  ;;  %v3972_v3 = vld [vmem:[#allocation5 + $0xb0] sm:$0xff] }
 0x542   : > { %6768 = vmatprep.subr.bf16.mxu0 %v7108_v9  ;;  %6817 = vmatpush3.bf16.msra.mxu1 %v7123_v39  ;;  %v3980_v9 = vpack.c.bf16 %v3972_v3, %v3972_v3 }
 0x544   : > { %4513 = vrot.lane.b32.xlu0 %v9482_v2, %s10853_s27  ;;  %4271 = vrot.lane.b32.xlu1 %v9505_v20, %s7231_s18 }
 0x545   : > { %6769 = vmatpush3.bf16.msra.mxu0 %v7109_v28 }
 0x546   : > { %6770 = vmatprep.subr.bf16.mxu0 %v7112_v22  ;;  %v4036_v22 = vld [vmem:[#allocation5 + $0xb1] sm:$0xff] }
 0x547   : > { %v9717_v58 = vpack.c.bf16 %v4036_v22, %v4036_v22 }
 0x548   : > { %4593 = vrot.lane.b32.xlu0 %v9475_v48, %s7231_s18  ;;  %4203 = vrot.lane.b32.xlu1 %v9511_v23, %s7222_s17 }
 0x549   : > { %6771 = vmatpush3.bf16.msra.mxu0 %v7113_v16  ;;  %v3893_v16 = vld [vmem:[#allocation5 + $0x21] sm:$0xff]  ;;  %10941 = vst [vmem:[#allocation14_spill] sm:$0xff] %v9717_v58 }
 0x54a   : > { %6772 = vmatprep.subr.bf16.mxu0 %v7116_v24  ;;  %v9719_v24 = vpack.c.bf16 %v3893_v16, %v3893_v16 }
 0x54c   : > { %4197 = vrot.lane.b32.xlu0 %v9517_v7, %s7222_s17  ;;  %4227 = vrot.lane.b32.xlu1 %v9519_v4, %s10853_s27 }
 0x54d   : > { %6773 = vmatpush3.bf16.msra.mxu0 %v7117_v12 }
 0x550   : > { %4221 = vrot.lane.b32.xlu0 %v9534_v18, %s10853_s27  ;;  %4251 = vrot.lane.b32.xlu1 %v9536_v10, %s7231_s18  ;;  %v3839_v36 = vpop.permute.xlu1 %3838  ;;  %v3774_v40 = vpop.permute.xlu0 %3773 }
 0x551   : > { %3857 = vst.msk [vmem:[#allocation5 + $0x71] sm:$0xff] %vm673_vm4, %v3839_v36  ;;  %3791 = vst.msk [vmem:[#allocation5 + $0x181] sm:$0xff] %vm673_vm4, %v3774_v40  ;;  %v7120_v36 = vld [vmem:[%s10739_s7 + $0x70] sm:$0xff]   ;;  %v9651_v40 = vpack.c.bf16 %v3990_v60, %v3990_v60 }
 0x552   : > { %6774 = vmatprep.subr.bf16.mxu0 %v7120_v36 }
 0x553   : > { %6775 = vmatpush3.bf16.msra.mxu0 %v7121_v47 }
 0x554   : > { %4245 = vrot.lane.b32.xlu0 %v9494_v29, %s7231_s18  ;;  %4179 = vrot.lane.b32.xlu1 %v9556_v56, %s7231_s18  ;;  %v3835_v27 = vpop.permute.xlu1 %3834  ;;  %v3806_v43 = vpop.permute.xlu0 %3805 }
 0x555   : > { %3855 = vst.msk [vmem:[#allocation5 + $0x51] sm:$0xff] %vm673_vm4, %v3835_v27  ;;  %3824 = vst.msk [vmem:[#allocation5 + $0x100] sm:$0xff] %vm673_vm4, %v3806_v43  ;;  %v7124_v27 = vld [vmem:[%s10739_s7 + $0x78] sm:$0xff]  }
 0x556   : > { %6776 = vmatprep.subr.bf16.mxu0 %v7124_v27 }
 0x558   : > { %4173 = vrot.lane.b32.xlu0 %v3915_v53, %s7231_s18  ;;  %4555 = vrot.lane.b32.xlu1 %v9519_v4, %s7222_s17  ;;  %v3776_v59 = vpop.permute.xlu1 %3775  ;;  %v3770_v11 = vpop.permute.xlu0 %3769 }
 0x559   : > { %3792 = vst.msk [vmem:[#allocation5 + $0x191] sm:$0xff] %vm673_vm4, %v3776_v59  ;;  %3789 = vst.msk [vmem:[#allocation5 + $0x161] sm:$0xff] %vm673_vm4, %v3770_v11  ;;  %v7125_v59 = vld [vmem:[%s10739_s7 + $0x38] sm:$0xff]   ;;  %v9684_v11 = vpack.c.bf16 %v3956_v57, %v3956_v57 }
 0x55a   : > { %6777 = vmatpush3.bf16.msra.mxu0 %v7125_v59  ;;  %v3898_v57 = vld [vmem:[#allocation5 + $0x71] sm:$0xff] }
 0x55b   : > { %v9757_v3 = vpack.c.bf16 %v3898_v57, %v3898_v57 }
 0x55c   : > { %4549 = vrot.lane.b32.xlu0 %v9534_v18, %s7222_s17  ;;  %4499 = vrot.lane.b32.xlu1 %v9587_v38, %s7222_s17  ;;  %v3808_v41 = vpop.permute.xlu1 %3807  ;;  %v3802_v13 = vpop.permute.xlu0 %3801  ;;  %v3882_v47 = vld [vmem:[#allocation5 + $0x100] sm:$0xff] }
 0x55d   : > { %3825 = vst.msk [vmem:[#allocation5 + $0x110] sm:$0xff] %vm673_vm4, %v3808_v41  ;;  %3822 = vst.msk [vmem:[#allocation5 + $0xe0] sm:$0xff] %vm673_vm4, %v3802_v13  ;;  %v3908_v41 = vld [vmem:[#allocation5 + $0x130] sm:$0xff]  ;;  %v3890_v27 = vpack.c.bf16 %v3882_v47, %v3882_v47 }
 0x55e   : > { %10950 = vst [vmem:[#allocation24_spill] sm:$0xff] %v9757_v3 }
 0x560   : > { %4493 = vrot.lane.b32.xlu0 %v9505_v20, %s7222_s17  ;;  %4571 = vrot.lane.b32.xlu1 %v9536_v10, %s10853_s27  ;;  %v9623_v44 = vpop.permute.xlu1 %4615  ;;  %v3841_v62 = vpop.permute.xlu0 %3840 }
 0x561   : > { %3858 = vst.msk [vmem:[#allocation5 + $0x81] sm:$0xff] %vm673_vm4, %v3841_v62 }
 0x564   : > { %4565 = vrot.lane.b32.xlu0 %v9494_v29, %s10853_s27  ;;  %4515 = vrot.lane.b32.xlu1 %v9556_v56, %s10853_s27  ;;  %v3772_v32 = vpop.permute.xlu1 %3771  ;;  %v9642_v6 = vpop.permute.xlu0 %4297  ;;  %v3940_v29 = vld [vmem:[#allocation5 + $0x131] sm:$0xff] }
 0x565   : > { %3790 = vst.msk [vmem:[#allocation5 + $0x171] sm:$0xff] %vm673_vm4, %v3772_v32  ;;  %v9671_v43 = vpack.c.bf16 %v3940_v29, %v3940_v29  ;;  %v3945_v32 = vld [vmem:[#allocation5 + $0x181] sm:$0xff] }
 0x566   : > { %v9742_v29 = vpack.c.bf16 %v3945_v32, %v3945_v32 }
 0x568   : > { %4509 = vrot.lane.b32.xlu0 %v3915_v53, %s10853_s27  ;;  %4595 = vrot.lane.b32.xlu1 %v9651_v40, %s7231_s18  ;;  %v3804_v34 = vpop.permute.xlu1 %3803  ;;  %v9656_v31 = vpop.permute.xlu0 %4537 }
 0x569   : > { %10934 = vst [vmem:[#allocation32_spill] sm:$0xff] %v9656_v31  ;;  %3823 = vst.msk [vmem:[#allocation5 + $0xf0] sm:$0xff] %vm673_vm4, %v3804_v34  ;;  %v3961_v34 = vld [vmem:[#allocation5 + $0x70] sm:$0xff] }
 0x56a   : > { %v9750_v39 = vpack.c.bf16 %v3961_v34, %v3961_v34  ;;  %v3880_v34 = vld [vmem:[#allocation5 + $0xe0] sm:$0xff]  ;;  %v3978_v31 = vld [vmem:[#allocation5 + $0x110] sm:$0xff] }
 0x56b   : > { %v9775_v33 = vpack.c.bf16 %v3880_v34, %v3880_v34  ;;  %v3986_v54 = vpack.c.bf16 %v3978_v31, %v3978_v31 }
 0x56c   : > { %4589 = vrot.lane.b32.xlu0 %v9500_v52, %s7231_s18  ;;  %4199 = vrot.lane.b32.xlu1 %v9671_v43, %s7222_s17  ;;  %v9677_v53 = vpop.permute.xlu1 %4299  ;;  %v9679_v1 = vpop.permute.xlu0 %4657  ;;  %10948 = vst [vmem:[#allocation9_spill] sm:$0xff] %v9750_v39 }
 0x56d   : > { %10935 = vst [vmem:[#allocation25_spill] sm:$0xff] %v9679_v1 }
 0x570   : > { %4133 = vrot.lane.b32.xlu0 %v9536_v10, %s7222_s17  ;;  %4223 = vrot.lane.b32.xlu1 %v9684_v11, %s10853_s27  ;;  %v9690_v37 = vpop.permute.xlu1 %4539  ;;  %v3837_v51 = vpop.permute.xlu0 %3836  ;;  %v9700_v10 = vpack.c.bf16 %v3908_v41, %v3908_v41 }
 0x571   : > { %10936 = vst [vmem:[#allocation31_spill] sm:$0xff] %v9690_v37  ;;  %3856 = vst.msk [vmem:[#allocation5 + $0x61] sm:$0xff] %vm673_vm4, %v3837_v51  ;;  %v3913_v51 = vld [vmem:[#allocation5 + $0x180] sm:$0xff] }
 0x572   : > { %10938 = vst [vmem:[#allocation20_spill] sm:$0xff] %v9700_v10  ;;  %v3921_v16 = vpack.c.bf16 %v3913_v51, %v3913_v51 }
 0x574   : > { %4157 = vrot.lane.b32.xlu0 %v9651_v40, %s10853_s27  ;;  %4247 = vrot.lane.b32.xlu1 %v3980_v9, %s7231_s18  ;;  %v9696_v13 = vpop.permute.xlu1 %4659  ;;  %v9698_v28 = vpop.permute.xlu0 %4293 }
 0x575   : > { %10937 = vst [vmem:[#allocation34_spill] sm:$0xff] %v9696_v13  ;;  %v3943_v13 = vld [vmem:[#allocation5 + $0x161] sm:$0xff] }
 0x578   : > { %4277 = vrot.lane.b32.xlu0 %v9587_v38, %s7231_s18  ;;  %4175 = vrot.lane.b32.xlu1 %v9700_v10, %s7231_s18  ;;  %v9706_v15 = vpop.permute.xlu1 %4295  ;;  %v9708_v0 = vpop.permute.xlu0 %4533  ;;  %v3896_v38 = vld [vmem:[#allocation5 + $0x51] sm:$0xff] }
 0x579   : > { %10939 = vst [vmem:[#allocation12_spill] sm:$0xff] %v9708_v0  ;;  %v9785_v20 = vpack.c.bf16 %v3896_v38, %v3896_v38  ;;  %v3897_v0 = vld [vmem:[#allocation5 + $0x61] sm:$0xff] }
 0x57c   : > { %4129 = vrot.lane.b32.xlu0 %v3980_v9, %s7222_s17  ;;  %4551 = vrot.lane.b32.xlu1 %v9684_v11, %s7222_s17  ;;  %v9713_v25 = vpop.permute.xlu1 %4535  ;;  %v9715_v62 = vpop.permute.xlu0 %4653 }
 0x57d   : > { %10940 = vst [vmem:[#allocation11_spill] sm:$0xff] %v9713_v25 }
 0x580   : > { %4495 = vrot.lane.b32.xlu1 %v9717_v58, %s7222_s17  ;;  %4153 = vrot.lane.b32.xlu0 %v9719_v24, %s10853_s27  ;;  %v9725_v60 = vpop.permute.xlu0 %4617  ;;  %v9727_v12 = vpop.permute.xlu1 %4655 }
 0x581   : > { %10942 = vst [vmem:[#allocation13_spill] sm:$0xff] %v9725_v60  ;;  %10943 = vst [vmem:[#allocation35_spill] sm:$0xff] %v9727_v12  ;;  %v3962_v60 = vld [vmem:[#allocation5 + $0x80] sm:$0xff]  ;;  %v3976_v12 = vld [vmem:[#allocation5 + $0xf0] sm:$0xff] }
 0x584   : > { %4567 = vrot.lane.b32.xlu1 %v3980_v9, %s10853_s27  ;;  %4273 = vrot.lane.b32.xlu0 %v9717_v58, %s7231_s18  ;;  %v9732_v30 = vpop.permute.xlu0 %4613  ;;  %v9734_v26 = vpop.permute.xlu1 %4619  ;;  %v4010_v9 = vld [vmem:[#allocation5 + $0x101] sm:$0xff] }
 0x585   : > { %10944 = vst [vmem:[#allocation38_spill] sm:$0xff] %v9732_v30  ;;  %10945 = vst [vmem:[#allocation22_spill] sm:$0xff] %v9734_v26  ;;  %v9766_v32 = vpack.c.bf16 %v4010_v9, %v4010_v9  ;;  %v4008_v58 = vld [vmem:[#allocation5 + $0xe1] sm:$0xff]  ;;  %v3946_v26 = vld [vmem:[#allocation5 + $0x191] sm:$0xff] }
 0x587   : > { %10953 = vst [vmem:[#allocation7_spill] sm:$0xff] %v9766_v32 }
 0x588   : > { %4511 = vrot.lane.b32.xlu1 %v9700_v10, %s10853_s27  ;;  %4637 = vrot.lane.b32.xlu0 %v9671_v43, %s10853_s27  ;;  %v9740_v36 = vpop.permute.xlu0 %4305  ;;  %v9748_v61 = vpop.permute.xlu1 %4307  ;;  %v3859_v10 = vld [vmem:[#allocation5] sm:$0xff] }
 0x589   : > { %10946 = vst [vmem:[#allocation15_spill] sm:$0xff] %v9740_v36  ;;  %10947 = vst [vmem:[#allocation19_spill] sm:$0xff] %v9748_v61  ;;  %v4042_v61 = vld [vmem:[#allocation5 + $0x111] sm:$0xff]  ;;  %v3867_v49 = vpack.c.bf16 %v3859_v10, %v3859_v10 }
 0x58c   : > { %4591 = vrot.lane.b32.xlu1 %v9719_v24, %s7231_s18  ;;  %4209 = vrot.lane.b32.xlu0 %v9742_v29, %s7222_s17  ;;  %v9752_v59 = vpop.permute.xlu0 %4301  ;;  %v9759_v41 = vpop.permute.xlu1 %4303 }
 0x58d   : > { %10949 = vst [vmem:[#allocation8_spill] sm:$0xff] %v9752_v59  ;;  %10951 = vst [vmem:[#allocation26_spill] sm:$0xff] %v9759_v41  ;;  %v3959_v41 = vld [vmem:[#allocation5 + $0x50] sm:$0xff] }
 0x58e   : > { %v3914_v59 = vld [vmem:[#allocation5 + $0x190] sm:$0xff]  ;;  %v9829_v5 = vpack.c.bf16 %v3959_v41, %v3959_v41 }
 0x58f   : > { %v3922_v63 = vpack.c.bf16 %v3914_v59, %v3914_v59 }
 0x590   : > { %4233 = vrot.lane.b32.xlu0 %v9750_v39, %s10853_s27  ;;  %4139 = vrot.lane.b32.xlu1 %v3890_v27, %s7222_s17  ;;  %v9764_v22 = vpop.permute.xlu0 %4541  ;;  %v9771_v47 = vpop.permute.xlu1 %4543  ;;  %10961 = vst [vmem:[#allocation44_spill] sm:$0xff] %v9829_v5 }
 0x591   : > { %10952 = vst [vmem:[#allocation33_spill] sm:$0xff] %v9764_v22  ;;  %10954 = vst [vmem:[#allocation23_spill] sm:$0xff] %v9771_v47  ;;  %v9795_v47 = vpack.c.bf16 %v4008_v58, %v4008_v58 }
 0x593   : > { %10955 = vst [vmem:[#allocation27_spill] sm:$0xff] %v9795_v47 }
 0x594   : > { %4257 = vrot.lane.b32.xlu0 %v3890_v27, %s7231_s18  ;;  %4163 = vrot.lane.b32.xlu1 %v9757_v3, %s10853_s27 }
 0x598   : > { %4185 = vrot.lane.b32.xlu0 %v3921_v16, %s7231_s18  ;;  %4283 = vrot.lane.b32.xlu1 %v9766_v32, %s7231_s18 }
 0x59a   : > { %v9773_v57 = vpop.permute.xlu0 %4201 }
 0x59c   : > { %4561 = vrot.lane.b32.xlu0 %v9750_v39, %s7222_s17  ;;  %4135 = vrot.lane.b32.xlu1 %v9775_v33, %s7222_s17 }
 0x59e   : > { %v9781_v51 = vpop.permute.xlu1 %4131  ;;  %v9783_v9 = vpop.permute.xlu0 %4225 }
 0x5a0   : > { %4505 = vrot.lane.b32.xlu0 %v9766_v32, %s7222_s17  ;;  %4159 = vrot.lane.b32.xlu1 %v9785_v20, %s10853_s27  ;;  %v9804_v32 = vpack.c.bf16 %v3946_v26, %v3946_v26 }
 0x5a2   : > { %v9791_v34 = vpop.permute.xlu1 %4155  ;;  %v9793_v22 = vpop.permute.xlu0 %4249  ;;  %10956 = vst [vmem:[#allocation39_spill] sm:$0xff] %v9804_v32 }
 0x5a4   : > { %4577 = vrot.lane.b32.xlu0 %v3890_v27, %s10853_s27  ;;  %4279 = vrot.lane.b32.xlu1 %v9795_v47, %s7231_s18  ;;  %v3970_v27 = vpack.c.bf16 %v3962_v60, %v3962_v60 }
 0x5a6   : > { %v9800_v38 = vpop.permute.xlu1 %4275  ;;  %v9802_v56 = vpop.permute.xlu0 %4177 }
 0x5a8   : > { %4521 = vrot.lane.b32.xlu0 %v3921_v16, %s10853_s27  ;;  %4211 = vrot.lane.b32.xlu1 %v9804_v32, %s7222_s17  ;;  %v9820_v16 = vpack.c.bf16 %v3943_v13, %v3943_v13  ;;  %v3960_v32 = vld [vmem:[#allocation5 + $0x60] sm:$0xff] }
 0x5aa   : > { %v9809_v58 = vpop.permute.xlu1 %4639  ;;  %v9811_v1 = vpop.permute.xlu0 %4553  ;;  %10959 = vst [vmem:[#allocation42_spill] sm:$0xff] %v9820_v16 }
 0x5ab   : > { %10957 = vst [vmem:[#allocation40_spill] sm:$0xff] %v9811_v1 }
 0x5ac   : > { %4601 = vrot.lane.b32.xlu0 %v9757_v3, %s7231_s18  ;;  %4235 = vrot.lane.b32.xlu1 %v3970_v27, %s10853_s27  ;;  %v9847_v3 = vpack.c.bf16 %v4042_v61, %v4042_v61 }
 0x5ae   : > { %v9816_v26 = vpop.permute.xlu1 %4127  ;;  %v9818_v37 = vpop.permute.xlu0 %4497  ;;  %10965 = vst [vmem:[#allocation48_spill] sm:$0xff] %v9847_v3 }
 0x5af   : > { %10958 = vst [vmem:[#allocation41_spill] sm:$0xff] %v9818_v37  ;;  %v4055_v37 = vld [vmem:[#allocation5 + $0x160] sm:$0xff] }
 0x5b0   : > { %4205 = vrot.lane.b32.xlu0 %v9820_v16, %s7222_s17  ;;  %4259 = vrot.lane.b32.xlu1 %v3986_v54, %s7231_s18 }
 0x5b2   : > { %v9825_v60 = vpop.permute.xlu1 %4151  ;;  %v9827_v1 = vpop.permute.xlu0 %4569 }
 0x5b3   : > { %10960 = vst [vmem:[#allocation43_spill] sm:$0xff] %v9827_v1  ;;  %v9841_v1 = vpack.c.bf16 %v4055_v37, %v4055_v37 }
 0x5b4   : > { %4229 = vrot.lane.b32.xlu0 %v9829_v5, %s10853_s27  ;;  %4187 = vrot.lane.b32.xlu1 %v3922_v63, %s7231_s18 }
 0x5b5   : > { %10963 = vst [vmem:[#allocation46_spill] sm:$0xff] %v9841_v1 }
 0x5b6   : > { %v9834_v31 = vpop.permute.xlu1 %4271  ;;  %v9836_v13 = vpop.permute.xlu0 %4513 }
 0x5b7   : > { %10962 = vst [vmem:[#allocation45_spill] sm:$0xff] %v9836_v13 }
 0x5b8   : > { %4563 = vrot.lane.b32.xlu1 %v3970_v27, %s7222_s17  ;;  %4253 = vrot.lane.b32.xlu0 %v9775_v33, %s7231_s18  ;;  %v7126_v27 = vld [vmem:[%s10739_s7 + $0x140] sm:$0xff]  }
 0x5b9   : > { %6842 = vmatprep.subr.bf16.mxu0 %v7126_v27 }
 0x5ba   : > { %v9843_v41 = vpop.permute.xlu1 %4203  ;;  %v9845_v59 = vpop.permute.xlu0 %4593 }
 0x5bb   : > { %10964 = vst [vmem:[#allocation47_spill] sm:$0xff] %v9845_v59  ;;  %v3994_v59 = vld [vmem:[#allocation5 + $0x81] sm:$0xff] }
 0x5bc   : > { %4507 = vrot.lane.b32.xlu1 %v9847_v3, %s7222_s17  ;;  %4181 = vrot.lane.b32.xlu0 %v9841_v1, %s7231_s18  ;;  %v9874_v27 = vpack.c.bf16 %v3994_v59, %v3994_v59 }
 0x5be   : > { %v9856_v13 = vpop.permute.xlu1 %4227  ;;  %v9858_v37 = vpop.permute.xlu0 %4197  ;;  %10966 = vst [vmem:[#allocation49_spill] sm:$0xff] %v9874_v27 }
 0x5c0   : > { %4579 = vrot.lane.b32.xlu1 %v3986_v54, %s10853_s27  ;;  %4557 = vrot.lane.b32.xlu0 %v9829_v5, %s7222_s17  ;;  %v3944_v54 = vld [vmem:[#allocation5 + $0x171] sm:$0xff] }
 0x5c1   : > { %v9887_v39 = vpack.c.bf16 %v3944_v54, %v3944_v54 }
 0x5c2   : > { %v9863_v61 = vpop.permute.xlu1 %4251  ;;  %v9865_v3 = vpop.permute.xlu0 %4221 }
 0x5c3   : > { %10968 = vst [vmem:[#allocation51_spill] sm:$0xff] %v9887_v39 }
 0x5c4   : > { %4523 = vrot.lane.b32.xlu1 %v3922_v63, %s10853_s27  ;;  %4501 = vrot.lane.b32.xlu0 %v9795_v47, %s7222_s17  ;;  %v7132_v63 = vld [vmem:[%s10739_s7 + $0x1c0] sm:$0xff]  }
 0x5c5   : > { %6882 = vmatprep.subr.bf16.mxu1 %v7132_v63 }
 0x5c6   : > { %v9870_v55 = vpop.permute.xlu1 %4179  ;;  %v9872_v36 = vpop.permute.xlu0 %4245 }
 0x5c8   : > { %4603 = vrot.lane.b32.xlu1 %v9874_v27, %s7231_s18  ;;  %4573 = vrot.lane.b32.xlu0 %v9775_v33, %s10853_s27  ;;  %v9895_v27 = vpack.c.bf16 %v3960_v32, %v3960_v32 }
 0x5ca   : > { %v9883_v5 = vpop.permute.xlu1 %4555  ;;  %v9885_v47 = vpop.permute.xlu0 %4173 }
 0x5cb   : > { %10967 = vst [vmem:[#allocation50_spill] sm:$0xff] %v9883_v5  ;;  %v9903_v5 = vpack.c.bf16 %v3976_v12, %v3976_v12 }
 0x5cc   : > { %4207 = vrot.lane.b32.xlu1 %v9887_v39, %s7222_s17  ;;  %4517 = vrot.lane.b32.xlu0 %v9841_v1, %s10853_s27  ;;  %v3912_v39 = vld [vmem:[#allocation5 + $0x170] sm:$0xff] }
 0x5cd   : > { %10971 = vst [vmem:[#allocation54_spill] sm:$0xff] %v9903_v5  ;;  %v9913_v25 = vpack.c.bf16 %v3912_v39, %v3912_v39 }
 0x5ce   : > { %v9893_v59 = vpop.permute.xlu1 %4499  ;;  %v4550_v33 = vpop.permute.xlu0 %4549 }
 0x5cf   : > { %10969 = vst [vmem:[#allocation52_spill] sm:$0xff] %v9893_v59  ;;  %v4719_v32 = vsel %vm673_vm4, %v9517_v7, %v4550_v33  ;;  %10973 = vst [vmem:[#allocation56_spill] sm:$0xff] %v9913_v25 }
 0x5d0   : > { %4231 = vrot.lane.b32.xlu1 %v9895_v27, %s10853_s27  ;;  %4597 = vrot.lane.b32.xlu0 %v9785_v20, %s7231_s18 }
 0x5d2   : > { %v9901_v54 = vpop.permute.xlu1 %4571  ;;  %v4494_v63 = vpop.permute.xlu0 %4493 }
 0x5d3   : > { %10970 = vst [vmem:[#allocation53_spill] sm:$0xff] %v9901_v54  ;;  %v9915_v54 = vpack.c.bf16 %v3897_v0, %v3897_v0  ;;  %v4670_v30 = vsel %vm673_vm4, %v9500_v52, %v4494_v63  ;;  %v3930_v0 = vld [vmem:[#allocation5 + $0x220] sm:$0xff]  ;;  %v4822_v63 = vsel %vm673_vm4, %v9517_v7, %v9715_v62  ;;  %v4373_v62 = vsel %vm673_vm4, %v9390_v50, %v9773_v57 }
 0x5d4   : > { %4255 = vrot.lane.b32.xlu1 %v9903_v5, %s7231_s18  ;;  %4137 = vrot.lane.b32.xlu0 %v9903_v5, %s7222_s17  ;;  %v3929_v5 = vld [vmem:[#allocation5 + $0x210] sm:$0xff]  ;;  %v4073_v7 = vld [vmem:[#allocation5 + $0x200] sm:$0xff]  ;;  %v4376_v50 = vsel %vm673_vm4, %v9402_v19, %v9843_v41 }
 0x5d5   : > { %10974 = vst [vmem:[#allocation57_spill] sm:$0xff] %v9915_v54 }
 0x5d6   : > { %v9911_v1 = vpop.permute.xlu1 %4515  ;;  %v4566_v59 = vpop.permute.xlu0 %4565 }
 0x5d7   : > { %10972 = vst [vmem:[#allocation55_spill] sm:$0xff] %v9911_v1  ;;  %v4742_v12 = vsel %vm1202_vm11, %v4719_v32, %v4566_v59  ;;  %v4422_v32 = vsel %vm673_vm4, %v9500_v52, %v9419_v45  ;;  %v4837_v10 = vsel %vm1202_vm11, %v4822_v63, %v4566_v59  ;;  %v4311_v52 = vsel %vm673_vm4, %v3867_v49, %v9419_v45  ;;  %v4009_v45 = vld [vmem:[#allocation5 + $0xf1] sm:$0xff] }
 0x5d8   : > { %4183 = vrot.lane.b32.xlu1 %v9913_v25, %s7231_s18  ;;  %4161 = vrot.lane.b32.xlu0 %v9915_v54, %s10853_s27  ;;  %v9942_v54 = vpack.c.bf16 %v3929_v5, %v3929_v5  ;;  %v4367_v49 = vsel %vm673_vm4, %v9409_v8, %v9858_v37  ;;  %v4334_v5 = vsel %vm1202_vm11, %v4311_v52, %v9430_v35 }
 0x5d9   : > { %v4424_v8 = vsel %vm673_vm4, %v9719_v24, %v9816_v26  ;;  %v9978_v37 = vpack.c.bf16 %v4009_v45, %v4009_v45  ;;  %v4462_v19 = vsel %vm1202_vm11, %v4367_v49, %v9698_v28  ;;  %v4314_v45 = vsel %vm673_vm4, %v9534_v18, %v9816_v26  ;;  %v7137_v26 = vld [vmem:[%s10739_s7 + $0x1c8] sm:$0xff]  }
 0x5da   : > { %v9924_v33 = vpop.permute.xlu1 %4595  ;;  %v4510_v1 = vpop.permute.xlu0 %4509  ;;  %v4477_v28 = vsel %vm2526_vm14, %v4462_v19, %v9872_v36  ;;  %v7139_v19 = vld [vmem:[%s10739_s7 + $0x188] sm:$0xff]  }
 0x5db   : > { %10975 = vst [vmem:[#allocation58_spill] sm:$0xff] %v9924_v33  ;;  %v9927_v39 = vsel %vm1202_vm11, %v4670_v30, %v4510_v1  ;;  %v9940_v33 = vpack.c.bf16 %v3930_v0, %v3930_v0  ;;  %v4081_v0 = vpack.c.bf16 %v4073_v7, %v4073_v7  ;;  %10976 = vst [vmem:[#allocation59_spill] sm:$0xff] %v9978_v37 }
 0x5dc   : > { %4643 = vrot.lane.b32.xlu1 %v9820_v16, %s10853_s27  ;;  %4641 = vrot.lane.b32.xlu0 %v9511_v23, %s10853_s27  ;;  %v4437_v16 = vsel %vm1202_vm11, %v4422_v32, %v9430_v35  ;;  %v4466_v32 = vsel %vm1202_vm11, %v4373_v62, %v9642_v6  ;;  %v4468_v6 = vsel %vm1202_vm11, %v4376_v50, %v9677_v53 }
 0x5dd   : > { %v4446_v59 = vsel %vm2526_vm14, %v4437_v16, %v9440_v21  ;;  %v4438_v21 = vsel %vm1202_vm11, %v4424_v8, %v9825_v60  ;;  %v4390_v16 = vsel %vm1202_vm11, %v4367_v49, %v9865_v3  ;;  %v4479_v8 = vsel %vm2526_vm14, %v4466_v32, %v9793_v22  ;;  %v4101_v32 = vld [vmem:[#allocation5 + $0x1c1] sm:$0xff] }
 0x5de   : > { %v4200_v1 = vpop.permute.xlu1 %4199  ;;  %v4590_v30 = vpop.permute.xlu0 %4589  ;;  %v4406_v41 = vsel %vm2526_vm14, %v4390_v16, %v9872_v36 }
 0x5df   : > { %v9949_v23 = vsel %vm2526_vm14, %v4742_v12, %v4590_v30  ;;  %v9952_v25 = vsel %vm2526_vm14, %v4837_v10, %v4590_v30  ;;  %v4370_v35 = vsel %vm673_vm4, %v9414_v42, %v4200_v1  ;;  %v4448_v42 = vsel %vm2526_vm14, %v4438_v21, %v9834_v31 }
 0x5e0   : > { %4547 = vrot.lane.b32.xlu1 %v9940_v33, %s7231_s18  ;;  %4545 = vrot.lane.b32.xlu0 %v9942_v54, %s7231_s18  ;;  %v4464_v31 = vsel %vm1202_vm11, %v4370_v35, %v9706_v15  ;;  %v4394_v15 = vsel %vm1202_vm11, %v4373_v62, %v9783_v9  ;;  %v6534_v49 = vcombine.low %v4446_v59, %v4448_v42 }
 0x5e1   : > { %v4109_v42 = vpack.c.bf16 %v4101_v32, %v4101_v32  ;;  %v10979_v32 = vld [vmem:[#allocation38_spill] sm:$0xff] }
 0x5e2   : > { %v4224_v57 = vpop.permute.xlu1 %4223  ;;  %v4134_v12 = vpop.permute.xlu0 %4133 }
 0x5e3   : > { %v4392_v3 = vsel %vm1202_vm11, %v4370_v35, %v4224_v57  ;;  %v4396_v57 = vsel %vm1202_vm11, %v4376_v50, %v9856_v13  ;;  %v4350_v13 = vsel %vm2526_vm14, %v4334_v5, %v9885_v47  ;;  %v4410_v35 = vsel %vm2526_vm14, %v4394_v15, %v9793_v22  ;;  %v7128_v5 = vld [vmem:[%s10739_s7 + $0x148] sm:$0xff]  }
 0x5e4   : > { %4663 = vrot.lane.b32.xlu1 %v9442_v17, %s7222_s17  ;;  %4661 = vrot.lane.b32.xlu0 %v9444_v46, %s7222_s17  ;;  %v4323_v17 = vsel %vm673_vm4, %v9519_v4, %v4134_v12  ;;  %v4430_v46 = vsel %vm673_vm4, %v9785_v20, %v4134_v12  ;;  %v4480_v4 = vsel %vm2526_vm14, %v4468_v6, %v9863_v61  ;;  %v7135_v12 = vld [vmem:[%s10739_s7 + $0x180] sm:$0xff]   ;;  %v7141_v6 = vld [vmem:[%s10739_s7 + $0x1d0] sm:$0xff]  }
 0x5e5   : > { %v4412_v9 = vsel %vm2526_vm14, %v4396_v57, %v9863_v61  ;;  %v7127_v61 = vld [vmem:[%s10739_s7 + $0x100] sm:$0xff]  }
 0x5e6   : > { %v4248_v63 = vpop.permute.xlu1 %4247  ;;  %v4158_v10 = vpop.permute.xlu0 %4157  ;;  %v6542_v47 = vcombine.low %v4410_v35, %v4412_v9 }
 0x5e7   : > { %v4408_v53 = vsel %vm2526_vm14, %v4392_v3, %v4248_v63  ;;  %v4478_v1 = vsel %vm2526_vm14, %v4464_v31, %v4248_v63  ;;  %v10008_v30 = vsel %vm1202_vm11, %v4323_v17, %v4158_v10  ;;  %v4441_v36 = vsel %vm1202_vm11, %v4430_v46, %v4158_v10  ;;  %v7130_v3 = vld [vmem:[%s10739_s7 + $0x150] sm:$0xff]  }
 0x5e8   : > { %v6533_v52 = vcombine.low %v4406_v41, %v4408_v53  ;;  %v6535_v7 = vcombine.low %v4477_v28, %v4478_v1  ;;  %4623 = vrot.lane.b32.xlu1 %v9942_v54, %s7222_s17  ;;  %4621 = vrot.lane.b32.xlu0 %v4081_v0, %s7222_s17  ;;  %v4336_v0 = vsel %vm1202_vm11, %v4314_v45, %v9825_v60  ;;  %v4103_v41 = vld [vmem:[#allocation5 + $0x1e1] sm:$0xff]  ;;  %v7143_v17 = vld [vmem:[%s10739_s7 + $0x190] sm:$0xff]   ;;  %v7145_v1 = vld [vmem:[%s10739_s7 + $0x1d8] sm:$0xff]  }
 0x5e9   : > { %v6544_v60 = vcombine.low %v4479_v8, %v4480_v4  ;;  %v7129_v28 = vld [vmem:[%s10739_s7 + $0x108] sm:$0xff]   ;;  %v4320_v46 = vsel %vm673_vm4, %v9468_v14, %v9781_v51  ;;  %v4111_v53 = vpack.c.bf16 %v4103_v41, %v4103_v41  ;;  %v7133_v8 = vld [vmem:[%s10739_s7 + $0x158] sm:$0xff]  }
 0x5ea   : > { %v4176_v62 = vpop.permute.xlu1 %4175  ;;  %5741 = vmatprep.mubr.bf16.mxu0 %v6533_v52  ;;  %5806 = vmatprep.mubr.bf16.mxu1 %v6535_v7  ;;  %v4278_v18 = vpop.permute.xlu0 %4277  ;;  %v4428_v52 = vsel %vm673_vm4, %v9651_v40, %v9781_v51  ;;  %v10982_v41 = vld [vmem:[#allocation12_spill] sm:$0xff] }
 0x5eb   : > { %v4352_v59 = vsel %vm2526_vm14, %v4336_v0, %v4176_v62  ;;  %v10039_v50 = vsel %vm2526_vm14, %v4441_v36, %v4278_v18  ;;  %5807 = vmatmul.mubr.bf16.vlgmr.msra.gmra.mrb[24].mxu1 %v6534_v49  ;;  %v4340_v36 = vsel %vm1202_vm11, %v4320_v46, %v9791_v34  ;;  %v4440_v45 = vsel %vm1202_vm11, %v4428_v52, %v9791_v34  ;;  %v7149_v18 = vld [vmem:[%s10739_s7 + $0x1e0] sm:$0xff]   ;;  %v10983_v46 = vld [vmem:[#allocation56_spill] sm:$0xff] }
 0x5ec   : > { %v6532_v21 = vcombine.low %v4350_v13, %v4352_v59  ;;  %4647 = vrot.lane.b32.xlu1 %v9742_v29, %s10853_s27  ;;  %4281 = vrot.lane.b32.xlu0 %v9978_v37, %s7231_s18  ;;  %v4356_v14 = vsel %vm2526_vm14, %v4340_v36, %v9870_v55  ;;  %v7131_v55 = vld [vmem:[%s10739_s7 + $0x110] sm:$0xff]   ;;  %v4778_v0 = vsel %vm673_vm4, %v9482_v2, %v9623_v44  ;;  %v10977_v59 = vld [vmem:[#allocation54_spill] sm:$0xff] }
 0x5ed   : > { %5814 = vmatprep.mubr.bf16.mxu1 %v6544_v60  ;;  %6883 = vmatpush3.bf16.msra.mxu1 %v7135_v12  ;;  %v4452_v9 = vsel %vm2526_vm14, %v4440_v45, %v9800_v38  ;;  %v10978_v2 = vld [vmem:[#allocation17_spill] sm:$0xff]  ;;  %v7151_v60 = vld [vmem:[%s10739_s7 + $0x1a0] sm:$0xff]  }
 0x5ee   : > { %v4552_v16 = vpop.permute.xlu1 %4551  ;;  %5742 = vmatmul.mubr.bf16.vlgmr.msra.gmra.mrb[24].mxu0 %v6532_v21  ;;  %v4130_v22 = vpop.permute.xlu0 %4129  ;;  %6884 = vmatprep.subr.bf16.mxu1 %v7137_v26  ;;  %v4800_v26 = vsel %vm1202_vm11, %v4778_v0, %v9809_v58  ;;  %v7134_v38 = vld [vmem:[%s10739_s7 + $0x118] sm:$0xff]  }
 0x5ef   : > { %5749 = vmatprep.mubr.bf16.mxu0 %v6542_v47  ;;  %6843 = vmatpush3.bf16.msra.mxu0 %v7127_v61  ;;  %v4317_v31 = vsel %vm673_vm4, %v9684_v11, %v4130_v22  ;;  %v4426_v7 = vsel %vm673_vm4, %v9475_v48, %v4130_v22  ;;  %v4722_v51 = vsel %vm673_vm4, %v9671_v43, %v4552_v16  ;;  %v10980_v61 = vld [vmem:[#allocation20_spill] sm:$0xff]  ;;  %v10981_v22 = vld [vmem:[#allocation11_spill] sm:$0xff]  ;;  %v10998_v45 = vld [vmem:[#allocation10_spill] sm:$0xff] }
 0x5f0   : > { %4559 = vrot.lane.b32.xlu1 %v9895_v27, %s7222_s17  ;;  %4861 = vrot.lane.b32.xlu0 %v4109_v42, %s7231_s18  ;;  %v4775_v35 = vsel %vm673_vm4, %v10980_v61, %v10979_v32  ;;  %v7152_v16 = vld [vmem:[%s10739_s7 + $0x1e8] sm:$0xff]   ;;  %v10145_v42 = vsel %vm2526_vm14, %v4800_v26, %v10981_v22  ;;  %v10988_v61 = vld [vmem:[#allocation9_spill] sm:$0xff] }
 0x5f1   : > { %6844 = vmatprep.subr.bf16.mxu0 %v7128_v5  ;;  %6885 = vmatpush3.bf16.msra.mxu1 %v7139_v19  ;;  %v7136_v19 = vld [vmem:[%s10739_s7 + $0x160] sm:$0xff]  }
 0x5f2   : > { %v4496_v63 = vpop.permute.xlu1 %4495  ;;  %v4154_v10 = vpop.permute.xlu0 %4153  ;;  %6886 = vmatprep.subr.bf16.mxu1 %v7141_v6 }
 0x5f3   : > { %v4338_v4 = vsel %vm1202_vm11, %v4317_v31, %v4154_v10  ;;  %6845 = vmatpush3.bf16.msra.mxu0 %v7129_v28  ;;  %v4439_v49 = vsel %vm1202_vm11, %v4426_v7, %v4154_v10  ;;  %v4672_v21 = vsel %vm673_vm4, %v9719_v24, %v4496_v63  ;;  %v10153_v28 = vsel %vm2526_vm14, %v9927_v39, %v10982_v41  ;;  %v10984_v31 = vld [vmem:[#allocation35_spill] sm:$0xff]  ;;  %v10997_v10 = vld [vmem:[#allocation21_spill] sm:$0xff] }
 0x5f4   : > { %v4354_v11 = vsel %vm2526_vm14, %v4338_v4, %v9802_v56  ;;  %4503 = vrot.lane.b32.xlu1 %v9978_v37, %s7222_s17  ;;  %4865 = vrot.lane.b32.xlu0 %v4111_v53, %s7231_s18  ;;  %v7147_v56 = vld [vmem:[%s10739_s7 + $0x198] sm:$0xff]   ;;  %v4824_v63 = vsel %vm673_vm4, %v9671_v43, %v10984_v31  ;;  %v7138_v53 = vld [vmem:[%s10739_s7 + $0x120] sm:$0xff]  }
 0x5f5   : > { %v6541_v15 = vcombine.low %v4354_v11, %v4356_v14  ;;  %6846 = vmatprep.subr.bf16.mxu0 %v7130_v3  ;;  %6887 = vmatpush3.bf16.msra.mxu1 %v7143_v17  ;;  %v7140_v14 = vld [vmem:[%s10739_s7 + $0x168] sm:$0xff]   ;;  %v7154_v11 = vld [vmem:[%s10739_s7 + $0x1f0] sm:$0xff]  }
 0x5f6   : > { %v4568_v57 = vpop.permute.xlu1 %4567  ;;  %v4274_v12 = vpop.permute.xlu0 %4273  ;;  %6888 = vmatprep.subr.bf16.mxu1 %v7145_v1  ;;  %v7153_v1 = vld [vmem:[%s10739_s7 + $0x1a8] sm:$0xff]  }
 0x5f7   : > { %v4744_v34 = vsel %vm1202_vm11, %v4722_v51, %v4568_v57  ;;  %v4450_v62 = vsel %vm2526_vm14, %v4439_v49, %v4274_v12  ;;  %5750 = vmatmul.mubr.bf16.gmra.mrb[28].mxu0 %v6541_v15  ;;  %v4838_v36 = vsel %vm1202_vm11, %v4824_v63, %v4568_v57  ;;  %v10985_v51 = vld [vmem:[#allocation57_spill] sm:$0xff]  ;;  %v10986_v49 = vld [vmem:[#allocation51_spill] sm:$0xff] }
 0x5f8   : > { %v6543_v13 = vcombine.low %v4450_v62, %v4452_v9  ;;  %4575 = vrot.lane.b32.xlu1 %v10977_v59, %s10853_s27  ;;  %4665 = vrot.lane.b32.xlu0 %v10978_v2, %s7222_s17  ;;  %v4104_v57 = vld [vmem:[#allocation5 + $0x1f1] sm:$0xff]  ;;  %v7142_v12 = vld [vmem:[%s10739_s7 + $0x128] sm:$0xff]  }
 0x5f9   : > { %6847 = vmatpush3.bf16.msra.mxu0 %v7131_v55  ;;  %6889 = vmatpush3.bf16.msra.mxu1 %v7147_v56  ;;  %v4102_v55 = vld [vmem:[#allocation5 + $0x1d1] sm:$0xff]  ;;  %v4112_v59 = vpack.c.bf16 %v4104_v57, %v4104_v57  ;;  %v10991_v57 = vld [vmem:[#allocation16_spill] sm:$0xff] }
 0x5fa   : > { %v4512_v47 = vpop.permute.xlu1 %4511  ;;  %5815 = vmatmul.mubr.bf16.gmra.mrb[28].mxu1 %v6543_v13  ;;  %v10135_v5 = vpop.permute.xlu0 %4637  ;;  %6848 = vmatprep.subr.bf16.mxu0 %v7133_v8  ;;  %v4110_v9 = vpack.c.bf16 %v4102_v55, %v4102_v55  ;;  %v7144_v62 = vld [vmem:[%s10739_s7 + $0x170] sm:$0xff]   ;;  %v10987_v13 = vld [vmem:[#allocation39_spill] sm:$0xff] }
 0x5fb   : > { %v4688_v6 = vsel %vm1202_vm11, %v4672_v21, %v4512_v47  ;;  %v4798_v24 = vsel %vm1202_vm11, %v4775_v35, %v10135_v5  ;;  %6890 = vmatprep.subr.bf16.mxu1 %v7149_v18  ;;  %v7156_v18 = vld [vmem:[%s10739_s7 + $0x1f8] sm:$0xff]  }
 0x5fc   : > { %v10157_v3 = vsel %vm2526_vm14, %v4688_v6, %v10981_v22  ;;  %v10161_v17 = vsel %vm2526_vm14, %v4798_v24, %v10982_v41  ;;  %4519 = vrot.lane.b32.xlu1 %v10983_v46, %s10853_s27  ;;  %4625 = vrot.lane.b32.xlu0 %v9940_v33, %s7222_s17  ;;  %v10989_v21 = vld [vmem:[#allocation49_spill] sm:$0xff] }
 0x5fd   : > { %6849 = vmatpush3.bf16.msra.mxu0 %v7134_v38  ;;  %6891 = vmatpush3.bf16.msra.mxu1 %v7151_v60  ;;  %v7146_v38 = vld [vmem:[%s10739_s7 + $0x130] sm:$0xff]   ;;  %v7157_v60 = vld [vmem:[%s10739_s7 + $0x1b8] sm:$0xff]  }
 0x5fe   : > { %v4592_v4 = vpop.permute.xlu1 %4591  ;;  %v4210_v43 = vpop.permute.xlu0 %4209  ;;  %6850 = vmatprep.subr.bf16.mxu0 %v7136_v19  ;;  %6892 = vmatprep.subr.bf16.mxu1 %v7152_v16  ;;  %v10990_v16 = vld [vmem:[#allocation15_spill] sm:$0xff]  ;;  %v7148_v24 = vld [vmem:[%s10739_s7 + $0x178] sm:$0xff]  }
 0x5ff   : > { %v10188_v52 = vsel %vm2526_vm14, %v4744_v34, %v4592_v4  ;;  %v10191_v7 = vsel %vm2526_vm14, %v4838_v36, %v4592_v4  ;;  %v4385_v15 = vsel %vm673_vm4, %v9942_v54, %v4210_v43  ;;  %v7155_v54 = vld [vmem:[%s10739_s7 + $0x1b0] sm:$0xff]   ;;  %v4105_v34 = vld [vmem:[#allocation5 + $0x201] sm:$0xff]  ;;  %v7150_v4 = vld [vmem:[%s10739_s7 + $0x138] sm:$0xff]  }
 0x600   : > { %4599 = vrot.lane.b32.xlu1 %v10985_v51, %s7231_s18  ;;  %4645 = vrot.lane.b32.xlu0 %v10986_v49, %s10853_s27  ;;  %v4113_v2 = vpack.c.bf16 %v4105_v34, %v4105_v34  ;;  %v4474_v22 = vsel %vm1202_vm11, %v4385_v15, %v10990_v16  ;;  %v4076_v36 = vld [vmem:[#allocation5 + $0x230] sm:$0xff] }
 0x601   : > { %6851 = vmatpush3.bf16.msra.mxu0 %v7138_v53  ;;  %6893 = vmatpush3.bf16.msra.mxu1 %v7153_v1  ;;  %v4107_v1 = vld [vmem:[#allocation5 + $0x221] sm:$0xff] }
 0x602   : > { %v4140_v8 = vpop.permute.xlu1 %4139  ;;  %v4234_v0 = vpop.permute.xlu0 %4233  ;;  %6852 = vmatprep.subr.bf16.mxu0 %v7140_v14  ;;  %6894 = vmatprep.subr.bf16.mxu1 %v7154_v11  ;;  %v4115_v11 = vpack.c.bf16 %v4107_v1, %v4107_v1  ;;  %v10994_v1 = vld [vmem:[#allocation19_spill] sm:$0xff] }
 0x603   : > { %v4402_v26 = vsel %vm1202_vm11, %v4385_v15, %v4234_v0  ;;  %v4332_v35 = vsel %vm673_vm4, %v10988_v61, %v4140_v8  ;;  %v4436_v47 = vsel %vm673_vm4, %v10989_v21, %v4140_v8  ;;  %v10254_v15 = vld [vmem:[%s10739_s7 + $0x200] sm:$0xff]   ;;  %v10992_v61 = vld [vmem:[#allocation24_spill] sm:$0xff] }
 0x604   : > { %4863 = vrot.lane.b32.xlu1 %v4110_v9, %s7231_s18  ;;  %4649 = vrot.lane.b32.xlu0 %v10987_v13, %s10853_s27 }
 0x605   : > { %6853 = vmatpush3.bf16.msra.mxu0 %v7142_v12  ;;  %6895 = vmatpush3.bf16.msra.mxu1 %v7155_v54  ;;  %v4084_v12 = vpack.c.bf16 %v4076_v36, %v4076_v36  ;;  %v4092_v54 = vld [vmem:[#allocation5 + $0x1a1] sm:$0xff] }
 0x606   : > { %v4164_v19 = vpop.permute.xlu1 %4163  ;;  %v4258_v6 = vpop.permute.xlu0 %4257  ;;  %6854 = vmatprep.subr.bf16.mxu0 %v7144_v62  ;;  %6896 = vmatprep.subr.bf16.mxu1 %v7156_v18  ;;  %v4100_v9 = vpack.c.bf16 %v4092_v54, %v4092_v54  ;;  %v4106_v18 = vld [vmem:[#allocation5 + $0x211] sm:$0xff] }
 0x607   : > { %v10235_v41 = vsel %vm1202_vm11, %v4332_v35, %v4164_v19  ;;  %v4444_v31 = vsel %vm1202_vm11, %v4436_v47, %v4164_v19  ;;  %v10239_v63 = vsel %vm2526_vm14, %v4402_v26, %v4258_v6  ;;  %v10242_v53 = vsel %vm2526_vm14, %v4474_v22, %v4258_v6  ;;  %v4108_v26 = vld [vmem:[#allocation5 + $0x231] sm:$0xff] }
 0x608   : > { %4867 = vrot.lane.b32.xlu1 %v4112_v59, %s7231_s18  ;;  %4869 = vrot.lane.b32.xlu0 %v4113_v2, %s7231_s18 }
 0x609   : > { %6855 = vmatpush3.bf16.msra.mxu0 %v7146_v38  ;;  %6897 = vmatpush3.bf16.msra.mxu1 %v7157_v60  ;;  %v4114_v38 = vpack.c.bf16 %v4106_v18, %v4106_v18  ;;  %v4116_v60 = vpack.c.bf16 %v4108_v26, %v4108_v26 }
 0x60a   : > { %v4284_v43 = vpop.permute.xlu1 %4283  ;;  %v10249_v14 = vpop.permute.xlu0 %4185  ;;  %6856 = vmatprep.subr.bf16.mxu0 %v7148_v24 }
 0x60b   : > { %v10257_v55 = vsel %vm2526_vm14, %v4444_v31, %v4284_v43 }
 0x60c   : > { %4667 = vrot.lane.b32.xlu1 %v10991_v57, %s7222_s17  ;;  %4873 = vrot.lane.b32.xlu0 %v4115_v11, %s7231_s18 }
 0x60d   : > { %6857 = vmatpush3.bf16.msra.mxu0 %v7150_v4 }
 0x60e   : > { %v10262_v8 = vpop.permute.xlu1 %4135  ;;  %v4562_v0 = vpop.permute.xlu0 %4561  ;;  %6980 = vmatprep.subr.bf16.mxu0 %v10254_v15 }
 0x610   : > { %4627 = vrot.lane.b32.xlu1 %v4084_v12, %s7222_s17  ;;  %v10999_v12 = vld [vmem:[#allocation8_spill] sm:$0xff] }
 0x612   : > { %v10266_v34 = vpop.permute.xlu1 %4159  ;;  %v4506_v62 = vpop.permute.xlu0 %4505 }
 0x613   : > { %v4682_v35 = vsel %vm673_vm4, %v10992_v61, %v4506_v62 }
 0x614   : > { %4651 = vrot.lane.b32.xlu1 %v4100_v9, %s10853_s27 }
 0x616   : > { %v4280_v59 = vpop.permute.xlu1 %4279  ;;  %v10269_v2 = vpop.permute.xlu0 %4577 }
 0x618   : > { %4871 = vrot.lane.b32.xlu1 %v4114_v38, %s7231_s18 }
 0x61a   : > { %v4212_v47 = vpop.permute.xlu1 %4211  ;;  %v4522_v19 = vpop.permute.xlu0 %4521 }
 0x61b   : > { %v10275_v16 = vsel %vm1202_vm11, %v4682_v35, %v4522_v19  ;;  %v4388_v24 = vsel %vm673_vm4, %v9940_v33, %v4212_v47 }
 0x61c   : > { %4875 = vrot.lane.b32.xlu1 %v4116_v60, %s7231_s18  ;;  %v4476_v36 = vsel %vm1202_vm11, %v4388_v24, %v10994_v1 }
 0x61e   : > { %v4236_v22 = vpop.permute.xlu1 %4235  ;;  %v10278_v6 = vpop.permute.xlu0 %4601 }
 0x61f   : > { %10993 = vst [vmem:[#allocation54_spill] sm:$0xff] %v10278_v6  ;;  %v4404_v31 = vsel %vm1202_vm11, %v4388_v24, %v4236_v22 }
 0x622   : > { %v4260_v4 = vpop.permute.xlu1 %4259  ;;  %v4206_v43 = vpop.permute.xlu0 %4205 }
 0x623   : > { %v10286_v11 = vsel %vm2526_vm14, %v4404_v31, %v4260_v4  ;;  %v4484_v57 = vsel %vm2526_vm14, %v4476_v36, %v4260_v4 }
 0x624   : > { %v6562_v54 = vcombine.low %v10242_v53, %v4484_v57  ;;  %v4737_v53 = vsel %vm673_vm4, %v9742_v29, %v4562_v0 }
 0x625   : > { %v4754_v1 = vsel %vm1202_vm11, %v4737_v53, %v10269_v2 }
 0x626   : > { %v4188_v9 = vpop.permute.xlu1 %4187  ;;  %v4230_v62 = vpop.permute.xlu0 %4229  ;;  %v10315_v57 = vsel %vm2526_vm14, %v4754_v1, %v10278_v6  ;;  %v4379_v1 = vsel %vm673_vm4, %v10997_v10, %v4206_v43  ;;  %v11000_v6 = vld [vmem:[#allocation26_spill] sm:$0xff] }
 0x627   : > { %v4398_v56 = vsel %vm1202_vm11, %v4379_v1, %v4230_v62  ;;  %v4470_v37 = vsel %vm1202_vm11, %v4379_v1, %v10999_v12 }
 0x62a   : > { %v4564_v33 = vpop.permute.xlu1 %4563  ;;  %v4254_v18 = vpop.permute.xlu0 %4253 }
 0x62b   : > { %v4740_v31 = vsel %vm673_vm4, %v10987_v13, %v4564_v33  ;;  %v4414_v43 = vsel %vm2526_vm14, %v4398_v56, %v4254_v18 }
 0x62e   : > { %v4508_v26 = vpop.permute.xlu1 %4507  ;;  %v4182_v38 = vpop.permute.xlu0 %4181 }
 0x62f   : > { %v4684_v47 = vsel %vm673_vm4, %v10989_v21, %v4508_v26 }
 0x632   : > { %v10292_v60 = vpop.permute.xlu1 %4579  ;;  %v10294_v35 = vpop.permute.xlu0 %4557 }
 0x633   : > { %10995 = vst [vmem:[#allocation17_spill] sm:$0xff] %v10292_v60  ;;  %v4756_v36 = vsel %vm1202_vm11, %v4740_v31, %v10292_v60  ;;  %v4432_v31 = vsel %vm673_vm4, %v10985_v51, %v10262_v8 }
 0x634   : > { %v4442_v39 = vsel %vm1202_vm11, %v4432_v31, %v10266_v34  ;;  %v11001_v31 = vld [vmem:[#allocation44_spill] sm:$0xff] }
 0x635   : > { %v4456_v33 = vsel %vm2526_vm14, %v4442_v39, %v4280_v59  ;;  %v4326_v12 = vsel %vm673_vm4, %v11001_v31, %v10262_v8  ;;  %v11009_v31 = vld [vmem:[#allocation58_spill] sm:$0xff] }
 0x636   : > { %v4524_v19 = vpop.permute.xlu1 %4523  ;;  %v10298_v22 = vpop.permute.xlu0 %4501 }
 0x637   : > { %v4700_v24 = vsel %vm1202_vm11, %v4684_v47, %v4524_v19 }
 0x63a   : > { %v10309_v4 = vpop.permute.xlu1 %4603  ;;  %v10311_v21 = vpop.permute.xlu0 %4573 }
 0x63b   : > { %10996 = vst [vmem:[#allocation38_spill] sm:$0xff] %v10309_v4  ;;  %v10319_v0 = vsel %vm2526_vm14, %v4756_v36, %v10309_v4 }
 0x63e   : > { %v4208_v26 = vpop.permute.xlu1 %4207  ;;  %v10323_v47 = vpop.permute.xlu0 %4517 }
 0x63f   : > { %v4382_v36 = vsel %vm673_vm4, %v10998_v45, %v4208_v26  ;;  %v4481_v45 = vsel %vm2526_vm14, %v4470_v37, %v4254_v18 }
 0x640   : > { %v4472_v60 = vsel %vm1202_vm11, %v4382_v36, %v11000_v6  ;;  %v4344_v6 = vsel %vm1202_vm11, %v4326_v12, %v10266_v34 }
 0x642   : > { %v4232_v19 = vpop.permute.xlu1 %4231  ;;  %v10325_v53 = vpop.permute.xlu0 %4597 }
 0x643   : > { %v4400_v4 = vsel %vm1202_vm11, %v4382_v36, %v4232_v19  ;;  %v6552_v19 = vcombine.low %v10039_v50, %v4456_v33  ;;  %v4364_v50 = vsel %vm2526_vm14, %v10235_v41, %v4188_v9 }
 0x646   : > { %v4256_v13 = vpop.permute.xlu1 %4255  ;;  %v4138_v10 = vpop.permute.xlu0 %4137 }
 0x647   : > { %v4416_v26 = vsel %vm2526_vm14, %v4400_v4, %v4256_v13  ;;  %v4482_v39 = vsel %vm2526_vm14, %v4472_v60, %v4256_v13  ;;  %v4329_v56 = vsel %vm673_vm4, %v9895_v27, %v4138_v10  ;;  %v4358_v13 = vsel %vm2526_vm14, %v10008_v30, %v4182_v38 }
 0x648   : > { %v6551_v59 = vcombine.low %v4414_v43, %v4416_v26  ;;  %v6553_v62 = vcombine.low %v4481_v45, %v4482_v39  ;;  %v11002_v30 = vcombine.low %v10239_v63, %v10286_v11  ;;  %v11003_v11 = vcombine.low %v9949_v23, %v10188_v52  ;;  %v11004_v43 = vld [vmem:[#allocation50_spill] sm:$0xff]  ;;  %v11006_v26 = vld [vmem:[#allocation53_spill] sm:$0xff]  ;;  %v11010_v23 = vld [vmem:[#allocation43_spill] sm:$0xff] }
 0x649   : > { %v11005_v45 = vld [vmem:[#allocation30_spill] sm:$0xff] }
 0x64a   : > { %v4184_v1 = vpop.permute.xlu1 %4183  ;;  %5757 = vmatprep.mubr.bf16.mxu0 %v6551_v59  ;;  %5822 = vmatprep.mubr.bf16.mxu1 %v6553_v62  ;;  %v4162_v37 = vpop.permute.xlu0 %4161  ;;  %v11008_v59 = vld [vmem:[#allocation18_spill] sm:$0xff] }
 0x64b   : > { %v4360_v18 = vsel %vm2526_vm14, %v4344_v6, %v4184_v1  ;;  %v4346_v60 = vsel %vm1202_vm11, %v4329_v56, %v4162_v37  ;;  %5823 = vmatmul.mubr.bf16.gmra.mrb[32].mxu1 %v6552_v19  ;;  %v11011_v56 = vld [vmem:[#allocation47_spill] sm:$0xff] }
 0x64c   : > { %v6550_v8 = vcombine.low %v4358_v13, %v4360_v18  ;;  %v4362_v34 = vsel %vm2526_vm14, %v4346_v60, %v10249_v14  ;;  %5830 = vmatprep.mubr.bf16.mxu1 %v6562_v54  ;;  %v7159_v13 = vld [vmem:[%s10739_s7 + $0x208] sm:$0xff]  }
 0x64d   : > { %v6559_v27 = vcombine.low %v4362_v34, %v4364_v50  ;;  %v11012_v18 = vld [vmem:[#allocation52_spill] sm:$0xff]  ;;  %v11013_v34 = vld [vmem:[#allocation55_spill] sm:$0xff] }
 0x64e   : > { %v10363_v4 = vpop.permute.xlu1 %4643  ;;  %5758 = vmatmul.mubr.bf16.gmra.mrb[32].mxu0 %v6550_v8  ;;  %v10365_v33 = vpop.permute.xlu0 %4641  ;;  %v4676_v60 = vsel %vm673_vm4, %v9651_v40, %v11012_v18  ;;  %v4434_v8 = vsel %vm673_vm4, %v10992_v61, %v4138_v10  ;;  %v11016_v61 = vld [vmem:[#allocation45_spill] sm:$0xff] }
 0x64f   : > { %5765 = vmatprep.mubr.bf16.mxu0 %v11002_v30  ;;  %v4443_v30 = vsel %vm1202_vm11, %v4434_v8, %v4162_v37 }
 0x652   : > { %v10370_v38 = vpop.permute.xlu1 %4547  ;;  %v10372_v36 = vpop.permute.xlu0 %4545 }
 0x653   : > { %v10376_v41 = vsel %vm2526_vm14, %v4700_v24, %v10370_v38  ;;  %v10381_v14 = vsel %vm2526_vm14, %v10275_v16, %v10372_v36  ;;  %v4728_v24 = vsel %vm673_vm4, %v11005_v45, %v11004_v43  ;;  %v11007_v16 = vld [vmem:[#allocation40_spill] sm:$0xff]  ;;  %v11014_v43 = vcombine.low %v10153_v28, %v10157_v3  ;;  %v11017_v3 = vld [vmem:[#allocation31_spill] sm:$0xff] }
 0x654   : > { %v6563_v54 = vcombine.low %v10381_v14, %v10376_v41  ;;  %v4748_v39 = vsel %vm1202_vm11, %v4728_v24, %v11006_v26  ;;  %v4725_v62 = vsel %vm673_vm4, %v11008_v59, %v11007_v16  ;;  %v7160_v28 = vld [vmem:[%s10739_s7 + $0x210] sm:$0xff]  }
 0x655   : > { %v4764_v12 = vsel %vm2526_vm14, %v4748_v39, %v11009_v31  ;;  %v4746_v52 = vsel %vm1202_vm11, %v4725_v62, %v11010_v23  ;;  %v11015_v39 = vld [vmem:[#allocation41_spill] sm:$0xff]  ;;  %v11038_v14 = vld [vmem:[#allocation28_spill] sm:$0xff] }
 0x656   : > { %v10385_v9 = vpop.permute.xlu1 %4663  ;;  %5766 = vmatmul.mubr.bf16.gmra.mrb[36].mxu0 %v6559_v27  ;;  %v4662_v63 = vpop.permute.xlu0 %4661  ;;  %v4762_v1 = vsel %vm2526_vm14, %v4746_v52, %v11011_v56  ;;  %v4692_v27 = vsel %vm1202_vm11, %v4676_v60, %v11013_v34  ;;  %v4674_v40 = vsel %vm673_vm4, %v9475_v48, %v11015_v39  ;;  %v11018_v52 = vld [vmem:[#allocation32_spill] sm:$0xff]  ;;  %v11021_v34 = vld [vmem:[#allocation25_spill] sm:$0xff]  ;;  %v11025_v39 = vld [vmem:[#allocation46_spill] sm:$0xff] }
 0x657   : > { %5871 = vmatprep.mubr.bf16.mxu0 %v11003_v11  ;;  %v6546_v50 = vcombine.low %v4762_v1, %v4764_v12  ;;  %v4690_v10 = vsel %vm1202_vm11, %v4674_v40, %v11016_v61  ;;  %v4708_v62 = vsel %vm2526_vm14, %v4692_v27, %v11017_v3  ;;  %v11019_v1 = vcombine.low %v9952_v25, %v10191_v7 }
 0x658   : > { %v4826_v27 = vsel %vm673_vm4, %v11008_v59, %v11021_v34  ;;  %v11022_v59 = vld [vmem:[#allocation13_spill] sm:$0xff] }
 0x65a   : > { %v10400_v19 = vpop.permute.xlu1 %4623  ;;  %v10402_v6 = vpop.permute.xlu0 %4621 }
 0x65e   : > { %v10419_v11 = vpop.permute.xlu1 %4647  ;;  %5872 = vmatmul.mubr.bf16.vlgmr.msra.gmra.mrb[40].mxu0 %v11014_v43  ;;  %v4282_v24 = vpop.permute.xlu0 %4281  ;;  %v11023_v43 = vld [vmem:[#allocation37_spill] sm:$0xff] }
 0x65f   : > { %v4458_v16 = vsel %vm2526_vm14, %v4443_v30, %v4282_v24  ;;  %5879 = vmatprep.mubr.bf16.mxu0 %v6546_v50  ;;  %6981 = vmatpush3.bf16.msra.mxu0 %v10254_v15  ;;  %v4706_v15 = vsel %vm2526_vm14, %v4690_v10, %v11018_v52  ;;  %v7161_v50 = vld [vmem:[%s10739_s7 + $0x218] sm:$0xff]   ;;  %v11026_v10 = vcombine.low %v10161_v17, %v10145_v42  ;;  %v4057_v42 = vld [vmem:[#allocation5 + $0x180] sm:$0xff] }
 0x660   : > { %v6561_v37 = vcombine.low %v4458_v16, %v10257_v55  ;;  %6982 = vmatprep.subr.bf16.mxu0 %v7159_v13  ;;  %v11020_v55 = vld [vmem:[#allocation34_spill] sm:$0xff]  ;;  %v6545_v60 = vcombine.low %v4706_v15, %v4708_v62  ;;  %v7163_v15 = vld [vmem:[%s10739_s7 + $0x228] sm:$0xff]   ;;  %v4065_v34 = vpack.c.bf16 %v4057_v42, %v4057_v42 }
 0x661   : > { %v4828_v18 = vsel %vm673_vm4, %v11005_v45, %v11020_v55  ;;  %v4839_v45 = vsel %vm1202_vm11, %v4826_v27, %v11010_v23  ;;  %v11024_v24 = vld [vmem:[#allocation22_spill] sm:$0xff] }
 0x662   : > { %v4560_v12 = vpop.permute.xlu1 %4559  ;;  %5831 = vmatmul.mubr.bf16.gmra.mrb[36].mxu1 %v6561_v37  ;;  %v10437_v48 = vpop.permute.xlu0 %4861  ;;  %v4840_v8 = vsel %vm1202_vm11, %v4828_v18, %v11006_v26  ;;  %v4847_v30 = vsel %vm2526_vm14, %v4839_v45, %v11011_v56  ;;  %v7162_v26 = vld [vmem:[%s10739_s7 + $0x220] sm:$0xff]   ;;  %v4784_v40 = vsel %vm673_vm4, %v11025_v39, %v11024_v24 }
 0x663   : > { %5936 = vmatprep.mubr.bf16.mxu1 %v11019_v1  ;;  %6983 = vmatpush3.bf16.msra.mxu0 %v7159_v13  ;;  %v4848_v25 = vsel %vm2526_vm14, %v4840_v8, %v11009_v31  ;;  %v4781_v31 = vsel %vm673_vm4, %v11023_v43, %v11022_v59  ;;  %v4804_v23 = vsel %vm1202_vm11, %v4784_v40, %v10363_v4 }
 0x664   : > { %6984 = vmatprep.subr.bf16.mxu0 %v7160_v28  ;;  %v6548_v16 = vcombine.low %v4847_v30, %v4848_v25  ;;  %v4802_v56 = vsel %vm1202_vm11, %v4781_v31, %v10365_v33  ;;  %v4816_v1 = vsel %vm2526_vm14, %v4804_v23, %v11017_v3  ;;  %v4678_v3 = vsel %vm673_vm4, %v9785_v20, %v10298_v22  ;;  %v11028_v30 = vld [vmem:[#allocation23_spill] sm:$0xff]  ;;  %v11029_v31 = vld [vmem:[#allocation33_spill] sm:$0xff] }
 0x665   : > { %v4815_v55 = vsel %vm2526_vm14, %v4802_v56, %v11018_v52  ;;  %v4832_v20 = vsel %vm673_vm4, %v10986_v49, %v10385_v9  ;;  %v4734_v22 = vsel %vm673_vm4, %v10986_v49, %v4560_v12  ;;  %v4790_v49 = vsel %vm673_vm4, %v4065_v34, %v10400_v19  ;;  %v11030_v56 = vld [vmem:[#allocation14_spill] sm:$0xff] }
 0x666   : > { %v4504_v7 = vpop.permute.xlu1 %4503  ;;  %5880 = vmatmul.mubr.bf16.gmra.mrb[44].mxu0 %v6545_v60  ;;  %v10457_v13 = vpop.permute.xlu0 %4865  ;;  %v6547_v27 = vcombine.low %v4815_v55, %v4816_v1  ;;  %v4808_v40 = vsel %vm1202_vm11, %v4790_v49, %v10419_v11  ;;  %v7165_v1 = vld [vmem:[%s10739_s7 + $0x238] sm:$0xff]  }
 0x667   : > { %6985 = vmatpush3.bf16.msra.mxu0 %v7160_v28  ;;  %v11027_v28 = vld [vmem:[#allocation42_spill] sm:$0xff] }
 0x668   : > { %6986 = vmatprep.subr.bf16.mxu0 %v7161_v50  ;;  %v4830_v62 = vsel %vm673_vm4, %v11027_v28, %v4662_v63  ;;  %v4680_v63 = vsel %vm673_vm4, %v10985_v51, %v4504_v7  ;;  %v4694_v51 = vsel %vm1202_vm11, %v4678_v3, %v10323_v47  ;;  %v4787_v47 = vsel %vm673_vm4, %v10983_v46, %v10402_v6 }
 0x669   : > { %v4841_v17 = vsel %vm1202_vm11, %v4830_v62, %v10311_v21  ;;  %v4710_v39 = vsel %vm2526_vm14, %v4694_v51, %v11029_v31  ;;  %v11033_v51 = vld [vmem:[#allocation39_spill] sm:$0xff] }
 0x66a   : > { %v4576_v61 = vpop.permute.xlu1 %4575  ;;  %5937 = vmatmul.mubr.bf16.vlgmr.msra.gmra.mrb[40].mxu1 %v11026_v10  ;;  %v10479_v37 = vpop.permute.xlu0 %4665  ;;  %v11031_v10 = vld [vmem:[#allocation29_spill] sm:$0xff] }
 0x66b   : > { %5944 = vmatprep.mubr.bf16.mxu1 %v6548_v16  ;;  %6987 = vmatpush3.bf16.msra.mxu0 %v7161_v50  ;;  %v4731_v50 = vsel %vm673_vm4, %v11027_v28, %v10294_v35  ;;  %v7164_v35 = vld [vmem:[%s10739_s7 + $0x230] sm:$0xff]   ;;  %v4752_v7 = vsel %vm1202_vm11, %v4734_v22, %v4576_v61  ;;  %v4842_v45 = vsel %vm1202_vm11, %v4832_v20, %v4576_v61  ;;  %v11036_v20 = vld [vmem:[#allocation54_spill] sm:$0xff] }
 0x66c   : > { %6988 = vmatprep.subr.bf16.mxu0 %v7162_v26  ;;  %v4750_v8 = vsel %vm1202_vm11, %v4731_v50, %v10311_v21  ;;  %v4849_v21 = vsel %vm2526_vm14, %v4841_v17, %v10325_v53  ;;  %v4880_v61 = vsel %vm673_vm4, %v11030_v56, %v9623_v44  ;;  %v4878_v28 = vsel %vm673_vm4, %v11031_v10, %v10979_v32 }
 0x66d   : > { %v4766_v25 = vsel %vm2526_vm14, %v4750_v8, %v10325_v53  ;;  %v4894_v55 = vsel %vm1202_vm11, %v4880_v61, %v9809_v58  ;;  %v4893_v42 = vsel %vm1202_vm11, %v4878_v28, %v10135_v5  ;;  %v4818_v44 = vsel %vm2526_vm14, %v4808_v40, %v11028_v30  ;;  %v11040_v40 = vld [vmem:[#allocation27_spill] sm:$0xff] }
 0x66e   : > { %v4520_v18 = vpop.permute.xlu1 %4519  ;;  %v10494_v60 = vpop.permute.xlu0 %4625  ;;  %v4902_v32 = vsel %vm2526_vm14, %v4893_v42, %v10437_v48  ;;  %v11032_v50 = vcombine.low %v10315_v57, %v10319_v0  ;;  %v4834_v3 = vsel %vm673_vm4, %v9742_v29, %v10479_v37  ;;  %v4059_v57 = vld [vmem:[#allocation5 + $0x1a0] sm:$0xff]  ;;  %v11034_v0 = vld [vmem:[#allocation36_spill] sm:$0xff]  ;;  %v11035_v29 = vld [vmem:[#allocation17_spill] sm:$0xff] }
 0x66f   : > { %v4696_v52 = vsel %vm1202_vm11, %v4680_v63, %v4520_v18  ;;  %6989 = vmatpush3.bf16.msra.mxu0 %v7162_v26  ;;  %v4843_v48 = vsel %vm1202_vm11, %v4834_v3, %v10269_v2 }
 0x670   : > { %6990 = vmatprep.subr.bf16.mxu0 %v7163_v15  ;;  %v4712_v26 = vsel %vm2526_vm14, %v4696_v52, %v11028_v30  ;;  %v4058_v52 = vld [vmem:[#allocation5 + $0x190] sm:$0xff]  ;;  %v4851_v22 = vsel %vm2526_vm14, %v4843_v48, %v11036_v20 }
 0x672   : > { %v4600_v43 = vpop.permute.xlu1 %4599  ;;  %5945 = vmatmul.mubr.bf16.gmra.mrb[44].mxu1 %v6547_v27  ;;  %v10526_v9 = vpop.permute.xlu0 %4645  ;;  %v4884_v27 = vsel %vm673_vm4, %v11034_v0, %v11024_v24  ;;  %v7166_v0 = vld [vmem:[%s10746_s14] sm:$0xff]  }
 0x673   : > { %v4768_v53 = vsel %vm2526_vm14, %v4752_v7, %v4600_v43  ;;  %v4850_v12 = vsel %vm2526_vm14, %v4842_v45, %v4600_v43  ;;  %v4806_v46 = vsel %vm1202_vm11, %v4787_v47, %v10526_v9  ;;  %6991 = vmatpush3.bf16.msra.mxu0 %v7163_v15  ;;  %v6554_v15 = vcombine.low %v4710_v39, %v4712_v26 }
 0x674   : > { %v6555_v16 = vcombine.low %v4766_v25, %v4768_v53  ;;  %v6557_v23 = vcombine.low %v4849_v21, %v4850_v12  ;;  %6992 = vmatprep.subr.bf16.mxu0 %v7164_v35  ;;  %v4817_v62 = vsel %vm2526_vm14, %v4806_v46, %v11029_v31  ;;  %v4896_v2 = vsel %vm1202_vm11, %v4884_v27, %v10363_v4  ;;  %v11037_v21 = vld [vmem:[#allocation38_spill] sm:$0xff]  ;;  %v11039_v31 = vld [vmem:[#allocation59_spill] sm:$0xff] }
 0x675   : > { %v6556_v58 = vcombine.low %v4817_v62, %v4818_v44  ;;  %v4066_v25 = vpack.c.bf16 %v4058_v52, %v4058_v52  ;;  %v4067_v47 = vpack.c.bf16 %v4059_v57, %v4059_v57  ;;  %v4888_v39 = vsel %vm673_vm4, %v11039_v31, %v10400_v19  ;;  %v11041_v19 = vld [vmem:[#allocation7_spill] sm:$0xff]  ;;  %7004 = vmatprep.subr.bf16.mxu1 %v7166_v0 }
 0x676   : > { %v4864_v17 = vpop.permute.xlu1 %4863  ;;  %5887 = vmatprep.mubr.bf16.mxu0 %v6555_v16  ;;  %5952 = vmatprep.mubr.bf16.mxu1 %v6557_v23  ;;  %v4886_v16 = vsel %vm673_vm4, %v11040_v40, %v10402_v6  ;;  %v4898_v56 = vsel %vm1202_vm11, %v4888_v39, %v10419_v11  ;;  %v11042_v6 = vld [vmem:[#allocation48_spill] sm:$0xff] }
 0x677   : > { %v4904_v63 = vsel %vm2526_vm14, %v4894_v55, %v4864_v17  ;;  %5888 = vmatmul.mubr.bf16.gmra.mrb[48].mxu0 %v6554_v15  ;;  %v4793_v26 = vsel %vm673_vm4, %v4066_v25, %v10494_v60  ;;  %v4897_v61 = vsel %vm1202_vm11, %v4886_v16, %v10526_v9  ;;  %v4890_v15 = vsel %vm673_vm4, %v11041_v19, %v10494_v60 }
 0x678   : > { %v6540_v18 = vcombine.low %v4902_v32, %v4904_v63  ;;  %5895 = vmatprep.mubr.bf16.mxu0 %v11032_v50  ;;  %6993 = vmatpush3.bf16.msra.mxu0 %v7164_v35  ;;  %v4650_v35 = vpop.permute.xlu0 %4649 }
 0x679   : > { %6994 = vmatprep.subr.bf16.mxu0 %v7165_v1  ;;  %v4810_v43 = vsel %vm1202_vm11, %v4793_v26, %v4650_v35  ;;  %v4899_v11 = vsel %vm1202_vm11, %v4890_v15, %v4650_v35  ;;  %7005 = vmatpush3.bf16.msra.mxu1 %v7166_v0  ;;  %v7171_v26 = vld [vmem:[%s10746_s14 + $0x28] sm:$0xff]  }
 0x67a   : > { %v4868_v5 = vpop.permute.xlu1 %4867  ;;  %5953 = vmatmul.mubr.bf16.gmra.mrb[48].mxu1 %v6556_v58 }
 0x67b   : > { %v4908_v24 = vsel %vm2526_vm14, %v4896_v2, %v4868_v5 }
 0x67c   : > { %6995 = vmatpush3.bf16.msra.mxu0 %v7165_v1  ;;  %v4870_v53 = vpop.permute.xlu0 %4869 }
 0x67e   : > { %v4668_v8 = vpop.permute.xlu1 %4667 }
 0x67f   : > { %v4836_v34 = vsel %vm673_vm4, %v11033_v51, %v4668_v8  ;;  %5896 = vmatmul.mubr.bf16.gmra.mrb[52].mxu0 %v6563_v54  ;;  %v4882_v54 = vsel %vm673_vm4, %v11038_v14, %v11022_v59 }
 0x680   : > { %v4844_v37 = vsel %vm1202_vm11, %v4836_v34, %v11035_v29  ;;  %6996 = vmatprep.mubr.bf16.mxu0 %v6540_v18  ;;  %v4895_v30 = vsel %vm1202_vm11, %v4882_v54, %v10365_v33  ;;  %v4819_v33 = vsel %vm2526_vm14, %v4810_v43, %v10372_v36  ;;  %v4910_v36 = vsel %vm2526_vm14, %v4897_v61, %v4870_v53  ;;  %v4874_v28 = vpop.permute.xlu0 %4873  ;;  %v7167_v54 = vld [vmem:[%s10746_s14 + $0x8] sm:$0xff]   ;;  %v7172_v43 = vld [vmem:[%s10746_s14 + $0x30] sm:$0xff]  }
 0x681   : > { %v4852_v41 = vsel %vm2526_vm14, %v4844_v37, %v11037_v21  ;;  %v4906_v4 = vsel %vm2526_vm14, %v4895_v30, %v10457_v13  ;;  %v4914_v42 = vsel %vm2526_vm14, %v4899_v11, %v4874_v28  ;;  %7006 = vmatprep.subr.bf16.mxu1 %v7167_v54  ;;  %v7169_v30 = vld [vmem:[%s10746_s14 + $0x18] sm:$0xff]  }
 0x682   : > { %v4628_v7 = vpop.permute.xlu1 %4627  ;;  %v6566_v45 = vcombine.low %v4851_v22, %v4852_v41  ;;  %v6549_v49 = vcombine.low %v4906_v4, %v4908_v24  ;;  %7007 = vmatpush3.bf16.msra.mxu1 %v7167_v54  ;;  %v7170_v4 = vld [vmem:[%s10746_s14 + $0x20] sm:$0xff]  }
 0x683   : > { %v4796_v59 = vsel %vm673_vm4, %v4067_v47, %v4628_v7  ;;  %v4892_v1 = vsel %vm673_vm4, %v11042_v6, %v4628_v7  ;;  %v7168_v7 = vld [vmem:[%s10746_s14 + $0x10] sm:$0xff]  }
 0x684   : > { %5960 = vmatprep.mubr.bf16.mxu1 %v6566_v45  ;;  %7008 = vmatprep.subr.bf16.mxu1 %v7168_v7 }
 0x686   : > { %v4652_v12 = vpop.permute.xlu1 %4651  ;;  %7009 = vmatpush3.bf16.msra.mxu1 %v7168_v7 }
 0x687   : > { %v4812_v46 = vsel %vm1202_vm11, %v4796_v59, %v4652_v12  ;;  %6997 = vmatmul.mubr.bf16.vlgmr.msra.gmra.mrb[56].mxu0 %v6549_v49  ;;  %v4900_v55 = vsel %vm1202_vm11, %v4892_v1, %v4652_v12  ;;  %7010 = vmatprep.subr.bf16.mxu1 %v7169_v30  ;;  %v7173_v49 = vld [vmem:[%s10746_s14 + $0x38] sm:$0xff]  }
 0x688   : > { %v4820_v13 = vsel %vm2526_vm14, %v4812_v46, %v10370_v38 }
 0x689   : > { %v6565_v23 = vcombine.low %v4819_v33, %v4820_v13 }
 0x68a   : > { %v4872_v10 = vpop.permute.xlu1 %4871  ;;  %7011 = vmatpush3.bf16.msra.mxu1 %v7169_v30 }
 0x68b   : > { %v4912_v38 = vsel %vm2526_vm14, %v4898_v56, %v4872_v10  ;;  %5961 = vmatmul.mubr.bf16.gmra.mrb[52].mxu1 %v6565_v23  ;;  %7012 = vmatprep.subr.bf16.mxu1 %v7170_v4 }
 0x68c   : > { %v6558_v62 = vcombine.low %v4910_v36, %v4912_v38 }
 0x68e   : > { %v4876_v9 = vpop.permute.xlu1 %4875  ;;  %7000 = vmatprep.mubr.bf16.mxu0 %v6558_v62  ;;  %7013 = vmatpush3.bf16.msra.mxu1 %v7170_v4 }
 0x68f   : > { %v4916_v17 = vsel %vm2526_vm14, %v4900_v55, %v4876_v9  ;;  %7014 = vmatprep.subr.bf16.mxu1 %v7171_v26 }
 0x690   : > { %v6567_v44 = vcombine.low %v4914_v42, %v4916_v17 }
 0x692   : > { %7001 = vmatmul.mubr.bf16.gmra.mrb[60].mxu0 %v6567_v44  ;;  %7015 = vmatpush3.bf16.msra.mxu1 %v7171_v26 }
 0x693   : > { %7016 = vmatprep.subr.bf16.mxu1 %v7172_v43 }
 0x696   : > { %7017 = vmatpush3.bf16.msra.mxu1 %v7172_v43 }
 0x697   : > { %7018 = vmatprep.subr.bf16.mxu1 %v7173_v49 }
 0x69a   : > { %7019 = vmatpush3.bf16.msra.mxu1 %v7173_v49 }
 0x6be   : > { %v6818_v32 = vpop.f32.mrb[24].mxu1 }
 0x6bf   : > { %v6819_v63 = vpop.f32.mrb[25].mxu1 }
 0x6c0   : > { %v6820_v18 = vadd.f32 %v6819_v63, %v6818_v32  ;;  %v6821_v50 = vpop.f32.mrb[26].mxu1 }
 0x6c1   : > { %v6778_v60 = vpop.f32.mrb[24].mxu0  ;;  %v6822_v58 = vpop.f32.mrb[27].mxu1 }
 0x6c2   : > { %v6823_v5 = vadd.f32 %v6822_v58, %v6821_v50  ;;  %v6779_v3 = vpop.f32.mrb[25].mxu0 }
 0x6c3   : > { %v6780_v48 = vadd.f32 %v6779_v3, %v6778_v60  ;;  %v6781_v52 = vpop.f32.mrb[26].mxu0 }
 0x6c4   : > { %v6782_v8 = vpop.f32.mrb[27].mxu0 }
 0x6c5   : > { %v10620_v51 = vadd.f32 %v6820_v18, %v6780_v48  ;;  %v6783_v34 = vadd.f32 %v6782_v8, %v6781_v52 }
 0x6c7   : > { %v10622_v57 = vadd.f32 %v6823_v5, %v6783_v34 }
 0x6ca   : > { %v6784_v27 = vpop.f32.mrb[28].mxu0 }
 0x6cb   : > { %v6785_v35 = vpop.f32.mrb[29].mxu0 }
 0x6cc   : > { %v6786_v29 = vadd.f32 %v6785_v35, %v6784_v27  ;;  %v6787_v37 = vpop.f32.mrb[30].mxu0 }
 0x6cd   : > { %v6788_v2 = vpop.f32.mrb[31].mxu0  ;;  %v6824_v25 = vpop.f32.mrb[28].mxu1 }
 0x6ce   : > { %v6789_v20 = vadd.f32 %v6788_v2, %v6787_v37  ;;  %v6825_v22 = vpop.f32.mrb[29].mxu1 }
 0x6cf   : > { %v6826_v21 = vadd.f32 %v6825_v22, %v6824_v25  ;;  %v6827_v41 = vpop.f32.mrb[30].mxu1 }
 0x6d0   : > { %v6828_v14 = vpop.f32.mrb[31].mxu1 }
 0x6d1   : > { %v10630_v24 = vadd.f32 %v6826_v21, %v6786_v29  ;;  %v6829_v47 = vadd.f32 %v6828_v14, %v6827_v41 }
 0x6d3   : > { %v10635_v45 = vadd.f32 %v6829_v47, %v6789_v20 }
 0x71e   : > { %v6830_v53 = vpop.f32.mrb[32].mxu1 }
 0x71f   : > { %v6831_v59 = vpop.f32.mrb[33].mxu1 }
 0x720   : > { %v6832_v12 = vadd.f32 %v6831_v59, %v6830_v53  ;;  %v6833_v46 = vpop.f32.mrb[34].mxu1 }
 0x721   : > { %v6790_v33 = vpop.f32.mrb[32].mxu0  ;;  %v6834_v13 = vpop.f32.mrb[35].mxu1 }
 0x722   : > { %v6835_v31 = vadd.f32 %v6834_v13, %v6833_v46  ;;  %v6791_v39 = vpop.f32.mrb[33].mxu0 }
 0x723   : > { %v6792_v40 = vadd.f32 %v6791_v39, %v6790_v33  ;;  %v6793_v16 = vpop.f32.mrb[34].mxu0 }
 0x724   : > { %v6794_v23 = vpop.f32.mrb[35].mxu0 }
 0x725   : > { %v5825_v56 = vadd.f32 %v6832_v12, %v6792_v40  ;;  %v6795_v61 = vadd.f32 %v6794_v23, %v6793_v16 }
 0x727   : > { %v5828_v10 = vadd.f32 %v6835_v31, %v6795_v61 }
 0x729   : > { %v6796_v36 = vpop.f32.mrb[36].mxu0 }
 0x72a   : > { %v6797_v38 = vpop.f32.mrb[37].mxu0 }
 0x72b   : > { %v6798_v28 = vadd.f32 %v6797_v38, %v6796_v36  ;;  %v6799_v62 = vpop.f32.mrb[38].mxu0 }
 0x72c   : > { %v6800_v19 = vpop.f32.mrb[39].mxu0 }
 0x72d   : > { %v6801_v15 = vadd.f32 %v6800_v19, %v6799_v62 }
 0x731   : > { %v6858_v6 = vpop.f32.mrb[40].mxu0 }
 0x732   : > { %v6859_v1 = vpop.f32.mrb[41].mxu0 }
 0x733   : > { %v6860_v11 = vadd.f32 %v6859_v1, %v6858_v6  ;;  %v6861_v55 = vpop.f32.mrb[42].mxu0 }
 0x734   : > { %v6862_v9 = vpop.f32.mrb[43].mxu0 }
 0x735   : > { %v5874_v42 = vadd.f32 %v6860_v11, %v10620_v51  ;;  %v6863_v17 = vadd.f32 %v6862_v9, %v6861_v55  ;;  %v6836_v44 = vpop.f32.mrb[36].mxu1 }
 0x736   : > { %v6837_v32 = vpop.f32.mrb[37].mxu1 }
 0x737   : > { %v5877_v63 = vadd.f32 %v6863_v17, %v10622_v57  ;;  %v6838_v18 = vadd.f32 %v6837_v32, %v6836_v44  ;;  %v6839_v50 = vpop.f32.mrb[38].mxu1  ;;  %v6641_v44 = vld [vmem:[%s10741_s9] ss:$0 sm:$0xff] }
 0x738   : > { %v6840_v60 = vpop.f32.mrb[39].mxu1 }
 0x739   : > { %v5833_v58 = vadd.f32 %v6838_v18, %v6798_v28  ;;  %v6841_v5 = vadd.f32 %v6840_v60, %v6839_v50  ;;  %v6864_v3 = vpop.f32.mrb[44].mxu0 }
 0x73a   : > { %v6865_v48 = vpop.f32.mrb[45].mxu0 }
 0x73b   : > { %v5836_v52 = vadd.f32 %v6841_v5, %v6801_v15  ;;  %v6866_v8 = vadd.f32 %v6865_v48, %v6864_v3  ;;  %v6867_v34 = vpop.f32.mrb[46].mxu0 }
 0x73c   : > { %v6868_v0 = vpop.f32.mrb[47].mxu0 }
 0x73d   : > { %v5882_v27 = vadd.f32 %v6866_v8, %v10630_v24  ;;  %v6869_v35 = vadd.f32 %v6868_v0, %v6867_v34  ;;  %v6898_v51 = vpop.f32.mrb[40].mxu1 }
 0x73e   : > { %v6899_v29 = vpop.f32.mrb[41].mxu1 }
 0x73f   : > { %v5885_v37 = vadd.f32 %v6869_v35, %v10635_v45  ;;  %v6900_v2 = vadd.f32 %v6899_v29, %v6898_v51  ;;  %v6901_v57 = vpop.f32.mrb[42].mxu1 }
 0x740   : > { %v6902_v25 = vpop.f32.mrb[43].mxu1 }
 0x741   : > { %v6903_v20 = vadd.f32 %v6902_v25, %v6901_v57  ;;  %v5939_v22 = vadd.f32 %v6900_v2, %v5874_v42 }
 0x743   : > { %v5942_v21 = vadd.f32 %v6903_v20, %v5877_v63 }
 0x745   : > { %v6904_v41 = vpop.f32.mrb[44].mxu1 }
 0x746   : > { %v6905_v14 = vpop.f32.mrb[45].mxu1 }
 0x747   : > { %v6906_v54 = vadd.f32 %v6905_v14, %v6904_v41  ;;  %v6907_v47 = vpop.f32.mrb[46].mxu1 }
 0x748   : > { %v6908_v7 = vpop.f32.mrb[47].mxu1 }
 0x749   : > { %v6909_v30 = vadd.f32 %v6908_v7, %v6907_v47  ;;  %v5947_v4 = vadd.f32 %v6906_v54, %v5882_v27 }
 0x74a   : > { %v6870_v26 = vpop.f32.mrb[48].mxu0 }
 0x74b   : > { %v6871_v24 = vpop.f32.mrb[49].mxu0  ;;  %v5950_v43 = vadd.f32 %v6909_v30, %v5885_v37 }
 0x74c   : > { %v6872_v49 = vadd.f32 %v6871_v24, %v6870_v26  ;;  %v6873_v53 = vpop.f32.mrb[50].mxu0 }
 0x74d   : > { %v6874_v59 = vpop.f32.mrb[51].mxu0  ;;  %v6910_v45 = vpop.f32.mrb[48].mxu1 }
 0x74e   : > { %v5890_v12 = vadd.f32 %v6872_v49, %v5825_v56  ;;  %v6875_v46 = vadd.f32 %v6874_v59, %v6873_v53  ;;  %v6911_v33 = vpop.f32.mrb[49].mxu1  ;;  %v6640_v56 = vld [vmem:[%s10740_s8] ss:$0 sm:$0xff] }
 0x74f   : > { %v6912_v13 = vadd.f32 %v6911_v33, %v6910_v45  ;;  %v6913_v31 = vpop.f32.mrb[50].mxu1 }
 0x750   : > { %v5893_v39 = vadd.f32 %v6875_v46, %v5828_v10  ;;  %v6914_v40 = vpop.f32.mrb[51].mxu1 }
 0x751   : > { %v6915_v16 = vadd.f32 %v6914_v40, %v6913_v31  ;;  %v5955_v23 = vadd.f32 %v6912_v13, %v5890_v12 }
 0x752   : > { %v6876_v61 = vpop.f32.mrb[52].mxu0 }
 0x753   : > { %v6877_v36 = vpop.f32.mrb[53].mxu0  ;;  %v5958_v38 = vadd.f32 %v6915_v16, %v5893_v39 }
 0x754   : > { %v6878_v28 = vadd.f32 %v6877_v36, %v6876_v61  ;;  %v6879_v62 = vpop.f32.mrb[54].mxu0 }
 0x755   : > { %v6880_v19 = vpop.f32.mrb[55].mxu0 }
 0x756   : > { %v5898_v15 = vadd.f32 %v6878_v28, %v5833_v58  ;;  %v6881_v6 = vadd.f32 %v6880_v19, %v6879_v62 }
 0x758   : > { %v5901_v1 = vadd.f32 %v6881_v6, %v5836_v52 }
 0x75a   : > { %v6998_v11 = vpop.f32.mrb[56].mxu0 }
 0x75b   : > { %v6012_v55 = vadd.f32 %v6998_v11, %v5947_v4  ;;  %v6003_v9 = vpop.f32.mrb[57].mxu0 }
 0x75c   : > { %v6004_v10 = vadd.f32 %v6003_v9, %v5939_v22  ;;  %v6999_v42 = vpop.f32.mrb[58].mxu0  ;;  %v6100_v9 = vlaneseq }
 0x75d   : > { %v6043_v17 = vmul.f32 %v6640_v56, %v6012_v55  ;;  %v6015_v32 = vadd.f32 %v6999_v42, %v5950_v43  ;;  %v6006_v63 = vpop.f32.mrb[59].mxu0 }
 0x75e   : > { %v6041_v18 = vmul.f32 %v6640_v56, %v6004_v10  ;;  %v6007_v50 = vadd.f32 %v6006_v63, %v5942_v21  ;;  %v6916_v60 = vpop.f32.mrb[52].mxu1 }
 0x75f   : > { %v6044_v58 = vmul.f32 %v6640_v56, %v6015_v32  ;;  %v6917_v5 = vpop.f32.mrb[53].mxu1  ;;  %v6058_v34 = vadd.f32 %v6641_v44, %v6043_v17  ;;  %v10697_v17 = vshrl.u32 %v6100_v9, 7 }
 0x760   : > { %v6056_v3 = vadd.f32 %v6641_v44, %v6041_v18  ;;  %v6042_v48 = vmul.f32 %v6640_v56, %v6007_v50  ;;  %v6918_v52 = vadd.f32 %v6917_v5, %v6916_v60  ;;  %v6919_v8 = vpop.f32.mrb[54].mxu1 }
 0x761   : > { %v6059_v0 = vadd.f32 %v6641_v44, %v6044_v58  ;;  %v6920_v27 = vpop.f32.mrb[55].mxu1  ;;  %v10668_v20 = vmax.f32 %v6058_v34, 0.0  ;;  %v6102_v18 = vsub.s32 0, %v10697_v17  ;;  %v6099_v58 = vld [vmem:[%s10742_s10] sm:$0x3] }
 0x762   : > { %v6057_v35 = vadd.f32 %v6641_v44, %v6042_v48  ;;  %v6921_v51 = vadd.f32 %v6920_v27, %v6919_v8  ;;  %v5963_v29 = vadd.f32 %v6918_v52, %v5898_v15  ;;  %v10664_v2 = vmax.f32 %v6056_v3, 0.0 }
 0x763   : > { %v10662_v37 = vmax.f32 %v6059_v0, 0.0  ;;  %v7232_v52 = vmov 0  }
 0x764   : > { %v10666_v57 = vmax.f32 %v6057_v35, 0.0  ;;  %v5966_v25 = vadd.f32 %v6921_v51, %v5901_v1  ;;  %7052 = vset.pattern.permute.xlu0 %v7232_v52 }
 0x765   : > { %v7002_v22 = vpop.f32.mrb[60].mxu0  ;;  %v6136_v47 = vpack.c.bf16 %v10662_v37, %v10668_v20 }
 0x766   : > { %v6072_v21 = vadd.f32 %v10666_v57, %v10664_v2  ;;  %v6028_v41 = vadd.f32 %v7002_v22, %v5963_v29  ;;  %v6019_v14 = vpop.f32.mrb[61].mxu0  ;;  %v6135_v54 = vpack.c.bf16 %v10666_v57, %v10664_v2  ;;  %v6109_v22 = vld [vmem:[%s10743_s11] sm:$0x3] }
 0x767   : > { %v6020_v7 = vadd.f32 %v6019_v14, %v5955_v23  ;;  %v7003_v30 = vpop.f32.mrb[62].mxu0 }
 0x768   : > { %v6047_v4 = vmul.f32 %v6640_v56, %v6028_v41  ;;  %v6031_v26 = vadd.f32 %v7003_v30, %v5966_v25  ;;  %v6022_v24 = vpop.f32.mrb[63].mxu0  ;;  %7020 = vmatprep.mubr.bf16.mxu1 %v6135_v54  ;;  %v6073_v43 = vadd.f32 %v6072_v21, %v10668_v20  ;;  %v6643_v54 = vld [vmem:[#allocation6] ss:$0 sm:$0xff] }
 0x769   : > { %v6045_v49 = vmul.f32 %v6640_v56, %v6020_v7  ;;  %v6023_v53 = vadd.f32 %v6022_v24, %v5958_v38  ;;  %7021 = vmatmul.mubr.bf16.vlgmr.msra.gmra.mrb[56].mxu1 %v6136_v47  ;;  %v6112_v47 = vld [vmem:[%s10744_s12] sm:$0x3] }
 0x76a   : > { %v6048_v59 = vmul.f32 %v6640_v56, %v6031_v26  ;;  %v6062_v46 = vadd.f32 %v6641_v44, %v6047_v4  ;;  %v6074_v31 = vadd.f32 %v6073_v43, %v10662_v37 }
 0x76b   : > { %v6060_v45 = vadd.f32 %v6641_v44, %v6045_v49  ;;  %v6046_v12 = vmul.f32 %v6640_v56, %v6023_v53 }
 0x76c   : > { %v6063_v33 = vadd.f32 %v6641_v44, %v6048_v59  ;;  %v10685_v61 = vmax.f32 %v6062_v46, 0.0 }
 0x76d   : > { %v10677_v13 = vmax.f32 %v6060_v45, 0.0  ;;  %v6061_v39 = vadd.f32 %v6641_v44, %v6046_v12 }
 0x76e   : > { %v10680_v40 = vmax.f32 %v6063_v33, 0.0 }
 0x76f   : > { %v6075_v16 = vadd.f32 %v6074_v31, %v10677_v13  ;;  %v10683_v23 = vmax.f32 %v6061_v39, 0.0 }
 0x770   : > { %v6138_v28 = vpack.c.bf16 %v10680_v40, %v10685_v61 }
 0x771   : > { %v6076_v36 = vadd.f32 %v6075_v16, %v10683_v23  ;;  %v6137_v38 = vpack.c.bf16 %v10683_v23, %v10677_v13 }
 0x773   : > { %v6077_v62 = vadd.f32 %v6076_v36, %v10685_v61  ;;  %7024 = vmatprep.mubr.bf16.mxu1 %v6137_v38 }
 0x774   : > { %7025 = vmatmul.mubr.bf16.gmra.mrb[60].mxu1 %v6138_v28 }
 0x775   : > { %v6078_v19 = vadd.f32 %v6077_v62, %v10680_v40 }
 0x777   : > { %v6079_v15 = vrot.slane %v6078_v19, 4 }
 0x779   : > { %v6080_v6 = vadd.f32 %v6079_v15, %v6078_v19 }
 0x77b   : > { %v6081_v1 = vrot.slane %v6080_v6, 2 }
 0x77d   : > { %v6082_v11 = vadd.f32 %v6081_v1, %v6080_v6  ;;  %v6127_v6 = vld [vmem:[%s10745_s13] sm:$0x1] }
 0x77f   : > { %v6083_v56 = vrot.slane %v6082_v11, 1 }
 0x781   : > { %v6084_v55 = vadd.f32 %v6083_v56, %v6082_v11 }
 0x783   : > { %6090 = vrot.lane.b32.xlu1 %v6084_v55, %s10853_s27  ;;  %6086 = vrot.lane.b32.xlu0 %v6084_v55, %s7231_s18 }
 0x787   : > { %6094 = vrot.lane.b32.xlu0 %v6084_v55, %s7222_s17 }
 0x7f5   : > { %v6087_v10 = vpop.permute.xlu0 %6086  ;;  %v6091_v44 = vpop.permute.xlu1 %6090 }
 0x7f6   : > { %v6089_v42 = vadd.f32 %v6087_v10, %v6084_v55 }
 0x7f8   : > { %v6093_v32 = vadd.f32 %v6091_v44, %v6089_v42 }
 0x7f9   : > { %v6095_v63 = vpop.permute.xlu0 %6094 }
 0x7fa   : > { %v6097_v50 = vadd.f32 %v6095_v63, %v6093_v32 }
 0x7fc   : > { %v6098_v60 = vmul.f32 0.00390625, %v6097_v50 }
 0x7fe   : > { %v6103_v5 = vrot.slane %v6098_v60, %v6102_v18 }
 0x800   : > { %v6104_v3 = vmul.f32 %v6103_v5, %v6099_v58 }
 0x802   : > { %v6106_v48 = vsel %vm6105_vm1, %v6104_v3, 0.0 }
 0x803   : > { %6107 = vadd.xlane.f32.xlu1 %v6106_v48 }
 0x83c   : > { %v7022_v8 = vpop.f32.mrb[56].mxu1 }
 0x83d   : > { %v6247_v34 = vpop.f32.mrb[57].mxu1 }
 0x83e   : > { %v7023_v0 = vpop.f32.mrb[58].mxu1 }
 0x83f   : > { %v6250_v27 = vpop.f32.mrb[59].mxu1 }
 0x847   : > { %v7026_v35 = vpop.f32.mrb[60].mxu1 }
 0x848   : > { %v6263_v51 = vpop.f32.mrb[61].mxu1 }
 0x849   : > { %v7027_v29 = vpop.f32.mrb[62].mxu1 }
 0x84a   : > { %v6266_v25 = vpop.f32.mrb[63].mxu1 }
 0x890   : > { %v6108_v21 = vpop.xlane.xlu1 %6107 }
 0x891   : > { %v6110_v41 = vadd.f32 %v6109_v22, %v6108_v21 }
 0x893   : > { %v6111_v14 = vmax.f32 %v6110_v41, 0.0 }
 0x895   : > { %6115 = vperm.xlu0 %7052, %v6111_v14  }
 0x899   : > { %6162 = vperm.xlu0 %7052, %v6643_v54  }
 0x914   : > { %v6116_v7 = vpop.permute.xlu0 %6115 }
 0x915   : > { %v6118_v30 = vmul.f32 %v6116_v7, %v6112_v47 }
 0x917   : > { %v6120_v4 = vsel %vm6119_vm2, %v6118_v30, 0.0 }
 0x918   : > { %v6121_v26 = vrot.slane %v6120_v4, 4  ;;  %v6163_v24 = vpop.permute.xlu0 %6162 }
 0x919   : > { %v6248_v43 = vadd.f32 %v6247_v34, %v6163_v24  ;;  %v6256_v49 = vadd.f32 %v7022_v8, %v6163_v24  ;;  %v6251_v53 = vadd.f32 %v6250_v27, %v6163_v24  ;;  %v6259_v45 = vadd.f32 %v7023_v0, %v6163_v24 }
 0x91a   : > { %v6122_v59 = vadd.f32 %v6121_v26, %v6120_v4  ;;  %v6264_v12 = vadd.f32 %v6263_v51, %v6163_v24  ;;  %v6267_v39 = vadd.f32 %v6266_v25, %v6163_v24  ;;  %v6272_v38 = vadd.f32 %v7026_v35, %v6163_v24 }
 0x91b   : > { %v6652_v46 = vmul.f32 -1.442695, %v6248_v43  ;;  %v6653_v31 = vmul.f32 -1.442695, %v6251_v53  ;;  %v6654_v16 = vmul.f32 -1.442695, %v6256_v49  ;;  %v6275_v62 = vadd.f32 %v7027_v29, %v6163_v24 }
 0x91c   : > { %v6123_v33 = vrot.slane %v6122_v59, 2  ;;  %v6655_v28 = vmul.f32 -1.442695, %v6259_v45  ;;  %v6656_v19 = vmul.f32 -1.442695, %v6264_v12 }
 0x91d   : > { %7174 = vpow2.f32 %v6652_v46  ;;  %v6657_v1 = vmul.f32 -1.442695, %v6267_v39  ;;  %v6658_v56 = vmul.f32 -1.442695, %v6272_v38  ;;  %v6659_v55 = vmul.f32 -1.442695, %v6275_v62 }
 0x91e   : > { %v6124_v36 = vadd.f32 %v6123_v33, %v6122_v59  ;;  %7176 = vpow2.f32 %v6653_v31 }
 0x91f   : > { %7178 = vpow2.f32 %v6654_v16 }
 0x920   : > { %v6125_v15 = vrot.slane %v6124_v36, 1  ;;  %7180 = vpow2.f32 %v6655_v28 }
 0x921   : > { %7182 = vpow2.f32 %v6656_v19 }
 0x922   : > { %v6126_v11 = vadd.f32 %v6125_v15, %v6124_v36  ;;  %7184 = vpow2.f32 %v6657_v1 }
 0x923   : > { %7186 = vpow2.f32 %v6658_v56 }
 0x924   : > { %v6128_v9 = vadd.f32 %v6127_v6, %v6126_v11  ;;  %7188 = vpow2.f32 %v6659_v55 }
 0x926   : > { %v6642_v10 = vmul.f32 -1.442695, %v6128_v9 }
 0x927   : > { %v7175_v42 = vpop.eup %7174 }
 0x928   : > { %7190 = vpow2.f32 %v6642_v10  ;;  %v7177_v44 = vpop.eup %7176  ;;  %v6302_v50 = vadd.f32 1.0, %v7175_v42 }
 0x929   : > { %v7179_v32 = vpop.eup %7178  ;;  %v6303_v58 = vadd.f32 1.0, %v7177_v44 }
 0x92a   : > { %v7181_v63 = vpop.eup %7180  ;;  %v6304_v5 = vadd.f32 1.0, %v7179_v32  ;;  %7192 = vrcp.f32 %v6302_v50 }
 0x92b   : > { %v7183_v60 = vpop.eup %7182  ;;  %v6305_v48 = vadd.f32 1.0, %v7181_v63  ;;  %7194 = vrcp.f32 %v6303_v58 }
 0x92c   : > { %v7185_v3 = vpop.eup %7184  ;;  %v6306_v8 = vadd.f32 1.0, %v7183_v60  ;;  %7196 = vrcp.f32 %v6304_v5 }
 0x92d   : > { %v7187_v52 = vpop.eup %7186  ;;  %v6307_v27 = vadd.f32 1.0, %v7185_v3  ;;  %7198 = vrcp.f32 %v6305_v48 }
 0x92e   : > { %v7189_v34 = vpop.eup %7188  ;;  %v6308_v51 = vadd.f32 1.0, %v7187_v52  ;;  %7200 = vrcp.f32 %v6306_v8 }
 0x92f   : > { %v6309_v29 = vadd.f32 1.0, %v7189_v34 }
 0x932   : > { %v7191_v0 = vpop.eup %7190 }
 0x933   : > { %v6132_v35 = vadd.f32 1.0, %v7191_v0 }
 0x934   : > { %v7193_v25 = vpop.eup %7192 }
 0x935   : > { %7202 = vrcp.f32 %v6132_v35  ;;  %v7195_v22 = vpop.eup %7194 }
 0x936   : > { %7204 = vrcp.f32 %v6307_v27  ;;  %v7197_v21 = vpop.eup %7196 }
 0x937   : > { %7206 = vrcp.f32 %v6308_v51  ;;  %v7199_v41 = vpop.eup %7198 }
 0x938   : > { %7208 = vrcp.f32 %v6309_v29  ;;  %v7201_v14 = vpop.eup %7200 }
 0x93f   : > { %v7203_v54 = vpop.eup %7202 }
 0x940   : > { %v7205_v47 = vpop.eup %7204  ;;  %v6329_v7 = vrot.slane %v7203_v54, %v6102_v18 }
 0x941   : > { %v7207_v30 = vpop.eup %7206 }
 0x942   : > { %v7209_v4 = vpop.eup %7208  ;;  %v6330_v26 = vadd.f32 %v7193_v25, %v6329_v7  ;;  %v6331_v24 = vadd.f32 %v7195_v22, %v6329_v7  ;;  %v6332_v43 = vadd.f32 %v7197_v21, %v6329_v7  ;;  %v6333_v49 = vadd.f32 %v7199_v41, %v6329_v7 }
 0x943   : > { %v6334_v53 = vadd.f32 %v7201_v14, %v6329_v7  ;;  %v6335_v59 = vadd.f32 %v7205_v47, %v6329_v7  ;;  %v6336_v45 = vadd.f32 %v7207_v30, %v6329_v7  ;;  %v6337_v12 = vadd.f32 %v7209_v4, %v6329_v7 }
 0x944   : > { %v6338_v46 = vmul.f32 %v6330_v26, %v10664_v2  ;;  %v6339_v17 = vmul.f32 %v6331_v24, %v10666_v57  ;;  %v6340_v18 = vmul.f32 %v6332_v43, %v10668_v20  ;;  %v6341_v33 = vmul.f32 %v6333_v49, %v10662_v37 }
 0x945   : > { %v6342_v31 = vmul.f32 %v6334_v53, %v10677_v13  ;;  %v6343_v39 = vmul.f32 %v6335_v59, %v10683_v23  ;;  %v6344_v16 = vmul.f32 %v6336_v45, %v10685_v61  ;;  %v6345_v36 = vmul.f32 %v6337_v12, %v10680_v40 }
 0x946   : > { %6346 = vst [vmem:[%s543_s30] sm:$0xff] %v6338_v46  ;;  %6347 = vst [vmem:[%s543_s30 + $0x8] sm:$0xff] %v6339_v17 }
 0x947   : > { %6348 = vst [vmem:[%s543_s30 + $0x10] sm:$0xff] %v6340_v18  ;;  %6349 = vst [vmem:[%s543_s30 + $0x18] sm:$0xff] %v6341_v33 }
 0x948   : > { %6350 = vst [vmem:[%s543_s30 + $0x20] sm:$0xff] %v6342_v31  ;;  %6351 = vst [vmem:[%s543_s30 + $0x28] sm:$0xff] %v6343_v39 }
 0x949   : > { %6352 = vst [vmem:[%s543_s30 + $0x30] sm:$0xff] %v6344_v16  ;;  %6353 = vst [vmem:[%s543_s30 + $0x38] sm:$0xff] %v6345_v36 }
 0x94a PF: > { %s28_s23 = sadd.s32 1, %s7216_s23  }
 0x94b   : > { %p25_p4 = scmp.ge.s32.totalorder %s28_s23, 4  }
 0x94d   :  { %27 = sbr.rel (!%p25_p4) target bundleno = 3 (0x3), region = 148 }

</bundles_post_ra>
